<compile_context>
chip_gen: v5e
topology: v5e:2x2
jax: 0.10.0
libtpu: 0.0.40
codegen_flags: <defaults>
</compile_context>

<pallas_src>
import functools
import math

import jax
import jax.numpy as jnp
from jax.experimental import pallas as pl
from jax.experimental.pallas import tpu as pltpu


def _round_up(a, b):
    return (a + b - 1) // b * b


def _cdiv(a, b):
    return (a + b - 1) // b


def mlp_kernel(
    xt_ref,                        # (TB, D+1) f32 : [x | t]
    fw2_ref, phase_ref,            # (1, t_dim) each: duplicated 2*pi*W and [0.., pi/2..]
    wt_ref, bt_ref,                # time-branch Linear
    win_x_ref, win_t_ref, bin_ref, # input Linear, split over cat([x, temb])
    wh1_ref, bh1_ref,              # hidden Linear 1
    wh2_ref, bh2_ref,              # hidden Linear 2
    wout_ref, bout_ref,            # output Linear
    out_ref,
    *, dims, exact,
):
    xt = xt_ref[...]               # (TB, D+1) f32
    x = xt[:, :dims]               # (TB, D)
    t = xt[:, dims:]               # (TB, 1)

    def swish(u):
        if exact:
            return u * jax.nn.sigmoid(u)
        # EUP path: exp + vrcp, keeps VALU slots free.
        return u * pl.reciprocal(1.0 + jnp.exp(-u), approx=True)

    # --- GaussianFourierProjection: emb = [sin(2*pi*t*W), cos(2*pi*t*W)] --------------
    proj = t * fw2_ref[...]                                        # (TB, t_dim)
    if exact:
        t_dim = proj.shape[-1]
        lane = jax.lax.broadcasted_iota(jnp.int32, proj.shape, 1)
        emb = jnp.where(lane < (t_dim // 2), jnp.sin(proj), jnp.cos(proj))
    else:
        # cos(z) = sin(z + pi/2); one sin per element instead of sin AND cos everywhere.
        emb = jnp.sin(proj + phase_ref[...])

    # MXU operand dtype (bf16 fast path / f32 exact path); accumulation always f32.
    mm = wh1_ref.dtype

    # --- time branch: temb = swish(emb @ W_t + b_t) ------------------------------------
    temb = swish(
        jnp.dot(emb.astype(mm), wt_ref[...], preferred_element_type=jnp.float32)
        + bt_ref[...]
    )                                                              # (TB, t_dim) f32

    # --- input layer on cat([x, temb]) as split matmuls (exact, no lane concat) --------
    h = (
        jnp.dot(x.astype(mm), win_x_ref[...], preferred_element_type=jnp.float32)
        + jnp.dot(temb.astype(mm), win_t_ref[...], preferred_element_type=jnp.float32)
        + bin_ref[...]
    )                                                              # (TB, units) f32

    # --- hidden layers ------------------------------------------------------------------
    h = swish(
        jnp.dot(h.astype(mm), wh1_ref[...], preferred_element_type=jnp.float32)
        + bh1_ref[...]
    )
    h = swish(
        jnp.dot(h.astype(mm), wh2_ref[...], preferred_element_type=jnp.float32)
        + bh2_ref[...]
    )

    # --- output layer -------------------------------------------------------------------
    out_ref[...] = (
        jnp.dot(h.astype(mm), wout_ref[...], preferred_element_type=jnp.float32)
        + bout_ref[...]
    ).astype(out_ref.dtype)


def mlp_forward(t, x, params, *, block_b=2048, matmul_dtype=jnp.bfloat16, nb_target=2):
    """t: (B, 1) f32, x: (B, D) f32 -> (B, D) f32."""
    B, D = x.shape
    exact = matmul_dtype == jnp.float32

    # Choose grid/tile from B:
    #  - nb >= ceil(B / block_b) so tb stays within the (v5e-safe) tile cap,
    #  - nb >= nb_target (when there is enough work) so v7x megacore has >= 2 grid steps,
    #  - tb = round_up(ceil(B / nb), 8) so padding is < 8 rows per grid step.
    nb = max(_cdiv(B, block_b), min(nb_target, _cdiv(B, 8)), 1)
    tb = _round_up(_cdiv(B, nb), 8)
    Bp = nb * tb

    # Merge t into the x stream: one (B, D+1) activation stream instead of two.
    xt = jnp.concatenate([x, t], axis=-1)
    if Bp != B:
        xt = jnp.pad(xt, ((0, Bp - B), (0, 0)))

    # Cast all matmul weights once for the MXU; biases / Fourier constants stay f32.
    mm = matmul_dtype
    wt = params["wt"].astype(mm)
    win_x = params["win_x"].astype(mm)
    win_t = params["win_t"].astype(mm)
    wh1 = params["wh1"].astype(mm)
    wh2 = params["wh2"].astype(mm)
    wout = params["wout"].astype(mm)

    args = (
        xt,
        params["fw2"], params["phase"],
        wt, params["bt"],
        win_x, win_t, params["bin"],
        wh1, params["bh1"],
        wh2, params["bh2"],
        wout, params["bout"],
    )

    def stream_spec(shape):
        return pl.BlockSpec(shape, lambda i: (i, 0))

    def resident_spec(a):
        # Full-size block, constant index -> fetched once, stays resident in VMEM.
        return pl.BlockSpec(a.shape, lambda i: (0, 0))

    in_specs = [stream_spec((tb, D + 1))] + [resident_spec(a) for a in args[1:]]

    kernel = functools.partial(mlp_kernel, dims=D, exact=exact)

    out = pl.pallas_call(
        kernel,
        out_shape=jax.ShapeDtypeStruct((Bp, D), x.dtype),
        grid_spec=pltpu.PrefetchScalarGridSpec(
            num_scalar_prefetch=0,
            grid=(nb,),
            in_specs=in_specs,
            out_specs=stream_spec((tb, D)),
        ),
        compiler_params=pltpu.CompilerParams(
            dimension_semantics=("parallel",),   # megacore sharding on v7x
        ),
    )(*args)
    return out[:B] if Bp != B else out


def init_params(key, dimensions, units=128, t_dim=32, scale=30.0):
    """Deterministic synthetic parameters (torch nn.Linear-style uniform init)."""
    ks = jax.random.split(key, 6)

    def linear(k, fan_in, fan_out):
        kw, kb = jax.random.split(k)
        lim = 1.0 / math.sqrt(fan_in)
        w = jax.random.uniform(kw, (fan_in, fan_out), jnp.float32, -lim, lim)
        b = jax.random.uniform(kb, (1, fan_out), jnp.float32, -lim, lim)
        return w, b

    # GaussianFourierProjection fixed (non-trainable) weights: N(0, 1) * scale
    fourier_w = jax.random.normal(ks[0], (1, t_dim // 2), jnp.float32) * scale
    fw2 = (2.0 * math.pi) * jnp.concatenate([fourier_w, fourier_w], axis=-1)   # (1, t_dim)
    phase = jnp.concatenate(
        [jnp.zeros((1, t_dim // 2), jnp.float32),
         jnp.full((1, t_dim // 2), math.pi / 2.0, jnp.float32)], axis=-1)      # (1, t_dim)

    wt, bt = linear(ks[1], t_dim, t_dim)                  # time-branch Linear
    win, bin_ = linear(ks[2], dimensions + t_dim, units)  # input Linear
    wh1, bh1 = linear(ks[3], units, units)                # hidden Linear 1
    wh2, bh2 = linear(ks[4], units, units)                # hidden Linear 2
    wout, bout = linear(ks[5], units, dimensions)         # output Linear

    return dict(
        fourier_w=fourier_w, fw2=fw2, phase=phase,
        wt=wt, bt=bt,
        win_x=win[:dimensions], win_t=win[dimensions:], bin=bin_,
        wh1=wh1, bh1=bh1,
        wh2=wh2, bh2=bh2,
        wout=wout, bout=bout,
    )


def mlp_reference(t, x, params):
    """Plain-JAX f32 reference of the same forward (for correctness check)."""
    proj = (2.0 * math.pi) * t * params["fourier_w"]
    emb = jnp.concatenate([jnp.sin(proj), jnp.cos(proj)], axis=-1)

    def swish(u):
        return u * jax.nn.sigmoid(u)

    temb = swish(emb @ params["wt"] + params["bt"])
    h = x @ params["win_x"] + temb @ params["win_t"] + params["bin"]
    h = swish(h @ params["wh1"] + params["bh1"])
    h = swish(h @ params["wh2"] + params["bh2"])
    return h @ params["wout"] + params["bout"]


if __name__ == "__main__":
    B, D = 300, 16          # batch (non-multiple of 8, exercises padding), dimensions
    UNITS, T_DIM = 128, 32

    key = jax.random.PRNGKey(0)
    k_param, k_t, k_x = jax.random.split(key, 3)

    params = init_params(k_param, dimensions=D, units=UNITS, t_dim=T_DIM, scale=30.0)
    t = jax.random.uniform(k_t, (B, 1), jnp.float32)      # diffusion time in [0, 1)
    x = jax.random.normal(k_x, (B, D), jnp.float32)

    ref = mlp_reference(t, x, params)

    # Exact f32 path (exact sigmoid, exact sin/cos, f32 matmuls): tight structural check.
    out_f32 = jax.block_until_ready(mlp_forward(t, x, params, matmul_dtype=jnp.float32))
    assert out_f32.shape == (B, D)
    assert jnp.allclose(out_f32, ref, rtol=1e-4, atol=1e-4), "f32 Pallas path mismatch vs reference"

    # Default fast path: bf16 MXU operands everywhere (f32 accumulation), sin(z+pi/2) for
    # cos, and approx-reciprocal swish; all within the stated 5e-2 tolerance.
    out = jax.block_until_ready(mlp_forward(t, x, params))
    assert out.shape == (B, D)
    assert jnp.allclose(out, ref, rtol=5e-2, atol=5e-2), "bf16 Pallas path mismatch vs reference"

    print("KERNEL_OK")
</pallas_src>

<mosaic_0001>
module attributes {stable_mosaic.version = 11 : i64} {
  func.func @mlp_kernel(%arg0: i32, %arg1: memref<152x17xf32, #tpu.memory_space<vmem>>, %arg2: memref<1x32xf32, #tpu.memory_space<vmem>>, %arg3: memref<1x32xf32, #tpu.memory_space<vmem>>, %arg4: memref<32x32xf32, #tpu.memory_space<vmem>>, %arg5: memref<1x32xf32, #tpu.memory_space<vmem>>, %arg6: memref<16x128xf32, #tpu.memory_space<vmem>>, %arg7: memref<32x128xf32, #tpu.memory_space<vmem>>, %arg8: memref<1x128xf32, #tpu.memory_space<vmem>>, %arg9: memref<128x128xf32, #tpu.memory_space<vmem>>, %arg10: memref<1x128xf32, #tpu.memory_space<vmem>>, %arg11: memref<128x128xf32, #tpu.memory_space<vmem>>, %arg12: memref<1x128xf32, #tpu.memory_space<vmem>>, %arg13: memref<128x16xf32, #tpu.memory_space<vmem>>, %arg14: memref<1x16xf32, #tpu.memory_space<vmem>>, %arg15: memref<152x16xf32, #tpu.memory_space<vmem>>) attributes {dimension_semantics = [#tpu.dimension_semantics<parallel>], iteration_bounds = array<i64: 2>, scalar_prefetch = 0 : i64, scratch_operands = 0 : i64, tpu.core_type = #tpu.core_type<tc>, window_params = [{transform_indices = @transform_0, window_bounds = array<i64: 152, 17>}, {pipeline_mode = #tpu.pipeline_mode<synchronous>, transform_indices = @transform_1, window_bounds = array<i64: 1, 32>}, {pipeline_mode = #tpu.pipeline_mode<synchronous>, transform_indices = @transform_2, window_bounds = array<i64: 1, 32>}, {pipeline_mode = #tpu.pipeline_mode<synchronous>, transform_indices = @transform_3, window_bounds = array<i64: 32, 32>}, {pipeline_mode = #tpu.pipeline_mode<synchronous>, transform_indices = @transform_4, window_bounds = array<i64: 1, 32>}, {pipeline_mode = #tpu.pipeline_mode<synchronous>, transform_indices = @transform_5, window_bounds = array<i64: 16, 128>}, {pipeline_mode = #tpu.pipeline_mode<synchronous>, transform_indices = @transform_6, window_bounds = array<i64: 32, 128>}, {pipeline_mode = #tpu.pipeline_mode<synchronous>, transform_indices = @transform_7, window_bounds = array<i64: 1, 128>}, {pipeline_mode = #tpu.pipeline_mode<synchronous>, transform_indices = @transform_8, window_bounds = array<i64: 128, 128>}, {pipeline_mode = #tpu.pipeline_mode<synchronous>, transform_indices = @transform_9, window_bounds = array<i64: 1, 128>}, {pipeline_mode = #tpu.pipeline_mode<synchronous>, transform_indices = @transform_10, window_bounds = array<i64: 128, 128>}, {pipeline_mode = #tpu.pipeline_mode<synchronous>, transform_indices = @transform_11, window_bounds = array<i64: 1, 128>}, {pipeline_mode = #tpu.pipeline_mode<synchronous>, transform_indices = @transform_12, window_bounds = array<i64: 128, 16>}, {pipeline_mode = #tpu.pipeline_mode<synchronous>, transform_indices = @transform_13, window_bounds = array<i64: 1, 16>}, {transform_indices = @transform_14, window_bounds = array<i64: 152, 16>}]} {
    %c0 = arith.constant 0 : index
    %c0_0 = arith.constant 0 : index
    %0 = vector.load %arg1[%c0, %c0_0] : memref<152x17xf32, #tpu.memory_space<vmem>>, vector<152x17xf32>
    %1 = vector.extract_strided_slice %0 {offsets = [0, 0], sizes = [152, 16], strides = [1, 1]} : vector<152x17xf32> to vector<152x16xf32>
    %2 = vector.extract_strided_slice %0 {offsets = [0, 16], sizes = [152, 1], strides = [1, 1]} : vector<152x17xf32> to vector<152x1xf32>
    %c0_1 = arith.constant 0 : index
    %c0_2 = arith.constant 0 : index
    %3 = vector.load %arg2[%c0_1, %c0_2] : memref<1x32xf32, #tpu.memory_space<vmem>>, vector<1x32xf32>
    %4 = vector.broadcast %2 : vector<152x1xf32> to vector<152x32xf32>
    %5 = vector.broadcast %3 : vector<1x32xf32> to vector<152x32xf32>
    %6 = arith.mulf %4, %5 : vector<152x32xf32>
    %7 = tpu.iota {dimensions = array<i32: 1>} : vector<152x32xi32>
    %c16_i32 = arith.constant 16 : i32
    %8 = vector.broadcast %c16_i32 : i32 to vector<152x32xi32>
    %9 = arith.cmpi slt, %7, %8 : vector<152x32xi32>
    %10 = math.sin %6 : vector<152x32xf32>
    %11 = math.cos %6 : vector<152x32xf32>
    %12 = arith.select %9, %10, %11 : vector<152x32xi1>, vector<152x32xf32>
    %c0_3 = arith.constant 0 : index
    %c0_4 = arith.constant 0 : index
    %13 = vector.load %arg4[%c0_3, %c0_4] : memref<32x32xf32, #tpu.memory_space<vmem>>, vector<32x32xf32>
    %cst = arith.constant dense<0.000000e+00> : vector<152x32xf32>
    %14 = tpu.matmul %12, %13, %cst {dimension_numbers = #tpu.dot_dimension_numbers<[1], [0], [0], [1], [0, 0, 1, 1], [], []>} : vector<152x32xf32>, vector<32x32xf32>, vector<152x32xf32> -> vector<152x32xf32>
    %c0_5 = arith.constant 0 : index
    %c0_6 = arith.constant 0 : index
    %15 = vector.load %arg5[%c0_5, %c0_6] : memref<1x32xf32, #tpu.memory_space<vmem>>, vector<1x32xf32>
    %16 = vector.broadcast %15 : vector<1x32xf32> to vector<152x32xf32>
    %17 = arith.addf %14, %16 : vector<152x32xf32>
    %18 = arith.negf %17 : vector<152x32xf32>
    %19 = math.exp %18 : vector<152x32xf32>
    %cst_7 = arith.constant 1.000000e+00 : f32
    %20 = vector.broadcast %cst_7 : f32 to vector<152x32xf32>
    %21 = arith.addf %20, %19 : vector<152x32xf32>
    %22 = arith.divf %20, %21 : vector<152x32xf32>
    %23 = arith.mulf %17, %22 : vector<152x32xf32>
    %c0_8 = arith.constant 0 : index
    %c0_9 = arith.constant 0 : index
    %24 = vector.load %arg6[%c0_8, %c0_9] : memref<16x128xf32, #tpu.memory_space<vmem>>, vector<16x128xf32>
    %cst_10 = arith.constant dense<0.000000e+00> : vector<152x128xf32>
    %25 = tpu.matmul %1, %24, %cst_10 {dimension_numbers = #tpu.dot_dimension_numbers<[1], [0], [0], [1], [0, 0, 1, 1], [], []>} : vector<152x16xf32>, vector<16x128xf32>, vector<152x128xf32> -> vector<152x128xf32>
    %c0_11 = arith.constant 0 : index
    %c0_12 = arith.constant 0 : index
    %26 = vector.load %arg7[%c0_11, %c0_12] : memref<32x128xf32, #tpu.memory_space<vmem>>, vector<32x128xf32>
    %cst_13 = arith.constant dense<0.000000e+00> : vector<152x128xf32>
    %27 = tpu.matmul %23, %26, %cst_13 {dimension_numbers = #tpu.dot_dimension_numbers<[1], [0], [0], [1], [0, 0, 1, 1], [], []>} : vector<152x32xf32>, vector<32x128xf32>, vector<152x128xf32> -> vector<152x128xf32>
    %28 = arith.addf %25, %27 : vector<152x128xf32>
    %c0_14 = arith.constant 0 : index
    %c0_15 = arith.constant 0 : index
    %29 = vector.load %arg8[%c0_14, %c0_15] : memref<1x128xf32, #tpu.memory_space<vmem>>, vector<1x128xf32>
    %30 = vector.broadcast %29 : vector<1x128xf32> to vector<152x128xf32>
    %31 = arith.addf %28, %30 : vector<152x128xf32>
    %c0_16 = arith.constant 0 : index
    %c0_17 = arith.constant 0 : index
    %32 = vector.load %arg9[%c0_16, %c0_17] : memref<128x128xf32, #tpu.memory_space<vmem>>, vector<128x128xf32>
    %cst_18 = arith.constant dense<0.000000e+00> : vector<152x128xf32>
    %33 = tpu.matmul %31, %32, %cst_18 {dimension_numbers = #tpu.dot_dimension_numbers<[1], [0], [0], [1], [0, 0, 1, 1], [], []>} : vector<152x128xf32>, vector<128x128xf32>, vector<152x128xf32> -> vector<152x128xf32>
    %c0_19 = arith.constant 0 : index
    %c0_20 = arith.constant 0 : index
    %34 = vector.load %arg10[%c0_19, %c0_20] : memref<1x128xf32, #tpu.memory_space<vmem>>, vector<1x128xf32>
    %35 = vector.broadcast %34 : vector<1x128xf32> to vector<152x128xf32>
    %36 = arith.addf %33, %35 : vector<152x128xf32>
    %37 = arith.negf %36 : vector<152x128xf32>
    %38 = math.exp %37 : vector<152x128xf32>
    %cst_21 = arith.constant 1.000000e+00 : f32
    %39 = vector.broadcast %cst_21 : f32 to vector<152x128xf32>
    %40 = arith.addf %39, %38 : vector<152x128xf32>
    %41 = arith.divf %39, %40 : vector<152x128xf32>
    %42 = arith.mulf %36, %41 : vector<152x128xf32>
    %c0_22 = arith.constant 0 : index
    %c0_23 = arith.constant 0 : index
    %43 = vector.load %arg11[%c0_22, %c0_23] : memref<128x128xf32, #tpu.memory_space<vmem>>, vector<128x128xf32>
    %cst_24 = arith.constant dense<0.000000e+00> : vector<152x128xf32>
    %44 = tpu.matmul %42, %43, %cst_24 {dimension_numbers = #tpu.dot_dimension_numbers<[1], [0], [0], [1], [0, 0, 1, 1], [], []>} : vector<152x128xf32>, vector<128x128xf32>, vector<152x128xf32> -> vector<152x128xf32>
    %c0_25 = arith.constant 0 : index
    %c0_26 = arith.constant 0 : index
    %45 = vector.load %arg12[%c0_25, %c0_26] : memref<1x128xf32, #tpu.memory_space<vmem>>, vector<1x128xf32>
    %46 = vector.broadcast %45 : vector<1x128xf32> to vector<152x128xf32>
    %47 = arith.addf %44, %46 : vector<152x128xf32>
    %48 = arith.negf %47 : vector<152x128xf32>
    %49 = math.exp %48 : vector<152x128xf32>
    %cst_27 = arith.constant 1.000000e+00 : f32
    %50 = vector.broadcast %cst_27 : f32 to vector<152x128xf32>
    %51 = arith.addf %50, %49 : vector<152x128xf32>
    %52 = arith.divf %50, %51 : vector<152x128xf32>
    %53 = arith.mulf %47, %52 : vector<152x128xf32>
    %c0_28 = arith.constant 0 : index
    %c0_29 = arith.constant 0 : index
    %54 = vector.load %arg13[%c0_28, %c0_29] : memref<128x16xf32, #tpu.memory_space<vmem>>, vector<128x16xf32>
    %cst_30 = arith.constant dense<0.000000e+00> : vector<152x16xf32>
    %55 = tpu.matmul %53, %54, %cst_30 {dimension_numbers = #tpu.dot_dimension_numbers<[1], [0], [0], [1], [0, 0, 1, 1], [], []>} : vector<152x128xf32>, vector<128x16xf32>, vector<152x16xf32> -> vector<152x16xf32>
    %c0_31 = arith.constant 0 : index
    %c0_32 = arith.constant 0 : index
    %56 = vector.load %arg14[%c0_31, %c0_32] : memref<1x16xf32, #tpu.memory_space<vmem>>, vector<1x16xf32>
    %57 = vector.broadcast %56 : vector<1x16xf32> to vector<152x16xf32>
    %58 = arith.addf %55, %57 : vector<152x16xf32>
    %c0_33 = arith.constant 0 : index
    %c0_34 = arith.constant 0 : index
    %59 = vector.load %arg15[%c0_33, %c0_34] : memref<152x16xf32, #tpu.memory_space<vmem>>, vector<152x16xf32>
    tpu.vector_store %arg15[%c0_33, %c0_34], %58 {strides = array<i32>} : memref<152x16xf32, #tpu.memory_space<vmem>>, vector<152x16xf32>,
    return
  }
  func.func @transform_0(%arg0: i32) -> (i32, i32) {
    %c0_i32 = arith.constant 0 : i32
    %c0_i32_0 = arith.constant 0 : i32
    return %arg0, %c0_i32 : i32, i32
  }
  func.func @transform_1(%arg0: i32) -> (i32, i32) {
    %c0_i32 = arith.constant 0 : i32
    %c0_i32_0 = arith.constant 0 : i32
    %c0_i32_1 = arith.constant 0 : i32
    return %c0_i32, %c0_i32_0 : i32, i32
  }
  func.func @transform_2(%arg0: i32) -> (i32, i32) {
    %c0_i32 = arith.constant 0 : i32
    %c0_i32_0 = arith.constant 0 : i32
    %c0_i32_1 = arith.constant 0 : i32
    return %c0_i32, %c0_i32_0 : i32, i32
  }
  func.func @transform_3(%arg0: i32) -> (i32, i32) {
    %c0_i32 = arith.constant 0 : i32
    %c0_i32_0 = arith.constant 0 : i32
    %c0_i32_1 = arith.constant 0 : i32
    return %c0_i32, %c0_i32_0 : i32, i32
  }
  func.func @transform_4(%arg0: i32) -> (i32, i32) {
    %c0_i32 = arith.constant 0 : i32
    %c0_i32_0 = arith.constant 0 : i32
    %c0_i32_1 = arith.constant 0 : i32
    return %c0_i32, %c0_i32_0 : i32, i32
  }
  func.func @transform_5(%arg0: i32) -> (i32, i32) {
    %c0_i32 = arith.constant 0 : i32
    %c0_i32_0 = arith.constant 0 : i32
    %c0_i32_1 = arith.constant 0 : i32
    return %c0_i32, %c0_i32_0 : i32, i32
  }
  func.func @transform_6(%arg0: i32) -> (i32, i32) {
    %c0_i32 = arith.constant 0 : i32
    %c0_i32_0 = arith.constant 0 : i32
    %c0_i32_1 = arith.constant 0 : i32
    return %c0_i32, %c0_i32_0 : i32, i32
  }
  func.func @transform_7(%arg0: i32) -> (i32, i32) {
    %c0_i32 = arith.constant 0 : i32
    %c0_i32_0 = arith.constant 0 : i32
    %c0_i32_1 = arith.constant 0 : i32
    return %c0_i32, %c0_i32_0 : i32, i32
  }
  func.func @transform_8(%arg0: i32) -> (i32, i32) {
    %c0_i32 = arith.constant 0 : i32
    %c0_i32_0 = arith.constant 0 : i32
    %c0_i32_1 = arith.constant 0 : i32
    return %c0_i32, %c0_i32_0 : i32, i32
  }
  func.func @transform_9(%arg0: i32) -> (i32, i32) {
    %c0_i32 = arith.constant 0 : i32
    %c0_i32_0 = arith.constant 0 : i32
    %c0_i32_1 = arith.constant 0 : i32
    return %c0_i32, %c0_i32_0 : i32, i32
  }
  func.func @transform_10(%arg0: i32) -> (i32, i32) {
    %c0_i32 = arith.constant 0 : i32
    %c0_i32_0 = arith.constant 0 : i32
    %c0_i32_1 = arith.constant 0 : i32
    return %c0_i32, %c0_i32_0 : i32, i32
  }
  func.func @transform_11(%arg0: i32) -> (i32, i32) {
    %c0_i32 = arith.constant 0 : i32
    %c0_i32_0 = arith.constant 0 : i32
    %c0_i32_1 = arith.constant 0 : i32
    return %c0_i32, %c0_i32_0 : i32, i32
  }
  func.func @transform_12(%arg0: i32) -> (i32, i32) {
    %c0_i32 = arith.constant 0 : i32
    %c0_i32_0 = arith.constant 0 : i32
    %c0_i32_1 = arith.constant 0 : i32
    return %c0_i32, %c0_i32_0 : i32, i32
  }
  func.func @transform_13(%arg0: i32) -> (i32, i32) {
    %c0_i32 = arith.constant 0 : i32
    %c0_i32_0 = arith.constant 0 : i32
    %c0_i32_1 = arith.constant 0 : i32
    return %c0_i32, %c0_i32_0 : i32, i32
  }
  func.func @transform_14(%arg0: i32) -> (i32, i32) {
    %c0_i32 = arith.constant 0 : i32
    %c0_i32_0 = arith.constant 0 : i32
    return %arg0, %c0_i32 : i32, i32
  }
}

</mosaic_0001>

<bundles_post_ra>
// kernel: tpu_custom_call.1
= control target key start
LH: loop header
LB: loop body
LE: loop exit
PB: predicated region body
PF: predicated region fallthrough
CT: control target
= control target key end

     0   :  { %s9019_s28 = smov 0   ;;  %s13436_s0 = inlined_call_operand.vmem [shape: f32[304,17], index: 0, kind: input, shape index: {}]   ;;  %s13437_s1 = inlined_call_operand.vmem [shape: f32[1,32], index: 1, kind: input, shape index: {}]   ;;  %s13438_s2 = inlined_call_operand.vmem [shape: f32[1,32], index: 2, kind: input, shape index: {}]   ;;  %s13439_s3 = inlined_call_operand.vmem [shape: f32[32,32], index: 3, kind: input, shape index: {}]   ;;  %s13440_s4 = inlined_call_operand.vmem [shape: f32[1,32], index: 4, kind: input, shape index: {}]   ;;  %s13441_s5 = inlined_call_operand.vmem [shape: f32[16,128], index: 5, kind: input, shape index: {}]   ;;  %s13442_s6 = inlined_call_operand.vmem [shape: f32[32,128], index: 6, kind: input, shape index: {}]   ;;  %s13443_s7 = inlined_call_operand.vmem [shape: f32[1,128], index: 7, kind: input, shape index: {}]   ;;  %s13444_s8 = inlined_call_operand.vmem [shape: f32[128,128], index: 8, kind: input, shape index: {}]   ;;  %s13445_s9 = inlined_call_operand.vmem [shape: f32[1,128], index: 9, kind: input, shape index: {}]   ;;  %s13446_s10 = inlined_call_operand.vmem [shape: f32[128,128], index: 10, kind: input, shape index: {}]   ;;  %s13447_s11 = inlined_call_operand.vmem [shape: f32[1,128], index: 11, kind: input, shape index: {}]   ;;  %s13448_s12 = inlined_call_operand.vmem [shape: f32[128,16], index: 12, kind: input, shape index: {}]   ;;  %s13449_s13 = inlined_call_operand.vmem [shape: f32[1,16], index: 13, kind: input, shape index: {}]   ;;  %s13450_s14 = inlined_call_operand.vmem [shape: f32[304,16], index: 14, kind: output, shape index: {}]  }
   0x1 LB: > { %s8411_s29 = sadd.s32 4294967295, %s8934_s28   ;;  %p8415_p0 = scmp.ge.s32.totalorder %s8934_s28, 1  ;;  %s8934_s28 = sphi %s9019_s28, %s24_s28  }
   0x2   : > { %p413_p1 = scmp.lt.s32.totalorder %s8934_s28, 3 }
   0x4   : > { %p414_p2 = pnand %p8415_p0, %p413_p1 }
   0x6   : > { %417 = sbr.rel (%p414_p2) target bundleno = 1672 (0x688), region = 76 }
   0xb   : > { %s459_s30 = smul.u32 19, %s8411_s29  ;;  %v8936_v0 = vmov 16   ;;  %v9059_v20 = vld [vmem:[%s13437_s1] ss:$0 sm:$0xff]  ;;  %v13465_v38 = vmov 920167782  }
   0xc   : > { %8672 = vset.pattern.permute.xlu2 %v8936_v0  ;;  %8671 = vset.pattern.permute.xlu1 %v8936_v0  ;;  %v13459_v40 = vmov 1326507024   ;;  %v13463_v46 = vmov 2475754826   ;;  %v13455_v48 = vmov 2131351028  }
   0xd   : > { %8670 = vset.pattern.permute.xlu0 %v8936_v0  ;;  %p460_p3 = scmp.lt.s32.totalorder %s459_s30, 37  ;;  %v13457_v51 = vmov 2102212464   ;;  %v13461_v56 = vmov 683565275  }
   0xf   : > { %s14116_s30 = smov (!%p460_p3, %s459_s30), 37 }
  0x10   : > { %s8416_s15 = sshll.u32 %s14116_s30, 3 }
  0x11   : > { %s9035_s2 = scalar_lea.vmem %s13436_s0, %s8416_s15  ;;  %s13353_s27 = scalar_lea.vmem %s13450_s14, %s8416_s15 }
  0x12   : > { %v475_v1 = vld [vmem:[%s9035_s2 + $0x20] sm:$0xff]  ;;  %v473_v2 = vld [vmem:[%s9035_s2 + $0x10] sm:$0xff]  ;;  %v476_v4 = vld [vmem:[%s9035_s2 + $0x28] sm:$0xff] }
  0x13   : > { %v471_v3 = vld [vmem:[%s9035_s2] sm:$0xff]  ;;  %513 = vperm.xlu2 %8672, %v475_v1   ;;  %503 = vperm.xlu1 %8671, %v473_v2   ;;  %v474_v5 = vld [vmem:[%s9035_s2 + $0x18] sm:$0xff]  ;;  %v472_v6 = vld [vmem:[%s9035_s2 + $0x8] sm:$0xff] }
  0x14   : > { %493 = vperm.xlu0 %8670, %v471_v3   ;;  %v479_v7 = vld [vmem:[%s9035_s2 + $0x40] sm:$0xff]  ;;  %v478_v8 = vld [vmem:[%s9035_s2 + $0x38] sm:$0xff]  ;;  %v477_v9 = vld [vmem:[%s9035_s2 + $0x30] sm:$0xff] }
  0x15   : > { %v482_v10 = vld [vmem:[%s9035_s2 + $0x58] sm:$0xff]  ;;  %v481_v11 = vld [vmem:[%s9035_s2 + $0x50] sm:$0xff]  ;;  %v480_v12 = vld [vmem:[%s9035_s2 + $0x48] sm:$0xff] }
  0x16   : > { %v485_v13 = vld [vmem:[%s9035_s2 + $0x70] sm:$0xff]  ;;  %v484_v14 = vld [vmem:[%s9035_s2 + $0x68] sm:$0xff]  ;;  %v483_v15 = vld [vmem:[%s9035_s2 + $0x60] sm:$0xff] }
  0x17   : > { %v488_v16 = vld [vmem:[%s9035_s2 + $0x88] sm:$0xff]  ;;  %v487_v17 = vld [vmem:[%s9035_s2 + $0x80] sm:$0xff]  ;;  %v486_v18 = vld [vmem:[%s9035_s2 + $0x78] sm:$0xff] }
  0x18   : > { %v489_v19 = vld [vmem:[%s9035_s2 + $0x90] sm:$0xff] }
  0x1b   : > { %518 = vperm.xlu2 %8672, %v476_v4   ;;  %508 = vperm.xlu1 %8671, %v474_v5  }
  0x1c   : > { %498 = vperm.xlu0 %8670, %v472_v6  }
  0x23   : > { %533 = vperm.xlu2 %8672, %v479_v7   ;;  %528 = vperm.xlu1 %8671, %v478_v8  }
  0x24   : > { %523 = vperm.xlu0 %8670, %v477_v9  }
  0x2b   : > { %548 = vperm.xlu2 %8672, %v482_v10   ;;  %543 = vperm.xlu1 %8671, %v481_v11  }
  0x2c   : > { %538 = vperm.xlu0 %8670, %v480_v12  }
  0x33   : > { %563 = vperm.xlu2 %8672, %v485_v13   ;;  %558 = vperm.xlu1 %8671, %v484_v14  }
  0x34   : > { %553 = vperm.xlu0 %8670, %v483_v15  }
  0x3b   : > { %578 = vperm.xlu2 %8672, %v488_v16   ;;  %573 = vperm.xlu1 %8671, %v487_v17  }
  0x3c   : > { %568 = vperm.xlu0 %8670, %v486_v18  }
  0x44   : > { %583 = vperm.xlu0 %8670, %v489_v19  }
  0x6d   : > { %v514_v21 = vpop.permute.xlu2 %513 }
  0x6e   : > { %v9062_v22 = vmul.f32 %v9059_v20, %v514_v21 }
  0x70   : > { %13639 = vst [vmem:[#allocation2_spill] sm:$0xff] %v9062_v22  ;;  %v1234_v23 = vand.u32 2139095040, %v9062_v22  ;;  %v13454_v36 = vand.u32 2147483647, %v9062_v22 }
  0x72   : > { %v1235_v24 = vshrl.u32 %v1234_v23, 23  ;;  %v1238_v44 = vand.u32 8388607, %v13454_v36 }
  0x74   : > { %v8430_v25 = vadd.s32 4294967169, %v1235_v24  ;;  %v1239_v60 = vor.u32 8388608, %v1238_v44 }
  0x75   : > { %v519_v27 = vpop.permute.xlu2 %518 }
  0x76   : > { %v1241_v26 = vadd.s32 1, %v8430_v25  ;;  %v9066_v28 = vmul.f32 %v9059_v20, %v519_v27  ;;  %v9092_v10 = vshll.u32 %v1239_v60, 8 }
  0x78   : > { %13640 = vst [vmem:[#allocation3_spill] sm:$0xff] %v9066_v28  ;;  %vm1242_vm0 = vcmp.gt.s32.totalorder %v1241_v26, 0  ;;  %v1389_v30 = vand.u32 2139095040, %v9066_v28  ;;  %v13452_v63 = vand.u32 2147483647, %v9066_v28  ;;  %v1280_v21 = vand.u32 65535, %v9092_v10 }
  0x79   : > { %v1243_v29 = vsel %vm1242_vm0, %v1241_v26, 0  ;;  %13642 = vst [vmem:[#allocation5_spill] sm:$0xff] %v9092_v10 }
  0x7a   : > { %v1245_v31 = vand.u32 31, %v1243_v29  ;;  %v1390_v32 = vshrl.u32 %v1389_v30, 23  ;;  %v1244_v42 = vshrl.u32 %v1243_v29, 5  ;;  %v1393_v11 = vand.u32 8388607, %v13452_v63 }
  0x7b   : > { %v1281_v29 = vshrl.u32 %v9092_v10, 16 }
  0x7c   : > { %v1246_v34 = vsub.s32 32, %v1245_v31  ;;  %v8433_v35 = vadd.s32 4294967169, %v1390_v32  ;;  %v1260_v39 = vshll.u32 %v13465_v38, %v1245_v31  ;;  %v1251_v47 = vshll.u32 %v13463_v46, %v1245_v31 }
  0x7d   : > { %v534_v33 = vpop.permute.xlu2 %533  ;;  %v1254_v50 = vshll.u32 %v13455_v48, %v1245_v31  ;;  %v1257_v54 = vshll.u32 %v13457_v51, %v1245_v31  ;;  %vm1266_vm1 = vcmp.lt.s32.totalorder %v1244_v42, 4  ;;  %v1248_v57 = vshll.u32 %v13461_v56, %v1245_v31 }
  0x7e   : > { %v9071_v37 = vmul.f32 %v9059_v20, %v534_v33  ;;  %v1261_v41 = vshrl.u32 %v13459_v40, %v1246_v34  ;;  %v1396_v43 = vadd.s32 1, %v8433_v35  ;;  %v1252_v49 = vshrl.u32 %v13455_v48, %v1246_v34 }
  0x7f   : > { %v1255_v52 = vshrl.u32 %v13457_v51, %v1246_v34  ;;  %v1258_v55 = vshrl.u32 %v13465_v38, %v1246_v34  ;;  %v1249_v58 = vshrl.u32 %v13463_v46, %v1246_v34  ;;  %vm1263_vm3 = vcmp.lt.s32.totalorder %v1244_v42, 1 }
  0x80   : > { %13641 = vst [vmem:[#allocation4_spill] sm:$0xff] %v9071_v37  ;;  %v1854_v45 = vand.u32 2139095040, %v9071_v37  ;;  %v1262_v53 = vor.u32 %v1261_v41, %v1260_v39  ;;  %vm1397_vm2 = vcmp.gt.s32.totalorder %v1396_v43, 0  ;;  %v1253_v61 = vor.u32 %v1252_v49, %v1251_v47 }
  0x81   : > { %v1256_v62 = vor.u32 %v1255_v52, %v1254_v50  ;;  %vm1265_vm4 = vcmp.lt.s32.totalorder %v1244_v42, 3  ;;  %v1398_v1 = vsel %vm1397_vm2, %v1396_v43, 0  ;;  %v1247_v2 = vshrl.u32 %v13461_v56, %v1246_v34 }
  0x82   : > { %v1855_v59 = vshrl.u32 %v1854_v45, 23  ;;  %v1276_v0 = vsel %vm1266_vm1, %v1262_v53, 1326507024  ;;  %v1259_v3 = vor.u32 %v1258_v55, %v1257_v54  ;;  %v1250_v4 = vor.u32 %v1249_v58, %v1248_v57 }
  0x83   : > { %vm1264_vm5 = vcmp.lt.s32.totalorder %v1244_v42, 2  ;;  %v1268_v6 = vsel %vm1266_vm1, %v1256_v62, 2102212464  ;;  %v1275_v7 = vsel %vm1263_vm3, %v1253_v61, %v1256_v62  ;;  %v1400_v9 = vand.u32 31, %v1398_v1 }
  0x84   : > { %v8442_v5 = vadd.s32 4294967169, %v1855_v59  ;;  %v1277_v8 = vsel %vm1265_vm4, %v1259_v3, %v1276_v0  ;;  %v1267_v13 = vsel %vm1263_vm3, %v1247_v2, %v1250_v4  ;;  %v1269_v14 = vsel %vm1265_vm4, %v1253_v61, %v1268_v6 }
  0x85   : > { %v549_v12 = vpop.permute.xlu2 %548  ;;  %v1272_v15 = vsel %vm1266_vm1, %v1259_v3, 920167782  ;;  %v1278_v16 = vsel %vm1264_vm5, %v1275_v7, %v1277_v8  ;;  %v9100_v18 = vsub.s32 32, %v1400_v9  ;;  %v1394_v23 = vor.u32 8388608, %v1393_v11 }
  0x86   : > { %v1861_v17 = vadd.s32 1, %v8442_v5  ;;  %v9103_v19 = vmul.f32 %v9059_v20, %v549_v12  ;;  %v9107_v24 = vsel %vm1264_vm5, %v1267_v13, %v1269_v14  ;;  %v1271_v25 = vsel %vm1263_vm3, %v1250_v4, %v1253_v61 }
  0x87   : > { %13644 = vst [vmem:[#allocation7_spill] sm:$0xff] %v9107_v24  ;;  %v1273_v26 = vsel %vm1265_vm4, %v1256_v62, %v1272_v15  ;;  %v1283_v27 = vshrl.u32 %v1278_v16, 16  ;;  %v1415_v30 = vshll.u32 %v13465_v38, %v1400_v9  ;;  %v1416_v31 = vshrl.u32 %v13459_v40, %v9100_v18 }
  0x88   : > { %13643 = vst [vmem:[#allocation6_spill] sm:$0xff] %v9103_v19  ;;  %vm1862_vm6 = vcmp.gt.s32.totalorder %v1861_v17, 0  ;;  %v2319_v32 = vand.u32 2139095040, %v9103_v19  ;;  %v1274_v33 = vsel %vm1264_vm5, %v1271_v25, %v1273_v26  ;;  %v9119_v35 = vshrl.u32 %v1398_v1, 5 }
  0x89   : > { %v9121_v39 = vshll.u32 %v1394_v23, 8  ;;  %v1282_v41 = vand.u32 65535, %v1278_v16  ;;  %v9123_v43 = vmul.u32 %v1283_v27, %v1280_v21  ;;  %v1304_v44 = vand.u32 65535, %v1274_v33 }
  0x8a   : > { %v1863_v45 = vsel %vm1862_vm6, %v1861_v17, 0  ;;  %v1406_v47 = vshll.u32 %v13463_v46, %v1400_v9  ;;  %v1407_v49 = vshrl.u32 %v13455_v48, %v9100_v18  ;;  %v1409_v42 = vshll.u32 %v13455_v48, %v1400_v9 }
  0x8b   : > { %13645 = vst [vmem:[#allocation8_spill] sm:$0xff] %v9121_v39  ;;  %v1410_v50 = vshrl.u32 %v13457_v51, %v9100_v18  ;;  %v1412_v52 = vshll.u32 %v13457_v51, %v1400_v9  ;;  %v1413_v53 = vshrl.u32 %v13465_v38, %v9100_v18  ;;  %v1417_v54 = vor.u32 %v1416_v31, %v1415_v30 }
  0x8c   : > { %13646 = vst [vmem:[#allocation9_spill] sm:$0xff] %v9123_v43  ;;  %v2320_v55 = vshrl.u32 %v2319_v32, 23  ;;  %v1305_v57 = vshrl.u32 %v1274_v33, 16  ;;  %vm1421_vm7 = vcmp.lt.s32.totalorder %v9119_v35, 4  ;;  %v9136_v58 = vand.u32 65535, %v9121_v39 }
  0x8d   : > { %v9138_v59 = vand.u32 31, %v1863_v45  ;;  %v1284_v60 = vmul.u32 %v1282_v41, %v1280_v21  ;;  %v1288_v61 = vshll.u32 %v9123_v43, 16  ;;  %v1403_v62 = vshll.u32 %v13461_v56, %v1400_v9 }
  0x8e   : > { %v1404_v0 = vshrl.u32 %v13463_v46, %v9100_v18  ;;  %v9144_v1 = vmul.u32 %v1282_v41, %v1281_v29  ;;  %v1408_v2 = vor.u32 %v1407_v49, %v1406_v47  ;;  %v1411_v3 = vor.u32 %v1410_v50, %v1409_v42 }
  0x8f   : > { %vm1418_vm8 = vcmp.lt.s32.totalorder %v9119_v35, 1  ;;  %v1414_v4 = vor.u32 %v1413_v53, %v1412_v52  ;;  %vm1420_vm9 = vcmp.lt.s32.totalorder %v9119_v35, 3  ;;  %v1431_v5 = vsel %vm1421_vm7, %v1417_v54, 1326507024 }
  0x90   : > { %13647 = vst [vmem:[#allocation10_spill] sm:$0xff] %v9144_v1  ;;  %v8451_v6 = vadd.s32 4294967169, %v2320_v55  ;;  %v1287_v7 = vmul.u32 %v1283_v27, %v1281_v29  ;;  %v9151_v8 = vshrl.u32 %v9121_v39, 16  ;;  %v13451_v9 = vand.u32 2147483647, %v9071_v37  ;;  %v504_v27 = vpop.permute.xlu1 %503 }
  0x91   : > { %v9155_v11 = vsub.s32 32, %v9138_v59  ;;  %vm1292_vm10 = vc.u32 %v1284_v60, %v1288_v61  ;;  %v9157_v12 = vmul.u32 %v1304_v44, %v1280_v21  ;;  %v9159_v13 = vmul.u32 %v1305_v57, %v1280_v21 }
  0x92   : > { %v1405_v14 = vor.u32 %v1404_v0, %v1403_v62  ;;  %v9161_v15 = vmul.u32 %v1304_v44, %v1281_v29  ;;  %vm1419_vm11 = vcmp.lt.s32.totalorder %v9119_v35, 2  ;;  %v1430_v16 = vsel %vm1418_vm8, %v1408_v2, %v1411_v3 }
  0x93   : > { %13648 = vst [vmem:[#allocation11_spill] sm:$0xff] %v9157_v12  ;;  %v1432_v17 = vsel %vm1420_vm9, %v1414_v4, %v1431_v5  ;;  %v9169_v25 = vmul.u32 %v1305_v57, %v1281_v29  ;;  %v1427_v26 = vsel %vm1421_vm7, %v1414_v4, 920167782  ;;  %v2326_v21 = vadd.s32 1, %v8451_v6 }
  0x94   : > { %13649 = vst [vmem:[#allocation12_spill] sm:$0xff] %v9159_v13  ;;  %v13467_v30 = vmov 0   ;;  %v1858_v32 = vand.u32 8388607, %v13451_v9  ;;  %v1880_v33 = vshll.u32 %v13465_v38, %v9138_v59  ;;  %v1881_v41 = vshrl.u32 %v13459_v40, %v9155_v11 }
  0x95   : > { %13650 = vst [vmem:[#allocation13_spill] sm:$0xff] %v9161_v15  ;;  %v1293_v31 = vsel %vm1292_vm10, 1, %v13467_v30  ;;  %v1402_v29 = vshrl.u32 %v13461_v56, %v9100_v18  ;;  %v1426_v44 = vsel %vm1418_vm8, %v1405_v14, %v1408_v2  ;;  %v1433_v47 = vsel %vm1419_vm11, %v1430_v16, %v1432_v17 }
  0x96   : > { %13651 = vst [vmem:[#allocation14_spill] sm:$0xff] %v9169_v25  ;;  %v9186_v49 = vshrl.u32 %v1863_v45, 5  ;;  %v1423_v42 = vsel %vm1421_vm7, %v1411_v3, 2102212464  ;;  %v1428_v50 = vsel %vm1420_vm9, %v1411_v3, %v1427_v26  ;;  %v1871_v52 = vshll.u32 %v13463_v46, %v9138_v59 }
  0x97   : > { %v9195_v53 = vmul.f32 %v9059_v20, %v504_v27  ;;  %v1872_v18 = vshrl.u32 %v13455_v48, %v9155_v11  ;;  %v1874_v54 = vshll.u32 %v13455_v48, %v9138_v59  ;;  %v1875_v45 = vshrl.u32 %v13457_v51, %v9155_v11 }
  0x98   : > { %vm2327_vm12 = vcmp.gt.s32.totalorder %v2326_v21, 0  ;;  %v9203_v55 = vadd.s32 %v1288_v61, %v1284_v60  ;;  %v9205_v57 = vadd.s32 %v1293_v31, %v1287_v7  ;;  %v1438_v62 = vshrl.u32 %v1433_v47, 16 }
  0x99   : > { %13652 = vst [vmem:[#allocation15_spill] sm:$0xff] %v9195_v53  ;;  %v1882_v0 = vor.u32 %v1881_v41, %v1880_v33  ;;  %v1422_v3 = vsel %vm1418_vm8, %v1402_v29, %v1405_v14  ;;  %v1877_v4 = vshll.u32 %v13457_v51, %v9138_v59  ;;  %v1878_v5 = vshrl.u32 %v13465_v38, %v9155_v11 }
  0x9a   : > { %13653 = vst [vmem:[#allocation16_spill] sm:$0xff] %v9203_v55  ;;  %vm1886_vm13 = vcmp.lt.s32.totalorder %v9186_v49, 4  ;;  %v1424_v6 = vsel %vm1420_vm9, %v1408_v2, %v1423_v42  ;;  %v1429_v60 = vsel %vm1419_vm11, %v1426_v44, %v1428_v50  ;;  %v1859_v61 = vor.u32 8388608, %v1858_v32 }
  0x9b   : > { %13654 = vst [vmem:[#allocation17_spill] sm:$0xff] %v9205_v57  ;;  %v2328_v7 = vsel %vm2327_vm12, %v2326_v21, 0  ;;  %v1437_v16 = vand.u32 65535, %v1433_v47  ;;  %v1873_v17 = vor.u32 %v1872_v18, %v1871_v52  ;;  %v1876_v26 = vor.u32 %v1875_v45, %v1874_v54 }
  0x9c   : > { %v924_v14 = vand.u32 2139095040, %v9195_v53  ;;  %v9220_v27 = vmul.u32 %v1438_v62, %v9136_v58  ;;  %vm1883_vm14 = vcmp.lt.s32.totalorder %v9186_v49, 1  ;;  %vm1885_vm15 = vcmp.lt.s32.totalorder %v9186_v49, 3 }
  0x9d   : > { %v1896_v2 = vsel %vm1886_vm13, %v1882_v0, 1326507024  ;;  %v9228_v31 = vsel %vm1419_vm11, %v1422_v3, %v1424_v6  ;;  %v1879_v21 = vor.u32 %v1878_v5, %v1877_v4  ;;  %v13453_v32 = vand.u32 2147483647, %v9103_v19  ;;  %v494_v5 = vpop.permute.xlu0 %493 }
  0x9e   : > { %13655 = vst [vmem:[#allocation18_spill] sm:$0xff] %v9220_v27  ;;  %v9231_v33 = vand.u32 31, %v2328_v7  ;;  %v1459_v41 = vand.u32 65535, %v1429_v60  ;;  %v1460_v29 = vshrl.u32 %v1429_v60, 16  ;;  %v1868_v44 = vshll.u32 %v13461_v56, %v9138_v59 }
  0x9f   : > { %13656 = vst [vmem:[#allocation19_spill] sm:$0xff] %v9228_v31  ;;  %v1869_v47 = vshrl.u32 %v13463_v46, %v9155_v11  ;;  %vm1884_vm0 = vcmp.lt.s32.totalorder %v9186_v49, 2  ;;  %v1895_v35 = vsel %vm1883_vm14, %v1873_v17, %v1876_v26  ;;  %v1897_v42 = vsel %vm1885_vm15, %v1879_v21, %v1896_v2 }
  0xa0   : > { %v925_v50 = vshrl.u32 %v924_v14, 23  ;;  %v1439_v52 = vmul.u32 %v1437_v16, %v9136_v58  ;;  %v1443_v18 = vshll.u32 %v9220_v27, 16  ;;  %v9246_v59 = vshll.u32 %v1859_v61, 8 }
  0xa1   : > { %v9249_v45 = vmul.u32 %v1437_v16, %v9151_v8  ;;  %v1442_v0 = vmul.u32 %v1438_v62, %v9151_v8  ;;  %v2323_v3 = vand.u32 8388607, %v13453_v32  ;;  %v9255_v4 = vsub.s32 32, %v9231_v33 }
  0xa2   : > { %13657 = vst [vmem:[#allocation20_spill] sm:$0xff] %v9246_v59  ;;  %v9258_v6 = vmul.u32 %v1459_v41, %v9136_v58  ;;  %v1867_v60 = vshrl.u32 %v13461_v56, %v9155_v11  ;;  %v1870_v61 = vor.u32 %v1869_v47, %v1868_v44  ;;  %v9264_v16 = vsel %vm1884_vm0, %v1895_v35, %v1897_v42 }
  0xa3   : > { %13658 = vst [vmem:[#allocation21_spill] sm:$0xff] %v9249_v45  ;;  %v9267_v62 = vmul.u32 %v1460_v29, %v9136_v58  ;;  %v9270_v14 = vmul.u32 %v1459_v41, %v9151_v8  ;;  %v1888_v2 = vsel %vm1886_vm13, %v1876_v26, 2102212464  ;;  %v8424_v9 = vadd.s32 4294967169, %v925_v50 }
  0xa4   : > { %13659 = vst [vmem:[#allocation22_spill] sm:$0xff] %v9258_v6  ;;  %vm9274_vm1 = vc.u32 %v1439_v52, %v1443_v18  ;;  %v1892_v11 = vsel %vm1886_vm13, %v1879_v21, 920167782  ;;  %v9281_v44 = vand.u32 65535, %v9246_v59  ;;  %v9284_v58 = vmul.f32 %v9059_v20, %v494_v5 }
  0xa5   : > { %13660 = vst [vmem:[#allocation23_spill] sm:$0xff] %v9267_v62  ;;  %v1903_v41 = vshrl.u32 %v9264_v16, 16  ;;  %v2324_v47 = vor.u32 8388608, %v2323_v3  ;;  %v2345_v35 = vshll.u32 %v13465_v38, %v9231_v33  ;;  %v2346_v42 = vshrl.u32 %v13459_v40, %v9255_v4 }
  0xa6   : > { %13661 = vst [vmem:[#allocation24_spill] sm:$0xff] %v9270_v14  ;;  %v1887_v50 = vsel %vm1883_vm14, %v1867_v60, %v1870_v61  ;;  %v1889_v21 = vsel %vm1885_vm15, %v1873_v17, %v1888_v2  ;;  %v1891_v54 = vsel %vm1883_vm14, %v1870_v61, %v1873_v17  ;;  %v9297_v5 = vshrl.u32 %v2328_v7, 5 }
  0xa7   : > { %13664 = vst [vmem:[#allocation25_spill] sm:$0xff] %v9284_v58  ;;  %v1893_v3 = vsel %vm1885_vm15, %v1876_v26, %v1892_v11  ;;  %v1902_v32 = vand.u32 65535, %v9264_v16  ;;  %v2336_v36 = vshll.u32 %v13463_v46, %v9231_v33  ;;  %v931_v34 = vadd.s32 1, %v8424_v9 }
  0xa8   : > { %v2337_v60 = vshrl.u32 %v13455_v48, %v9255_v4  ;;  %v2339_v2 = vshll.u32 %v13455_v48, %v9231_v33  ;;  %v2340_v17 = vshrl.u32 %v13457_v51, %v9255_v4  ;;  %v614_v7 = vand.u32 2139095040, %v9284_v58 }
  0xa9   : > { %v9313_v26 = vmul.u32 %v1460_v29, %v9151_v8  ;;  %v9316_v16 = vmul.u32 %v1903_v41, %v9281_v44  ;;  %v2347_v9 = vor.u32 %v2346_v42, %v2345_v35  ;;  %v1448_v11 = vsel %vm9274_vm1, 1, %v13467_v30 }
  0xaa   : > { %v2342_v23 = vshll.u32 %v13457_v51, %v9231_v33  ;;  %v2343_v48 = vshrl.u32 %v13465_v38, %v9255_v4  ;;  %vm2351_vm2 = vcmp.lt.s32.totalorder %v9297_v5, 4  ;;  %v9328_v8 = vsel %vm1884_vm0, %v1887_v50, %v1889_v21 }
  0xab   : > { %13665 = vst [vmem:[#allocation26_spill] sm:$0xff] %v9313_v26  ;;  %v1894_v29 = vsel %vm1884_vm0, %v1891_v54, %v1893_v3  ;;  %v9332_v35 = vshll.u32 %v2324_v47, 8  ;;  %vm932_vm3 = vcmp.gt.s32.totalorder %v931_v34, 0  ;;  %v1904_v63 = vmul.u32 %v1902_v32, %v9281_v44 }
  0xac   : > { %13666 = vst [vmem:[#allocation27_spill] sm:$0xff] %v9316_v16  ;;  %v2338_v42 = vor.u32 %v2337_v60, %v2336_v36  ;;  %v2341_v61 = vor.u32 %v2340_v17, %v2339_v2  ;;  %v615_v51 = vshrl.u32 %v614_v7, 23  ;;  %v1908_v40 = vshll.u32 %v9316_v16, 16 }
  0xad   : > { %13667 = vst [vmem:[#allocation28_spill] sm:$0xff] %v9328_v8  ;;  %vm2348_vm4 = vcmp.lt.s32.totalorder %v9297_v5, 1  ;;  %vm2350_vm5 = vcmp.lt.s32.totalorder %v9297_v5, 3  ;;  %v2361_v50 = vsel %vm2351_vm2, %v2347_v9, 1326507024  ;;  %v2333_v49 = vshll.u32 %v13461_v56, %v9231_v33 }
  0xae   : > { %13668 = vst [vmem:[#allocation29_spill] sm:$0xff] %v9332_v35  ;;  %v2334_v54 = vshrl.u32 %v13463_v46, %v9255_v4  ;;  %v2344_v47 = vor.u32 %v2343_v48, %v2342_v23  ;;  %v933_v21 = vsel %vm932_vm3, %v931_v34, 0  ;;  %v9344_v36 = vadd.s32 %v1443_v18, %v1439_v52 }
  0xaf   : > { %v9346_v3 = vadd.s32 %v1448_v11, %v1442_v0  ;;  %v1901_v60 = vshrl.u32 %v9246_v59, 16  ;;  %v1924_v2 = vand.u32 65535, %v1894_v29  ;;  %vm2349_vm6 = vcmp.lt.s32.totalorder %v9297_v5, 2 }
  0xb0   : > { %13669 = vst [vmem:[#allocation30_spill] sm:$0xff] %v9344_v36  ;;  %v2360_v17 = vsel %vm2348_vm4, %v2338_v42, %v2341_v61  ;;  %v2362_v33 = vsel %vm2350_vm5, %v2344_v47, %v2361_v50  ;;  %v8418_v7 = vadd.s32 4294967169, %v615_v51  ;;  %v2332_v34 = vshrl.u32 %v13461_v56, %v9255_v4 }
  0xb1   : > { %13670 = vst [vmem:[#allocation31_spill] sm:$0xff] %v9346_v3  ;;  %v13471_v23 = vand.u32 2147483647, %v9195_v53  ;;  %v9359_v52 = vand.u32 31, %v933_v21  ;;  %vm1912_vm7 = vc.u32 %v1904_v63, %v1908_v40  ;;  %v1925_v18 = vshrl.u32 %v1894_v29, 16 }
  0xb2   : > { %v2335_v0 = vor.u32 %v2334_v54, %v2333_v49  ;;  %v2365_v9 = vand.u32 65535, %v9332_v35  ;;  %v2353_v11 = vsel %vm2351_vm2, %v2341_v61, 2102212464  ;;  %v2357_v51 = vsel %vm2351_vm2, %v2344_v47, 920167782  ;;  %v564_v54 = vpop.permute.xlu2 %563 }
  0xb3   : > { %v2363_v50 = vsel %vm2349_vm6, %v2360_v17, %v2362_v33  ;;  %v9369_v4 = vshrl.u32 %v9332_v35, 16  ;;  %v9371_v48 = vmul.u32 %v1902_v32, %v1901_v60  ;;  %v1907_v56 = vmul.u32 %v1903_v41, %v1901_v60 }
  0xb4   : > { %v9374_v29 = vmul.u32 %v1924_v2, %v9281_v44  ;;  %v621_v49 = vadd.s32 1, %v8418_v7  ;;  %v1913_v46 = vsel %vm1912_vm7, 1, %v13467_v30  ;;  %v2352_v38 = vsel %vm2348_vm4, %v2332_v34, %v2335_v0 }
  0xb5   : > { %13671 = vst [vmem:[#allocation32_spill] sm:$0xff] %v9371_v48  ;;  %v928_v47 = vand.u32 8388607, %v13471_v23  ;;  %v936_v17 = vsub.s32 32, %v9359_v52  ;;  %v2354_v32 = vsel %vm2350_vm5, %v2338_v42, %v2353_v11  ;;  %v2356_v41 = vsel %vm2348_vm4, %v2335_v0, %v2338_v42 }
  0xb6   : > { %13672 = vst [vmem:[#allocation33_spill] sm:$0xff] %v9374_v29  ;;  %v2358_v33 = vsel %vm2350_vm5, %v2341_v61, %v2357_v51  ;;  %v2368_v7 = vshrl.u32 %v2363_v50, 16  ;;  %v9389_v30 = vmul.u32 %v1925_v18, %v9281_v44  ;;  %v9391_v37 = vmul.u32 %v1924_v2, %v1901_v60 }
  0xb7   : > { %v9393_v34 = vmul.u32 %v1925_v18, %v1901_v60  ;;  %v9396_v23 = vmul.f32 %v9059_v20, %v564_v54  ;;  %v9399_v11 = vadd.s32 %v1908_v40, %v1904_v63  ;;  %v9401_v59 = vadd.s32 %v1913_v46, %v1907_v56 }
  0xb8   : > { %13673 = vst [vmem:[#allocation34_spill] sm:$0xff] %v9389_v30  ;;  %vm622_vm8 = vcmp.gt.s32.totalorder %v621_v49, 0  ;;  %v9405_v61 = vsel %vm2349_vm6, %v2352_v38, %v2354_v32  ;;  %v2359_v44 = vsel %vm2349_vm6, %v2356_v41, %v2358_v33  ;;  %v13680_v42 = vmov 920167782  }
  0xb9   : > { %13674 = vst [vmem:[#allocation35_spill] sm:$0xff] %v9391_v37  ;;  %v950_v60 = vshll.u32 %v13680_v42, %v9359_v52  ;;  %v13681_v2 = vmov 1326507024   ;;  %v2367_v0 = vand.u32 65535, %v2363_v50  ;;  %v9412_v51 = vmul.u32 %v2368_v7, %v2365_v9 }
  0xba   : > { %13675 = vst [vmem:[#allocation36_spill] sm:$0xff] %v9393_v34  ;;  %v951_v18 = vshrl.u32 %v13681_v2, %v936_v17  ;;  %v929_v40 = vor.u32 8388608, %v928_v47  ;;  %v9414_v63 = vshrl.u32 %v933_v21, 5  ;;  %v13683_v46 = vmov 2475754826   ;;  %v579_v25 = vpop.permute.xlu2 %578 }
  0xbb   : > { %13676 = vst [vmem:[#allocation37_spill] sm:$0xff] %v9396_v23  ;;  %v941_v56 = vshll.u32 %v13683_v46, %v9359_v52  ;;  %v13684_v38 = vmov 2131351028   ;;  %v623_v32 = vsel %vm622_vm8, %v621_v49, 0  ;;  %v2784_v5 = vand.u32 2139095040, %v9396_v23 }
  0xbc   : > { %13677 = vst [vmem:[#allocation38_spill] sm:$0xff] %v9399_v11  ;;  %v944_v54 = vshll.u32 %v13684_v38, %v9359_v52  ;;  %v942_v41 = vshrl.u32 %v13684_v38, %v936_v17  ;;  %v13685_v33 = vmov 2102212464   ;;  %v948_v47 = vshrl.u32 %v13680_v42, %v936_v17 }
  0xbd   : > { %13678 = vst [vmem:[#allocation39_spill] sm:$0xff] %v9401_v59  ;;  %v945_v8 = vshrl.u32 %v13685_v33, %v936_v17  ;;  %v947_v50 = vshll.u32 %v13685_v33, %v9359_v52  ;;  %v2389_v21 = vand.u32 65535, %v2359_v44  ;;  %v2390_v34 = vshrl.u32 %v2359_v44, 16 }
  0xbe   : > { %13679 = vst [vmem:[#allocation40_spill] sm:$0xff] %v9405_v61  ;;  %v952_v29 = vor.u32 %v951_v18, %v950_v60  ;;  %vm956_vm9 = vcmp.lt.s32.totalorder %v9414_v63, 4  ;;  %v9429_v49 = vshll.u32 %v929_v40, 8  ;;  %v9432_v16 = vand.u32 31, %v623_v32 }
  0xbf   : > { %13682 = vst [vmem:[#allocation41_spill] sm:$0xff] %v9412_v51  ;;  %v2369_v30 = vmul.u32 %v2367_v0, %v2365_v9  ;;  %v9435_v11 = vmul.u32 %v2367_v0, %v9369_v4  ;;  %v2373_v48 = vshll.u32 %v9412_v51, 16  ;;  %v2785_v28 = vshrl.u32 %v2784_v5, 23 }
  0xc0   : > { %13686 = vst [vmem:[#allocation42_spill] sm:$0xff] %v9429_v49  ;;  %v2372_v44 = vmul.u32 %v2368_v7, %v9369_v4  ;;  %v943_v31 = vor.u32 %v942_v41, %v941_v56  ;;  %v946_v59 = vor.u32 %v945_v8, %v944_v54  ;;  %v949_v60 = vor.u32 %v948_v47, %v947_v50 }
  0xc1   : > { %13687 = vst [vmem:[#allocation43_spill] sm:$0xff] %v9435_v11  ;;  %v9439_v18 = vmul.u32 %v2389_v21, %v2365_v9  ;;  %vm953_vm10 = vcmp.lt.s32.totalorder %v9414_v63, 1  ;;  %vm955_vm11 = vcmp.lt.s32.totalorder %v9414_v63, 3  ;;  %v966_v40 = vsel %vm956_vm9, %v952_v29, 1326507024 }
  0xc2   : > { %v9445_v37 = vmul.u32 %v2390_v34, %v2365_v9  ;;  %v13690_v0 = vmov 683565275   ;;  %v939_v5 = vshrl.u32 %v13683_v46, %v936_v17  ;;  %v9451_v7 = vsub.s32 32, %v9432_v16 }
  0xc3   : > { %13688 = vst [vmem:[#allocation44_spill] sm:$0xff] %v9439_v18  ;;  %v938_v39 = vshll.u32 %v13690_v0, %v9359_v52  ;;  %vm2377_vm12 = vc.u32 %v2369_v30, %v2373_v48  ;;  %v9454_v8 = vmul.u32 %v2389_v21, %v9369_v4  ;;  %v13692_v56 = vand.u32 2147483647, %v9284_v58 }
  0xc4   : > { %13689 = vst [vmem:[#allocation45_spill] sm:$0xff] %v9445_v37  ;;  %v8460_v41 = vadd.s32 4294967169, %v2785_v28  ;;  %v937_v29 = vshrl.u32 %v13690_v0, %v936_v17  ;;  %vm954_vm13 = vcmp.lt.s32.totalorder %v9414_v63, 2  ;;  %v965_v52 = vsel %vm953_vm10, %v943_v31, %v946_v59  ;;  %v509_v17 = vpop.permute.xlu1 %508 }
  0xc5   : > { %13691 = vst [vmem:[#allocation46_spill] sm:$0xff] %v9454_v8  ;;  %v618_v54 = vand.u32 8388607, %v13692_v56  ;;  %v967_v9 = vsel %vm955_vm11, %v949_v60, %v966_v40  ;;  %v9466_v47 = vmul.u32 %v2390_v34, %v9369_v4  ;;  %v958_v21 = vsel %vm956_vm9, %v946_v59, 2102212464 }
  0xc6   : > { %v9471_v28 = vand.u32 65535, %v9429_v49  ;;  %v13694_v56 = vmov 0   ;;  %v940_v19 = vor.u32 %v939_v5, %v938_v39  ;;  %v9475_v3 = vshrl.u32 %v9429_v49, 16 }
  0xc7   : > { %13693 = vst [vmem:[#allocation47_spill] sm:$0xff] %v9466_v47  ;;  %v2378_v26 = vsel %vm2377_vm12, 1, %v13694_v56  ;;  %v641_v40 = vshrl.u32 %v13681_v2, %v9451_v7  ;;  %v962_v4 = vsel %vm956_vm9, %v949_v60, 920167782  ;;  %v968_v34 = vsel %vm954_vm13, %v965_v52, %v967_v9 }
  0xc8   : > { %v619_v50 = vor.u32 8388608, %v618_v54  ;;  %v2791_v27 = vadd.s32 1, %v8460_v41  ;;  %v957_v6 = vsel %vm953_vm10, %v937_v29, %v940_v19  ;;  %v959_v39 = vsel %vm955_vm11, %v943_v31, %v958_v21 }
  0xc9   : > { %v640_v5 = vshll.u32 %v13680_v42, %v9432_v16  ;;  %v9490_v14 = vmul.f32 %v9059_v20, %v509_v17  ;;  %v9492_v62 = vshrl.u32 %v623_v32, 5  ;;  %v632_v60 = vshrl.u32 %v13684_v38, %v9451_v7 }
  0xca   : > { %v635_v54 = vshrl.u32 %v13685_v33, %v9451_v7  ;;  %v638_v41 = vshrl.u32 %v13680_v42, %v9451_v7  ;;  %v961_v29 = vsel %vm953_vm10, %v940_v19, %v943_v31  ;;  %v963_v52 = vsel %vm955_vm11, %v946_v59, %v962_v4 }
  0xcb   : > { %13695 = vst [vmem:[#allocation48_spill] sm:$0xff] %v9490_v14  ;;  %v973_v9 = vshrl.u32 %v968_v34, 16  ;;  %v642_v21 = vor.u32 %v641_v40, %v640_v5  ;;  %v631_v32 = vshll.u32 %v13683_v46, %v9432_v16  ;;  %v634_v17 = vshll.u32 %v13684_v38, %v9432_v16 }
  0xcc   : > { %v637_v36 = vshll.u32 %v13685_v33, %v9432_v16  ;;  %vm2792_vm14 = vcmp.gt.s32.totalorder %v2791_v27, 0  ;;  %v9510_v45 = vadd.s32 %v2373_v48, %v2369_v30  ;;  %v9512_v61 = vadd.s32 %v2378_v26, %v2372_v44 }
  0xcd   : > { %v9516_v19 = vsel %vm954_vm13, %v957_v6, %v959_v39  ;;  %v1079_v31 = vand.u32 2139095040, %v9490_v14  ;;  %v633_v59 = vor.u32 %v632_v60, %v631_v32  ;;  %v636_v40 = vor.u32 %v635_v54, %v634_v17 }
  0xce   : > { %13696 = vst [vmem:[#allocation49_spill] sm:$0xff] %v9510_v45  ;;  %v639_v4 = vor.u32 %v638_v41, %v637_v36  ;;  %vm646_vm15 = vcmp.lt.s32.totalorder %v9492_v62, 4  ;;  %v964_v5 = vsel %vm954_vm13, %v961_v29, %v963_v52  ;;  %v9524_v48 = vshll.u32 %v619_v50, 8 }
  0xcf   : > { %13697 = vst [vmem:[#allocation50_spill] sm:$0xff] %v9512_v61  ;;  %v656_v30 = vsel %vm646_vm15, %v642_v21, 1326507024  ;;  %v2793_v26 = vsel %vm2792_vm14, %v2791_v27, 0  ;;  %v972_v44 = vand.u32 65535, %v968_v34  ;;  %v9527_v6 = vmul.u32 %v973_v9, %v9471_v28 }
  0xd0   : > { %13698 = vst [vmem:[#allocation51_spill] sm:$0xff] %v9516_v19  ;;  %v629_v36 = vshrl.u32 %v13683_v46, %v9451_v7  ;;  %v994_v60 = vand.u32 65535, %v964_v5  ;;  %vm643_vm0 = vcmp.lt.s32.totalorder %v9492_v62, 1  ;;  %vm645_vm1 = vcmp.lt.s32.totalorder %v9492_v62, 3 }
  0xd1   : > { %13699 = vst [vmem:[#allocation52_spill] sm:$0xff] %v9524_v48  ;;  %v1080_v63 = vshrl.u32 %v1079_v31, 23  ;;  %v628_v50 = vshll.u32 %v13690_v0, %v9432_v16  ;;  %v655_v27 = vsel %vm643_vm0, %v633_v59, %v636_v40  ;;  %v657_v34 = vsel %vm645_vm1, %v639_v4, %v656_v30 }
  0xd2   : > { %13700 = vst [vmem:[#allocation53_spill] sm:$0xff] %v9527_v6  ;;  %v9541_v54 = vand.u32 31, %v2793_v26  ;;  %v995_v41 = vshrl.u32 %v964_v5, 16  ;;  %v9544_v29 = vand.u32 65535, %v9524_v48  ;;  %v9547_v52 = vshrl.u32 %v9524_v48, 16 }
  0xd3   : > { %v974_v32 = vmul.u32 %v972_v44, %v9471_v28  ;;  %v978_v16 = vshll.u32 %v9527_v6, 16  ;;  %v630_v17 = vor.u32 %v629_v36, %v628_v50  ;;  %vm644_vm2 = vcmp.lt.s32.totalorder %v9492_v62, 2 }
  0xd4   : > { %v9554_v31 = vmul.u32 %v972_v44, %v9475_v3  ;;  %v648_v5 = vsel %vm646_vm15, %v636_v40, 2102212464  ;;  %v658_v30 = vsel %vm644_vm2, %v655_v27, %v657_v34  ;;  %v8427_v39 = vadd.s32 4294967169, %v1080_v63  ;;  %v499_v27 = vpop.permute.xlu0 %498 }
  0xd5   : > { %v977_v35 = vmul.u32 %v973_v9, %v9475_v3  ;;  %v627_v21 = vshrl.u32 %v13690_v0, %v9451_v7  ;;  %v652_v36 = vsel %vm646_vm15, %v639_v4, 920167782  ;;  %v2796_v50 = vsub.s32 32, %v9541_v54 }
  0xd6   : > { %v9567_v44 = vmul.u32 %v994_v60, %v9471_v28  ;;  %v9570_v22 = vmul.u32 %v995_v41, %v9471_v28  ;;  %v9573_v47 = vmul.u32 %v994_v60, %v9475_v3  ;;  %v13704_v63 = vand.u32 2147483647, %v9396_v23 }
  0xd7   : > { %vm982_vm3 = vc.u32 %v974_v32, %v978_v16  ;;  %v647_v7 = vsel %vm643_vm0, %v627_v21, %v630_v17  ;;  %v649_v4 = vsel %vm645_vm1, %v633_v59, %v648_v5  ;;  %v663_v34 = vshrl.u32 %v658_v30, 16 }
  0xd8   : > { %13701 = vst [vmem:[#allocation54_spill] sm:$0xff] %v9567_v44  ;;  %v2788_v9 = vand.u32 8388607, %v13704_v63  ;;  %v9582_v61 = vmul.u32 %v995_v41, %v9475_v3  ;;  %v651_v28 = vsel %vm643_vm0, %v630_v17, %v633_v59  ;;  %v653_v60 = vsel %vm645_vm1, %v636_v40, %v652_v36 }
  0xd9   : > { %13702 = vst [vmem:[#allocation55_spill] sm:$0xff] %v9570_v22  ;;  %v1086_v23 = vadd.s32 1, %v8427_v39  ;;  %v2810_v51 = vshll.u32 %v13680_v42, %v9541_v54  ;;  %v2811_v21 = vshrl.u32 %v13681_v2, %v2796_v50  ;;  %v9593_v5 = vmul.f32 %v9059_v20, %v499_v27 }
  0xda   : > { %13703 = vst [vmem:[#allocation56_spill] sm:$0xff] %v9573_v47  ;;  %v983_v3 = vsel %vm982_vm3, 1, %v13694_v56  ;;  %v9596_v41 = vadd.s32 %v978_v16, %v974_v32  ;;  %v9600_v59 = vsel %vm644_vm2, %v647_v7, %v649_v4  ;;  %v9602_v40 = vshrl.u32 %v2793_v26, 5 }
  0xdb   : > { %13705 = vst [vmem:[#allocation57_spill] sm:$0xff] %v9582_v61  ;;  %v654_v39 = vsel %vm644_vm2, %v651_v28, %v653_v60  ;;  %v9607_v17 = vmul.u32 %v663_v34, %v9544_v29  ;;  %v2789_v36 = vor.u32 8388608, %v2788_v9  ;;  %v2801_v27 = vshll.u32 %v13683_v46, %v9541_v54 }
  0xdc   : > { %13706 = vst [vmem:[#allocation58_spill] sm:$0xff] %v9593_v5  ;;  %v2802_v63 = vshrl.u32 %v13684_v38, %v2796_v50  ;;  %v2804_v32 = vshll.u32 %v13684_v38, %v9541_v54  ;;  %v2805_v16 = vshrl.u32 %v13685_v33, %v2796_v50  ;;  %vm1087_vm4 = vcmp.gt.s32.totalorder %v1086_v23, 0 }
  0xdd   : > { %13707 = vst [vmem:[#allocation59_spill] sm:$0xff] %v9600_v59  ;;  %v9615_v26 = vadd.s32 %v983_v3, %v977_v35  ;;  %v662_v7 = vand.u32 65535, %v658_v30  ;;  %v2812_v62 = vor.u32 %v2811_v21, %v2810_v51  ;;  %v769_v4 = vand.u32 2139095040, %v9593_v5 }
  0xde   : > { %v684_v28 = vand.u32 65535, %v654_v39  ;;  %v2807_v9 = vshll.u32 %v13685_v33, %v9541_v54  ;;  %v2808_v60 = vshrl.u32 %v13680_v42, %v2796_v50  ;;  %vm2816_vm5 = vcmp.lt.s32.totalorder %v9602_v40, 4 }
  0xdf   : > { %13708 = vst [vmem:[#allocation60_spill] sm:$0xff] %v9615_v26  ;;  %v685_v8 = vshrl.u32 %v654_v39, 16  ;;  %v9624_v10 = vshll.u32 %v2789_v36, 8  ;;  %v1088_v35 = vsel %vm1087_vm4, %v1086_v23, 0  ;;  %v668_v30 = vshll.u32 %v9607_v17, 16 }
  0xe0   : > { %v2803_v51 = vor.u32 %v2802_v63, %v2801_v27  ;;  %v2806_v21 = vor.u32 %v2805_v16, %v2804_v32  ;;  %v13507_v3 = vand.u32 2147483647, %v9490_v14  ;;  %vm2813_vm6 = vcmp.lt.s32.totalorder %v9602_v40, 1 }
  0xe1   : > { %13709 = vst [vmem:[#allocation61_spill] sm:$0xff] %v9624_v10  ;;  %vm2815_vm7 = vcmp.lt.s32.totalorder %v9602_v40, 3  ;;  %v2826_v18 = vsel %vm2816_vm5, %v2812_v62, 1326507024  ;;  %v770_v39 = vshrl.u32 %v769_v4, 23  ;;  %v2798_v24 = vshll.u32 %v13690_v0, %v9541_v54 }
  0xe2   : > { %v2799_v36 = vshrl.u32 %v13683_v46, %v2796_v50  ;;  %v2809_v23 = vor.u32 %v2808_v60, %v2807_v9  ;;  %v1090_v45 = vand.u32 31, %v1088_v35  ;;  %v664_v63 = vmul.u32 %v662_v7, %v9544_v29 }
  0xe3   : > { %v9637_v27 = vmul.u32 %v662_v7, %v9547_v52  ;;  %v667_v32 = vmul.u32 %v663_v34, %v9547_v52  ;;  %v9641_v16 = vmul.u32 %v684_v28, %v9544_v29  ;;  %v2797_v62 = vshrl.u32 %v13690_v0, %v2796_v50 }
  0xe4   : > { %vm2814_vm8 = vcmp.lt.s32.totalorder %v9602_v40, 2  ;;  %v2825_v54 = vsel %vm2813_vm6, %v2803_v51, %v2806_v21  ;;  %v2827_v4 = vsel %vm2815_vm7, %v2809_v23, %v2826_v18  ;;  %v9650_v9 = vmul.u32 %v685_v8, %v9544_v29 }
  0xe5   : > { %v2818_v7 = vsel %vm2816_vm5, %v2806_v21, 2102212464  ;;  %v1083_v34 = vand.u32 8388607, %v13507_v3  ;;  %v8421_v60 = vadd.s32 4294967169, %v770_v39  ;;  %vm672_vm9 = vc.u32 %v664_v63, %v668_v30 }
  0xe6   : > { %v9657_v50 = vmul.u32 %v684_v28, %v9547_v52  ;;  %v2800_v11 = vor.u32 %v2799_v36, %v2798_v24  ;;  %v1091_v37 = vsub.s32 32, %v1090_v45  ;;  %v9661_v18 = vmul.u32 %v685_v8, %v9547_v52 }
  0xe7   : > { %v9665_v29 = vsel %vm2814_vm8, %v2825_v54, %v2827_v4  ;;  %v9668_v57 = vand.u32 65535, %v9624_v10  ;;  %v2819_v24 = vsel %vm2815_vm7, %v2803_v51, %v2818_v7  ;;  %v2822_v28 = vsel %vm2816_vm5, %v2809_v23, 920167782 }
  0xe8   : > { %v2817_v39 = vsel %vm2813_vm6, %v2797_v62, %v2800_v11  ;;  %v9677_v36 = vshrl.u32 %v9624_v10, 16  ;;  %v673_v8 = vsel %vm672_vm9, 1, %v13694_v56  ;;  %v1084_v52 = vor.u32 8388608, %v1083_v34 }
  0xe9   : > { %v776_v54 = vadd.s32 1, %v8421_v60  ;;  %v9681_v4 = vmul.f32 %v9059_v20, %v579_v25  ;;  %v2821_v3 = vsel %vm2813_vm6, %v2800_v11, %v2803_v51  ;;  %v2833_v62 = vshrl.u32 %v9665_v29, 16 }
  0xea   : > { %v1105_v7 = vshll.u32 %v13680_v42, %v1090_v45  ;;  %v1106_v12 = vshrl.u32 %v13681_v2, %v1091_v37  ;;  %v9690_v23 = vsel %vm2814_vm8, %v2817_v39, %v2819_v24  ;;  %v2823_v34 = vsel %vm2815_vm7, %v2806_v21, %v2822_v28 }
  0xeb   : > { %13710 = vst [vmem:[#allocation62_spill] sm:$0xff] %v9681_v4  ;;  %v2832_v60 = vand.u32 65535, %v9665_v29  ;;  %v9695_v20 = vshrl.u32 %v1088_v35, 5  ;;  %v1096_v25 = vshll.u32 %v13683_v46, %v1090_v45  ;;  %v1099_v11 = vshll.u32 %v13684_v38, %v1090_v45 }
  0xec   : > { %13711 = vst [vmem:[#allocation63_spill] sm:$0xff] %v9690_v23  ;;  %v1102_v51 = vshll.u32 %v13685_v33, %v1090_v45  ;;  %v1103_v15 = vshrl.u32 %v13680_v42, %v1091_v37  ;;  %v1097_v13 = vshrl.u32 %v13684_v38, %v1091_v37  ;;  %v1100_v39 = vshrl.u32 %v13685_v33, %v1091_v37 }
  0xed   : > { %vm777_vm10 = vcmp.gt.s32.totalorder %v776_v54, 0  ;;  %v3249_v24 = vand.u32 2139095040, %v9681_v4  ;;  %v9704_v21 = vadd.s32 %v668_v30, %v664_v63  ;;  %v9706_v29 = vadd.s32 %v673_v8, %v667_v32 }
  0xee   : > { %v9709_v35 = vmul.u32 %v2833_v62, %v9668_v57  ;;  %v1107_v28 = vor.u32 %v1106_v12, %v1105_v7  ;;  %v1093_v55 = vshll.u32 %v13690_v0, %v1090_v45  ;;  %v1094_v1 = vshrl.u32 %v13683_v46, %v1091_v37 }
  0xef   : > { %vm1111_vm11 = vcmp.lt.s32.totalorder %v9695_v20, 4  ;;  %v9714_v43 = vshll.u32 %v1084_v52, 8  ;;  %v2824_v14 = vsel %vm2814_vm8, %v2821_v3, %v2823_v34  ;;  %v1104_v63 = vor.u32 %v1103_v15, %v1102_v51 }
  0xf0   : > { %13712 = vst [vmem:[#allocation64_spill] sm:$0xff] %v9709_v35  ;;  %v778_v32 = vsel %vm777_vm10, %v776_v54, 0  ;;  %v2834_v8 = vmul.u32 %v2832_v60, %v9668_v57  ;;  %v1098_v53 = vor.u32 %v1097_v13, %v1096_v25  ;;  %v1101_v12 = vor.u32 %v1100_v39, %v1099_v11 }
  0xf1   : > { %13713 = vst [vmem:[#allocation65_spill] sm:$0xff] %v9714_v43  ;;  %v3250_v7 = vshrl.u32 %v3249_v24, 23  ;;  %v2838_v45 = vshll.u32 %v9709_v35, 16  ;;  %vm1108_vm12 = vcmp.lt.s32.totalorder %v9695_v20, 1  ;;  %vm1110_vm13 = vcmp.lt.s32.totalorder %v9695_v20, 3 }
  0xf2   : > { %v1121_v40 = vsel %vm1111_vm11, %v1107_v28, 1326507024  ;;  %v2854_v3 = vand.u32 65535, %v2824_v14  ;;  %v2855_v52 = vshrl.u32 %v2824_v14, 16  ;;  %v1095_v34 = vor.u32 %v1094_v1, %v1093_v55  ;;  %v529_v14 = vpop.permute.xlu1 %528 }
  0xf3   : > { %v9726_v30 = vand.u32 31, %v778_v32  ;;  %v1092_v15 = vshrl.u32 %v13690_v0, %v1091_v37  ;;  %v1117_v13 = vsel %vm1111_vm11, %v1104_v63, 920167782  ;;  %v9732_v54 = vand.u32 65535, %v9714_v43 }
  0xf4   : > { %v13520_v25 = vand.u32 2147483647, %v9593_v5  ;;  %vm1109_vm14 = vcmp.lt.s32.totalorder %v9695_v20, 2  ;;  %v1120_v11 = vsel %vm1108_vm12, %v1098_v53, %v1101_v12  ;;  %v1122_v1 = vsel %vm1110_vm13, %v1104_v63, %v1121_v40 }
  0xf5   : > { %v8469_v55 = vadd.s32 4294967169, %v3250_v7  ;;  %v9741_v37 = vmul.u32 %v2832_v60, %v9677_v36  ;;  %vm2842_vm15 = vc.u32 %v2834_v8, %v2838_v45  ;;  %v1113_v51 = vsel %vm1111_vm11, %v1101_v12, 2102212464 }
  0xf6   : > { %v9746_v39 = vshrl.u32 %v9714_v43, 16  ;;  %v2837_v24 = vmul.u32 %v2833_v62, %v9677_v36  ;;  %v1116_v28 = vsel %vm1108_vm12, %v1095_v34, %v1098_v53  ;;  %v1118_v63 = vsel %vm1110_vm13, %v1101_v12, %v1117_v13  ;;  %v9766_v62 = vld [vmem:[%s13437_s1] ss:$0 sm:$0xff] }
  0xf7   : > { %13714 = vst [vmem:[#allocation66_spill] sm:$0xff] %v9741_v37  ;;  %v9754_v7 = vsub.s32 32, %v9726_v30  ;;  %v9757_v60 = vmul.u32 %v2854_v3, %v9668_v57  ;;  %v1123_v40 = vsel %vm1109_vm14, %v1120_v11, %v1122_v1  ;;  %v773_v23 = vand.u32 8388607, %v13520_v25 }
  0xf8   : > { %v9769_v10 = vmul.f32 %v9766_v62, %v529_v14  ;;  %v2843_v12 = vsel %vm2842_vm15, 1, %v13694_v56  ;;  %v1112_v13 = vsel %vm1108_vm12, %v1092_v15, %v1095_v34  ;;  %v3256_v11 = vadd.s32 1, %v8469_v55 }
  0xf9   : > { %13715 = vst [vmem:[#allocation67_spill] sm:$0xff] %v9757_v60  ;;  %v1114_v60 = vsel %vm1110_vm13, %v1098_v53, %v1113_v51  ;;  %v9777_v1 = vmul.u32 %v2855_v52, %v9668_v57  ;;  %v9780_v25 = vmul.u32 %v2854_v3, %v9677_v36  ;;  %v9783_v35 = vmul.u32 %v2855_v52, %v9677_v36 }
  0xfa   : > { %13716 = vst [vmem:[#allocation68_spill] sm:$0xff] %v9769_v10  ;;  %v1119_v14 = vsel %vm1109_vm14, %v1116_v28, %v1118_v63  ;;  %v9788_v19 = vadd.s32 %v2838_v45, %v2834_v8  ;;  %v1128_v34 = vshrl.u32 %v1123_v40, 16  ;;  %v796_v53 = vshrl.u32 %v13681_v2, %v9754_v7 }
  0xfb   : > { %13717 = vst [vmem:[#allocation69_spill] sm:$0xff] %v9777_v1  ;;  %v9792_v15 = vadd.s32 %v2843_v12, %v2837_v24  ;;  %v9796_v57 = vsel %vm1109_vm14, %v1112_v13, %v1114_v60  ;;  %v774_v3 = vor.u32 8388608, %v773_v23  ;;  %v1699_v36 = vand.u32 2139095040, %v9769_v10 }
  0xfc   : > { %13718 = vst [vmem:[#allocation70_spill] sm:$0xff] %v9780_v25  ;;  %v1127_v52 = vand.u32 65535, %v1123_v40  ;;  %v1149_v55 = vand.u32 65535, %v1119_v14  ;;  %v795_v51 = vshll.u32 %v13680_v42, %v9726_v30  ;;  %vm3257_vm0 = vcmp.gt.s32.totalorder %v3256_v11, 0 }
  0xfd   : > { %13719 = vst [vmem:[#allocation71_spill] sm:$0xff] %v9783_v35  ;;  %v9801_v8 = vshrl.u32 %v778_v32, 5  ;;  %v787_v45 = vshrl.u32 %v13684_v38, %v9754_v7  ;;  %v790_v24 = vshrl.u32 %v13685_v33, %v9754_v7  ;;  %v793_v20 = vshrl.u32 %v13680_v42, %v9754_v7 }
  0xfe   : > { %13720 = vst [vmem:[#allocation72_spill] sm:$0xff] %v9788_v19  ;;  %v9810_v23 = vmul.u32 %v1128_v34, %v9732_v54  ;;  %v1150_v28 = vshrl.u32 %v1119_v14, 16  ;;  %v786_v63 = vshll.u32 %v13683_v46, %v9726_v30  ;;  %v797_v60 = vor.u32 %v796_v53, %v795_v51 }
  0xff   : > { %13721 = vst [vmem:[#allocation73_spill] sm:$0xff] %v9792_v15  ;;  %v789_v32 = vshll.u32 %v13684_v38, %v9726_v30  ;;  %v792_v40 = vshll.u32 %v13685_v33, %v9726_v30  ;;  %v3258_v12 = vsel %vm3257_vm0, %v3256_v11, 0  ;;  %v1700_v13 = vshrl.u32 %v1699_v36, 23 }
 0x100   : > { %13722 = vst [vmem:[#allocation74_spill] sm:$0xff] %v9796_v57  ;;  %v1129_v5 = vmul.u32 %v1127_v52, %v9732_v54  ;;  %v9821_v25 = vshll.u32 %v774_v3, 8  ;;  %v13530_v14 = vand.u32 2147483647, %v9681_v4  ;;  %v788_v15 = vor.u32 %v787_v45, %v786_v63  ;;  %v524_v57 = vpop.permute.xlu0 %523 }
 0x101   : > { %13723 = vst [vmem:[#allocation75_spill] sm:$0xff] %v9810_v23  ;;  %v791_v1 = vor.u32 %v790_v24, %v789_v32  ;;  %v794_v53 = vor.u32 %v793_v20, %v792_v40  ;;  %vm801_vm1 = vcmp.lt.s32.totalorder %v9801_v8, 4  ;;  %v1133_v51 = vshll.u32 %v9810_v23, 16 }
 0x102   : > { %13724 = vst [vmem:[#allocation76_spill] sm:$0xff] %v9821_v25  ;;  %v784_v11 = vshrl.u32 %v13683_v46, %v9754_v7  ;;  %v811_v36 = vsel %vm801_vm1, %v797_v60, 1326507024  ;;  %v3260_v19 = vand.u32 31, %v3258_v12  ;;  %v9831_v35 = vmul.u32 %v1127_v52, %v9746_v39 }
 0x103   : > { %v1132_v3 = vmul.u32 %v1128_v34, %v9746_v39  ;;  %v9835_v45 = vmul.u32 %v1149_v55, %v9732_v54  ;;  %v8439_v24 = vadd.s32 4294967169, %v1700_v13  ;;  %v9838_v20 = vmul.u32 %v1150_v28, %v9732_v54 }
 0x104   : > { %13725 = vst [vmem:[#allocation77_spill] sm:$0xff] %v9831_v35  ;;  %v783_v63 = vshll.u32 %v13690_v0, %v9726_v30  ;;  %vm798_vm2 = vcmp.lt.s32.totalorder %v9801_v8, 1  ;;  %vm800_vm3 = vcmp.lt.s32.totalorder %v9801_v8, 3  ;;  %v9845_v60 = vmul.u32 %v1149_v55, %v9746_v39 }
 0x105   : > { %13726 = vst [vmem:[#allocation78_spill] sm:$0xff] %v9835_v45  ;;  %v810_v34 = vsel %vm798_vm2, %v788_v15, %v791_v1  ;;  %v812_v52 = vsel %vm800_vm3, %v794_v53, %v811_v36  ;;  %v3253_v54 = vand.u32 8388607, %v13530_v14  ;;  %vm1137_vm4 = vc.u32 %v1129_v5, %v1133_v51 }
 0x106   : > { %13727 = vst [vmem:[#allocation79_spill] sm:$0xff] %v9838_v20  ;;  %v9854_v32 = vmul.u32 %v1150_v28, %v9746_v39  ;;  %v785_v30 = vor.u32 %v784_v11, %v783_v63  ;;  %v9856_v40 = vsub.s32 32, %v3260_v19  ;;  %vm799_vm5 = vcmp.lt.s32.totalorder %v9801_v8, 2 }
 0x107   : > { %13728 = vst [vmem:[#allocation80_spill] sm:$0xff] %v9845_v60  ;;  %v9861_v55 = vand.u32 65535, %v9821_v25  ;;  %v1706_v37 = vadd.s32 1, %v8439_v24  ;;  %v9863_v36 = vadd.s32 %v1133_v51, %v1129_v5  ;;  %v782_v14 = vshrl.u32 %v13690_v0, %v9754_v7 }
 0x108   : > { %13729 = vst [vmem:[#allocation81_spill] sm:$0xff] %v9854_v32  ;;  %v813_v39 = vsel %vm799_vm5, %v810_v34, %v812_v52  ;;  %v816_v28 = vshrl.u32 %v9821_v25, 16  ;;  %v1138_v11 = vsel %vm1137_vm4, 1, %v13694_v56  ;;  %v803_v63 = vsel %vm801_vm1, %v791_v1, 2102212464 }
 0x109   : > { %13730 = vst [vmem:[#allocation82_spill] sm:$0xff] %v9863_v36  ;;  %v807_v13 = vsel %vm801_vm1, %v794_v53, 920167782  ;;  %v3254_v24 = vor.u32 8388608, %v3253_v54  ;;  %v802_v5 = vsel %vm798_vm2, %v782_v14, %v785_v30  ;;  %v3275_v51 = vshll.u32 %v13680_v42, %v3260_v19 }
 0x10a   : > { %v3276_v7 = vshrl.u32 %v13681_v2, %v9856_v40  ;;  %v9881_v34 = vmul.f32 %v9766_v62, %v524_v57  ;;  %v806_v52 = vsel %vm798_vm2, %v785_v30, %v788_v15  ;;  %v818_v4 = vshrl.u32 %v813_v39, 16 }
 0x10b   : > { %v9885_v43 = vshrl.u32 %v3258_v12, 5  ;;  %vm1707_vm6 = vcmp.gt.s32.totalorder %v1706_v37, 0  ;;  %v804_v53 = vsel %vm800_vm3, %v788_v15, %v803_v63  ;;  %v808_v14 = vsel %vm800_vm3, %v791_v1, %v807_v13 }
 0x10c   : > { %13731 = vst [vmem:[#allocation83_spill] sm:$0xff] %v9881_v34  ;;  %v3266_v54 = vshll.u32 %v13683_v46, %v3260_v19  ;;  %v3269_v32 = vshll.u32 %v13684_v38, %v3260_v19  ;;  %v3267_v57 = vshrl.u32 %v13684_v38, %v9856_v40  ;;  %v3270_v30 = vshrl.u32 %v13685_v33, %v9856_v40 }
 0x10d   : > { %v3272_v12 = vshll.u32 %v13685_v33, %v3260_v19  ;;  %v3273_v60 = vshrl.u32 %v13680_v42, %v9856_v40  ;;  %v9900_v45 = vadd.s32 %v1138_v11, %v1132_v3  ;;  %v3277_v15 = vor.u32 %v3276_v7, %v3275_v51 }
 0x10e   : > { %v1708_v63 = vsel %vm1707_vm6, %v1706_v37, 0  ;;  %v1544_v1 = vand.u32 2139095040, %v9881_v34  ;;  %v9905_v13 = vsel %vm799_vm5, %v802_v5, %v804_v53  ;;  %v9908_v23 = vmul.u32 %v818_v4, %v9861_v55 }
 0x10f   : > { %13732 = vst [vmem:[#allocation84_spill] sm:$0xff] %v9900_v45  ;;  %vm3281_vm7 = vcmp.lt.s32.totalorder %v9885_v43, 4  ;;  %v9911_v20 = vshll.u32 %v3254_v24, 8  ;;  %v809_v36 = vsel %vm799_vm5, %v806_v52, %v808_v14  ;;  %v817_v3 = vand.u32 65535, %v813_v39 }
 0x110   : > { %13733 = vst [vmem:[#allocation85_spill] sm:$0xff] %v9905_v13  ;;  %v3263_v11 = vshll.u32 %v13690_v0, %v3260_v19  ;;  %v3264_v37 = vshrl.u32 %v13683_v46, %v9856_v40  ;;  %v3268_v51 = vor.u32 %v3267_v57, %v3266_v54  ;;  %v3271_v7 = vor.u32 %v3270_v30, %v3269_v32 }
 0x111   : > { %13734 = vst [vmem:[#allocation86_spill] sm:$0xff] %v9911_v20  ;;  %v3274_v5 = vor.u32 %v3273_v60, %v3272_v12  ;;  %v9918_v53 = vand.u32 31, %v1708_v63  ;;  %vm3278_vm8 = vcmp.lt.s32.totalorder %v9885_v43, 1  ;;  %vm3280_vm9 = vcmp.lt.s32.totalorder %v9885_v43, 3 }
 0x112   : > { %v3291_v24 = vsel %vm3281_vm7, %v3277_v15, 1326507024  ;;  %v1545_v8 = vshrl.u32 %v1544_v1, 23  ;;  %v823_v39 = vshll.u32 %v9908_v23, 16  ;;  %v839_v52 = vand.u32 65535, %v809_v36 }
 0x113   : > { %v840_v19 = vshrl.u32 %v809_v36, 16  ;;  %v819_v32 = vmul.u32 %v817_v3, %v9861_v55  ;;  %v9928_v60 = vmul.u32 %v817_v3, %v816_v28  ;;  %v9931_v54 = vand.u32 65535, %v9911_v20 }
 0x114   : > { %vm3279_vm10 = vcmp.lt.s32.totalorder %v9885_v43, 2  ;;  %v3290_v30 = vsel %vm3278_vm8, %v3268_v51, %v3271_v7  ;;  %v3292_v36 = vsel %vm3280_vm9, %v3274_v5, %v3291_v24  ;;  %v9940_v12 = vsub.s32 32, %v9918_v53 }
 0x115   : > { %v822_v15 = vmul.u32 %v818_v4, %v816_v28  ;;  %v3265_v1 = vor.u32 %v3264_v37, %v3263_v11  ;;  %v9943_v3 = vshrl.u32 %v9911_v20, 16  ;;  %v8436_v14 = vadd.s32 4294967169, %v1545_v8  ;;  %v544_v37 = vpop.permute.xlu1 %543 }
 0x116   : > { %vm827_vm11 = vc.u32 %v819_v32, %v823_v39  ;;  %v9946_v57 = vmul.u32 %v839_v52, %v9861_v55  ;;  %v9949_v45 = vmul.u32 %v840_v19, %v9861_v55  ;;  %v9951_v35 = vmul.u32 %v839_v52, %v816_v28 }
 0x117   : > { %v9954_v49 = vmul.u32 %v840_v19, %v816_v28  ;;  %v3287_v4 = vsel %vm3281_vm7, %v3274_v5, 920167782  ;;  %v3293_v11 = vsel %vm3279_vm10, %v3290_v30, %v3292_v36  ;;  %v9960_v8 = vadd.s32 %v823_v39, %v819_v32 }
 0x118   : > { %v3262_v58 = vshrl.u32 %v13690_v0, %v9856_v40  ;;  %v13735_v55 = vand.u32 2147483647, %v9769_v10  ;;  %v1726_v24 = vshrl.u32 %v13681_v2, %v9940_v12  ;;  %v828_v28 = vsel %vm827_vm11, 1, %v13694_v56 }
 0x119   : > { %v3283_v5 = vsel %vm3281_vm7, %v3271_v7, 2102212464  ;;  %v3286_v19 = vsel %vm3278_vm8, %v3265_v1, %v3268_v51  ;;  %v1551_v30 = vadd.s32 1, %v8436_v14  ;;  %v3288_v39 = vsel %vm3280_vm9, %v3271_v7, %v3287_v4 }
 0x11a   : > { %v1703_v52 = vand.u32 8388607, %v13735_v55  ;;  %v3298_v32 = vshrl.u32 %v3293_v11, 16  ;;  %v1725_v40 = vshll.u32 %v13680_v42, %v9918_v53  ;;  %v9978_v36 = vmul.f32 %v9766_v62, %v544_v37 }
 0x11b   : > { %v9980_v55 = vshrl.u32 %v1708_v63, 5  ;;  %v1717_v10 = vshrl.u32 %v13684_v38, %v9940_v12  ;;  %v1720_v13 = vshrl.u32 %v13685_v33, %v9940_v12  ;;  %v1723_v14 = vshrl.u32 %v13680_v42, %v9940_v12 }
 0x11c   : > { %13736 = vst [vmem:[#allocation87_spill] sm:$0xff] %v9978_v36  ;;  %v9988_v25 = vadd.s32 %v828_v28, %v822_v15  ;;  %v3282_v7 = vsel %vm3278_vm8, %v3262_v58, %v3265_v1  ;;  %v3297_v4 = vand.u32 65535, %v3293_v11  ;;  %v1727_v61 = vor.u32 %v1726_v24, %v1725_v40 }
 0x11d   : > { %v1716_v63 = vshll.u32 %v13683_v46, %v9918_v53  ;;  %v1719_v37 = vshll.u32 %v13684_v38, %v9918_v53  ;;  %v1722_v6 = vshll.u32 %v13685_v33, %v9918_v53  ;;  %vm1552_vm12 = vcmp.gt.s32.totalorder %v1551_v30, 0 }
 0x11e   : > { %v3284_v44 = vsel %vm3280_vm9, %v3268_v51, %v3283_v5  ;;  %v3289_v15 = vsel %vm3279_vm10, %v3286_v19, %v3288_v39  ;;  %v10003_v58 = vmul.u32 %v3298_v32, %v9931_v54  ;;  %v2164_v1 = vand.u32 2139095040, %v9978_v36 }
 0x11f   : > { %v1718_v24 = vor.u32 %v1717_v10, %v1716_v63  ;;  %v1721_v11 = vor.u32 %v1720_v13, %v1719_v37  ;;  %v1724_v28 = vor.u32 %v1723_v14, %v1722_v6  ;;  %vm1731_vm13 = vcmp.lt.s32.totalorder %v9980_v55, 4 }
 0x120   : > { %13737 = vst [vmem:[#allocation88_spill] sm:$0xff] %v10003_v58  ;;  %v1704_v40 = vor.u32 8388608, %v1703_v52  ;;  %v1741_v59 = vsel %vm1731_vm13, %v1727_v61, 1326507024  ;;  %v13551_v48 = vand.u32 2147483647, %v9881_v34  ;;  %v10012_v5 = vsel %vm3279_vm10, %v3282_v7, %v3284_v44 }
 0x121   : > { %v1553_v51 = vsel %vm1552_vm12, %v1551_v30, 0  ;;  %13738 = vst [vmem:[#allocation89_spill] sm:$0xff] %v10012_v5  ;;  %v3299_v19 = vmul.u32 %v3297_v4, %v9931_v54  ;;  %v3319_v39 = vand.u32 65535, %v3289_v15  ;;  %v1714_v10 = vshrl.u32 %v13683_v46, %v9940_v12 }
 0x122   : > { %v3303_v6 = vshll.u32 %v10003_v58, 16  ;;  %vm1728_vm14 = vcmp.lt.s32.totalorder %v9980_v55, 1  ;;  %vm1730_vm15 = vcmp.lt.s32.totalorder %v9980_v55, 3  ;;  %v2165_v61 = vshrl.u32 %v2164_v1, 23 }
 0x123   : > { %v1713_v13 = vshll.u32 %v13690_v0, %v9918_v53  ;;  %v1740_v43 = vsel %vm1728_vm14, %v1718_v24, %v1721_v11  ;;  %v1742_v44 = vsel %vm1730_vm15, %v1724_v28, %v1741_v59  ;;  %v1555_v52 = vand.u32 31, %v1553_v51 }
 0x124   : > { %v3320_v30 = vshrl.u32 %v3289_v15, 16  ;;  %v10028_v7 = vshll.u32 %v1704_v40, 8  ;;  %v1548_v63 = vand.u32 8388607, %v13551_v48  ;;  %v10033_v37 = vmul.u32 %v3297_v4, %v9943_v3 }
 0x125   : > { %v3302_v53 = vmul.u32 %v3298_v32, %v9943_v3  ;;  %v1715_v1 = vor.u32 %v1714_v10, %v1713_v13  ;;  %vm1729_vm0 = vcmp.lt.s32.totalorder %v9980_v55, 2  ;;  %vm3307_vm1 = vc.u32 %v3299_v19, %v3303_v6 }
 0x126   : > { %13739 = vst [vmem:[#allocation90_spill] sm:$0xff] %v10028_v7  ;;  %v1733_v59 = vsel %vm1731_vm13, %v1721_v11, 2102212464  ;;  %v10041_v15 = vsel %vm1729_vm0, %v1740_v43, %v1742_v44  ;;  %v8448_v40 = vadd.s32 4294967169, %v2165_v61  ;;  %v10044_v14 = vmul.u32 %v3319_v39, %v9931_v54  ;;  %v539_v44 = vpop.permute.xlu0 %538 }
 0x127   : > { %13740 = vst [vmem:[#allocation91_spill] sm:$0xff] %v10033_v37  ;;  %v1712_v4 = vshrl.u32 %v13690_v0, %v9940_v12  ;;  %v1737_v32 = vsel %vm1731_vm13, %v1724_v28, 920167782  ;;  %v10050_v10 = vsub.s32 32, %v1555_v52  ;;  %v10053_v13 = vmul.u32 %v3320_v30, %v9931_v54 }
 0x128   : > { %13741 = vst [vmem:[#allocation92_spill] sm:$0xff] %v10044_v14  ;;  %v10056_v48 = vmul.u32 %v3319_v39, %v9943_v3  ;;  %v10059_v43 = vmul.u32 %v3320_v30, %v9943_v3  ;;  %v1549_v61 = vor.u32 8388608, %v1548_v63  ;;  %v3308_v5 = vsel %vm3307_vm1, 1, %v13694_v56 }
 0x129   : > { %13742 = vst [vmem:[#allocation93_spill] sm:$0xff] %v10053_v13  ;;  %v1732_v12 = vsel %vm1728_vm14, %v1712_v4, %v1715_v1  ;;  %v1734_v28 = vsel %vm1730_vm15, %v1718_v24, %v1733_v59  ;;  %v1748_v20 = vshrl.u32 %v10041_v15, 16  ;;  %v1736_v39 = vsel %vm1728_vm14, %v1715_v1, %v1718_v24 }
 0x12a   : > { %13743 = vst [vmem:[#allocation94_spill] sm:$0xff] %v10056_v48  ;;  %v1738_v3 = vsel %vm1730_vm15, %v1721_v11, %v1737_v32  ;;  %v2171_v30 = vadd.s32 1, %v8448_v40  ;;  %v1745_v63 = vand.u32 65535, %v10028_v7  ;;  %v10074_v58 = vshrl.u32 %v10028_v7, 16 }
 0x12b   : > { %13744 = vst [vmem:[#allocation95_spill] sm:$0xff] %v10059_v43  ;;  %v1571_v4 = vshrl.u32 %v13681_v2, %v10050_v10  ;;  %v10079_v59 = vmul.f32 %v9766_v62, %v539_v44  ;;  %v10081_v43 = vadd.s32 %v3303_v6, %v3299_v19  ;;  %v10083_v54 = vadd.s32 %v3308_v5, %v3302_v53 }
 0x12c   : > { %v10087_v24 = vsel %vm1729_vm0, %v1732_v12, %v1734_v28  ;;  %v10089_v11 = vshll.u32 %v1549_v61, 8  ;;  %v1739_v1 = vsel %vm1729_vm0, %v1736_v39, %v1738_v3  ;;  %v10093_v40 = vmul.u32 %v1748_v20, %v1745_v63 }
 0x12d   : > { %13745 = vst [vmem:[#allocation96_spill] sm:$0xff] %v10079_v59  ;;  %v1568_v32 = vshrl.u32 %v13680_v42, %v10050_v10  ;;  %v1570_v44 = vshll.u32 %v13680_v42, %v1555_v52  ;;  %v10098_v19 = vshrl.u32 %v1553_v51, 5  ;;  %v1562_v5 = vshrl.u32 %v13684_v38, %v10050_v10 }
 0x12e   : > { %13746 = vst [vmem:[#allocation97_spill] sm:$0xff] %v10081_v43  ;;  %v1565_v6 = vshrl.u32 %v13685_v33, %v10050_v10  ;;  %vm2172_vm2 = vcmp.gt.s32.totalorder %v2171_v30, 0  ;;  %v1567_v53 = vshll.u32 %v13685_v33, %v1555_v52  ;;  %v2009_v12 = vand.u32 2139095040, %v10079_v59 }
 0x12f   : > { %13747 = vst [vmem:[#allocation98_spill] sm:$0xff] %v10083_v54  ;;  %v1572_v61 = vor.u32 %v1571_v4, %v1570_v44  ;;  %v1747_v28 = vand.u32 65535, %v10041_v15  ;;  %v1559_v51 = vshrl.u32 %v13683_v46, %v10050_v10  ;;  %v1561_v39 = vshll.u32 %v13683_v46, %v1555_v52 }
 0x130   : > { %13748 = vst [vmem:[#allocation99_spill] sm:$0xff] %v10087_v24  ;;  %v1564_v3 = vshll.u32 %v13684_v38, %v1555_v52  ;;  %v1753_v54 = vshll.u32 %v10093_v40, 16  ;;  %v1769_v14 = vand.u32 65535, %v1739_v1  ;;  %v1569_v48 = vor.u32 %v1568_v32, %v1567_v53 }
 0x131   : > { %13749 = vst [vmem:[#allocation100_spill] sm:$0xff] %v10089_v11  ;;  %v2173_v43 = vsel %vm2172_vm2, %v2171_v30, 0  ;;  %v1558_v55 = vshll.u32 %v13690_v0, %v1555_v52  ;;  %v1563_v37 = vor.u32 %v1562_v5, %v1561_v39  ;;  %vm1576_vm3 = vcmp.lt.s32.totalorder %v10098_v19, 4 }
 0x132   : > { %13750 = vst [vmem:[#allocation101_spill] sm:$0xff] %v10093_v40  ;;  %v1566_v4 = vor.u32 %v1565_v6, %v1564_v3  ;;  %v1770_v44 = vshrl.u32 %v1739_v1, 16  ;;  %v1586_v15 = vsel %vm1576_vm3, %v1572_v61, 1326507024  ;;  %v10119_v13 = vand.u32 65535, %v10089_v11 }
 0x133   : > { %v2010_v24 = vshrl.u32 %v2009_v12, 23  ;;  %v1749_v7 = vmul.u32 %v1747_v28, %v1745_v63  ;;  %v1560_v34 = vor.u32 %v1559_v51, %v1558_v55  ;;  %v10122_v40 = vshrl.u32 %v10089_v11, 16 }
 0x134   : > { %v2175_v30 = vand.u32 31, %v2173_v43  ;;  %vm1573_vm4 = vcmp.lt.s32.totalorder %v10098_v19, 1  ;;  %vm1575_vm5 = vcmp.lt.s32.totalorder %v10098_v19, 3  ;;  %v1582_v52 = vsel %vm1576_vm3, %v1569_v48, 920167782 }
 0x135   : > { %v13566_v1 = vand.u32 2147483647, %v9978_v36  ;;  %v10130_v32 = vmul.u32 %v1747_v28, %v10074_v58  ;;  %vm1757_vm6 = vc.u32 %v1749_v7, %v1753_v54  ;;  %v1585_v5 = vsel %vm1573_vm4, %v1563_v37, %v1566_v4 }
 0x136   : > { %v1587_v6 = vsel %vm1575_vm5, %v1569_v48, %v1586_v15  ;;  %v1752_v55 = vmul.u32 %v1748_v20, %v10074_v58  ;;  %v1557_v53 = vshrl.u32 %v13690_v0, %v10050_v10  ;;  %v1578_v61 = vsel %vm1576_vm3, %v1566_v4, 2102212464 }
 0x137   : > { %13751 = vst [vmem:[#allocation102_spill] sm:$0xff] %v10130_v32  ;;  %v8445_v12 = vadd.s32 4294967169, %v2010_v24  ;;  %vm1574_vm7 = vcmp.lt.s32.totalorder %v10098_v19, 2  ;;  %v1581_v28 = vsel %vm1573_vm4, %v1560_v34, %v1563_v37  ;;  %v1583_v51 = vsel %vm1575_vm5, %v1566_v4, %v1582_v52 }
 0x138   : > { %v2176_v39 = vsub.s32 32, %v2175_v30  ;;  %v1758_v48 = vsel %vm1757_vm6, 1, %v13694_v56  ;;  %v10147_v3 = vmul.u32 %v1769_v14, %v1745_v63  ;;  %v1588_v20 = vsel %vm1574_vm7, %v1585_v5, %v1587_v6  ;;  %v559_v6 = vpop.permute.xlu1 %558 }
 0x139   : > { %v2168_v10 = vand.u32 8388607, %v13566_v1  ;;  %v10153_v24 = vmul.u32 %v1770_v44, %v1745_v63  ;;  %v10156_v15 = vmul.u32 %v1769_v14, %v10074_v58  ;;  %v1577_v26 = vsel %vm1573_vm4, %v1557_v53, %v1560_v34 }
 0x13a   : > { %13752 = vst [vmem:[#allocation103_spill] sm:$0xff] %v10147_v3  ;;  %v1579_v4 = vsel %vm1575_vm5, %v1563_v37, %v1578_v61  ;;  %v10164_v3 = vmul.u32 %v1770_v44, %v10074_v58  ;;  %v10168_v5 = vsel %vm1574_vm7, %v1581_v28, %v1583_v51  ;;  %v2016_v63 = vadd.s32 1, %v8445_v12 }
 0x13b   : > { %13753 = vst [vmem:[#allocation104_spill] sm:$0xff] %v10153_v24  ;;  %v10170_v1 = vadd.s32 %v1753_v54, %v1749_v7  ;;  %v10172_v14 = vadd.s32 %v1758_v48, %v1752_v55  ;;  %v2191_v34 = vshrl.u32 %v13681_v2, %v2176_v39  ;;  %v10177_v37 = vsel %vm1574_vm7, %v1577_v26, %v1579_v4 }
 0x13c   : > { %13754 = vst [vmem:[#allocation105_spill] sm:$0xff] %v10156_v15  ;;  %v1593_v15 = vshrl.u32 %v1588_v20, 16  ;;  %v1592_v53 = vand.u32 65535, %v1588_v20  ;;  %v2169_v58 = vor.u32 8388608, %v2168_v10  ;;  %v2185_v44 = vshrl.u32 %v13685_v33, %v2176_v39 }
 0x13d   : > { %13755 = vst [vmem:[#allocation106_spill] sm:$0xff] %v10164_v3  ;;  %v1614_v61 = vand.u32 65535, %v10168_v5  ;;  %v10181_v28 = vshrl.u32 %v2173_v43, 5  ;;  %v2190_v7 = vshll.u32 %v13680_v42, %v2175_v30  ;;  %v10185_v54 = vmul.f32 %v9766_v62, %v559_v6 }
 0x13e   : > { %13756 = vst [vmem:[#allocation107_spill] sm:$0xff] %v10170_v1  ;;  %v2182_v55 = vshrl.u32 %v13684_v38, %v2176_v39  ;;  %v2184_v12 = vshll.u32 %v13684_v38, %v2175_v30  ;;  %v2188_v26 = vshrl.u32 %v13680_v42, %v2176_v39  ;;  %vm2017_vm8 = vcmp.gt.s32.totalorder %v2016_v63, 0 }
 0x13f   : > { %13757 = vst [vmem:[#allocation108_spill] sm:$0xff] %v10172_v14  ;;  %v10191_v19 = vmul.u32 %v1593_v15, %v10119_v13  ;;  %v1615_v51 = vshrl.u32 %v10168_v5, 16  ;;  %v2179_v43 = vshrl.u32 %v13683_v46, %v2176_v39  ;;  %v2192_v48 = vor.u32 %v2191_v34, %v2190_v7 }
 0x140   : > { %13758 = vst [vmem:[#allocation109_spill] sm:$0xff] %v10177_v37  ;;  %v2181_v20 = vshll.u32 %v13683_v46, %v2175_v30  ;;  %v2186_v10 = vor.u32 %v2185_v44, %v2184_v12  ;;  %v2187_v4 = vshll.u32 %v13685_v33, %v2175_v30  ;;  %v2178_v3 = vshll.u32 %v13690_v0, %v2175_v30 }
 0x141   : > { %13759 = vst [vmem:[#allocation110_spill] sm:$0xff] %v10185_v54  ;;  %v2018_v14 = vsel %vm2017_vm8, %v2016_v63, 0  ;;  %v2629_v24 = vand.u32 2139095040, %v10185_v54  ;;  %vm2196_vm9 = vcmp.lt.s32.totalorder %v10181_v28, 4  ;;  %v10203_v34 = vshll.u32 %v2169_v58, 8 }
 0x142   : > { %13760 = vst [vmem:[#allocation111_spill] sm:$0xff] %v10191_v19  ;;  %v2183_v1 = vor.u32 %v2182_v55, %v2181_v20  ;;  %v2189_v5 = vor.u32 %v2188_v26, %v2187_v4  ;;  %v1594_v44 = vmul.u32 %v1592_v53, %v10119_v13  ;;  %v1598_v7 = vshll.u32 %v10191_v19, 16 }
 0x143   : > { %13761 = vst [vmem:[#allocation112_spill] sm:$0xff] %v10203_v34  ;;  %v2180_v12 = vor.u32 %v2179_v43, %v2178_v3  ;;  %v2206_v6 = vsel %vm2196_vm9, %v2192_v48, 1326507024  ;;  %v10208_v32 = vmul.u32 %v1592_v53, %v10122_v40  ;;  %v2198_v52 = vsel %vm2196_vm9, %v2186_v10, 2102212464 }
 0x144   : > { %v13763_v30 = vand.u32 2147483647, %v10079_v59  ;;  %v2020_v37 = vand.u32 31, %v2018_v14  ;;  %v2177_v55 = vshrl.u32 %v13690_v0, %v2176_v39  ;;  %vm2193_vm10 = vcmp.lt.s32.totalorder %v10181_v28, 1 }
 0x145   : > { %13762 = vst [vmem:[#allocation113_spill] sm:$0xff] %v10208_v32  ;;  %vm2195_vm11 = vcmp.lt.s32.totalorder %v10181_v28, 3  ;;  %v2630_v58 = vshrl.u32 %v2629_v24, 23  ;;  %v1597_v26 = vmul.u32 %v1593_v15, %v10122_v40  ;;  %v2202_v20 = vsel %vm2196_vm9, %v2189_v5, 920167782  ;;  %v554_v24 = vpop.permute.xlu0 %553 }
 0x146   : > { %v2013_v63 = vand.u32 8388607, %v13763_v30  ;;  %v2205_v3 = vsel %vm2193_vm10, %v2183_v1, %v2186_v10  ;;  %v2207_v53 = vsel %vm2195_vm11, %v2189_v5, %v2206_v6  ;;  %vm1602_vm12 = vc.u32 %v1594_v44, %v1598_v7 }
 0x147   : > { %v10221_v43 = vmul.u32 %v1614_v61, %v10119_v13  ;;  %v2197_v39 = vsel %vm2193_vm10, %v2177_v55, %v2180_v12  ;;  %v2199_v48 = vsel %vm2195_vm11, %v2183_v1, %v2198_v52  ;;  %v10228_v15 = vmul.u32 %v1615_v51, %v10119_v13 }
 0x148   : > { %vm2194_vm13 = vcmp.lt.s32.totalorder %v10181_v28, 2  ;;  %v2014_v4 = vor.u32 8388608, %v2013_v63  ;;  %v2021_v30 = vsub.s32 32, %v2020_v37  ;;  %v2201_v6 = vsel %vm2193_vm10, %v2180_v12, %v2183_v1 }
 0x149   : > { %13764 = vst [vmem:[#allocation114_spill] sm:$0xff] %v10221_v43  ;;  %v2203_v5 = vsel %vm2195_vm11, %v2186_v10, %v2202_v20  ;;  %v10237_v55 = vsel %vm2194_vm13, %v2205_v3, %v2207_v53  ;;  %v8457_v59 = vadd.s32 4294967169, %v2630_v58  ;;  %v1603_v52 = vsel %vm1602_vm12, 1, %v13694_v56 }
 0x14a   : > { %13765 = vst [vmem:[#allocation115_spill] sm:$0xff] %v10228_v15  ;;  %v10241_v13 = vmul.u32 %v1614_v61, %v10122_v40  ;;  %v10245_v63 = vsel %vm2194_vm13, %v2197_v39, %v2199_v48  ;;  %v10248_v11 = vmul.f32 %v9766_v62, %v554_v24  ;;  %v10252_v10 = vmul.u32 %v1615_v51, %v10122_v40 }
 0x14b   : > { %13767 = vst [vmem:[#allocation117_spill] sm:$0xff] %v10245_v63  ;;  %v10255_v12 = vand.u32 65535, %v10203_v34  ;;  %v10258_v58 = vshrl.u32 %v10203_v34, 16  ;;  %v10260_v61 = vadd.s32 %v1598_v7, %v1594_v44  ;;  %v10264_v20 = vsel %vm2194_vm13, %v2201_v6, %v2203_v5 }
 0x14c   : > { %13766 = vst [vmem:[#allocation116_spill] sm:$0xff] %v10241_v13  ;;  %v2213_v3 = vshrl.u32 %v10237_v55, 16  ;;  %v2036_v53 = vshrl.u32 %v13681_v2, %v2021_v30  ;;  %v10268_v39 = vadd.s32 %v1603_v52, %v1597_v26  ;;  %v10272_v51 = vshll.u32 %v2014_v4, 8 }
 0x14d   : > { %13768 = vst [vmem:[#allocation118_spill] sm:$0xff] %v10248_v11  ;;  %v2636_v48 = vadd.s32 1, %v8457_v59  ;;  %v2030_v24 = vshrl.u32 %v13685_v33, %v2021_v30  ;;  %v2033_v44 = vshrl.u32 %v13680_v42, %v2021_v30  ;;  %v2035_v28 = vshll.u32 %v13680_v42, %v2020_v37 }
 0x14e   : > { %13769 = vst [vmem:[#allocation119_spill] sm:$0xff] %v10252_v10  ;;  %v2474_v7 = vand.u32 2139095040, %v10248_v11  ;;  %v2212_v6 = vand.u32 65535, %v10237_v55  ;;  %v2234_v5 = vand.u32 65535, %v10264_v20  ;;  %v2019_v26 = vshrl.u32 %v2018_v14, 5 }
 0x14f   : > { %13770 = vst [vmem:[#allocation120_spill] sm:$0xff] %v10260_v61  ;;  %v2027_v52 = vshrl.u32 %v13684_v38, %v2021_v30  ;;  %v10282_v1 = vmul.u32 %v2213_v3, %v10255_v12  ;;  %v2029_v59 = vshll.u32 %v13684_v38, %v2020_v37  ;;  %v2032_v4 = vshll.u32 %v13685_v33, %v2020_v37 }
 0x150   : > { %13771 = vst [vmem:[#allocation121_spill] sm:$0xff] %v10268_v39  ;;  %v2037_v40 = vor.u32 %v2036_v53, %v2035_v28  ;;  %v2235_v10 = vshrl.u32 %v10264_v20, 16  ;;  %v2024_v43 = vshrl.u32 %v13683_v46, %v2021_v30  ;;  %v2026_v13 = vshll.u32 %v13683_v46, %v2020_v37  ;;  %v574_v53 = vpop.permute.xlu1 %573 }
 0x151   : > { %13772 = vst [vmem:[#allocation122_spill] sm:$0xff] %v10272_v51  ;;  %vm2637_vm14 = vcmp.gt.s32.totalorder %v2636_v48, 0  ;;  %v2031_v55 = vor.u32 %v2030_v24, %v2029_v59  ;;  %v2034_v39 = vor.u32 %v2033_v44, %v2032_v4  ;;  %v10290_v14 = vand.u32 65535, %v10272_v51 }
 0x152   : > { %13773 = vst [vmem:[#allocation123_spill] sm:$0xff] %v10282_v1  ;;  %v2475_v15 = vshrl.u32 %v2474_v7, 23  ;;  %v2023_v19 = vshll.u32 %v13690_v0, %v2020_v37  ;;  %v2028_v61 = vor.u32 %v2027_v52, %v2026_v13  ;;  %vm2041_vm15 = vcmp.lt.s32.totalorder %v2019_v26, 4 }
 0x153   : > { %v10294_v32 = vshrl.u32 %v10272_v51, 16  ;;  %v2218_v20 = vshll.u32 %v10282_v1, 16  ;;  %v2051_v28 = vsel %vm2041_vm15, %v2037_v40, 1326507024  ;;  %v13589_v36 = vand.u32 2147483647, %v10185_v54 }
 0x154   : > { %v2638_v63 = vsel %vm2637_vm14, %v2636_v48, 0  ;;  %v2214_v24 = vmul.u32 %v2212_v6, %v10255_v12  ;;  %v2025_v44 = vor.u32 %v2024_v43, %v2023_v19  ;;  %vm2038_vm0 = vcmp.lt.s32.totalorder %v2019_v26, 1 }
 0x155   : > { %vm2040_vm1 = vcmp.lt.s32.totalorder %v2019_v26, 3  ;;  %v2043_v7 = vsel %vm2041_vm15, %v2031_v55, 2102212464  ;;  %v2047_v59 = vsel %vm2041_vm15, %v2034_v39, 920167782  ;;  %v8454_v37 = vadd.s32 4294967169, %v2475_v15 }
 0x156   : > { %v10300_v13 = vmul.f32 %v9766_v62, %v574_v53  ;;  %v2022_v52 = vshrl.u32 %v13690_v0, %v2021_v30  ;;  %v2050_v4 = vsel %vm2038_vm0, %v2028_v61, %v2031_v55  ;;  %v2052_v40 = vsel %vm2040_vm1, %v2034_v39, %v2051_v28 }
 0x157   : > { %v2640_v34 = vand.u32 31, %v2638_v63  ;;  %v10306_v48 = vmul.u32 %v2212_v6, %v10258_v58  ;;  %vm2222_vm2 = vc.u32 %v2214_v24, %v2218_v20  ;;  %vm2039_vm3 = vcmp.lt.s32.totalorder %v2019_v26, 2 }
 0x158   : > { %13774 = vst [vmem:[#allocation124_spill] sm:$0xff] %v10300_v13  ;;  %v2633_v19 = vand.u32 8388607, %v13589_v36  ;;  %v2042_v43 = vsel %vm2038_vm0, %v2022_v52, %v2025_v44  ;;  %v2044_v62 = vsel %vm2040_vm1, %v2028_v61, %v2043_v7  ;;  %v2046_v15 = vsel %vm2038_vm0, %v2025_v44, %v2028_v61 }
 0x159   : > { %13775 = vst [vmem:[#allocation125_spill] sm:$0xff] %v10306_v48  ;;  %v2048_v30 = vsel %vm2040_vm1, %v2031_v55, %v2047_v59  ;;  %v2217_v53 = vmul.u32 %v2213_v3, %v10258_v58  ;;  %v2053_v39 = vsel %vm2039_vm3, %v2050_v4, %v2052_v40  ;;  %v2481_v28 = vadd.s32 1, %v8454_v37 }
 0x15a   : > { %v3094_v6 = vand.u32 2139095040, %v10300_v13  ;;  %v2223_v1 = vsel %vm2222_vm2, 1, %v13694_v56  ;;  %v10319_v54 = vmul.u32 %v2234_v5, %v10255_v12  ;;  %v10322_v52 = vmul.u32 %v2235_v10, %v10255_v12 }
 0x15b   : > { %v2641_v7 = vsub.s32 32, %v2640_v34  ;;  %v10325_v61 = vmul.u32 %v2234_v5, %v10258_v58  ;;  %v10328_v55 = vsel %vm2039_vm3, %v2042_v43, %v2044_v62  ;;  %v2049_v3 = vsel %vm2039_vm3, %v2046_v15, %v2048_v30 }
 0x15c   : > { %13776 = vst [vmem:[#allocation126_spill] sm:$0xff] %v10319_v54  ;;  %v2634_v44 = vor.u32 8388608, %v2633_v19  ;;  %v10332_v37 = vadd.s32 %v2218_v20, %v2214_v24  ;;  %v10335_v4 = vmul.u32 %v2235_v10, %v10258_v58  ;;  %v2058_v40 = vshrl.u32 %v2053_v39, 16 }
 0x15d   : > { %13777 = vst [vmem:[#allocation127_spill] sm:$0xff] %v10322_v52  ;;  %v10337_v12 = vadd.s32 %v2223_v1, %v2217_v53  ;;  %v2057_v36 = vand.u32 65535, %v2053_v39  ;;  %vm2482_vm4 = vcmp.gt.s32.totalorder %v2481_v28, 0  ;;  %v3095_v5 = vshrl.u32 %v3094_v6, 23 }
 0x15e   : > { %13778 = vst [vmem:[#allocation128_spill] sm:$0xff] %v10325_v61  ;;  %v2079_v61 = vand.u32 65535, %v2049_v3  ;;  %v2080_v54 = vshrl.u32 %v2049_v3, 16  ;;  %v2656_v19 = vshrl.u32 %v13681_v2, %v2641_v7  ;;  %v2650_v43 = vshrl.u32 %v13685_v33, %v2641_v7 }
 0x15f   : > { %13779 = vst [vmem:[#allocation129_spill] sm:$0xff] %v10328_v55  ;;  %v2653_v20 = vshrl.u32 %v13680_v42, %v2641_v7  ;;  %v10344_v24 = vshll.u32 %v2634_v44, 8  ;;  %v10348_v1 = vmul.u32 %v2058_v40, %v10290_v14  ;;  %v2639_v58 = vshrl.u32 %v2638_v63, 5 }
 0x160   : > { %13780 = vst [vmem:[#allocation130_spill] sm:$0xff] %v10332_v37  ;;  %v2655_v62 = vshll.u32 %v13680_v42, %v2640_v34  ;;  %v2483_v15 = vsel %vm2482_vm4, %v2481_v28, 0  ;;  %v2647_v30 = vshrl.u32 %v13684_v38, %v2641_v7  ;;  %v2649_v53 = vshll.u32 %v13684_v38, %v2640_v34 }
 0x161   : > { %13781 = vst [vmem:[#allocation131_spill] sm:$0xff] %v10335_v4  ;;  %v2652_v39 = vshll.u32 %v13685_v33, %v2640_v34  ;;  %v8466_v6 = vadd.s32 4294967169, %v3095_v5  ;;  %v2059_v3 = vmul.u32 %v2057_v36, %v10290_v14  ;;  %v10356_v44 = vmul.u32 %v2057_v36, %v10294_v32 }
 0x162   : > { %13782 = vst [vmem:[#allocation132_spill] sm:$0xff] %v10337_v12  ;;  %v2644_v26 = vshrl.u32 %v13683_v46, %v2641_v7  ;;  %v2657_v59 = vor.u32 %v2656_v19, %v2655_v62  ;;  %v2646_v63 = vshll.u32 %v13683_v46, %v2640_v34  ;;  %v2651_v10 = vor.u32 %v2650_v43, %v2649_v53 }
 0x163   : > { %13783 = vst [vmem:[#allocation133_spill] sm:$0xff] %v10344_v24  ;;  %v2654_v55 = vor.u32 %v2653_v20, %v2652_v39  ;;  %v10360_v28 = vand.u32 31, %v2483_v15  ;;  %v2062_v51 = vmul.u32 %v2058_v40, %v10294_v32  ;;  %v10364_v4 = vmul.u32 %v2079_v61, %v10290_v14 }
 0x164   : > { %13784 = vst [vmem:[#allocation134_spill] sm:$0xff] %v10348_v1  ;;  %v10367_v5 = vmul.u32 %v2080_v54, %v10290_v14  ;;  %v2643_v36 = vshll.u32 %v13690_v0, %v2640_v34  ;;  %v2063_v52 = vshll.u32 %v10348_v1, 16  ;;  %v2648_v12 = vor.u32 %v2647_v30, %v2646_v63 }
 0x165   : > { %13785 = vst [vmem:[#allocation135_spill] sm:$0xff] %v10356_v44  ;;  %vm2661_vm5 = vcmp.lt.s32.totalorder %v2639_v58, 4  ;;  %v3101_v19 = vadd.s32 1, %v8466_v6  ;;  %v10372_v43 = vmul.u32 %v2079_v61, %v10294_v32  ;;  %v13789_v40 = vand.u32 2147483647, %v10248_v11 }
 0x166   : > { %13786 = vst [vmem:[#allocation136_spill] sm:$0xff] %v10364_v4  ;;  %v2645_v20 = vor.u32 %v2644_v26, %v2643_v36  ;;  %v2671_v62 = vsel %vm2661_vm5, %v2657_v59, 1326507024  ;;  %v10377_v39 = vmul.u32 %v2080_v54, %v10294_v32  ;;  %v2663_v14 = vsel %vm2661_vm5, %v2651_v10, 2102212464 }
 0x167   : > { %13787 = vst [vmem:[#allocation137_spill] sm:$0xff] %v10367_v5  ;;  %v2478_v53 = vand.u32 8388607, %v13789_v40  ;;  %v2667_v4 = vsel %vm2661_vm5, %v2654_v55, 920167782  ;;  %v10380_v34 = vsub.s32 32, %v10360_v28  ;;  %v2642_v6 = vshrl.u32 %v13690_v0, %v2641_v7 }
 0x168   : > { %13788 = vst [vmem:[#allocation138_spill] sm:$0xff] %v10372_v43  ;;  %vm2658_vm6 = vcmp.lt.s32.totalorder %v2639_v58, 1  ;;  %vm2660_vm7 = vcmp.lt.s32.totalorder %v2639_v58, 3  ;;  %vm10384_vm8 = vc.u32 %v2059_v3, %v2063_v52  ;;  %vm3102_vm9 = vcmp.gt.s32.totalorder %v3101_v19, 0 }
 0x169   : > { %13790 = vst [vmem:[#allocation139_spill] sm:$0xff] %v10377_v39  ;;  %v2670_v59 = vsel %vm2658_vm6, %v2648_v12, %v2651_v10  ;;  %v2672_v26 = vsel %vm2660_vm7, %v2654_v55, %v2671_v62  ;;  %v2662_v32 = vsel %vm2658_vm6, %v2642_v6, %v2645_v20  ;;  %v2664_v54 = vsel %vm2660_vm7, %v2648_v12, %v2663_v14 }
 0x16a   : > { %v2666_v63 = vsel %vm2658_vm6, %v2645_v20, %v2648_v12  ;;  %v2668_v36 = vsel %vm2660_vm7, %v2651_v10, %v2667_v4  ;;  %vm2659_vm10 = vcmp.lt.s32.totalorder %v2639_v58, 2  ;;  %v2675_v40 = vand.u32 65535, %v10344_v24 }
 0x16b   : > { %v2479_v39 = vor.u32 8388608, %v2478_v53  ;;  %v2501_v7 = vshrl.u32 %v13681_v2, %v10380_v34  ;;  %v10391_v30 = vadd.s32 %v2063_v52, %v2059_v3  ;;  %v2673_v43 = vsel %vm2659_vm10, %v2670_v59, %v2672_v26 }
 0x16c   : > { %v2676_v5 = vshrl.u32 %v10344_v24, 16  ;;  %v3103_v1 = vsel %vm3102_vm9, %v3101_v19, 0  ;;  %v2068_v55 = vsel %vm10384_vm8, 1, %v13694_v56  ;;  %v10397_v62 = vsel %vm2659_vm10, %v2662_v32, %v2664_v54 }
 0x16d   : > { %13793 = vst [vmem:[#allocation140_spill] sm:$0xff] %v10391_v30  ;;  %v2669_v4 = vsel %vm2659_vm10, %v2666_v63, %v2668_v36  ;;  %v2500_v12 = vshll.u32 %v13680_v42, %v10360_v28  ;;  %v10401_v10 = vshrl.u32 %v2483_v15, 5  ;;  %v2492_v52 = vshrl.u32 %v13684_v38, %v10380_v34 }
 0x16e   : > { %13794 = vst [vmem:[#allocation141_spill] sm:$0xff] %v10397_v62  ;;  %v2495_v58 = vshrl.u32 %v13685_v33, %v10380_v34  ;;  %v2498_v3 = vshrl.u32 %v13680_v42, %v10380_v34  ;;  %v2678_v19 = vshrl.u32 %v2673_v43, 16  ;;  %v10409_v53 = vshll.u32 %v2479_v39, 8 }
 0x16f   : > { %v2502_v20 = vor.u32 %v2501_v7, %v2500_v12  ;;  %v10411_v14 = vand.u32 31, %v3103_v1  ;;  %v2677_v6 = vand.u32 65535, %v2673_v43  ;;  %v2491_v15 = vshll.u32 %v13683_v46, %v10360_v28  ;;  %v569_v7 = vpop.permute.xlu0 %568 }
 0x170   : > { %v2494_v61 = vshll.u32 %v13684_v38, %v10360_v28  ;;  %v2497_v59 = vshll.u32 %v13685_v33, %v10360_v28  ;;  %v10419_v26 = vadd.s32 %v2068_v55, %v2062_v51  ;;  %v2699_v32 = vand.u32 65535, %v2669_v4 }
 0x171   : > { %v2700_v54 = vshrl.u32 %v2669_v4, 16  ;;  %v10423_v63 = vor.u32 %v2492_v52, %v2491_v15  ;;  %vm2506_vm11 = vcmp.lt.s32.totalorder %v10401_v10, 4  ;;  %v10426_v12 = vmul.u32 %v2678_v19, %v2675_v40 }
 0x172   : > { %13795 = vst [vmem:[#allocation142_spill] sm:$0xff] %v10419_v26  ;;  %v2496_v36 = vor.u32 %v2495_v58, %v2494_v61  ;;  %v2499_v43 = vor.u32 %v2498_v3, %v2497_v59  ;;  %v2516_v30 = vsel %vm2506_vm11, %v2502_v20, 1326507024  ;;  %v10431_v51 = vand.u32 65535, %v10409_v53  ;;  %v10451_v20 = vld [vmem:[%s13437_s1] ss:$0 sm:$0xff] }
 0x173   : > { %13796 = vst [vmem:[#allocation143_spill] sm:$0xff] %v10426_v12  ;;  %v10434_v55 = vsub.s32 32, %v10411_v14  ;;  %v10436_v4 = vmul.u32 %v2677_v6, %v2675_v40  ;;  %v2489_v52 = vshrl.u32 %v13683_v46, %v10380_v34  ;;  %v10441_v58 = vshrl.u32 %v10409_v53, 16 }
 0x174   : > { %v10444_v15 = vmul.u32 %v2677_v6, %v2676_v5  ;;  %vm2503_vm12 = vcmp.lt.s32.totalorder %v10401_v10, 1  ;;  %vm2505_vm13 = vcmp.lt.s32.totalorder %v10401_v10, 3  ;;  %v10454_v61 = vmul.f32 %v10451_v20, %v569_v7 }
 0x175   : > { %v10456_v59 = vmul.u32 %v2678_v19, %v2676_v5  ;;  %v2488_v39 = vshll.u32 %v13690_v0, %v10360_v28  ;;  %v2515_v6 = vsel %vm2503_vm12, %v10423_v63, %v2496_v36  ;;  %v2517_v3 = vsel %vm2505_vm13, %v2499_v43, %v2516_v30 }
 0x176   : > { %13797 = vst [vmem:[#allocation144_spill] sm:$0xff] %v10444_v15  ;;  %v2683_v26 = vshll.u32 %v10426_v12, 16  ;;  %v10466_v44 = vmul.u32 %v2699_v32, %v2675_v40  ;;  %v10468_v62 = vmul.u32 %v2700_v54, %v2675_v40  ;;  %v3121_v19 = vshrl.u32 %v13681_v2, %v10434_v55  ;;  %v6502_v12 = vld [vmem:[%s13439_s3 + $0x8] sm:$0xff]  ;;  %v13828_v15 = vld [vmem:[#allocation54_spill] sm:$0xff] }
 0x177   : > { %13798 = vst [vmem:[#allocation145_spill] sm:$0xff] %v10454_v61  ;;  %v10472_v7 = vmul.u32 %v2699_v32, %v2676_v5  ;;  %v10474_v24 = vmul.u32 %v2700_v54, %v2676_v5  ;;  %v2490_v28 = vor.u32 %v2489_v52, %v2488_v39  ;;  %vm2504_vm14 = vcmp.lt.s32.totalorder %v10401_v10, 2  ;;  %v6504_v5 = vld [vmem:[%s13439_s3 + $0x18] sm:$0xff]  ;;  %v6503_v32 = vld [vmem:[%s13439_s3 + $0x10] sm:$0xff] }
 0x178   : > { %13799 = vst [vmem:[#allocation146_spill] sm:$0xff] %v10466_v44  ;;  %v2512_v11 = vsel %vm2506_vm11, %v2499_v43, 920167782  ;;  %v10481_v30 = vsel %vm2504_vm14, %v2515_v6, %v2517_v3  ;;  %v3120_v40 = vshll.u32 %v13680_v42, %v10411_v14  ;;  %v2939_v44 = vand.u32 2139095040, %v10454_v61  ;;  %6579 = vmatpush.msra.mxu0 %v6504_v5  ;;  %8648 = vmatpush.msra.mxu1 %v6504_v5 }
 0x179   : > { %13800 = vst [vmem:[#allocation147_spill] sm:$0xff] %v10468_v62  ;;  %v10492_v54 = vshrl.u32 %v3103_v1, 5  ;;  %v3112_v39 = vshrl.u32 %v13684_v38, %v10434_v55  ;;  %v3115_v43 = vshrl.u32 %v13685_v33, %v10434_v55  ;;  %v3118_v52 = vshrl.u32 %v13680_v42, %v10434_v55 }
 0x17a   : > { %13801 = vst [vmem:[#allocation148_spill] sm:$0xff] %v10472_v7  ;;  %vm10501_vm15 = vc.u32 %v10436_v4, %v2683_v26  ;;  %v2487_v1 = vshrl.u32 %v13690_v0, %v10380_v34  ;;  %v13805_v6 = vand.u32 2147483647, %v10300_v13  ;;  %v3122_v7 = vor.u32 %v3121_v19, %v3120_v40  ;;  %6580 = vmatpush.msra.mxu0 %v6503_v32  ;;  %v6501_v13 = vld [vmem:[%s13439_s3] sm:$0xff] }
 0x17b   : > { %13802 = vst [vmem:[#allocation149_spill] sm:$0xff] %v10474_v24  ;;  %v2523_v62 = vshrl.u32 %v10481_v30, 16  ;;  %v3111_v5 = vshll.u32 %v13683_v46, %v10411_v14  ;;  %v3114_v37 = vshll.u32 %v13684_v38, %v10411_v14  ;;  %v3117_v48 = vshll.u32 %v13685_v33, %v10411_v14  ;;  %8649 = vmatpush.msra.mxu1 %v6503_v32 }
 0x17c   : > { %v3098_v24 = vand.u32 8388607, %v13805_v6  ;;  %v2508_v34 = vsel %vm2506_vm11, %v2496_v36, 2102212464  ;;  %v2511_v19 = vsel %vm2503_vm12, %v2490_v28, %v10423_v63  ;;  %v2513_v40 = vsel %vm2505_vm13, %v2496_v36, %v2512_v11  ;;  %6581 = vmatpush.msra.mxu0 %v6502_v12 }
 0x17d   : > { %v2940_v6 = vshrl.u32 %v2939_v44, 23  ;;  %v3113_v2 = vor.u32 %v3112_v39, %v3111_v5  ;;  %v3116_v42 = vor.u32 %v3115_v43, %v3114_v37  ;;  %v3119_v47 = vor.u32 %v3118_v52, %v3117_v48  ;;  %8650 = vmatpush.msra.mxu1 %v6502_v12 }
 0x17e   : > { %vm3126_vm0 = vcmp.lt.s32.totalorder %v10492_v54, 4  ;;  %v2688_v32 = vsel %vm10501_vm15, 1, %v13694_v56  ;;  %v2507_v22 = vsel %vm2503_vm12, %v2487_v1, %v2490_v28  ;;  %v3109_v11 = vshrl.u32 %v13683_v46, %v10434_v55  ;;  %6582 = vmatpush.msra.mxu0 %v6501_v13 }
 0x17f   : > { %v3136_v44 = vsel %vm3126_vm0, %v3122_v7, 1326507024  ;;  %v2509_v48 = vsel %vm2505_vm13, %v10423_v63, %v2508_v34  ;;  %v2514_v37 = vsel %vm2504_vm14, %v2511_v19, %v2513_v40  ;;  %v10545_v36 = vmul.u32 %v2523_v62, %v10431_v51  ;;  %8651 = vmatpush.msra.mxu1 %v6501_v13 }
 0x180   : > { %v13617_v12 = vand.u32 2147483647, %v10454_v61  ;;  %v3099_v28 = vor.u32 8388608, %v3098_v24  ;;  %v3108_v39 = vshll.u32 %v13690_v0, %v10411_v14  ;;  %vm3123_vm1 = vcmp.lt.s32.totalorder %v10492_v54, 1 }
 0x181   : > { %vm3125_vm2 = vcmp.lt.s32.totalorder %v10492_v54, 3  ;;  %v2522_v63 = vand.u32 65535, %v10481_v30  ;;  %v3135_v7 = vsel %vm3123_vm1, %v3113_v2, %v3116_v42  ;;  %v8463_v52 = vadd.s32 4294967169, %v2940_v6 }
 0x182   : > { %v3137_v43 = vsel %vm3125_vm2, %v3119_v47, %v3136_v44  ;;  %v10559_v13 = vadd.s32 %v2683_v26, %v10436_v4  ;;  %v10563_v24 = vsel %vm2504_vm14, %v2507_v22, %v2509_v48  ;;  %v3110_v14 = vor.u32 %v3109_v11, %v3108_v39 }
 0x183   : > { %v2528_v1 = vshll.u32 %v10545_v36, 16  ;;  %vm3124_vm3 = vcmp.lt.s32.totalorder %v10492_v54, 2  ;;  %v3132_v30 = vsel %vm3126_vm0, %v3119_v47, 920167782  ;;  %v2943_v5 = vand.u32 8388607, %v13617_v12 }
 0x184   : > { %13806 = vst [vmem:[#allocation150_spill] sm:$0xff] %v10559_v13  ;;  %v10572_v34 = vadd.s32 %v2688_v32, %v10456_v59  ;;  %v2544_v26 = vand.u32 65535, %v2514_v37  ;;  %v2545_v4 = vshrl.u32 %v2514_v37, 16  ;;  %v3138_v22 = vsel %vm3124_vm3, %v3135_v7, %v3137_v43  ;;  %v13826_v13 = vld [vmem:[#allocation59_spill] sm:$0xff] }
 0x185   : > { %v2524_v10 = vmul.u32 %v2522_v63, %v10431_v51  ;;  %v3128_v19 = vsel %vm3126_vm0, %v3116_v42, 2102212464  ;;  %v10579_v40 = vshll.u32 %v3099_v28, 8  ;;  %v2946_v6 = vadd.s32 1, %v8463_v52  ;;  %v584_v28 = vpop.permute.xlu0 %583 }
 0x186   : > { %13807 = vst [vmem:[#allocation151_spill] sm:$0xff] %v10572_v34  ;;  %v3107_v59 = vshrl.u32 %v13690_v0, %v10434_v55  ;;  %v3131_v32 = vsel %vm3123_vm1, %v3110_v14, %v3113_v2  ;;  %v3133_v11 = vsel %vm3125_vm2, %v3116_v42, %v3132_v30  ;;  %v10590_v44 = vmul.u32 %v2522_v63, %v10441_v58  ;;  %v13825_v34 = vld [vmem:[#allocation52_spill] sm:$0xff] }
 0x187   : > { %13808 = vst [vmem:[#allocation152_spill] sm:$0xff] %v10579_v40  ;;  %vm2532_vm4 = vc.u32 %v2524_v10, %v2528_v1  ;;  %v3143_v48 = vshrl.u32 %v3138_v22, 16  ;;  %v2944_v37 = vor.u32 8388608, %v2943_v5  ;;  %v2527_v39 = vmul.u32 %v2523_v62, %v10441_v58 }
 0x188   : > { %v10594_v7 = vmul.u32 %v2544_v26, %v10431_v51  ;;  %v3127_v55 = vsel %vm3123_vm1, %v3107_v59, %v3110_v14  ;;  %v3129_v43 = vsel %vm3125_vm2, %v3113_v2, %v3128_v19  ;;  %v10601_v42 = vmul.u32 %v2545_v4, %v10431_v51 }
 0x189   : > { %v3134_v63 = vsel %vm3124_vm3, %v3131_v32, %v3133_v11  ;;  %v3140_v52 = vand.u32 65535, %v10579_v40  ;;  %vm2947_vm5 = vcmp.gt.s32.totalorder %v2946_v6, 0  ;;  %v2533_v62 = vsel %vm2532_vm4, 1, %v13694_v56 }
 0x18a   : > { %v10608_v30 = vmul.u32 %v2544_v26, %v10441_v58  ;;  %v3142_v5 = vand.u32 65535, %v3138_v22  ;;  %v10611_v14 = vmul.f32 %v10451_v20, %v584_v28  ;;  %v10615_v2 = vsel %vm3124_vm3, %v3127_v55, %v3129_v43 }
 0x18b   : > { %13810 = vst [vmem:[#allocation154_spill] sm:$0xff] %v10615_v2  ;;  %v10617_v51 = vmul.u32 %v3143_v48, %v3140_v52  ;;  %v10619_v19 = vshll.u32 %v2944_v37, 8  ;;  %v13812_v59 = vshll.u32 %v9637_v27, 16  ;;  %v10625_v32 = vmul.u32 %v2545_v4, %v10441_v58 }
 0x18c   : > { %13809 = vst [vmem:[#allocation153_spill] sm:$0xff] %v10611_v14  ;;  %v3141_v26 = vshrl.u32 %v10579_v40, 16  ;;  %v3164_v22 = vand.u32 65535, %v3134_v63  ;;  %v2948_v20 = vsel %vm2947_vm5, %v2946_v6, 0  ;;  %v10629_v54 = vadd.s32 %v2528_v1, %v2524_v10 }
 0x18d   : > { %13811 = vst [vmem:[#allocation155_spill] sm:$0xff] %v10617_v51  ;;  %vm676_vm6 = vc.u32 %v9704_v21, %v13812_v59  ;;  %v3165_v28 = vshrl.u32 %v3134_v63, 16  ;;  %v690_v55 = vshll.u32 %v9650_v9, 16  ;;  %v10632_v37 = vadd.s32 %v2533_v62, %v2527_v39 }
 0x18e   : > { %v10634_v43 = vmul.u32 %v3142_v5, %v3141_v26  ;;  %v677_v58 = vsel %vm676_vm6, 1, %v13694_v56  ;;  %v3148_v4 = vshll.u32 %v10617_v51, 16  ;;  %v10640_v59 = vand.u32 31, %v2948_v20 }
 0x18f   : > { %v10643_v6 = vand.u32 65535, %v10619_v19  ;;  %v3144_v10 = vmul.u32 %v3142_v5, %v3140_v52  ;;  %v10646_v63 = vmul.u32 %v3143_v48, %v3141_v26  ;;  %v10648_v39 = vmul.u32 %v3164_v22, %v3140_v52 }
 0x190   : > { %13813 = vst [vmem:[#allocation156_spill] sm:$0xff] %v10634_v43  ;;  %v10651_v62 = vshrl.u32 %v10619_v19, 16  ;;  %v10653_v21 = vmul.u32 %v3165_v28, %v3140_v52  ;;  %v10655_v12 = vmul.u32 %v3164_v22, %v3141_v26  ;;  %v679_v3 = vadd.s32 %v677_v58, %v9706_v29 }
 0x191   : > { %13814 = vst [vmem:[#allocation157_spill] sm:$0xff] %v10648_v39  ;;  %vm694_vm7 = vc.u32 %v9641_v16, %v690_v55  ;;  %v10660_v11 = vmul.u32 %v3165_v28, %v3141_v26  ;;  %v10662_v5 = vshrl.u32 %v2948_v20, 5  ;;  %vm3152_vm8 = vc.u32 %v3144_v10, %v3148_v4 }
 0x192   : > { %13815 = vst [vmem:[#allocation158_spill] sm:$0xff] %v10653_v21  ;;  %v10666_v1 = vsub.s32 32, %v10640_v59  ;;  %v13818_v52 = vand.u32 2147483647, %v10611_v14  ;;  %v669_v29 = vshrl.u32 %v9607_v17, 16  ;;  %v692_v2 = vshll.u32 %v9657_v50, 16 }
 0x193   : > { %13816 = vst [vmem:[#allocation159_spill] sm:$0xff] %v10655_v12  ;;  %v695_v26 = vsel %vm694_vm7, 1, %v13694_v56  ;;  %v696_v20 = vadd.s32 %v690_v55, %v9641_v16  ;;  %v10676_v28 = vadd.s32 %v3148_v4, %v3144_v10  ;;  %v10680_v47 = vshll.u32 %v13690_v0, %v10640_v59 }
 0x194   : > { %13817 = vst [vmem:[#allocation160_spill] sm:$0xff] %v10660_v11  ;;  %v10670_v22 = vand.u32 8388607, %v13818_v52  ;;  %v680_v48 = vadd.s32 %v679_v3, %v669_v29  ;;  %v697_v40 = vadd.s32 %v695_v26, %v9661_v18  ;;  %v10684_v52 = vsel %vm3152_vm8, 1, %v13694_v56 }
 0x195   : > { %13819 = vst [vmem:[#allocation161_spill] sm:$0xff] %v10676_v28  ;;  %v10688_v17 = vshll.u32 %v13683_v46, %v10640_v59  ;;  %v2959_v58 = vshll.u32 %v13684_v38, %v10640_v59  ;;  %vm698_vm9 = vc.u32 %v696_v20, %v692_v2  ;;  %v10694_v16 = vshrl.u32 %v13690_v0, %v10666_v1 }
 0x196   : > { %v2962_v3 = vshll.u32 %v13685_v33, %v10640_v59  ;;  %v671_v18 = vshrl.u32 %v9637_v27, 16  ;;  %v699_v55 = vsel %vm698_vm9, 1, %v13694_v56  ;;  %v10702_v4 = vshrl.u32 %v13683_v46, %v10666_v1 }
 0x197   : > { %v10706_v10 = vshrl.u32 %v13684_v38, %v10666_v1  ;;  %v691_v29 = vshrl.u32 %v9650_v9, 16  ;;  %v701_v26 = vadd.s32 %v699_v55, %v697_v40  ;;  %v2960_v11 = vshrl.u32 %v13685_v33, %v10666_v1 }
 0x198   : > { %v10711_v12 = vadd.s32 %v680_v48, %v671_v18  ;;  %v693_v27 = vshrl.u32 %v9657_v50, 16  ;;  %v845_v51 = vshll.u32 %v9949_v45, 16  ;;  %v10715_v39 = vadd.s32 %v696_v20, %v692_v2 }
 0x199   : > { %v702_v21 = vadd.s32 %v701_v26, %v691_v29  ;;  %v824_v28 = vshrl.u32 %v9908_v23, 16  ;;  %v13820_v43 = vshll.u32 %v9928_v60, 16  ;;  %v847_v40 = vshll.u32 %v9951_v35, 16  ;;  %v13822_v29 = vld [vmem:[#allocation55_spill] sm:$0xff] }
 0x19a   : > { %vm849_vm11 = vc.u32 %v9946_v57, %v845_v51  ;;  %v851_v48 = vadd.s32 %v845_v51, %v9946_v57  ;;  %v13821_v20 = vshll.u32 %v9554_v31, 16  ;;  %vm706_vm13 = vc.u32 %v10711_v12, %v10715_v39 }
 0x19b   : > { %vm831_vm10 = vc.u32 %v9960_v8, %v13820_v43  ;;  %v703_v50 = vadd.s32 %v702_v21, %v693_v27  ;;  %v850_v2 = vsel %vm849_vm11, 1, %v13694_v56  ;;  %v826_v57 = vshrl.u32 %v9928_v60, 16 }
 0x19c   : > { %v832_v9 = vsel %vm831_vm10, 1, %v13694_v56  ;;  %vm986_vm12 = vc.u32 %v9596_v41, %v13821_v20  ;;  %v852_v23 = vadd.s32 %v850_v2, %v9954_v49  ;;  %vm853_vm14 = vc.u32 %v851_v48, %v847_v40  ;;  %v13823_v41 = vld [vmem:[#allocation56_spill] sm:$0xff] }
 0x19d   : > { %v834_v18 = vadd.s32 %v832_v9, %v9988_v25  ;;  %v987_v8 = vsel %vm986_vm12, 1, %v13694_v56  ;;  %v707_v43 = vadd.s32 1, %v703_v50  ;;  %v854_v25 = vsel %vm853_vm14, 1, %v13694_v56  ;;  %v13824_v2 = vld [vmem:[#allocation60_spill] sm:$0xff] }
 0x19e   : > { %v846_v21 = vshrl.u32 %v9949_v45, 16  ;;  %v856_v55 = vadd.s32 %v854_v25, %v852_v23  ;;  %v1000_v26 = vshll.u32 %v13822_v29, 16  ;;  %v1002_v27 = vshll.u32 %v13823_v41, 16 }
 0x19f   : > { %v835_v51 = vadd.s32 %v834_v18, %v824_v28  ;;  %v708_v9 = vsel %vm706_vm13, %v707_v43, %v703_v50  ;;  %v848_v49 = vshrl.u32 %v9951_v35, 16  ;;  %v989_v61 = vadd.s32 %v987_v8, %v13824_v2  ;;  %v13830_v50 = vld [vmem:[#allocation53_spill] sm:$0xff] }
 0x1a0   : > { %v13827_v60 = vmul.u32 %v13825_v34, %v13826_v13  ;;  %v857_v18 = vadd.s32 %v856_v55, %v846_v21  ;;  %vm1004_vm15 = vc.u32 %v13828_v15, %v1000_v26  ;;  %v1006_v45 = vadd.s32 %v1000_v26, %v13828_v15 }
 0x1a1   : > { %v10739_v20 = vadd.s32 %v835_v51, %v826_v57  ;;  %v13829_v23 = vmov 920167782   ;;  %v10750_v33 = vadd.s32 %v851_v48, %v847_v40  ;;  %v979_v43 = vshrl.u32 %v13830_v50, 16  ;;  %v13831_v51 = vld [vmem:[#allocation57_spill] sm:$0xff] }
 0x1a2   : > { %v709_v28 = vadd.s32 %v708_v9, %v13827_v60  ;;  %v2963_v25 = vshrl.u32 %v13829_v23, %v10666_v1  ;;  %v1005_v35 = vsel %vm1004_vm15, 1, %v13694_v56  ;;  %v858_v8 = vadd.s32 %v857_v18, %v848_v49 }
 0x1a3   : > { %v1007_v2 = vadd.s32 %v1005_v35, %v13831_v51  ;;  %vm1008_vm0 = vc.u32 %v1006_v45, %v1002_v27  ;;  %v13832_v13 = vmov 1326507024   ;;  %vm861_vm1 = vc.u32 %v10739_v20, %v10750_v33 }
 0x1a4   : > { %v710_v57 = vadd.s32 536870912, %v709_v28  ;;  %v2966_v34 = vshrl.u32 %v13832_v13, %v10666_v1  ;;  %v990_v15 = vadd.s32 %v989_v61, %v979_v43  ;;  %v1009_v21 = vsel %vm1008_vm0, 1, %v13694_v56 }
 0x1a5   : > { %v862_v48 = vadd.s32 1, %v858_v8  ;;  %v1001_v55 = vshrl.u32 %v13822_v29, 16  ;;  %v1011_v26 = vadd.s32 %v1009_v21, %v1007_v2  ;;  %v2961_v9 = vor.u32 %v2960_v11, %v2959_v58  ;;  %v13834_v11 = vld [vmem:[#allocation85_spill] sm:$0xff] }
 0x1a6   : > { %v10760_v40 = vshrl.u32 %v710_v57, 30  ;;  %v2964_v49 = vor.u32 %v2963_v25, %v2962_v3  ;;  %v2965_v60 = vshll.u32 %v13829_v23, %v10640_v59  ;;  %v981_v18 = vshrl.u32 %v9554_v31, 16  ;;  %v13833_v57 = vld [vmem:[#allocation76_spill] sm:$0xff] }
 0x1a7   : > { %v863_v50 = vsel %vm861_vm1, %v862_v48, %v858_v8  ;;  %v1003_v61 = vshrl.u32 %v13823_v41, 16  ;;  %v1012_v43 = vadd.s32 %v1011_v26, %v1001_v55  ;;  %v2955_v35 = vor.u32 %v10702_v4, %v10680_v47  ;;  %v13837_v48 = vld [vmem:[#allocation25_spill] sm:$0xff] }
 0x1a8   : > { %v712_v1 = vshll.u32 %v10760_v40, 30  ;;  %v2958_v29 = vor.u32 %v10706_v10, %v10688_v17  ;;  %v13835_v58 = vmul.u32 %v13833_v57, %v13834_v11  ;;  %v10775_v25 = vadd.s32 %v990_v15, %v981_v18  ;;  %v13839_v57 = vld [vmem:[#allocation42_spill] sm:$0xff]  ;;  %v13840_v11 = vld [vmem:[#allocation51_spill] sm:$0xff] }
 0x1a9   : > { %v2967_v59 = vor.u32 %v2966_v34, %v2965_v60  ;;  %vm2968_vm2 = vcmp.lt.s32.totalorder %v10662_v5, 1  ;;  %v1013_v8 = vadd.s32 %v1012_v43, %v1003_v61  ;;  %vm2970_vm3 = vcmp.lt.s32.totalorder %v10662_v5, 3 }
 0x1aa   : > { %v864_v3 = vadd.s32 %v863_v50, %v13835_v58  ;;  %v713_v31 = vsub.s32 %v709_v28, %v712_v1  ;;  %vm2971_vm4 = vcmp.lt.s32.totalorder %v10662_v5, 4  ;;  %v1010_v47 = vadd.s32 %v1006_v45, %v1002_v27 }
 0x1ab   : > { %v2973_v4 = vsel %vm2971_vm4, %v2961_v9, 2102212464  ;;  %v2977_v51 = vsel %vm2971_vm4, %v2964_v49, 920167782  ;;  %v2972_v10 = vsel %vm2968_vm2, %v10694_v16, %v2955_v35  ;;  %v1017_v28 = vadd.s32 1, %v1013_v8 }
 0x1ac   : > { %v865_v41 = vadd.s32 536870912, %v864_v3  ;;  %vm714_vm5 = vcmp.lt.s32.totalorder %v713_v31, 0  ;;  %v715_v17 = vsub.s32 0, %v713_v31  ;;  %vm1016_vm6 = vc.u32 %v10775_v25, %v1010_v47 }
 0x1ad   : > { %v2976_v34 = vsel %vm2968_vm2, %v2955_v35, %v2958_v29  ;;  %v2981_v15 = vsel %vm2971_vm4, %v2967_v59, 1326507024  ;;  %v13836_v21 = vand.u32 2139095040, %v10611_v14  ;;  %vm613_vm7 = vcmp.lt.s32.totalorder %v13837_v48, 0 }
 0x1ae   : > { %v10783_v2 = vshrl.u32 %v865_v41, 30  ;;  %v716_v45 = vsel %vm714_vm5, %v715_v17, %v713_v31  ;;  %v2974_v55 = vsel %vm2970_vm3, %v2958_v29, %v2973_v4  ;;  %v2978_v16 = vsel %vm2970_vm3, %v2961_v9, %v2977_v51  ;;  %v13845_v4 = vld [vmem:[#allocation82_spill] sm:$0xff] }
 0x1af   : > { %v3405_v27 = vshrl.u32 %v13836_v21, 23  ;;  %v717_v26 = vclz %v716_v45  ;;  %v10798_v18 = vadd.s32 %v10684_v52, %v10646_v63  ;;  %vm13636_vm8 = vcmp.lt.s32.totalorder %v10662_v5, 2 }
 0x1b0   : > { %v867_v60 = vshll.u32 %v10783_v2, 30  ;;  %v10803_v1 = vsel %vm2968_vm2, %v2958_v29, %v2961_v9  ;;  %v1018_v50 = vsel %vm1016_vm6, %v1017_v28, %v1013_v8  ;;  %v10807_v61 = vsel %vm2970_vm3, %v2964_v49, %v2981_v15  ;;  %v13846_v28 = vld [vmem:[#allocation79_spill] sm:$0xff] }
 0x1b1   : > { %13838 = vst [vmem:[#allocation55_spill] sm:$0xff] %v10798_v18  ;;  %v8419_v43 = vadd.s32 4294967294, %v717_v26  ;;  %v13841_v58 = vmul.u32 %v13839_v57, %v13840_v11  ;;  %v10814_v63 = vsel %vm13636_vm8, %v2972_v10, %v2974_v55  ;;  %v10818_v52 = vsel %vm13636_vm8, %v2976_v34, %v2978_v16  ;;  %v13860_v18 = vld [vmem:[#allocation81_spill] sm:$0xff] }
 0x1b2   : > { %v868_v35 = vsub.s32 %v864_v3, %v867_v60  ;;  %v10820_v9 = vadd.s32 4294967169, %v3405_v27  ;;  %v13842_v29 = vlaneseq  ;;  %v13843_v3 = vld [vmem:[#allocation77_spill] sm:$0xff]  ;;  %v735_v17 = vsub.s32 4, %v10760_v40 }
 0x1b3   : > { %v1019_v59 = vadd.s32 %v1018_v50, %v13841_v58  ;;  %vm8420_vm9 = vcmp.lt.s32.totalorder %v8419_v43, 0  ;;  %v13844_v41 = vshll.u32 %v13843_v3, 16  ;;  %v1155_v15 = vshll.u32 %v13846_v28, 16 }
 0x1b4   : > { %v10823_v8 = vand.u32 127, %v13842_v29  ;;  %vm869_vm10 = vcmp.lt.s32.totalorder %v868_v35, 0  ;;  %v870_v49 = vsub.s32 0, %v868_v35  ;;  %v720_v51 = vsel %vm8420_vm9, 0, %v8419_v43  ;;  %v13850_v29 = vld [vmem:[#allocation75_spill] sm:$0xff] }
 0x1b5   : > { %vm1141_vm11 = vc.u32 %v13845_v4, %v13844_v41  ;;  %v1020_v10 = vadd.s32 536870912, %v1019_v59  ;;  %v705_v34 = vadd.s32 %v10715_v39, %v10711_v12  ;;  %v721_v21 = vsub.s32 32, %v720_v51  ;;  %v13851_v41 = vld [vmem:[#allocation78_spill] sm:$0xff] }
 0x1b6   : > { %v725_v27 = vsub.s32 4294967266, %v720_v51  ;;  %v871_v45 = vsel %vm869_vm10, %v870_v49, %v868_v35  ;;  %v13847_v55 = vand.u32 2147483647, %v13837_v48  ;;  %v860_v26 = vadd.s32 %v10750_v33, %v10739_v20  ;;  %v13852_v20 = vld [vmem:[#allocation58_spill] sm:$0xff] }
 0x1b7   : > { %v872_v60 = vclz %v871_v45  ;;  %v1142_v50 = vsel %vm1141_vm11, 1, %v13694_v56  ;;  %v722_v43 = vshll.u32 %v713_v31, %v720_v51  ;;  %v723_v57 = vshrl.u32 %v705_v34, %v721_v21  ;;  %v13853_v51 = vld [vmem:[#allocation84_spill] sm:$0xff] }
 0x1b8   : > { %vm10834_vm12 = vcmp.le.f32.partialorder %v13847_v55, 0.7853982  ;;  %v726_v11 = vadd.s32 127, %v725_v27  ;;  %v10841_v58 = vshrl.u32 %v1020_v10, 30  ;;  %v736_v12 = vsel %vm613_vm7, %v735_v17, %v10760_v40  ;;  %v13854_v34 = vld [vmem:[#allocation80_spill] sm:$0xff] }
 0x1b9   : > { %v8422_v39 = vadd.s32 4294967294, %v872_v60  ;;  %v1134_v49 = vshrl.u32 %v13850_v29, 16  ;;  %v1161_v4 = vadd.s32 %v1155_v15, %v13851_v41  ;;  %v724_v55 = vor.u32 %v723_v57, %v722_v43 }
 0x1ba   : > { %v727_v14 = vshll.u32 %v726_v11, 23  ;;  %v1022_v33 = vshll.u32 %v10841_v58, 30  ;;  %vm1159_vm13 = vc.u32 %v13851_v41, %v1155_v15  ;;  %vm768_vm14 = vcmp.lt.s32.totalorder %v13852_v20, 0 }
 0x1bb   : > { %vm8423_vm15 = vcmp.lt.s32.totalorder %v8422_v39, 0  ;;  %v1015_v31 = vadd.s32 %v1010_v47, %v10775_v25  ;;  %v1144_v10 = vadd.s32 %v1142_v50, %v13853_v51  ;;  %v1157_v40 = vshll.u32 %v13854_v34, 16 }
 0x1bc   : > { %v728_v17 = vor.u32 4788187, %v727_v14  ;;  %v738_v21 = vsel %vm10834_vm12, 0, %v736_v12  ;;  %v875_v27 = vsel %vm8423_vm15, 0, %v8422_v39  ;;  %v1023_v45 = vsub.s32 %v1019_v59, %v1022_v33 }
 0x1bd   : > { %v876_v60 = vsub.s32 32, %v875_v27  ;;  %v880_v43 = vsub.s32 4294967266, %v875_v27  ;;  %v1160_v57 = vsel %vm1159_vm13, 1, %v13694_v56  ;;  %vm10857_vm0 = vc.u32 %v1161_v4, %v1157_v40 }
 0x1be   : > { %v729_v11 = vand.u32 2147483647, %v728_v17  ;;  %v731_v25 = vcvt.s32.f32 %v724_v55  ;;  %v13857_v47 = vand.u32 2147483647, %v13852_v20  ;;  %vm1024_vm2 = vcmp.lt.s32.totalorder %v1023_v45, 0 }
 0x1bf   : > { %v1025_v14 = vsub.s32 0, %v1023_v45  ;;  %v877_v12 = vshll.u32 %v868_v35, %v875_v27  ;;  %v878_v59 = vshrl.u32 %v860_v26, %v876_v60  ;;  %v881_v39 = vadd.s32 127, %v880_v43 }
 0x1c0   : > { %vm10863_vm1 = vcmp.le.f32.partialorder %v13857_v47, 0.7853982  ;;  %v1145_v29 = vadd.s32 %v1144_v10, %v1134_v49  ;;  %v732_v41 = vmul.f32 %v731_v25, %v729_v11  ;;  %v890_v33 = vsub.s32 4, %v10783_v2 }
 0x1c1   : > { %v1026_v51 = vsel %vm1024_vm2, %v1025_v14, %v1023_v45  ;;  %v1162_v13 = vadd.s32 %v1160_v57, %v13860_v18  ;;  %v879_v17 = vor.u32 %v878_v59, %v877_v12  ;;  %v882_v55 = vshll.u32 %v881_v39, 23 }
 0x1c2   : > { %v1027_v23 = vclz %v1026_v51  ;;  %v1164_v47 = vsel %vm10857_vm0, 1, %v13694_v56  ;;  %v733_v38 = vxor.u32 2147483648, %v732_v41  ;;  %v1136_v46 = vshrl.u32 %v13843_v3, 16  ;;  %v13861_v3 = vld [vmem:[#allocation15_spill] sm:$0xff] }
 0x1c3   : > { %v1156_v35 = vshrl.u32 %v13846_v28, 16  ;;  %v1158_v26 = vshrl.u32 %v13854_v34, 16  ;;  %v755_v49 = vadd.s32 3, %v738_v21  ;;  %v10875_v10 = vand.u32 3, %v738_v21 }
 0x1c4   : > { %v883_v27 = vor.u32 4788187, %v882_v55  ;;  %v8425_v60 = vadd.s32 4294967294, %v1027_v23  ;;  %v734_v18 = vsel %vm613_vm7, %v733_v38, %v732_v41  ;;  %v891_v43 = vsel %vm768_vm14, %v890_v33, %v10783_v2 }
 0x1c5   : > { %v10882_v57 = vadd.s32 %v1145_v29, %v1136_v46  ;;  %v1166_v15 = vadd.s32 %v1164_v47, %v1162_v13  ;;  %vm923_vm3 = vcmp.lt.s32.totalorder %v13861_v3, 0  ;;  %v10888_v28 = vsel %vm10834_vm12, %v13837_v48, %v734_v18 }
 0x1c6   : > { %v884_v34 = vand.u32 2147483647, %v883_v27  ;;  %v886_v21 = vcvt.s32.f32 %v879_v17  ;;  %vm8426_vm4 = vcmp.lt.s32.totalorder %v8425_v60, 0  ;;  %v739_v38 = vmul.f32 %v10888_v28, %v10888_v28 }
 0x1c7   : > { %v1030_v23 = vsel %vm8426_vm4, 0, %v8425_v60  ;;  %v10892_v11 = vadd.s32 %v1161_v4, %v1157_v40  ;;  %v1167_v2 = vadd.s32 %v1166_v15, %v1156_v35  ;;  %v893_v13 = vsel %vm10863_vm1, 0, %v891_v43  ;;  %v13862_v15 = vld [vmem:[#allocation65_spill] sm:$0xff] }
 0x1c8   : > { %v887_v46 = vmul.f32 %v886_v21, %v884_v34  ;;  %v1031_v25 = vsub.s32 32, %v1030_v23  ;;  %v1035_v14 = vsub.s32 4294967266, %v1030_v23  ;;  %v740_v12 = vmul.f32 -0.001358992, %v739_v38  ;;  %v13863_v34 = vld [vmem:[#allocation74_spill] sm:$0xff] }
 0x1c9   : > { %v747_v16 = vmul.f32 -0.00019511016, %v739_v38  ;;  %v1168_v59 = vadd.s32 %v1167_v2, %v1158_v26  ;;  %vm1171_vm5 = vc.u32 %v10882_v57, %v10892_v11  ;;  %v1032_v29 = vshll.u32 %v1023_v45, %v1030_v23 }
 0x1ca   : > { %v888_v39 = vxor.u32 2147483648, %v887_v46  ;;  %v1033_v41 = vshrl.u32 %v1015_v31, %v1031_v25  ;;  %v1036_v33 = vadd.s32 127, %v1035_v14  ;;  %v741_v51 = vadd.f32 0.041655596, %v740_v12 }
 0x1cb   : > { %v748_v4 = vadd.f32 0.008332121, %v747_v16  ;;  %v1045_v40 = vsub.s32 4, %v10841_v58  ;;  %v1172_v17 = vadd.s32 1, %v1168_v59  ;;  %v10899_v55 = vand.u32 3, %v755_v49 }
 0x1cc   : > { %v889_v47 = vsel %vm768_vm14, %v888_v39, %v887_v46  ;;  %v1034_v35 = vor.u32 %v1033_v41, %v1032_v29  ;;  %v1037_v27 = vshll.u32 %v1036_v33, 23  ;;  %v742_v26 = vmul.f32 %v741_v51, %v739_v38 }
 0x1cd   : > { %v749_v60 = vmul.f32 %v748_v4, %v739_v38  ;;  %v10906_v45 = vsel %vm10863_vm1, %v13852_v20, %v889_v47  ;;  %v1173_v31 = vsel %vm1171_vm5, %v1172_v17, %v1168_v59  ;;  %v910_v18 = vadd.s32 3, %v893_v13 }
 0x1ce   : > { %v894_v49 = vmul.f32 %v10906_v45, %v10906_v45  ;;  %v1038_v43 = vor.u32 4788187, %v1037_v27  ;;  %v13864_v21 = vmul.u32 %v13862_v15, %v13863_v34  ;;  %v743_v2 = vadd.f32 -0.4999988, %v742_v26  ;;  %v13870_v15 = vld [vmem:[#allocation130_spill] sm:$0xff] }
 0x1cf   : > { %v750_v46 = vadd.f32 -0.16666654, %v749_v60  ;;  %v13865_v25 = vand.u32 2147483647, %v13861_v3  ;;  %v1046_v14 = vsel %vm923_vm3, %v1045_v40, %v10841_v58  ;;  %vm758_vm7 = vcmp.eq.s32.totalorder %v10899_v55, 0 }
 0x1d0   : > { %v1174_v23 = vadd.s32 %v1173_v31, %v13864_v21  ;;  %vm761_vm9 = vcmp.eq.s32.totalorder %v10899_v55, 2  ;;  %vm3702_vm10 = vcmp.eq.s32.totalorder %v10875_v10, 0  ;;  %vm3705_vm11 = vcmp.eq.s32.totalorder %v10875_v10, 2  ;;  %v13868_v31 = vld [vmem:[#allocation125_spill] sm:$0xff] }
 0x1d1   : > { %vm10918_vm6 = vcmp.le.f32.partialorder %v13865_v25, 0.7853982  ;;  %v895_v12 = vmul.f32 -0.001358992, %v894_v49  ;;  %v902_v16 = vmul.f32 -0.00019511016, %v894_v49  ;;  %v1041_v39 = vcvt.s32.f32 %v1034_v35 }
 0x1d2   : > { %v1039_v59 = vand.u32 2147483647, %v1038_v43  ;;  %v744_v29 = vmul.f32 %v743_v2, %v739_v38  ;;  %v751_v41 = vmul.f32 %v750_v46, %v739_v38  ;;  %vm757_vm12 = vcmp.lt.s32.totalorder %v10899_v55, 2 }
 0x1d3   : > { %vm3701_vm13 = vcmp.lt.s32.totalorder %v10875_v10, 2  ;;  %v10931_v33 = vand.u32 3, %v893_v13  ;;  %v1175_v58 = vadd.s32 536870912, %v1174_v23  ;;  %vm754_vm14 = vweird.f32 %v13837_v48 }
 0x1d4   : > { %v896_v51 = vadd.f32 0.041655596, %v895_v12  ;;  %v903_v4 = vadd.f32 0.008332121, %v902_v16  ;;  %v10934_v40 = vand.u32 3, %v910_v18  ;;  %v1042_v17 = vmul.f32 %v1041_v39, %v1039_v59 }
 0x1d5   : > { %vm610_vm15 = vcmp.lt.s32.totalorder %v10823_v8, 16  ;;  %v745_v47 = vadd.f32 1.0, %v744_v29  ;;  %v752_v35 = vadd.f32 1.0, %v751_v41  ;;  %v1048_v38 = vsel %vm10918_vm6, 0, %v1046_v14 }
 0x1d6   : > { %v10939_v27 = vshrl.u32 %v1175_v58, 30  ;;  %v897_v26 = vmul.f32 %v896_v51, %v894_v49  ;;  %v904_v13 = vmul.f32 %v903_v4, %v894_v49  ;;  %v1043_v60 = vxor.u32 2147483648, %v1042_v17 }
 0x1d7   : > { %v13869_v43 = vshll.u32 %v13868_v31, 16  ;;  %v753_v18 = vmul.f32 %v752_v35, %v10888_v28  ;;  %v762_v21 = vxor.u32 2147483648, %v745_v47  ;;  %vm6509_vm1 = vcmask 261120  }
 0x1d8   : > { %v1177_v2 = vshll.u32 %v10939_v27, 30  ;;  %v898_v46 = vadd.f32 -0.4999988, %v897_v26  ;;  %v905_v25 = vadd.f32 -0.16666654, %v904_v13  ;;  %vm916_vm2 = vcmp.eq.s32.totalorder %v10934_v40, 2 }
 0x1d9   : > { %vm10944_vm0 = vc.u32 %v13870_v15, %v13869_v43  ;;  %v1044_v14 = vsel %vm923_vm3, %v1043_v60, %v1042_v17  ;;  %v1065_v12 = vadd.s32 3, %v1048_v38  ;;  %v759_v16 = vxor.u32 2147483648, %v753_v18 }
 0x1da   : > { %vm3856_vm5 = vcmp.eq.s32.totalorder %v10931_v33, 0  ;;  %vm3859_vm8 = vcmp.eq.s32.totalorder %v10931_v33, 2  ;;  %v10959_v28 = vsel %vm10918_vm6, %v13861_v3, %v1044_v14  ;;  %v10961_v59 = vand.u32 3, %v1048_v38 }
 0x1db   : > { %v2227_v39 = vsel %vm10944_vm0, 1, %v13694_v56  ;;  %v899_v29 = vmul.f32 %v898_v46, %v894_v49  ;;  %v906_v41 = vmul.f32 %v905_v25, %v894_v49  ;;  %vm912_vm3 = vcmp.lt.s32.totalorder %v10934_v40, 2  ;;  %v13873_v25 = vld [vmem:[#allocation132_spill] sm:$0xff] }
 0x1dc   : > { %vm3855_vm4 = vcmp.lt.s32.totalorder %v10931_v33, 2  ;;  %v1049_v58 = vmul.f32 %v10959_v28, %v10959_v28  ;;  %v10970_v51 = vsub.s32 %v1174_v23, %v1177_v2  ;;  %v760_v50 = vsel %vm758_vm7, %v745_v47, %v759_v16 }
 0x1dd   : > { %v763_v4 = vsel %vm761_vm9, %v762_v21, %v753_v18  ;;  %v3704_v17 = vsel %vm3702_vm10, %v745_v47, %v759_v16  ;;  %v3707_v49 = vsel %vm3705_vm11, %v762_v21, %v753_v18  ;;  %vm909_vm6 = vweird.f32 %v13852_v20  ;;  %v13874_v16 = vld [vmem:[#allocation127_spill] sm:$0xff]  ;;  %v13878_v20 = vld [vmem:[#allocation126_spill] sm:$0xff] }
 0x1de   : > { %v764_v35 = vsel %vm757_vm12, %v760_v50, %v763_v4  ;;  %v3708_v23 = vsel %vm3701_vm13, %v3704_v17, %v3707_v49  ;;  %v900_v38 = vadd.f32 1.0, %v899_v29  ;;  %v907_v26 = vadd.f32 1.0, %v906_v41  ;;  %v13875_v17 = vld [vmem:[#allocation48_spill] sm:$0xff] }
 0x1df   : > { %v765_v13 = vsel %vm754_vm14, nan, %v764_v35  ;;  %v3709_v60 = vsel %vm754_vm14, nan, %v3708_v23  ;;  %v1050_v47 = vmul.f32 -0.001358992, %v1049_v58  ;;  %v1057_v43 = vmul.f32 -0.00019511016, %v1049_v58 }
 0x1e0   : > { %v6482_v15 = vsel %vm610_vm15, %v765_v13, %v3709_v60  ;;  %v908_v34 = vmul.f32 %v907_v26, %v10906_v45  ;;  %v917_v55 = vxor.u32 2147483648, %v900_v38  ;;  %vm1179_vm7 = vcmp.lt.s32.totalorder %v10970_v51, 0 }
 0x1e1   : > { %8532 = vmatmul.msk.f32.vlgmr.msra.gmra.mxu0 %vm6509_vm1, %v6482_v15  ;;  %v1051_v10 = vadd.f32 0.041655596, %v1050_v47  ;;  %v1058_v18 = vadd.f32 0.008332121, %v1057_v43  ;;  %v1170_v21 = vadd.s32 %v10892_v11, %v10882_v57  ;;  %v1180_v48 = vsub.s32 0, %v10970_v51 }
 0x1e2   : > { %v914_v2 = vxor.u32 2147483648, %v908_v34  ;;  %v10997_v46 = vand.u32 3, %v1065_v12  ;;  %v2229_v14 = vadd.s32 %v2227_v39, %v13873_v25  ;;  %v2240_v29 = vshll.u32 %v13874_v16, 16 }
 0x1e3   : > { %v918_v45 = vsel %vm916_vm2, %v917_v55, %v908_v34  ;;  %v1052_v41 = vmul.f32 %v1051_v10, %v1049_v58  ;;  %v1059_v50 = vmul.f32 %v1058_v18, %v1049_v58  ;;  %v1181_v4 = vsel %vm1179_vm7, %v1180_v48, %v10970_v51 }
 0x1e4   : > { %vm1078_vm9 = vcmp.lt.s32.totalorder %v13875_v17, 0  ;;  %vm13876_vm10 = vcmp.eq.s32.totalorder %v10934_v40, 0  ;;  %v3858_v11 = vsel %vm3856_vm5, %v900_v38, %v914_v2  ;;  %v3861_v12 = vsel %vm3859_vm8, %v917_v55, %v908_v34  ;;  %v13877_v40 = vld [vmem:[#allocation123_spill] sm:$0xff] }
 0x1e5   : > { %v915_v57 = vsel %vm13876_vm10, %v900_v38, %v914_v2  ;;  %v1182_v39 = vclz %v1181_v4  ;;  %v3862_v35 = vsel %vm3855_vm4, %v3858_v11, %v3861_v12  ;;  %v1053_v23 = vadd.f32 -0.4999988, %v1052_v41 }
 0x1e6   : > { %v919_v49 = vsel %vm912_vm3, %v915_v57, %v918_v45  ;;  %v1060_v26 = vadd.f32 -0.16666654, %v1059_v50  ;;  %v3863_v60 = vsel %vm909_vm6, nan, %v3862_v35  ;;  %vm1068_vm11 = vcmp.eq.s32.totalorder %v10997_v46, 0  ;;  %v13882_v50 = vld [vmem:[#allocation128_spill] sm:$0xff] }
 0x1e7   : > { %v920_v13 = vsel %vm909_vm6, nan, %v919_v49  ;;  %vm4010_vm12 = vcmp.eq.s32.totalorder %v10961_v59, 0  ;;  %vm4013_vm8 = vcmp.eq.s32.totalorder %v10961_v59, 2  ;;  %v8428_v38 = vadd.s32 4294967294, %v1182_v39 }
 0x1e8   : > { %v2219_v47 = vshrl.u32 %v13877_v40, 16  ;;  %v6483_v33 = vsel %vm610_vm15, %v920_v13, %v3863_v60  ;;  %v1054_v43 = vmul.f32 %v1053_v23, %v1049_v58  ;;  %v1061_v15 = vmul.f32 %v1060_v26, %v1049_v58 }
 0x1e9   : > { %vm1067_vm13 = vcmp.lt.s32.totalorder %v10997_v46, 2  ;;  %vm4009_vm14 = vcmp.lt.s32.totalorder %v10961_v59, 2  ;;  %vm2244_vm0 = vc.u32 %v13878_v20, %v2240_v29  ;;  %vm1064_vm2 = vweird.f32 %v13861_v3  ;;  %8533 = vmatmul.msk.f32.gmra.mxu0 %vm6509_vm1, %v6483_v33  ;;  %v13887_v3 = vld [vmem:[#allocation16_spill] sm:$0xff] }
 0x1ea   : > { %vm1071_vm4 = vcmp.eq.s32.totalorder %v10997_v46, 2  ;;  %v13879_v34 = vand.u32 2147483647, %v13875_v17  ;;  %vm8429_vm3 = vcmp.lt.s32.totalorder %v8428_v38, 0  ;;  %v2221_v10 = vshrl.u32 %v13868_v31, 16  ;;  %v13883_v31 = vld [vmem:[#allocation131_spill] sm:$0xff] }
 0x1eb   : > { %v2230_v58 = vadd.s32 %v2229_v14, %v2219_v47  ;;  %v1055_v18 = vadd.f32 1.0, %v1054_v43  ;;  %v1062_v48 = vadd.f32 1.0, %v1061_v15  ;;  %v1185_v2 = vsel %vm8429_vm3, 0, %v8428_v38 }
 0x1ec   : > { %vm11032_vm5 = vcmp.le.f32.partialorder %v13879_v34, 0.7853982  ;;  %v1200_v25 = vsub.s32 4, %v10939_v27  ;;  %v1186_v45 = vsub.s32 32, %v1185_v2  ;;  %v1190_v41 = vsub.s32 4294967266, %v1185_v2 }
 0x1ed   : > { %v2242_v4 = vshll.u32 %v13882_v50, 16  ;;  %v2245_v57 = vsel %vm2244_vm0, 1, %v13694_v56  ;;  %v1063_v11 = vmul.f32 %v1062_v48, %v10959_v28  ;;  %v1072_v12 = vxor.u32 2147483648, %v1055_v18 }
 0x1ee   : > { %v2246_v39 = vadd.s32 %v2240_v29, %v13878_v20  ;;  %v2247_v14 = vadd.s32 %v2245_v57, %v13883_v31  ;;  %v1187_v49 = vshll.u32 %v10970_v51, %v1185_v2  ;;  %v1188_v35 = vshrl.u32 %v1170_v21, %v1186_v45  ;;  %v13884_v45 = vld [vmem:[#allocation9_spill] sm:$0xff] }
 0x1ef   : > { %v1191_v23 = vadd.s32 127, %v1190_v41  ;;  %v2241_v26 = vshrl.u32 %v13874_v16, 16  ;;  %v1069_v13 = vxor.u32 2147483648, %v1063_v11  ;;  %v1201_v60 = vsel %vm1078_vm9, %v1200_v25, %v10939_v27 }
 0x1f0   : > { %v11049_v38 = vadd.s32 %v2230_v58, %v2221_v10  ;;  %vm2248_vm6 = vc.u32 %v2246_v39, %v2242_v4  ;;  %v1073_v28 = vsel %vm1071_vm4, %v1072_v12, %v1063_v11  ;;  %v1189_v29 = vor.u32 %v1188_v35, %v1187_v49  ;;  %v13889_v49 = vld [vmem:[#allocation13_spill] sm:$0xff] }
 0x1f1   : > { %v1192_v40 = vshll.u32 %v1191_v23, 23  ;;  %v2249_v47 = vsel %vm2248_vm6, 1, %v13694_v56  ;;  %v1070_v51 = vsel %vm1068_vm11, %v1055_v18, %v1069_v13  ;;  %v4012_v21 = vsel %vm4010_vm12, %v1055_v18, %v1069_v13  ;;  %v13890_v35 = vld [vmem:[#allocation17_spill] sm:$0xff] }
 0x1f2   : > { %v4015_v16 = vsel %vm4013_vm8, %v1072_v12, %v1063_v11  ;;  %v2251_v27 = vadd.s32 %v2249_v47, %v2247_v14  ;;  %v1074_v33 = vsel %vm1067_vm13, %v1070_v51, %v1073_v28  ;;  %v2243_v20 = vshrl.u32 %v13882_v50, 16  ;;  %v13885_v50 = vld [vmem:[#allocation10_spill] sm:$0xff]  ;;  %v13888_v11 = vld [vmem:[#allocation12_spill] sm:$0xff] }
 0x1f3   : > { %v4016_v43 = vsel %vm4009_vm14, %v4012_v21, %v4015_v16  ;;  %v1193_v15 = vor.u32 4788187, %v1192_v40  ;;  %v1075_v34 = vsel %vm1064_vm2, nan, %v1074_v33  ;;  %v1203_v58 = vsel %vm11032_vm5, 0, %v1201_v60  ;;  %v13892_v21 = vld [vmem:[#allocation14_spill] sm:$0xff] }
 0x1f4   : > { %v4017_v10 = vsel %vm1064_vm2, nan, %v4016_v43  ;;  %v2252_v18 = vadd.s32 %v2251_v27, %v2241_v26  ;;  %v1196_v2 = vcvt.s32.f32 %v1189_v29  ;;  %v11073_v59 = vadd.s32 %v2246_v39, %v2242_v4  ;;  %v13891_v26 = vld [vmem:[#allocation11_spill] sm:$0xff]  ;;  %v13894_v43 = vld [vmem:[#allocation112_spill] sm:$0xff] }
 0x1f5   : > { %v6484_v46 = vsel %vm610_vm15, %v1075_v34, %v4017_v10  ;;  %v1194_v48 = vand.u32 2147483647, %v1193_v15  ;;  %v1289_v41 = vshrl.u32 %v13884_v45, 16  ;;  %v13886_v57 = vshll.u32 %v13885_v50, 16  ;;  %v13895_v15 = vld [vmem:[#allocation117_spill] sm:$0xff] }
 0x1f6   : > { %8534 = vmatmul.msk.f32.gmra.mxu0 %vm6509_vm1, %v6484_v46  ;;  %v2253_v25 = vadd.s32 %v2252_v18, %v2243_v20  ;;  %v1310_v12 = vshll.u32 %v13888_v11, 16  ;;  %vm2256_vm10 = vc.u32 %v11049_v38, %v11073_v59  ;;  %v1312_v4 = vshll.u32 %v13889_v49, 16 }
 0x1f7   : > { %vm1296_vm7 = vc.u32 %v13887_v3, %v13886_v57  ;;  %v1197_v31 = vmul.f32 %v1196_v2, %v1194_v48  ;;  %v1291_v28 = vshrl.u32 %v13885_v50, 16  ;;  %v1311_v29 = vshrl.u32 %v13888_v11, 16 }
 0x1f8   : > { %v1297_v14 = vsel %vm1296_vm7, 1, %v13694_v56  ;;  %v2257_v39 = vadd.s32 1, %v2253_v25  ;;  %vm1314_vm11 = vc.u32 %v13891_v26, %v1310_v12  ;;  %v1316_v13 = vadd.s32 %v1310_v12, %v13891_v26  ;;  %v13897_v12 = vld [vmem:[#allocation45_spill] sm:$0xff] }
 0x1f9   : > { %v1299_v23 = vadd.s32 %v1297_v14, %v13890_v35  ;;  %v1198_v60 = vxor.u32 2147483648, %v1197_v31  ;;  %v1315_v40 = vsel %vm1314_vm11, 1, %v13694_v56  ;;  %vm13893_vm8 = vcmp.lt.s32.totalorder %v10662_v5, 2 }
 0x1fa   : > { %v2258_v47 = vsel %vm2256_vm10, %v2257_v39, %v2253_v25  ;;  %v1317_v16 = vadd.s32 %v1315_v40, %v13892_v21  ;;  %vm1318_vm12 = vc.u32 %v1316_v13, %v1312_v4  ;;  %v11096_v27 = vsel %vm13893_vm8, %v10803_v1, %v10807_v61  ;;  %v13900_v40 = vld [vmem:[#allocation49_spill] sm:$0xff] }
 0x1fb   : > { %v1300_v51 = vadd.s32 %v1299_v23, %v1289_v41  ;;  %v1199_v33 = vsel %vm1078_vm9, %v1198_v60, %v1197_v31  ;;  %v13896_v20 = vmul.u32 %v13894_v43, %v13895_v15  ;;  %v1319_v10 = vsel %vm1318_vm12, 1, %v13694_v56 }
 0x1fc   : > { %v11107_v18 = vsel %vm11032_vm5, %v13875_v17, %v1199_v33  ;;  %v1220_v46 = vadd.s32 3, %v1203_v58  ;;  %v1313_v48 = vshrl.u32 %v13889_v49, 16  ;;  %v1321_v5 = vadd.s32 %v1319_v10, %v1317_v16  ;;  %v13901_v16 = vld [vmem:[#allocation44_spill] sm:$0xff] }
 0x1fd   : > { %v2259_v34 = vadd.s32 %v2258_v47, %v13896_v20  ;;  %v1204_v1 = vmul.f32 %v11107_v18, %v11107_v18  ;;  %v11112_v2 = vadd.s32 %v1300_v51, %v1291_v28  ;;  %v11114_v25 = vadd.s32 %v1316_v13, %v1312_v4  ;;  %v13898_v28 = vld [vmem:[#allocation43_spill] sm:$0xff] }
 0x1fe   : > { %v2987_v45 = vand.u32 65535, %v11096_v27  ;;  %v2988_v41 = vshrl.u32 %v11096_v27, 16  ;;  %v3409_v55 = vor.u32 8388608, %v10670_v22  ;;  %v1322_v50 = vadd.s32 %v1321_v5, %v1311_v29 }
 0x1ff   : > { %v2260_v61 = vadd.s32 536870912, %v2259_v34  ;;  %v1205_v57 = vmul.f32 -0.001358992, %v1204_v1  ;;  %v1212_v3 = vmul.f32 -0.00019511016, %v1204_v1  ;;  %v2395_v31 = vshll.u32 %v13897_v12, 16 }
 0x200   : > { %v3009_v14 = vand.u32 65535, %v10818_v52  ;;  %v3010_v49 = vshrl.u32 %v10818_v52, 16  ;;  %v11124_v39 = vand.u32 3, %v1220_v46  ;;  %v1323_v4 = vadd.s32 %v1322_v50, %v1313_v48  ;;  %v13903_v46 = vld [vmem:[#allocation7_spill] sm:$0xff]  ;;  %v13917_v52 = vld [vmem:[#allocation21_spill] sm:$0xff] }
 0x201   : > { %v11119_v11 = vshrl.u32 %v2260_v61, 30  ;;  %v1206_v35 = vadd.f32 0.041655596, %v1205_v57  ;;  %v1213_v23 = vadd.f32 0.008332121, %v1212_v3  ;;  %vm1326_vm9 = vc.u32 %v11112_v2, %v11114_v25  ;;  %v13905_v61 = vld [vmem:[#allocation46_spill] sm:$0xff] }
 0x202   : > { %v11131_v13 = vand.u32 3, %v1203_v58  ;;  %v1327_v60 = vadd.s32 1, %v1323_v4  ;;  %v13899_v29 = vshll.u32 %v13898_v28, 16  ;;  %vm2399_vm14 = vc.u32 %v13901_v16, %v2395_v31 }
 0x203   : > { %v2262_v26 = vshll.u32 %v11119_v11, 30  ;;  %v1207_v47 = vmul.f32 %v1206_v35, %v1204_v1  ;;  %v1214_v51 = vmul.f32 %v1213_v23, %v1204_v1  ;;  %v11140_v33 = vadd.s32 1, %v10820_v9 }
 0x204   : > { %vm2381_vm13 = vc.u32 %v13900_v40, %v13899_v29  ;;  %v11142_v43 = vshll.u32 %v3409_v55, 8  ;;  %vm1226_vm0 = vcmp.eq.s32.totalorder %v11124_v39, 2  ;;  %v1328_v58 = vsel %vm1326_vm9, %v1327_v60, %v1323_v4 }
 0x205   : > { %v11136_v21 = vsub.s32 %v2259_v34, %v2262_v26  ;;  %v1208_v15 = vadd.f32 -0.4999988, %v1207_v47  ;;  %v1215_v20 = vadd.f32 -0.16666654, %v1214_v51  ;;  %vm1223_vm4 = vcmp.eq.s32.totalorder %v11124_v39, 0  ;;  %v13902_v34 = vld [vmem:[#allocation5_spill] sm:$0xff] }
 0x206   : > { %v13904_v48 = vmul.u32 %v13902_v34, %v13903_v46  ;;  %v2382_v9 = vsel %vm2381_vm13, 1, %v13694_v56  ;;  %v2397_v55 = vshll.u32 %v13905_v61, 16  ;;  %v2400_v50 = vsel %vm2399_vm14, 1, %v13694_v56  ;;  %v13906_v26 = vld [vmem:[#allocation41_spill] sm:$0xff]  ;;  %v13907_v47 = vld [vmem:[#allocation50_spill] sm:$0xff] }
 0x207   : > { %vm2264_vm2 = vcmp.lt.s32.totalorder %v11136_v21, 0  ;;  %v2265_v10 = vsub.s32 0, %v11136_v21  ;;  %v1209_v57 = vmul.f32 %v1208_v15, %v1204_v1  ;;  %v1216_v3 = vmul.f32 %v1215_v20, %v1204_v1 }
 0x208   : > { %v1329_v5 = vadd.s32 %v1328_v58, %v13904_v48  ;;  %vm1222_vm5 = vcmp.lt.s32.totalorder %v11124_v39, 2  ;;  %vm4163_vm3 = vcmp.lt.s32.totalorder %v11131_v13, 2  ;;  %v2401_v35 = vadd.s32 %v2395_v31, %v13901_v16  ;;  %v13908_v16 = vld [vmem:[#allocation47_spill] sm:$0xff] }
 0x209   : > { %v2266_v4 = vsel %vm2264_vm2, %v2265_v10, %v11136_v21  ;;  %vm1219_vm6 = vweird.f32 %v13875_v17  ;;  %vm4164_vm7 = vcmp.eq.s32.totalorder %v11131_v13, 0  ;;  %vm4167_vm10 = vcmp.eq.s32.totalorder %v11131_v13, 2  ;;  %v13909_v10 = vld [vmem:[#allocation87_spill] sm:$0xff] }
 0x20a   : > { %v2267_v23 = vclz %v2266_v4  ;;  %v2374_v60 = vshrl.u32 %v13906_v26, 16  ;;  %v1210_v29 = vadd.f32 1.0, %v1209_v57  ;;  %v1217_v40 = vadd.f32 1.0, %v1216_v3 }
 0x20b   : > { %v1330_v1 = vadd.s32 536870912, %v1329_v5  ;;  %v2384_v51 = vadd.s32 %v2382_v9, %v13907_v47  ;;  %v2255_v58 = vadd.s32 %v11073_v59, %v11049_v38  ;;  %v2376_v31 = vshrl.u32 %v13898_v28, 16 }
 0x20c   : > { %v8449_v15 = vadd.s32 4294967294, %v2267_v23  ;;  %v2402_v20 = vadd.s32 %v2400_v50, %v13908_v16  ;;  %vm2163_vm11 = vcmp.lt.s32.totalorder %v13909_v10, 0  ;;  %v1218_v34 = vmul.f32 %v1217_v40, %v11107_v18 }
 0x20d   : > { %v1227_v46 = vxor.u32 2147483648, %v1210_v29  ;;  %v11169_v48 = vshrl.u32 %v1330_v1, 30  ;;  %vm2403_vm12 = vc.u32 %v2401_v35, %v2397_v55  ;;  %v2285_v57 = vsub.s32 4, %v11119_v11 }
 0x20e   : > { %vm8450_vm8 = vcmp.lt.s32.totalorder %v8449_v15, 0  ;;  %v2396_v9 = vshrl.u32 %v13897_v12, 16  ;;  %v2404_v38 = vsel %vm2403_vm12, 1, %v13694_v56  ;;  %v1224_v59 = vxor.u32 2147483648, %v1218_v34 }
 0x20f   : > { %v1228_v28 = vsel %vm1226_vm0, %v1227_v46, %v1218_v34  ;;  %v2270_v50 = vsel %vm8450_vm8, 0, %v8449_v15  ;;  %v2385_v3 = vadd.s32 %v2384_v51, %v2374_v60  ;;  %v4169_v18 = vsel %vm4167_vm10, %v1227_v46, %v1218_v34 }
 0x210   : > { %v2271_v4 = vsub.s32 32, %v2270_v50  ;;  %v2275_v23 = vsub.s32 4294967266, %v2270_v50  ;;  %v1332_v26 = vshll.u32 %v11169_v48, 30  ;;  %v1225_v40 = vsel %vm1223_vm4, %v1210_v29, %v1224_v59 }
 0x211   : > { %v4166_v12 = vsel %vm4164_vm7, %v1210_v29, %v1224_v59  ;;  %v2272_v1 = vshll.u32 %v11136_v21, %v2270_v50  ;;  %v2406_v47 = vadd.s32 %v2404_v38, %v2402_v20  ;;  %v1229_v15 = vsel %vm1222_vm5, %v1225_v40, %v1228_v28 }
 0x212   : > { %v4170_v60 = vsel %vm4163_vm3, %v4166_v12, %v4169_v18  ;;  %v2273_v51 = vshrl.u32 %v2255_v58, %v2271_v4  ;;  %v2276_v16 = vadd.s32 127, %v2275_v23  ;;  %v11191_v34 = vmul.u32 %v2987_v45, %v10643_v6 }
 0x213   : > { %v1230_v46 = vsel %vm1219_vm6, nan, %v1229_v15  ;;  %v4171_v21 = vsel %vm1219_vm6, nan, %v4170_v60  ;;  %v1333_v29 = vsub.s32 %v1329_v5, %v1332_v26  ;;  %v2398_v58 = vshrl.u32 %v13905_v61, 16 }
 0x214   : > { %v6485_v39 = vsel %vm610_vm15, %v1230_v46, %v4171_v21  ;;  %v2274_v20 = vor.u32 %v2273_v51, %v2272_v1  ;;  %v2277_v13 = vshll.u32 %v2276_v16, 23  ;;  %v11201_v59 = vadd.s32 %v2385_v3, %v2376_v31  ;;  %v13915_v21 = vld [vmem:[#allocation40_spill] sm:$0xff] }
 0x215   : > { %8535 = vmatmul.msk.f32.gmra.mxu0 %vm6509_vm1, %v6485_v39  ;;  %vm1334_vm9 = vcmp.lt.s32.totalorder %v1333_v29, 0  ;;  %v1335_v38 = vsub.s32 0, %v1333_v29  ;;  %v11203_v28 = vadd.s32 %v2401_v35, %v2397_v55  ;;  %v11208_v17 = vmul.u32 %v2988_v41, %v10643_v6 }
 0x216   : > { %v2278_v5 = vor.u32 4788187, %v2277_v13  ;;  %v2286_v50 = vsel %vm2163_vm11, %v2285_v57, %v11119_v11  ;;  %v2407_v18 = vadd.s32 %v2406_v47, %v2396_v9  ;;  %v11216_v61 = vmul.u32 %v2987_v45, %v10651_v62  ;;  %v13913_v9 = vld [vmem:[#allocation2_spill] sm:$0xff]  ;;  %v13920_v13 = vld [vmem:[#allocation23_spill] sm:$0xff] }
 0x217   : > { %vm3412_vm13 = vcmp.gt.s32.totalorder %v11140_v33, 0  ;;  %v13910_v55 = vand.u32 2147483647, %v13909_v10  ;;  %v1336_v31 = vsel %vm1334_vm9, %v1335_v38, %v1333_v29  ;;  %v2281_v4 = vcvt.s32.f32 %v2274_v20 }
 0x218   : > { %v2279_v3 = vand.u32 2147483647, %v2278_v5  ;;  %v1337_v23 = vclz %v1336_v31  ;;  %v2408_v26 = vadd.s32 %v2407_v18, %v2398_v58  ;;  %v11228_v11 = vmul.u32 %v2988_v41, %v10651_v62 }
 0x219   : > { %vm11221_vm14 = vcmp.le.f32.partialorder %v13910_v55, 0.7853982  ;;  %v11233_v45 = vmul.u32 %v3009_v14, %v10643_v6  ;;  %vm2411_vm0 = vc.u32 %v11201_v59, %v11203_v28  ;;  %vm1233_vm2 = vcmp.lt.s32.totalorder %v13913_v9, 0 }
 0x21a   : > { %v2288_v57 = vsel %vm11221_vm14, 0, %v2286_v50  ;;  %v11243_v40 = vmul.u32 %v3010_v49, %v10643_v6  ;;  %v2282_v27 = vmul.f32 %v2281_v4, %v2279_v3  ;;  %v8431_v41 = vadd.s32 4294967294, %v1337_v23 }
 0x21b   : > { %v2412_v12 = vadd.s32 1, %v2408_v26  ;;  %v11248_v1 = vmul.u32 %v3009_v14, %v10651_v62  ;;  %v11253_v47 = vmul.u32 %v3010_v49, %v10651_v62  ;;  %v11258_v15 = vsel %vm3412_vm13, %v11140_v33, 0  ;;  %v13914_v14 = vld [vmem:[#allocation29_spill] sm:$0xff]  ;;  %v13919_v49 = vld [vmem:[#allocation30_spill] sm:$0xff] }
 0x21c   : > { %v1325_v6 = vadd.s32 %v11114_v25, %v11112_v2  ;;  %v2283_v60 = vxor.u32 2147483648, %v2282_v27  ;;  %v2305_v51 = vadd.s32 3, %v2288_v57  ;;  %vm8432_vm4 = vcmp.lt.s32.totalorder %v8431_v41, 0 }
 0x21d   : > { %v2413_v16 = vsel %vm2411_vm0, %v2412_v12, %v2408_v26  ;;  %v1340_v46 = vsel %vm8432_vm4, 0, %v8431_v41  ;;  %v13916_v39 = vmul.u32 %v13914_v14, %v13915_v21  ;;  %v13918_v62 = vshll.u32 %v13917_v52, 16  ;;  %v13922_v41 = vld [vmem:[#allocation22_spill] sm:$0xff] }
 0x21e   : > { %v1465_v58 = vshll.u32 %v13920_v13, 16  ;;  %v2284_v33 = vsel %vm2163_vm11, %v2283_v60, %v2282_v27  ;;  %v1341_v38 = vsub.s32 32, %v1340_v46  ;;  %v1342_v2 = vshll.u32 %v1333_v29, %v1340_v46  ;;  %v13921_v29 = vld [vmem:[#allocation24_spill] sm:$0xff]  ;;  %v13925_v21 = vld [vmem:[#allocation18_spill] sm:$0xff] }
 0x21f   : > { %v2414_v20 = vadd.s32 %v2413_v16, %v13916_v39  ;;  %vm1451_vm5 = vc.u32 %v13919_v49, %v13918_v62  ;;  %v1345_v25 = vsub.s32 4294967266, %v1340_v46  ;;  %v11274_v5 = vsel %vm11221_vm14, %v13909_v10, %v2284_v33  ;;  %v13926_v62 = vld [vmem:[#allocation31_spill] sm:$0xff] }
 0x220   : > { %v11276_v50 = vand.u32 3, %v2288_v57  ;;  %v1355_v18 = vsub.s32 4, %v11169_v48  ;;  %v2289_v31 = vmul.f32 %v11274_v5, %v11274_v5  ;;  %v1343_v3 = vshrl.u32 %v1325_v6, %v1341_v38 }
 0x221   : > { %v2415_v55 = vadd.s32 536870912, %v2414_v20  ;;  %v1346_v4 = vadd.s32 127, %v1345_v25  ;;  %v1452_v23 = vsel %vm1451_vm5, 1, %v13694_v56  ;;  %v1467_v27 = vshll.u32 %v13921_v29, 16 }
 0x222   : > { %vm11286_vm3 = vc.u32 %v13922_v41, %v1465_v58  ;;  %v1471_v57 = vadd.s32 %v1465_v58, %v13922_v41  ;;  %v2290_v12 = vmul.f32 -0.001358992, %v2289_v31  ;;  %v2297_v60 = vmul.f32 -0.00019511016, %v2289_v31 }
 0x223   : > { %v11282_v26 = vshrl.u32 %v2415_v55, 30  ;;  %v1344_v16 = vor.u32 %v1343_v3, %v1342_v2  ;;  %v1347_v46 = vshll.u32 %v1346_v4, 23  ;;  %v11291_v14 = vand.u32 3, %v2305_v51  ;;  %v13930_v4 = vld [vmem:[#allocation6_spill] sm:$0xff] }
 0x224   : > { %v1444_v39 = vshrl.u32 %v13925_v21, 16  ;;  %v1454_v49 = vadd.s32 %v1452_v23, %v13926_v62  ;;  %v2291_v33 = vadd.f32 0.041655596, %v2290_v12  ;;  %v2298_v38 = vadd.f32 0.008332121, %v2297_v60 }
 0x225   : > { %v2417_v6 = vshll.u32 %v11282_v26, 30  ;;  %v1348_v25 = vor.u32 4788187, %v1347_v46  ;;  %v1351_v55 = vcvt.s32.f32 %v1344_v16  ;;  %v13927_v22 = vand.u32 2147483647, %v13913_v9 }
 0x226   : > { %v1356_v51 = vsel %vm1233_vm2, %v1355_v18, %v11169_v48  ;;  %v1470_v3 = vsel %vm11286_vm3, 1, %v13694_v56  ;;  %vm2318_vm7 = vcmp.lt.s32.totalorder %v13930_v4, 0  ;;  %v2292_v23 = vmul.f32 %v2291_v33, %v2289_v31 }
 0x227   : > { %vm11298_vm6 = vcmp.le.f32.partialorder %v13927_v22, 0.7853982  ;;  %v11305_v2 = vsub.s32 %v2414_v20, %v2417_v6  ;;  %v2299_v41 = vmul.f32 %v2298_v38, %v2289_v31  ;;  %v1349_v12 = vand.u32 2147483647, %v1348_v25  ;;  %v13931_v6 = vld [vmem:[#allocation26_spill] sm:$0xff] }
 0x228   : > { %vm1473_vm10 = vc.u32 %v1471_v57, %v1467_v27  ;;  %vm5245_vm11 = vcmp.eq.s32.totalorder %v11276_v50, 2  ;;  %v1446_v48 = vshrl.u32 %v13917_v52, 16  ;;  %v1455_v20 = vadd.s32 %v1454_v49, %v1444_v39 }
 0x229   : > { %vm2419_vm12 = vcmp.lt.s32.totalorder %v11305_v2, 0  ;;  %v2420_v22 = vsub.s32 0, %v11305_v2  ;;  %v2293_v18 = vadd.f32 -0.4999988, %v2292_v23  ;;  %v2300_v60 = vadd.f32 -0.16666654, %v2299_v41 }
 0x22a   : > { %vm2311_vm8 = vcmp.eq.s32.totalorder %v11291_v14, 2  ;;  %v1352_v35 = vmul.f32 %v1351_v55, %v1349_v12  ;;  %vm2308_vm9 = vcmp.eq.s32.totalorder %v11291_v14, 0  ;;  %vm5242_vm13 = vcmp.eq.s32.totalorder %v11276_v50, 0 }
 0x22b   : > { %v1358_v16 = vsel %vm11298_vm6, 0, %v1356_v51  ;;  %v2421_v46 = vsel %vm2419_vm12, %v2420_v22, %v11305_v2  ;;  %v1472_v21 = vadd.s32 %v1470_v3, %v13931_v6  ;;  %v1474_v62 = vsel %vm1473_vm10, 1, %v13694_v56 }
 0x22c   : > { %v2294_v52 = vmul.f32 %v2293_v18, %v2289_v31  ;;  %v2301_v39 = vmul.f32 %v2300_v60, %v2289_v31  ;;  %vm2307_vm14 = vcmp.lt.s32.totalorder %v11291_v14, 2  ;;  %vm5241_vm0 = vcmp.lt.s32.totalorder %v11276_v50, 2 }
 0x22d   : > { %v1353_v49 = vxor.u32 2147483648, %v1352_v35  ;;  %v2422_v33 = vclz %v2421_v46  ;;  %vm2304_vm4 = vweird.f32 %v13909_v10  ;;  %v2440_v38 = vsub.s32 4, %v11282_v26 }
 0x22e   : > { %v11327_v25 = vadd.s32 %v1455_v20, %v1446_v48  ;;  %v1466_v55 = vshrl.u32 %v13920_v13, 16  ;;  %v11330_v51 = vadd.s32 %v1471_v57, %v1467_v27  ;;  %v2295_v3 = vadd.f32 1.0, %v2294_v52 }
 0x22f   : > { %v2302_v23 = vadd.f32 1.0, %v2301_v39  ;;  %v1354_v31 = vsel %vm1233_vm2, %v1353_v49, %v1352_v35  ;;  %v8452_v41 = vadd.s32 4294967294, %v2422_v33  ;;  %v13932_v22 = vand.u32 2147483647, %v13930_v4 }
 0x230   : > { %v11337_v12 = vsel %vm11298_vm6, %v13913_v9, %v1354_v31  ;;  %v2410_v13 = vadd.s32 %v11203_v28, %v11201_v59  ;;  %v1468_v27 = vshrl.u32 %v13921_v29, 16  ;;  %v1476_v57 = vadd.s32 %v1474_v62, %v1472_v21 }
 0x231   : > { %vm11341_vm5 = vcmp.le.f32.partialorder %v13932_v22, 0.7853982  ;;  %v2303_v20 = vmul.f32 %v2302_v23, %v11274_v5  ;;  %v2312_v18 = vxor.u32 2147483648, %v2295_v3  ;;  %v1359_v58 = vmul.f32 %v11337_v12, %v11337_v12 }
 0x232   : > { %vm8453_vm2 = vcmp.lt.s32.totalorder %v8452_v41, 0  ;;  %v2441_v35 = vsel %vm2318_vm7, %v2440_v38, %v11282_v26  ;;  %v1477_v46 = vadd.s32 %v1476_v57, %v1466_v55  ;;  %vm1481_vm3 = vc.u32 %v11327_v25, %v11330_v51 }
 0x233   : > { %v2425_v60 = vsel %vm8453_vm2, 0, %v8452_v41  ;;  %v2309_v59 = vxor.u32 2147483648, %v2303_v20  ;;  %v2313_v28 = vsel %vm2311_vm8, %v2312_v18, %v2303_v20  ;;  %v5247_v5 = vsel %vm5245_vm11, %v2312_v18, %v2303_v20 }
 0x234   : > { %v1360_v29 = vmul.f32 -0.001358992, %v1359_v58  ;;  %v1367_v6 = vmul.f32 -0.00019511016, %v1359_v58  ;;  %v2426_v21 = vsub.s32 32, %v2425_v60  ;;  %v2427_v62 = vshll.u32 %v11305_v2, %v2425_v60 }
 0x235   : > { %v2430_v52 = vsub.s32 4294967266, %v2425_v60  ;;  %v2310_v26 = vsel %vm2308_vm9, %v2295_v3, %v2309_v59  ;;  %v5244_v39 = vsel %vm5242_vm13, %v2295_v3, %v2309_v59  ;;  %v1478_v33 = vadd.s32 %v1477_v46, %v1468_v27 }
 0x236   : > { %v1361_v49 = vadd.f32 0.041655596, %v1360_v29  ;;  %v2314_v38 = vsel %vm2307_vm14, %v2310_v26, %v2313_v28  ;;  %v5248_v55 = vsel %vm5241_vm0, %v5244_v39, %v5247_v5  ;;  %v1368_v23 = vadd.f32 0.008332121, %v1367_v6  ;;  %v13982_v5 = vld [vmem:[#allocation149_spill] sm:$0xff] }
 0x237   : > { %v2428_v31 = vshrl.u32 %v2410_v13, %v2426_v21  ;;  %v2315_v2 = vsel %vm2304_vm4, nan, %v2314_v38  ;;  %v5249_v41 = vsel %vm2304_vm4, nan, %v5248_v55  ;;  %v2431_v57 = vadd.s32 127, %v2430_v52  ;;  %v13935_v21 = vld [vmem:[#allocation8_spill] sm:$0xff]  ;;  %v13936_v52 = vld [vmem:[#allocation19_spill] sm:$0xff] }
 0x238   : > { %v1362_v22 = vmul.f32 %v1361_v49, %v1359_v58  ;;  %v6492_v3 = vsel %vm610_vm15, %v2315_v2, %v5249_v41  ;;  %v1369_v27 = vmul.f32 %v1368_v23, %v1359_v58  ;;  %v1375_v20 = vadd.s32 3, %v1358_v16 }
 0x239   : > { %v1482_v14 = vadd.s32 1, %v1478_v33  ;;  %8542 = vmatmul.msk.f32.vlgmr.msra.gmra.mxu1 %vm6509_vm1, %v6492_v3  ;;  %v2429_v18 = vor.u32 %v2428_v31, %v2427_v62  ;;  %v2432_v60 = vshll.u32 %v2431_v57, 23  ;;  %v2443_v13 = vsel %vm11341_vm5, 0, %v2441_v35 }
 0x23a   : > { %v1363_v50 = vadd.f32 -0.4999988, %v1362_v22  ;;  %v2993_v46 = vshll.u32 %v11208_v17, 16  ;;  %v1370_v10 = vadd.f32 -0.16666654, %v1369_v27  ;;  %v4316_v59 = vand.u32 3, %v1358_v16 }
 0x23b   : > { %v1483_v28 = vsel %vm1481_vm3, %v1482_v14, %v1478_v33  ;;  %v2433_v6 = vor.u32 4788187, %v2432_v60  ;;  %v13937_v26 = vmul.u32 %v13935_v21, %v13936_v52  ;;  %v11387_v39 = vand.u32 31, %v11258_v15  ;;  %v13938_v60 = vld [vmem:[#allocation113_spill] sm:$0xff] }
 0x23c   : > { %v1364_v29 = vmul.f32 %v1363_v50, %v1359_v58  ;;  %v1371_v35 = vmul.f32 %v1370_v10, %v1359_v58  ;;  %v1376_v49 = vand.u32 3, %v1375_v20  ;;  %v2460_v38 = vadd.s32 3, %v2443_v13 }
 0x23d   : > { %v1484_v62 = vadd.s32 %v1483_v28, %v13937_v26  ;;  %v2434_v16 = vand.u32 2147483647, %v2433_v6  ;;  %v2436_v23 = vcvt.s32.f32 %v2429_v18  ;;  %vm1374_vm6 = vweird.f32 %v13913_v9 }
 0x23e   : > { %v1365_v55 = vadd.f32 1.0, %v1364_v29  ;;  %v1372_v2 = vadd.f32 1.0, %v1371_v35  ;;  %vm4317_vm10 = vcmp.lt.s32.totalorder %v4316_v59, 2  ;;  %vm4318_vm11 = vcmp.eq.s32.totalorder %v4316_v59, 0 }
 0x23f   : > { %v1485_v31 = vadd.s32 536870912, %v1484_v62  ;;  %vm4321_vm12 = vcmp.eq.s32.totalorder %v4316_v59, 2  ;;  %v2437_v41 = vmul.f32 %v2436_v23, %v2434_v16  ;;  %vm1377_vm8 = vcmp.lt.s32.totalorder %v1376_v49, 2  ;;  %v13944_v23 = vld [vmem:[#allocation111_spill] sm:$0xff] }
 0x240   : > { %v1382_v33 = vxor.u32 2147483648, %v1365_v55  ;;  %v1373_v57 = vmul.f32 %v1372_v2, %v11337_v12  ;;  %vm1378_vm9 = vcmp.eq.s32.totalorder %v1376_v49, 0  ;;  %vm1381_vm13 = vcmp.eq.s32.totalorder %v1376_v49, 2  ;;  %v13940_v12 = vld [vmem:[#allocation120_spill] sm:$0xff] }
 0x241   : > { %v11390_v22 = vshrl.u32 %v1485_v31, 30  ;;  %v2438_v58 = vxor.u32 2147483648, %v2437_v41  ;;  %v11393_v3 = vand.u32 3, %v2460_v38  ;;  %v11395_v27 = vand.u32 3, %v2443_v13 }
 0x242   : > { %v1379_v14 = vxor.u32 2147483648, %v1373_v57  ;;  %v11400_v50 = vadd.s32 %v11330_v51, %v11327_v25  ;;  %v2550_v18 = vshll.u32 %v10601_v42, 16  ;;  %v13939_v10 = vshll.u32 %v13938_v60, 16 }
 0x243   : > { %v1487_v20 = vshll.u32 %v11390_v22, 30  ;;  %v1383_v29 = vsel %vm1381_vm13, %v1382_v33, %v1373_v57  ;;  %v4323_v13 = vsel %vm4321_vm12, %v1382_v33, %v1373_v57  ;;  %v2439_v6 = vsel %vm2318_vm7, %v2438_v58, %v2437_v41  ;;  %v13945_v57 = vld [vmem:[#allocation115_spill] sm:$0xff] }
 0x244   : > { %vm11406_vm14 = vc.u32 %v13940_v12, %v13939_v10  ;;  %v1380_v52 = vsel %vm1378_vm9, %v1365_v55, %v1379_v14  ;;  %v4320_v25 = vsel %vm4318_vm11, %v1365_v55, %v1379_v14  ;;  %v11419_v51 = vsel %vm11341_vm5, %v13930_v4, %v2439_v6  ;;  %v13947_v6 = vld [vmem:[#allocation116_spill] sm:$0xff] }
 0x245   : > { %v11413_v21 = vsub.s32 %v1484_v62, %v1487_v20  ;;  %v13943_v26 = vshll.u32 %v10590_v44, 16  ;;  %v1384_v35 = vsel %vm1377_vm8, %v1380_v52, %v1383_v29  ;;  %v4324_v38 = vsel %vm4317_vm10, %v4320_v25, %v4323_v13  ;;  %v13946_v29 = vld [vmem:[#allocation121_spill] sm:$0xff] }
 0x246   : > { %v2444_v62 = vmul.f32 %v11419_v51, %v11419_v51  ;;  %v1385_v55 = vsel %vm1374_vm6, nan, %v1384_v35  ;;  %v4325_v48 = vsel %vm1374_vm6, nan, %v4324_v38  ;;  %v1599_v31 = vshrl.u32 %v13944_v23, 16 }
 0x247   : > { %vm2536_vm0 = vc.u32 %v10629_v54, %v13943_v26  ;;  %vm1489_vm7 = vcmp.lt.s32.totalorder %v11413_v21, 0  ;;  %v1490_v16 = vsub.s32 0, %v11413_v21  ;;  %v6486_v54 = vsel %vm610_vm15, %v1385_v55, %v4325_v48 }
 0x248   : > { %v2445_v59 = vmul.f32 -0.001358992, %v2444_v62  ;;  %v2452_v49 = vmul.f32 -0.00019511016, %v2444_v62  ;;  %v1607_v2 = vsel %vm11406_vm14, 1, %v13694_v56  ;;  %8536 = vmatmul.msk.f32.gmra.mxu0 %vm6509_vm1, %v6486_v54  ;;  %v2537_v9 = vsel %vm2536_vm0, 1, %v13694_v56 }
 0x249   : > { %v1491_v33 = vsel %vm1489_vm7, %v1490_v16, %v11413_v21  ;;  %v1601_v41 = vshrl.u32 %v13938_v60, 16  ;;  %v1620_v58 = vshll.u32 %v13945_v57, 16  ;;  %vm2554_vm4 = vc.u32 %v10594_v7, %v2550_v18 }
 0x24a   : > { %v2446_v20 = vadd.f32 0.041655596, %v2445_v59  ;;  %v2453_v14 = vadd.f32 0.008332121, %v2452_v49  ;;  %v1492_v10 = vclz %v1491_v33  ;;  %v2529_v12 = vshrl.u32 %v10545_v36, 16 }
 0x24b   : > { %v1609_v28 = vadd.s32 %v1607_v2, %v13946_v29  ;;  %v1621_v13 = vshrl.u32 %v13945_v57, 16  ;;  %v1622_v52 = vshll.u32 %v13947_v6, 16  ;;  %v2531_v38 = vshrl.u32 %v10590_v44, 16  ;;  %v13948_v2 = vld [vmem:[#allocation3_spill] sm:$0xff] }
 0x24c   : > { %v2447_v25 = vmul.f32 %v2446_v20, %v2444_v62  ;;  %v2454_v26 = vmul.f32 %v2453_v14, %v2444_v62  ;;  %v8434_v35 = vadd.s32 4294967294, %v1492_v10  ;;  %vm2466_vm5 = vcmp.eq.s32.totalorder %v11393_v3, 2 }
 0x24d   : > { %v2539_v55 = vadd.s32 %v2537_v9, %v10632_v37  ;;  %v2552_v48 = vshll.u32 %v10608_v30, 16  ;;  %v2555_v16 = vsel %vm2554_vm4, 1, %v13694_v56  ;;  %v2556_v36 = vadd.s32 %v2550_v18, %v10594_v7 }
 0x24e   : > { %v2448_v54 = vadd.f32 -0.4999988, %v2447_v25  ;;  %v2455_v59 = vadd.f32 -0.16666654, %v2454_v26  ;;  %vm8435_vm2 = vcmp.lt.s32.totalorder %v8434_v35, 0  ;;  %v2557_v49 = vadd.s32 %v2555_v16, %v10625_v32 }
 0x24f   : > { %vm1388_vm3 = vcmp.lt.s32.totalorder %v13948_v2, 0  ;;  %vm2463_vm6 = vcmp.eq.s32.totalorder %v11393_v3, 0  ;;  %vm5396_vm10 = vcmp.eq.s32.totalorder %v11395_v27, 0  ;;  %vm5399_vm11 = vcmp.eq.s32.totalorder %v11395_v27, 2 }
 0x250   : > { %v1495_v44 = vsel %vm8435_vm2, 0, %v8434_v35  ;;  %v2540_v37 = vadd.s32 %v2539_v55, %v2529_v12  ;;  %v2551_v33 = vshrl.u32 %v10601_v42, 16  ;;  %vm2558_vm12 = vc.u32 %v2556_v36, %v2552_v48 }
 0x251   : > { %v2449_v9 = vmul.f32 %v2448_v54, %v2444_v62  ;;  %v2456_v7 = vmul.f32 %v2455_v59, %v2444_v62  ;;  %vm2462_vm8 = vcmp.lt.s32.totalorder %v11393_v3, 2  ;;  %vm5395_vm9 = vcmp.lt.s32.totalorder %v11395_v27, 2 }
 0x252   : > { %v1496_v32 = vsub.s32 32, %v1495_v44  ;;  %v1497_v18 = vshll.u32 %v11413_v21, %v1495_v44  ;;  %vm11468_vm13 = vc.u32 %v11191_v34, %v2993_v46  ;;  %vm2459_vm14 = vweird.f32 %v13930_v4 }
 0x253   : > { %v1500_v42 = vsub.s32 4294967266, %v1495_v44  ;;  %v1510_v14 = vsub.s32 4, %v11390_v22  ;;  %v11474_v62 = vadd.s32 %v2540_v37, %v2531_v38  ;;  %v2559_v10 = vsel %vm2558_vm12, 1, %v13694_v56  ;;  %v13954_v38 = vld [vmem:[#allocation114_spill] sm:$0xff] }
 0x254   : > { %v2450_v12 = vadd.f32 1.0, %v2449_v9  ;;  %v2457_v29 = vadd.f32 1.0, %v2456_v7  ;;  %v1498_v21 = vshrl.u32 %v11400_v50, %v1496_v32  ;;  %v2561_v25 = vadd.s32 %v2559_v10, %v2557_v49 }
 0x255   : > { %v13951_v26 = vand.u32 2147483647, %v13948_v2  ;;  %v1501_v55 = vadd.s32 127, %v1500_v42  ;;  %v2553_v16 = vshrl.u32 %v10608_v30, 16  ;;  %v11485_v54 = vadd.s32 %v2556_v36, %v2552_v48 }
 0x256   : > { %vm1624_vm7 = vc.u32 %v13954_v38, %v1620_v58  ;;  %v2458_v59 = vmul.f32 %v2457_v29, %v11419_v51  ;;  %v2467_v44 = vxor.u32 2147483648, %v2450_v12  ;;  %v1499_v37 = vor.u32 %v1498_v21, %v1497_v18  ;;  %v13955_v18 = vld [vmem:[#allocation119_spill] sm:$0xff] }
 0x257   : > { %vm11480_vm0 = vcmp.le.f32.partialorder %v13951_v26, 0.7853982  ;;  %v2562_v9 = vadd.s32 %v2561_v25, %v2551_v33  ;;  %v1502_v50 = vshll.u32 %v1501_v55, 23  ;;  %v1610_v49 = vadd.s32 %v1609_v28, %v1599_v31 }
 0x258   : > { %v1625_v7 = vsel %vm1624_vm7, 1, %v13694_v56  ;;  %v1626_v32 = vadd.s32 %v1620_v58, %v13954_v38  ;;  %v2464_v42 = vxor.u32 2147483648, %v2458_v59  ;;  %v2468_v30 = vsel %vm2466_vm5, %v2467_v44, %v2458_v59 }
 0x259   : > { %v1506_v48 = vcvt.s32.f32 %v1499_v37  ;;  %vm2566_vm4 = vc.u32 %v11474_v62, %v11485_v54  ;;  %v1503_v51 = vor.u32 4788187, %v1502_v50  ;;  %v2563_v36 = vadd.s32 %v2562_v9, %v2553_v16 }
 0x25a   : > { %v1627_v33 = vadd.s32 %v1625_v7, %v13955_v18  ;;  %vm1628_vm2 = vc.u32 %v1626_v32, %v1622_v52  ;;  %v2465_v23 = vsel %vm2463_vm6, %v2450_v12, %v2464_v42  ;;  %v5398_v31 = vsel %vm5396_vm10, %v2450_v12, %v2464_v42 }
 0x25b   : > { %v5401_v58 = vsel %vm5399_vm11, %v2467_v44, %v2458_v59  ;;  %v1629_v28 = vsel %vm1628_vm2, 1, %v13694_v56  ;;  %v2469_v10 = vsel %vm2462_vm8, %v2465_v23, %v2468_v30  ;;  %v1504_v21 = vand.u32 2147483647, %v1503_v51 }
 0x25c   : > { %v5402_v29 = vsel %vm5395_vm9, %v5398_v31, %v5401_v58  ;;  %v2567_v25 = vadd.s32 1, %v2563_v36  ;;  %v2470_v26 = vsel %vm2459_vm14, nan, %v2469_v10  ;;  %v1511_v12 = vsel %vm1388_vm3, %v1510_v14, %v11390_v22  ;;  %v13961_v10 = vld [vmem:[#allocation100_spill] sm:$0xff] }
 0x25d   : > { %v5403_v55 = vsel %vm2459_vm14, nan, %v5402_v29  ;;  %v1631_v16 = vadd.s32 %v1629_v28, %v1627_v33  ;;  %v1507_v38 = vmul.f32 %v1506_v48, %v1504_v21  ;;  %v1611_v59 = vadd.s32 %v1610_v49, %v1601_v41  ;;  %v13962_v29 = vld [vmem:[#allocation109_spill] sm:$0xff] }
 0x25e   : > { %v6493_v3 = vsel %vm610_vm15, %v2470_v26, %v5403_v55  ;;  %v2568_v27 = vsel %vm2566_vm4, %v2567_v25, %v2563_v36  ;;  %v2998_v4 = vsel %vm11468_vm13, 1, %v13694_v56  ;;  %v13956_v22 = vmul.u32 %v10409_v53, %v10563_v24 }
 0x25f   : > { %8543 = vmatmul.msk.f32.gmra.mxu1 %vm6509_vm1, %v6493_v3  ;;  %v1623_v44 = vshrl.u32 %v13947_v6, 16  ;;  %v1632_v37 = vadd.s32 %v1631_v16, %v1621_v13  ;;  %v11538_v60 = vadd.s32 %v2993_v46, %v11191_v34  ;;  %v11541_v41 = vshrl.u32 %v11258_v15, 5 }
 0x260   : > { %v2569_v14 = vadd.s32 %v2568_v27, %v13956_v22  ;;  %v1508_v20 = vxor.u32 2147483648, %v1507_v38  ;;  %v1630_v9 = vadd.s32 %v1626_v32, %v1622_v52  ;;  %v11546_v53 = vsub.s32 32, %v11387_v39 }
 0x261   : > { %v1513_v24 = vsel %vm11480_vm0, 0, %v1511_v12  ;;  %v1633_v13 = vadd.s32 %v1632_v37, %v1623_v44  ;;  %v11551_v50 = vadd.s32 %v2998_v4, %v11228_v11  ;;  %v3418_v34 = vshll.u32 %v13690_v0, %v11387_v39 }
 0x262   : > { %v2570_v57 = vadd.s32 536870912, %v2569_v14  ;;  %v1509_v15 = vsel %vm1388_vm3, %v1508_v20, %v1507_v38  ;;  %vm1636_vm5 = vc.u32 %v1611_v59, %v1630_v9  ;;  %v13957_v46 = vmov 2475754826  }
 0x263   : > { %v3421_v6 = vshll.u32 %v13957_v46, %v11387_v39  ;;  %v11562_v52 = vsel %vm11480_vm0, %v13948_v2, %v1509_v15  ;;  %v1637_v7 = vadd.s32 1, %v1633_v13  ;;  %v13958_v11 = vmov 2131351028  }
 0x264   : > { %v11564_v49 = vshrl.u32 %v2570_v57, 30  ;;  %v11568_v32 = vshll.u32 %v13958_v11, %v11387_v39  ;;  %v13959_v42 = vmov 2102212464   ;;  %v1514_v48 = vmul.f32 %v11562_v52, %v11562_v52 }
 0x265   : > { %v3427_v30 = vshll.u32 %v13959_v42, %v11387_v39  ;;  %v1530_v51 = vadd.s32 3, %v1513_v24  ;;  %v3419_v36 = vshrl.u32 %v13957_v46, %v11546_v53  ;;  %v13960_v35 = vmov 920167782  }
 0x266   : > { %v11578_v18 = vshll.u32 %v13960_v35, %v11387_v39  ;;  %v2572_v33 = vshll.u32 %v11564_v49, 30  ;;  %v1638_v23 = vsel %vm1636_vm5, %v1637_v7, %v1633_v13  ;;  %v3422_v31 = vshrl.u32 %v13958_v11, %v11546_v53  ;;  %v13965_v7 = vld [vmem:[#allocation147_spill] sm:$0xff] }
 0x267   : > { %v1515_v58 = vmul.f32 -0.001358992, %v1514_v48  ;;  %v1522_v28 = vmul.f32 -0.00019511016, %v1514_v48  ;;  %v13963_v21 = vmul.u32 %v13961_v10, %v13962_v29  ;;  %v11588_v26 = vshrl.u32 %v13959_v42, %v11546_v53  ;;  %v13969_v10 = vld [vmem:[#allocation143_spill] sm:$0xff] }
 0x268   : > { %v3428_v39 = vshrl.u32 %v13960_v35, %v11546_v53  ;;  %v13964_v55 = vmov 1326507024   ;;  %v11596_v16 = vsub.s32 %v2569_v14, %v2572_v33  ;;  %v11598_v27 = vand.u32 3, %v1530_v51  ;;  %v13966_v35 = vld [vmem:[#allocation144_spill] sm:$0xff] }
 0x269   : > { %v1639_v25 = vadd.s32 %v1638_v23, %v13963_v21  ;;  %v11594_v12 = vshrl.u32 %v13964_v55, %v11546_v53  ;;  %v1516_v3 = vadd.f32 0.041655596, %v1515_v58  ;;  %v1523_v38 = vadd.f32 0.008332121, %v1522_v28  ;;  %v13968_v23 = vld [vmem:[#allocation150_spill] sm:$0xff] }
 0x26a   : > { %v11600_v22 = vor.u32 %v3419_v36, %v3418_v34  ;;  %v11602_v44 = vand.u32 3, %v1513_v24  ;;  %vm2574_vm3 = vcmp.lt.s32.totalorder %v11596_v16, 0  ;;  %v2575_v37 = vsub.s32 0, %v11596_v16 }
 0x26b   : > { %v1640_v4 = vadd.s32 536870912, %v1639_v25  ;;  %v11606_v20 = vor.u32 %v3422_v31, %v3421_v6  ;;  %v1517_v57 = vmul.f32 %v1516_v3, %v1514_v48  ;;  %v1524_v13 = vmul.f32 %v1523_v38, %v1514_v48  ;;  %v13973_v3 = vld [vmem:[#allocation118_spill] sm:$0xff] }
 0x26c   : > { %v11610_v14 = vor.u32 %v3428_v39, %v3427_v30  ;;  %v3432_v46 = vor.u32 %v11594_v12, %v11578_v18  ;;  %v2576_v34 = vsel %vm2574_vm3, %v2575_v37, %v11596_v16  ;;  %v2705_v24 = vshll.u32 %v13965_v7, 16 }
 0x26d   : > { %v11608_v15 = vshrl.u32 %v1640_v4, 30  ;;  %v1518_v11 = vadd.f32 -0.4999988, %v1517_v57  ;;  %v1525_v42 = vadd.f32 -0.16666654, %v1524_v13  ;;  %vm1536_vm6 = vcmp.eq.s32.totalorder %v11598_v27, 2 }
 0x26e   : > { %v2577_v51 = vclz %v2576_v34  ;;  %vm1533_vm10 = vcmp.eq.s32.totalorder %v11598_v27, 0  ;;  %vm4472_vm11 = vcmp.eq.s32.totalorder %v11602_v44, 0  ;;  %vm4475_vm12 = vcmp.eq.s32.totalorder %v11602_v44, 2  ;;  %v13974_v34 = vld [vmem:[#allocation148_spill] sm:$0xff] }
 0x26f   : > { %v2565_v6 = vadd.s32 %v11485_v54, %v11474_v62  ;;  %v11622_v30 = vadd.s32 %v1630_v9, %v1611_v59  ;;  %v1642_v36 = vshll.u32 %v11608_v15, 30  ;;  %v13967_v33 = vshll.u32 %v13966_v35, 16  ;;  %v13970_v9 = vld [vmem:[#allocation146_spill] sm:$0xff] }
 0x270   : > { %v1519_v31 = vmul.f32 %v1518_v11, %v1514_v48  ;;  %v1526_v58 = vmul.f32 %v1525_v42, %v1514_v48  ;;  %vm1532_vm9 = vcmp.lt.s32.totalorder %v11598_v27, 2  ;;  %vm4471_vm13 = vcmp.lt.s32.totalorder %v11602_v44, 2  ;;  %v13983_v27 = vld [vmem:[#allocation102_spill] sm:$0xff]  ;;  %v13985_v44 = vld [vmem:[#allocation107_spill] sm:$0xff] }
 0x271   : > { %vm2691_vm8 = vc.u32 %v13968_v23, %v13967_v33  ;;  %v8455_v28 = vadd.s32 4294967294, %v2577_v51  ;;  %v2684_v29 = vshrl.u32 %v13969_v10, 16  ;;  %vm1529_vm14 = vweird.f32 %v13948_v2 }
 0x272   : > { %v11632_v62 = vsub.s32 %v1639_v25, %v1642_v36  ;;  %v2686_v54 = vshrl.u32 %v13966_v35, 16  ;;  %v2706_v59 = vshrl.u32 %v13965_v7, 16  ;;  %vm11637_vm0 = vc.u32 %v13970_v9, %v2705_v24  ;;  %v13975_v35 = vld [vmem:[#allocation151_spill] sm:$0xff] }
 0x273   : > { %v1520_v48 = vadd.f32 1.0, %v1519_v31  ;;  %v1527_v39 = vadd.f32 1.0, %v1526_v58  ;;  %vm8456_vm7 = vcmp.lt.s32.totalorder %v8455_v28, 0  ;;  %v2692_v55 = vsel %vm2691_vm8, 1, %v13694_v56 }
 0x274   : > { %vm2473_vm4 = vcmp.lt.s32.totalorder %v13973_v3, 0  ;;  %v2580_v38 = vsel %vm8456_vm7, 0, %v8455_v28  ;;  %vm1644_vm2 = vcmp.lt.s32.totalorder %v11632_v62, 0  ;;  %v1645_v25 = vsub.s32 0, %v11632_v62 }
 0x275   : > { %v2711_v4 = vadd.s32 %v2705_v24, %v13970_v9  ;;  %v1528_v37 = vmul.f32 %v1527_v39, %v11562_v52  ;;  %v1537_v57 = vxor.u32 2147483648, %v1520_v48  ;;  %v2581_v13 = vsub.s32 32, %v2580_v38 }
 0x276   : > { %v2707_v11 = vshll.u32 %v13974_v34, 16  ;;  %v2585_v42 = vsub.s32 4294967266, %v2580_v38  ;;  %v2595_v51 = vsub.s32 4, %v11564_v49  ;;  %v1646_v36 = vsel %vm1644_vm2, %v1645_v25, %v11632_v62  ;;  %v13981_v25 = vld [vmem:[#allocation83_spill] sm:$0xff] }
 0x277   : > { %v2694_v33 = vadd.s32 %v2692_v55, %v13975_v35  ;;  %v1534_v23 = vxor.u32 2147483648, %v1528_v37  ;;  %v2582_v31 = vshll.u32 %v11596_v16, %v2580_v38  ;;  %v2583_v58 = vshrl.u32 %v2565_v6, %v2581_v13 }
 0x278   : > { %v2710_v24 = vsel %vm11637_vm0, 1, %v13694_v56  ;;  %v1538_v52 = vsel %vm1536_vm6, %v1537_v57, %v1528_v37  ;;  %v13976_v28 = vand.u32 2147483647, %v13973_v3  ;;  %v2586_v9 = vadd.s32 127, %v2585_v42 }
 0x279   : > { %v1647_v39 = vclz %v1646_v36  ;;  %vm11663_vm3 = vc.u32 %v2711_v4, %v2707_v11  ;;  %v1535_v16 = vsel %vm1533_vm10, %v1520_v48, %v1534_v23  ;;  %v4474_v6 = vsel %vm4472_vm11, %v1520_v48, %v1534_v23 }
 0x27a   : > { %vm11659_vm5 = vcmp.le.f32.partialorder %v13976_v28, 0.7853982  ;;  %v4477_v21 = vsel %vm4475_vm12, %v1537_v57, %v1528_v37  ;;  %v2584_v38 = vor.u32 %v2583_v58, %v2582_v31  ;;  %vm1543_vm6 = vcmp.lt.s32.totalorder %v13981_v25, 0 }
 0x27b   : > { %v1539_v13 = vsel %vm1532_vm9, %v1535_v16, %v1538_v52  ;;  %v4478_v42 = vsel %vm4471_vm13, %v4474_v6, %v4477_v21  ;;  %v2587_v36 = vshll.u32 %v2586_v9, 23  ;;  %v8437_v35 = vadd.s32 4294967294, %v1647_v39 }
 0x27c   : > { %v1540_v28 = vsel %vm1529_vm14, nan, %v1539_v13  ;;  %v4479_v48 = vsel %vm1529_vm14, nan, %v4478_v42  ;;  %v2695_v23 = vadd.s32 %v2694_v33, %v2684_v29  ;;  %v2712_v37 = vadd.s32 %v2710_v24, %v13982_v5  ;;  %v13991_v42 = vld [vmem:[#allocation104_spill] sm:$0xff] }
 0x27d   : > { %v6487_v57 = vsel %vm610_vm15, %v1540_v28, %v4479_v48  ;;  %v2588_v31 = vor.u32 4788187, %v2587_v36  ;;  %vm8438_vm10 = vcmp.lt.s32.totalorder %v8437_v35, 0  ;;  %v13984_v58 = vshll.u32 %v13983_v27, 16 }
 0x27e   : > { %8537 = vmatmul.msk.f32.gmra.mxu0 %vm6509_vm1, %v6487_v57  ;;  %v2596_v2 = vsel %vm2473_vm4, %v2595_v51, %v11564_v49  ;;  %v1650_v29 = vsel %vm8438_vm10, 0, %v8437_v35  ;;  %v1665_v5 = vsub.s32 4, %v11608_v15  ;;  %v2714_v33 = vsel %vm11663_vm3, 1, %v13694_v56 }
 0x27f   : > { %vm11688_vm11 = vc.u32 %v13985_v44, %v13984_v58  ;;  %v2589_v24 = vand.u32 2147483647, %v2588_v31  ;;  %v2591_v9 = vcvt.s32.f32 %v2584_v38  ;;  %v13988_v39 = vand.u32 2147483647, %v13981_v25 }
 0x280   : > { %v1651_v6 = vsub.s32 32, %v1650_v29  ;;  %v1655_v21 = vsub.s32 4294967266, %v1650_v29  ;;  %v1652_v13 = vshll.u32 %v11632_v62, %v1650_v29  ;;  %v11707_v49 = vadd.s32 %v2695_v23, %v2686_v54  ;;  %v13992_v54 = vld [vmem:[#allocation101_spill] sm:$0xff]  ;;  %v13993_v29 = vld [vmem:[#allocation108_spill] sm:$0xff] }
 0x281   : > { %vm11702_vm12 = vcmp.le.f32.partialorder %v13988_v39, 0.7853982  ;;  %v2716_v51 = vadd.s32 %v2714_v33, %v2712_v37  ;;  %v1775_v36 = vshll.u32 %v13991_v42, 16  ;;  %v2592_v35 = vmul.f32 %v2591_v9, %v2589_v24 }
 0x282   : > { %v1653_v55 = vshrl.u32 %v11622_v30, %v1651_v6  ;;  %v1656_v28 = vadd.s32 127, %v1655_v21  ;;  %v1762_v38 = vsel %vm11688_vm11, 1, %v13694_v56  ;;  %v2598_v48 = vsel %vm11659_vm5, 0, %v2596_v2  ;;  %v13994_v2 = vld [vmem:[#allocation103_spill] sm:$0xff] }
 0x283   : > { %v2708_v57 = vshrl.u32 %v13974_v34, 16  ;;  %v2717_v62 = vadd.s32 %v2716_v51, %v2706_v59  ;;  %v1754_v23 = vshrl.u32 %v13992_v54, 16  ;;  %v2593_v37 = vxor.u32 2147483648, %v2592_v35  ;;  %v13995_v34 = vld [vmem:[#allocation105_spill] sm:$0xff] }
 0x284   : > { %v1654_v31 = vor.u32 %v1653_v55, %v1652_v13  ;;  %v1657_v58 = vshll.u32 %v1656_v28, 23  ;;  %v11720_v44 = vadd.s32 %v2711_v4, %v2707_v11  ;;  %v1666_v30 = vsel %vm1543_vm6, %v1665_v5, %v11608_v15 }
 0x285   : > { %v2718_v52 = vadd.s32 %v2717_v62, %v2708_v57  ;;  %v1764_v33 = vadd.s32 %v1762_v38, %v13993_v29  ;;  %vm1779_vm8 = vc.u32 %v13994_v2, %v1775_v36  ;;  %v2594_v7 = vsel %vm2473_vm4, %v2593_v37, %v2592_v35  ;;  %v13996_v35 = vld [vmem:[#allocation106_spill] sm:$0xff]  ;;  %v13997_v57 = vld [vmem:[#allocation133_spill] sm:$0xff] }
 0x286   : > { %v1658_v59 = vor.u32 4788187, %v1657_v58  ;;  %vm2721_vm9 = vc.u32 %v11707_v49, %v11720_v44  ;;  %v1777_v24 = vshll.u32 %v13995_v34, 16  ;;  %v11735_v4 = vsel %vm11659_vm5, %v13973_v3, %v2594_v7  ;;  %v13998_v62 = vld [vmem:[#allocation141_spill] sm:$0xff] }
 0x287   : > { %v2722_v15 = vadd.s32 1, %v2718_v52  ;;  %v1780_v11 = vsel %vm1779_vm8, 1, %v13694_v56  ;;  %v1781_v5 = vadd.s32 %v1775_v36, %v13994_v2  ;;  %v2599_v9 = vmul.f32 %v11735_v4, %v11735_v4 }
 0x288   : > { %v2615_v39 = vadd.s32 3, %v2598_v48  ;;  %v1659_v6 = vand.u32 2147483647, %v1658_v59  ;;  %v1661_v21 = vcvt.s32.f32 %v1654_v31  ;;  %v1668_v13 = vsel %vm11702_vm12, 0, %v1666_v30 }
 0x289   : > { %v2723_v51 = vsel %vm2721_vm9, %v2722_v15, %v2718_v52  ;;  %v1782_v55 = vadd.s32 %v1780_v11, %v13996_v35  ;;  %vm1783_vm13 = vc.u32 %v1781_v5, %v1777_v24  ;;  %v2600_v10 = vmul.f32 -0.001358992, %v2599_v9 }
 0x28a   : > { %v2607_v28 = vmul.f32 -0.00019511016, %v2599_v9  ;;  %v1662_v38 = vmul.f32 %v1661_v21, %v1659_v6  ;;  %v13999_v54 = vmul.u32 %v13997_v57, %v13998_v62  ;;  %v11747_v37 = vand.u32 3, %v2598_v48 }
 0x28b   : > { %v1756_v58 = vshrl.u32 %v13983_v27, 16  ;;  %v1765_v29 = vadd.s32 %v1764_v33, %v1754_v23  ;;  %v1784_v31 = vsel %vm1783_vm13, 1, %v13694_v56  ;;  %v2601_v2 = vadd.f32 0.041655596, %v2600_v10 }
 0x28c   : > { %v2724_v36 = vadd.s32 %v2723_v51, %v13999_v54  ;;  %v2608_v30 = vadd.f32 0.008332121, %v2607_v28  ;;  %v1663_v52 = vxor.u32 2147483648, %v1662_v38  ;;  %v11751_v59 = vand.u32 3, %v2615_v39 }
 0x28d   : > { %v1685_v15 = vadd.s32 3, %v1668_v13  ;;  %v1776_v11 = vshrl.u32 %v13991_v42, 16  ;;  %v1786_v6 = vadd.s32 %v1784_v31, %v1782_v55  ;;  %v2602_v21 = vmul.f32 %v2601_v2, %v2599_v9 }
 0x28e   : > { %v2725_v7 = vadd.s32 536870912, %v2724_v36  ;;  %v2609_v35 = vmul.f32 %v2608_v30, %v2599_v9  ;;  %v1664_v48 = vsel %vm1543_vm6, %v1663_v52, %v1662_v38  ;;  %v11763_v23 = vadd.s32 %v1765_v29, %v1756_v58 }
 0x28f   : > { %v11761_v27 = vsel %vm11702_vm12, %v13981_v25, %v1664_v48  ;;  %v1778_v33 = vshrl.u32 %v13995_v34, 16  ;;  %v1787_v39 = vadd.s32 %v1786_v6, %v1776_v11  ;;  %v2603_v10 = vadd.f32 -0.4999988, %v2602_v21 }
 0x290   : > { %v11756_v51 = vshrl.u32 %v2725_v7, 30  ;;  %v2610_v42 = vadd.f32 -0.16666654, %v2609_v35  ;;  %v1669_v55 = vmul.f32 %v11761_v27, %v11761_v27  ;;  %vm5550_vm14 = vcmp.eq.s32.totalorder %v11747_v37, 0  ;;  %v14000_v7 = vld [vmem:[#allocation66_spill] sm:$0xff] }
 0x291   : > { %vm5553_vm0 = vcmp.eq.s32.totalorder %v11747_v37, 2  ;;  %v11771_v38 = vadd.s32 %v1781_v5, %v1777_v24  ;;  %v1788_v16 = vadd.s32 %v1787_v39, %v1778_v33  ;;  %v2604_v57 = vmul.f32 %v2603_v10, %v2599_v9  ;;  %v14003_v35 = vld [vmem:[#allocation110_spill] sm:$0xff]  ;;  %v14004_v33 = vld [vmem:[#allocation69_spill] sm:$0xff] }
 0x292   : > { %v2727_v28 = vshll.u32 %v11756_v51, 30  ;;  %v2611_v62 = vmul.f32 %v2610_v42, %v2599_v9  ;;  %vm2617_vm7 = vcmp.lt.s32.totalorder %v11751_v59, 2  ;;  %vm5549_vm4 = vcmp.lt.s32.totalorder %v11747_v37, 2 }
 0x293   : > { %v1670_v34 = vmul.f32 -0.001358992, %v1669_v55  ;;  %v1677_v54 = vmul.f32 -0.00019511016, %v1669_v55  ;;  %vm2614_vm2 = vweird.f32 %v13973_v3  ;;  %v11776_v58 = vand.u32 3, %v1685_v15  ;;  %v14002_v15 = vld [vmem:[#allocation72_spill] sm:$0xff] }
 0x294   : > { %v11778_v29 = vand.u32 3, %v1668_v13  ;;  %v11780_v31 = vsub.s32 %v2724_v36, %v2727_v28  ;;  %vm1791_vm5 = vc.u32 %v11763_v23, %v11771_v38  ;;  %v2605_v24 = vadd.f32 1.0, %v2604_v57 }
 0x295   : > { %v2612_v5 = vadd.f32 1.0, %v2611_v62  ;;  %v1671_v9 = vadd.f32 0.041655596, %v1670_v34  ;;  %v1678_v2 = vadd.f32 0.008332121, %v1677_v54  ;;  %v1792_v52 = vadd.s32 1, %v1788_v16 }
 0x296   : > { %vm2729_vm3 = vcmp.lt.s32.totalorder %v11780_v31, 0  ;;  %v2730_v30 = vsub.s32 0, %v11780_v31  ;;  %v14001_v11 = vshll.u32 %v14000_v7, 16  ;;  %v2622_v36 = vxor.u32 2147483648, %v2605_v24 }
 0x297   : > { %v2613_v13 = vmul.f32 %v2612_v5, %v11735_v4  ;;  %v1672_v6 = vmul.f32 %v1671_v9, %v1669_v55  ;;  %v1679_v21 = vmul.f32 %v1678_v2, %v1669_v55  ;;  %vm2628_vm10 = vcmp.lt.s32.totalorder %v14003_v35, 0 }
 0x298   : > { %vm2846_vm6 = vc.u32 %v14002_v15, %v14001_v11  ;;  %vm2618_vm11 = vcmp.eq.s32.totalorder %v11751_v59, 0  ;;  %vm2621_vm12 = vcmp.eq.s32.totalorder %v11751_v59, 2  ;;  %v2731_v48 = vsel %vm2729_vm3, %v2730_v30, %v11780_v31  ;;  %v14005_v59 = vld [vmem:[#allocation90_spill] sm:$0xff] }
 0x299   : > { %v2860_v39 = vshll.u32 %v14004_v33, 16  ;;  %v2619_v10 = vxor.u32 2147483648, %v2613_v13  ;;  %v1673_v42 = vadd.f32 -0.4999988, %v1672_v6  ;;  %vm1691_vm8 = vcmp.eq.s32.totalorder %v11776_v58, 2 }
 0x29a   : > { %v2750_v28 = vsub.s32 4, %v11756_v51  ;;  %v2847_v4 = vsel %vm2846_vm6, 1, %v13694_v56  ;;  %v2623_v57 = vsel %vm2621_vm12, %v2622_v36, %v2613_v13  ;;  %v1680_v62 = vadd.f32 -0.16666654, %v1679_v21 }
 0x29b   : > { %v2732_v34 = vclz %v2731_v48  ;;  %v1793_v54 = vsel %vm1791_vm5, %v1792_v52, %v1788_v16  ;;  %v2620_v5 = vsel %vm2618_vm11, %v2605_v24, %v2619_v10  ;;  %v5552_v9 = vsel %vm5550_vm14, %v2605_v24, %v2619_v10 }
 0x29c   : > { %v5555_v2 = vsel %vm5553_vm0, %v2622_v36, %v2613_v13  ;;  %v1674_v30 = vmul.f32 %v1673_v42, %v1669_v55  ;;  %vm1688_vm9 = vcmp.eq.s32.totalorder %v11776_v58, 0  ;;  %vm4626_vm13 = vcmp.eq.s32.totalorder %v11778_v29, 0  ;;  %v14006_v36 = vld [vmem:[#allocation99_spill] sm:$0xff]  ;;  %v14018_v42 = vld [vmem:[#allocation38_spill] sm:$0xff] }
 0x29d   : > { %v2624_v11 = vsel %vm2617_vm7, %v2620_v5, %v2623_v57  ;;  %v5556_v15 = vsel %vm5549_vm4, %v5552_v9, %v5555_v2  ;;  %v1681_v6 = vmul.f32 %v1680_v62, %v1669_v55  ;;  %vm1687_vm5 = vcmp.lt.s32.totalorder %v11776_v58, 2 }
 0x29e   : > { %vm4625_vm3 = vcmp.lt.s32.totalorder %v11778_v29, 2  ;;  %v8458_v16 = vadd.s32 4294967294, %v2732_v34  ;;  %v2625_v24 = vsel %vm2614_vm2, nan, %v2624_v11  ;;  %v5557_v52 = vsel %vm2614_vm2, nan, %v5556_v15  ;;  %v14011_v34 = vld [vmem:[#allocation64_spill] sm:$0xff] }
 0x29f   : > { %v1675_v13 = vadd.f32 1.0, %v1674_v30  ;;  %vm1684_vm14 = vweird.f32 %v13981_v25  ;;  %v14007_v21 = vmul.u32 %v14005_v59, %v14006_v36  ;;  %v6494_v55 = vsel %vm610_vm15, %v2625_v24, %v5557_v52  ;;  %v14012_v30 = vld [vmem:[#allocation73_spill] sm:$0xff]  ;;  %v14013_v24 = vld [vmem:[#allocation70_spill] sm:$0xff]  ;;  %v14014_v59 = vld [vmem:[#allocation67_spill] sm:$0xff] }
 0x2a0   : > { %v1682_v48 = vadd.f32 1.0, %v1681_v6  ;;  %vm4629_vm0 = vcmp.eq.s32.totalorder %v11778_v29, 2  ;;  %vm8459_vm7 = vcmp.lt.s32.totalorder %v8458_v16, 0  ;;  %8544 = vmatmul.msk.f32.gmra.mxu1 %vm6509_vm1, %v6494_v55  ;;  %v14008_v3 = vand.u32 2147483647, %v14003_v35 }
 0x2a1   : > { %v1794_v37 = vadd.s32 %v1793_v54, %v14007_v21  ;;  %v1692_v10 = vxor.u32 2147483648, %v1675_v13  ;;  %v2720_v57 = vadd.s32 %v11720_v44, %v11707_v49  ;;  %v2735_v62 = vsel %vm8459_vm7, 0, %v8458_v16 }
 0x2a2   : > { %vm11827_vm4 = vcmp.le.f32.partialorder %v14008_v3, 0.7853982  ;;  %v2839_v54 = vshrl.u32 %v14011_v34, 16  ;;  %v1683_v5 = vmul.f32 %v1682_v48, %v11761_v27  ;;  %v2736_v9 = vsub.s32 32, %v2735_v62 }
 0x2a3   : > { %v2740_v2 = vsub.s32 4294967266, %v2735_v62  ;;  %v2849_v11 = vadd.s32 %v2847_v4, %v14012_v30  ;;  %vm3436_vm2 = vcmp.lt.s32.totalorder %v11541_v41, 4  ;;  %v2751_v15 = vsel %vm2628_vm10, %v2750_v28, %v11756_v51 }
 0x2a4   : > { %v1795_v6 = vadd.s32 536870912, %v1794_v37  ;;  %v2862_v52 = vshll.u32 %v14013_v24, 16  ;;  %vm2864_vm6 = vc.u32 %v14014_v59, %v2860_v39  ;;  %v1689_v49 = vxor.u32 2147483648, %v1683_v5 }
 0x2a5   : > { %v1693_v44 = vsel %vm1691_vm8, %v1692_v10, %v1683_v5  ;;  %v2737_v27 = vshll.u32 %v11780_v31, %v2735_v62  ;;  %v2738_v16 = vshrl.u32 %v2720_v57, %v2736_v9  ;;  %v2741_v36 = vadd.s32 127, %v2740_v2  ;;  %v14015_v2 = vld [vmem:[#allocation71_spill] sm:$0xff] }
 0x2a6   : > { %v11845_v4 = vshrl.u32 %v1795_v6, 30  ;;  %v2865_v21 = vsel %vm2864_vm6, 1, %v13694_v56  ;;  %v2866_v55 = vadd.s32 %v2860_v39, %v14014_v59  ;;  %v1690_v51 = vsel %vm1688_vm9, %v1675_v13, %v1689_v49 }
 0x2a7   : > { %v4628_v28 = vsel %vm4626_vm13, %v1675_v13, %v1689_v49  ;;  %v4631_v48 = vsel %vm4629_vm0, %v1692_v10, %v1683_v5  ;;  %v2739_v3 = vor.u32 %v2738_v16, %v2737_v27  ;;  %v1694_v31 = vsel %vm1687_vm5, %v1690_v51, %v1693_v44 }
 0x2a8   : > { %v4632_v57 = vsel %vm4625_vm3, %v4628_v28, %v4631_v48  ;;  %v2742_v62 = vshll.u32 %v2741_v36, 23  ;;  %v1797_v34 = vshll.u32 %v11845_v4, 30  ;;  %v1695_v39 = vsel %vm1684_vm14, nan, %v1694_v31 }
 0x2a9   : > { %v4633_v9 = vsel %vm1684_vm14, nan, %v4632_v57  ;;  %v2841_v13 = vshrl.u32 %v14000_v7, 16  ;;  %v2867_v10 = vadd.s32 %v2865_v21, %v14015_v2  ;;  %vm2868_vm11 = vc.u32 %v2866_v55, %v2862_v52 }
 0x2aa   : > { %v6488_v58 = vsel %vm610_vm15, %v1695_v39, %v4633_v9  ;;  %v2743_v5 = vor.u32 4788187, %v2742_v62  ;;  %v1798_v30 = vsub.s32 %v1794_v37, %v1797_v34  ;;  %v2753_v29 = vsel %vm11827_vm4, 0, %v2751_v15 }
 0x2ab   : > { %8538 = vmatmul.msk.f32.gmra.mxu0 %vm6509_vm1, %v6488_v58  ;;  %v2850_v6 = vadd.s32 %v2849_v11, %v2839_v54  ;;  %v2861_v59 = vshrl.u32 %v14004_v33, 16  ;;  %v2869_v25 = vsel %vm2868_vm11, 1, %v13694_v56  ;;  %v2746_v7 = vcvt.s32.f32 %v2739_v3 }
 0x2ac   : > { %v2744_v49 = vand.u32 2147483647, %v2743_v5  ;;  %vm1799_vm12 = vcmp.lt.s32.totalorder %v1798_v30, 0  ;;  %v1800_v44 = vsub.s32 0, %v1798_v30  ;;  %v11875_v27 = vor.u32 %v11588_v26, %v11568_v32  ;;  %v14020_v5 = vld [vmem:[#allocation68_spill] sm:$0xff] }
 0x2ad   : > { %vm13638_vm8 = vcmp.lt.s32.totalorder %v11541_v41, 1  ;;  %v3442_v37 = vsel %vm3436_vm2, %v11610_v14, 920167782  ;;  %v2871_v15 = vadd.s32 %v2869_v25, %v2867_v10  ;;  %v3446_v33 = vsel %vm3436_vm2, %v3432_v46, 1326507024  ;;  %v14019_v10 = vld [vmem:[#allocation34_spill] sm:$0xff] }
 0x2ae   : > { %v2747_v54 = vmul.f32 %v2746_v7, %v2744_v49  ;;  %v1801_v11 = vsel %vm1799_vm12, %v1800_v44, %v1798_v30  ;;  %v2863_v16 = vshrl.u32 %v14013_v24, 16  ;;  %v2770_v36 = vadd.s32 3, %v2753_v29  ;;  %v14021_v25 = vld [vmem:[#allocation27_spill] sm:$0xff] }
 0x2af   : > { %v1802_v32 = vclz %v1801_v11  ;;  %v11887_v26 = vadd.s32 %v2850_v6, %v2841_v13  ;;  %v11889_v21 = vadd.s32 %v2866_v55, %v2862_v52  ;;  %vm13637_vm9 = vcmp.lt.s32.totalorder %v11541_v41, 3  ;;  %v14016_v13 = vld [vmem:[#allocation32_spill] sm:$0xff] }
 0x2b0   : > { %v11896_v18 = vsel %vm13638_vm8, %v11600_v22, %v11606_v20  ;;  %v2748_v12 = vxor.u32 2147483648, %v2747_v54  ;;  %v2872_v46 = vadd.s32 %v2871_v15, %v2861_v59  ;;  %v11901_v24 = vsel %vm13637_vm9, %v11875_v27, %v3442_v37  ;;  %v14022_v15 = vld [vmem:[#allocation61_spill] sm:$0xff] }
 0x2b1   : > { %v11907_v52 = vsel %vm13638_vm8, %v11606_v20, %v11875_v27  ;;  %v11912_v55 = vsel %vm13637_vm9, %v11610_v14, %v3446_v33  ;;  %v8440_v51 = vadd.s32 4294967294, %v1802_v32  ;;  %v11916_v48 = vand.u32 3, %v2753_v29  ;;  %v14023_v33 = vld [vmem:[#allocation63_spill] sm:$0xff] }
 0x2b2   : > { %v2749_v28 = vsel %vm2628_vm10, %v2748_v12, %v2747_v54  ;;  %v1790_v3 = vadd.s32 %v11771_v38, %v11763_v23  ;;  %v2873_v31 = vadd.s32 %v2872_v46, %v2863_v16  ;;  %v11925_v62 = vand.u32 3, %v2770_v36  ;;  %v14025_v12 = vld [vmem:[#allocation35_spill] sm:$0xff] }
 0x2b3   : > { %v11923_v57 = vsel %vm11827_vm4, %v14003_v35, %v2749_v28  ;;  %vm8441_vm13 = vcmp.lt.s32.totalorder %v8440_v51, 0  ;;  %vm2876_vm5 = vc.u32 %v11887_v26, %v11889_v21  ;;  %v1820_v39 = vsub.s32 4, %v11845_v4 }
 0x2b4   : > { %v2754_v14 = vmul.f32 %v11923_v57, %v11923_v57  ;;  %v1805_v34 = vsel %vm8441_vm13, 0, %v8440_v51  ;;  %v2877_v9 = vadd.s32 1, %v2873_v31  ;;  %v14017_v2 = vshll.u32 %v14016_v13, 16 }
 0x2b5   : > { %v1806_v23 = vsub.s32 32, %v1805_v34  ;;  %v1810_v38 = vsub.s32 4294967266, %v1805_v34  ;;  %v1930_v58 = vshll.u32 %v14019_v10, 16  ;;  %vm1698_vm3 = vcmp.lt.s32.totalorder %v14020_v5, 0 }
 0x2b6   : > { %vm1916_vm10 = vc.u32 %v14018_v42, %v14017_v2  ;;  %v2755_v29 = vmul.f32 -0.001358992, %v2754_v14  ;;  %v2762_v6 = vmul.f32 -0.00019511016, %v2754_v14  ;;  %v2878_v59 = vsel %vm2876_vm5, %v2877_v9, %v2873_v31  ;;  %v14026_v42 = vld [vmem:[#allocation33_spill] sm:$0xff] }
 0x2b7   : > { %v1909_v49 = vshrl.u32 %v14021_v25, 16  ;;  %v1807_v7 = vshll.u32 %v1798_v30, %v1805_v34  ;;  %v1808_v44 = vshrl.u32 %v1790_v3, %v1806_v23  ;;  %v1811_v37 = vadd.s32 127, %v1810_v38  ;;  %v14031_v25 = vld [vmem:[#allocation36_spill] sm:$0xff] }
 0x2b8   : > { %v14024_v54 = vmul.u32 %v14022_v15, %v14023_v33  ;;  %v2756_v16 = vadd.f32 0.041655596, %v2755_v29  ;;  %v2763_v36 = vadd.f32 0.008332121, %v2762_v6  ;;  %v1917_v32 = vsel %vm1916_vm10, 1, %v13694_v56  ;;  %v14030_v6 = vld [vmem:[#allocation39_spill] sm:$0xff] }
 0x2b9   : > { %v1932_v46 = vshll.u32 %v14025_v12, 16  ;;  %v1809_v51 = vor.u32 %v1808_v44, %v1807_v7  ;;  %v1812_v28 = vshll.u32 %v1811_v37, 23  ;;  %vm1934_vm14 = vc.u32 %v14026_v42, %v1930_v58 }
 0x2ba   : > { %v2879_v11 = vadd.s32 %v2878_v59, %v14024_v54  ;;  %v2757_v31 = vmul.f32 %v2756_v16, %v2754_v14  ;;  %v2764_v9 = vmul.f32 %v2763_v36, %v2754_v14  ;;  %v1935_v30 = vsel %vm1934_vm14, 1, %v13694_v56 }
 0x2bb   : > { %v1936_v3 = vadd.s32 %v1930_v58, %v14026_v42  ;;  %v14027_v34 = vand.u32 2147483647, %v14020_v5  ;;  %v1813_v38 = vor.u32 4788187, %v1812_v28  ;;  %v1919_v59 = vadd.s32 %v1917_v32, %v14030_v6 }
 0x2bc   : > { %v2880_v2 = vadd.s32 536870912, %v2879_v11  ;;  %v1937_v7 = vadd.s32 %v1935_v30, %v14031_v25  ;;  %v2758_v44 = vadd.f32 -0.4999988, %v2757_v31  ;;  %v2765_v37 = vadd.f32 -0.16666654, %v2764_v9 }
 0x2bd   : > { %vm11948_vm0 = vcmp.le.f32.partialorder %v14027_v34, 0.7853982  ;;  %v1931_v15 = vshrl.u32 %v14019_v10, 16  ;;  %vm1938_vm7 = vc.u32 %v1936_v3, %v1932_v46  ;;  %v1814_v33 = vand.u32 2147483647, %v1813_v38 }
 0x2be   : > { %v11952_v29 = vshrl.u32 %v2880_v2, 30  ;;  %v1816_v58 = vcvt.s32.f32 %v1809_v51  ;;  %v1939_v16 = vsel %vm1938_vm7, 1, %v13694_v56  ;;  %v2759_v36 = vmul.f32 %v2758_v44, %v2754_v14 }
 0x2bf   : > { %v2766_v42 = vmul.f32 %v2765_v37, %v2754_v14  ;;  %vm5703_vm4 = vcmp.lt.s32.totalorder %v11916_v48, 2  ;;  %vm5704_vm6 = vcmp.eq.s32.totalorder %v11916_v48, 0  ;;  %v1941_v32 = vadd.s32 %v1939_v16, %v1937_v7 }
 0x2c0   : > { %v2882_v54 = vshll.u32 %v11952_v29, 30  ;;  %vm2769_vm11 = vweird.f32 %v14003_v35  ;;  %v1817_v28 = vmul.f32 %v1816_v58, %v1814_v33  ;;  %v1821_v10 = vsel %vm1698_vm3, %v1820_v39, %v11845_v4 }
 0x2c1   : > { %v1911_v51 = vshrl.u32 %v14016_v13, 16  ;;  %v2760_v31 = vadd.f32 1.0, %v2759_v36  ;;  %v2767_v9 = vadd.f32 1.0, %v2766_v42  ;;  %v1920_v30 = vadd.s32 %v1919_v59, %v1909_v49  ;;  %v14032_v59 = vld [vmem:[#allocation37_spill] sm:$0xff] }
 0x2c2   : > { %v11965_v2 = vsub.s32 %v2879_v11, %v2882_v54  ;;  %v1933_v14 = vshrl.u32 %v14025_v12, 16  ;;  %vm3434_vm12 = vcmp.lt.s32.totalorder %v11541_v41, 2  ;;  %v1818_v34 = vxor.u32 2147483648, %v1817_v28 }
 0x2c3   : > { %v1942_v6 = vadd.s32 %v1941_v32, %v1931_v15  ;;  %v2768_v25 = vmul.f32 %v2767_v9, %v11923_v57  ;;  %vm2772_vm5 = vcmp.lt.s32.totalorder %v11925_v62, 2  ;;  %vm2773_vm10 = vcmp.eq.s32.totalorder %v11925_v62, 0 }
 0x2c4   : > { %vm2884_vm13 = vcmp.lt.s32.totalorder %v11965_v2, 0  ;;  %v2885_v38 = vsub.s32 0, %v11965_v2  ;;  %v2777_v4 = vxor.u32 2147483648, %v2760_v31  ;;  %vm2776_vm14 = vcmp.eq.s32.totalorder %v11925_v62, 2 }
 0x2c5   : > { %vm5707_vm7 = vcmp.eq.s32.totalorder %v11916_v48, 2  ;;  %v1819_v39 = vsel %vm1698_vm3, %v1818_v34, %v1817_v28  ;;  %v2774_v49 = vxor.u32 2147483648, %v2768_v25  ;;  %v1823_v57 = vsel %vm11948_vm0, 0, %v1821_v10 }
 0x2c6   : > { %v2886_v13 = vsel %vm2884_vm13, %v2885_v38, %v11965_v2  ;;  %v1822_v11 = vsel %vm11948_vm0, %v14020_v5, %v1819_v39  ;;  %v11985_v12 = vadd.s32 %v1920_v30, %v1911_v51  ;;  %vm2783_vm9 = vcmp.lt.s32.totalorder %v14032_v59, 0 }
 0x2c7   : > { %v1824_v7 = vmul.f32 %v1822_v11, %v1822_v11  ;;  %v2887_v44 = vclz %v2886_v13  ;;  %v11988_v37 = vadd.s32 %v1936_v3, %v1932_v46  ;;  %v1943_v15 = vadd.s32 %v1942_v6, %v1933_v14 }
 0x2c8   : > { %v2775_v33 = vsel %vm2773_vm10, %v2760_v31, %v2774_v49  ;;  %v2778_v58 = vsel %vm2776_vm14, %v2777_v4, %v2768_v25  ;;  %v5706_v54 = vsel %vm5704_vm6, %v2760_v31, %v2774_v49  ;;  %v5709_v16 = vsel %vm5707_vm7, %v2777_v4, %v2768_v25 }
 0x2c9   : > { %v2779_v36 = vsel %vm2772_vm5, %v2775_v33, %v2778_v58  ;;  %v5710_v23 = vsel %vm5703_vm4, %v5706_v54, %v5709_v16  ;;  %v1825_v42 = vmul.f32 -0.001358992, %v1824_v7  ;;  %v1832_v32 = vmul.f32 -0.00019511016, %v1824_v7 }
 0x2ca   : > { %v2780_v28 = vsel %vm2769_vm11, nan, %v2779_v36  ;;  %v5711_v46 = vsel %vm2769_vm11, nan, %v5710_v23  ;;  %v1840_v3 = vadd.s32 3, %v1823_v57  ;;  %v8461_v10 = vadd.s32 4294967294, %v2887_v44  ;;  %v14034_v44 = vld [vmem:[#allocation28_spill] sm:$0xff] }
 0x2cb   : > { %v6495_v51 = vsel %vm610_vm15, %v2780_v28, %v5711_v46  ;;  %v1826_v31 = vadd.f32 0.041655596, %v1825_v42  ;;  %v1833_v9 = vadd.f32 0.008332121, %v1832_v32  ;;  %vm1946_vm3 = vc.u32 %v11985_v12, %v11988_v37 }
 0x2cc   : > { %v12008_v48 = vsel %vm3434_vm12, %v11907_v52, %v11912_v55  ;;  %8545 = vmatmul.msk.f32.gmra.mxu1 %vm6509_vm1, %v6495_v51  ;;  %vm8462_vm0 = vcmp.lt.s32.totalorder %v8461_v10, 0  ;;  %v2905_v35 = vsub.s32 4, %v11952_v29  ;;  %v1947_v62 = vadd.s32 1, %v1943_v15  ;;  %v14033_v55 = vld [vmem:[#allocation20_spill] sm:$0xff] }
 0x2cd   : > { %v1827_v30 = vmul.f32 %v1826_v31, %v1824_v7  ;;  %v1834_v14 = vmul.f32 %v1833_v9, %v1824_v7  ;;  %v4778_v34 = vand.u32 3, %v1823_v57  ;;  %v2890_v38 = vsel %vm8462_vm0, 0, %v8461_v10 }
 0x2ce   : > { %v2875_v6 = vadd.s32 %v11889_v21, %v11887_v26  ;;  %v2891_v25 = vsub.s32 32, %v2890_v38  ;;  %v2895_v4 = vsub.s32 4294967266, %v2890_v38  ;;  %v1948_v39 = vsel %vm1946_vm3, %v1947_v62, %v1943_v15 }
 0x2cf   : > { %v1828_v13 = vadd.f32 -0.4999988, %v1827_v30  ;;  %v1835_v49 = vadd.f32 -0.16666654, %v1834_v14  ;;  %v1841_v52 = vand.u32 3, %v1840_v3  ;;  %v14035_v33 = vmul.u32 %v14033_v55, %v14034_v44 }
 0x2d0   : > { %v2892_v54 = vshll.u32 %v11965_v2, %v2890_v38  ;;  %v2893_v16 = vshrl.u32 %v2875_v6, %v2891_v25  ;;  %v2896_v36 = vadd.s32 127, %v2895_v4  ;;  %v2906_v57 = vsel %vm2783_vm9, %v2905_v35, %v11952_v29  ;;  %v14039_v25 = vld [vmem:[#allocation135_spill] sm:$0xff] }
 0x2d1   : > { %v1949_v58 = vadd.s32 %v1948_v39, %v14035_v33  ;;  %v1829_v23 = vmul.f32 %v1828_v13, %v1824_v7  ;;  %v1836_v26 = vmul.f32 %v1835_v49, %v1824_v7  ;;  %v14036_v21 = vand.u32 2147483647, %v14032_v59  ;;  %v14041_v39 = vld [vmem:[#allocation140_spill] sm:$0xff] }
 0x2d2   : > { %vm1839_vm6 = vweird.f32 %v14020_v5  ;;  %vm4779_vm11 = vcmp.lt.s32.totalorder %v4778_v34, 2  ;;  %vm4780_vm13 = vcmp.eq.s32.totalorder %v4778_v34, 0  ;;  %v2894_v2 = vor.u32 %v2893_v16, %v2892_v54 }
 0x2d3   : > { %vm12023_vm4 = vcmp.le.f32.partialorder %v14036_v21, 0.7853982  ;;  %v1950_v42 = vadd.s32 536870912, %v1949_v58  ;;  %v2897_v32 = vshll.u32 %v2896_v36, 23  ;;  %v1830_v28 = vadd.f32 1.0, %v1829_v23 }
 0x2d4   : > { %v1837_v46 = vadd.f32 1.0, %v1836_v26  ;;  %v2908_v29 = vsel %vm12023_vm4, 0, %v2906_v57  ;;  %vm1842_vm5 = vcmp.lt.s32.totalorder %v1841_v52, 2  ;;  %vm1843_vm10 = vcmp.eq.s32.totalorder %v1841_v52, 0 }
 0x2d5   : > { %v12030_v3 = vshrl.u32 %v1950_v42, 30  ;;  %vm4783_vm14 = vcmp.eq.s32.totalorder %v4778_v34, 2  ;;  %v2898_v7 = vor.u32 4788187, %v2897_v32  ;;  %vm1846_vm7 = vcmp.eq.s32.totalorder %v1841_v52, 2 }
 0x2d6   : > { %v1838_v10 = vmul.f32 %v1837_v46, %v1822_v11  ;;  %v1847_v51 = vxor.u32 2147483648, %v1830_v28  ;;  %v2901_v35 = vcvt.s32.f32 %v2894_v2  ;;  %v2925_v62 = vadd.s32 3, %v2908_v29  ;;  %v14045_v2 = vld [vmem:[#allocation4_spill] sm:$0xff] }
 0x2d7   : > { %v1952_v31 = vshll.u32 %v12030_v3, 30  ;;  %v2899_v9 = vand.u32 2147483647, %v2898_v7  ;;  %v1945_v30 = vadd.s32 %v11988_v37, %v11985_v12  ;;  %v12035_v38 = vand.u32 3, %v2908_v29 }
 0x2d8   : > { %v1844_v14 = vxor.u32 2147483648, %v1838_v10  ;;  %v14040_v4 = vshll.u32 %v14039_v25, 16  ;;  %v1848_v13 = vsel %vm1846_vm7, %v1847_v51, %v1838_v10  ;;  %v4785_v49 = vsel %vm4783_vm14, %v1847_v51, %v1838_v10  ;;  %v14047_v51 = vld [vmem:[#allocation142_spill] sm:$0xff] }
 0x2d9   : > { %v12037_v6 = vsub.s32 %v1949_v58, %v1952_v31  ;;  %v2902_v55 = vmul.f32 %v2901_v35, %v2899_v9  ;;  %v3015_v44 = vshll.u32 %v11243_v40, 16  ;;  %v14044_v36 = vshll.u32 %v11216_v61, 16 }
 0x2da   : > { %vm12042_vm3 = vc.u32 %v14041_v39, %v14040_v4  ;;  %v1845_v33 = vsel %vm1843_vm10, %v1830_v28, %v1844_v14  ;;  %v4782_v12 = vsel %vm4780_vm13, %v1830_v28, %v1844_v14  ;;  %v12068_v42 = vand.u32 3, %v2925_v62  ;;  %v14046_v28 = vld [vmem:[#allocation134_spill] sm:$0xff]  ;;  %v14048_v62 = vld [vmem:[#allocation137_spill] sm:$0xff] }
 0x2db   : > { %vm1954_vm0 = vcmp.lt.s32.totalorder %v12037_v6, 0  ;;  %v1955_v37 = vsub.s32 0, %v12037_v6  ;;  %v1849_v58 = vsel %vm1842_vm5, %v1845_v33, %v1848_v13  ;;  %v4786_v54 = vsel %vm4779_vm11, %v4782_v12, %v4785_v49 }
 0x2dc   : > { %v2903_v16 = vxor.u32 2147483648, %v2902_v55  ;;  %vm3001_vm14 = vc.u32 %v11538_v60, %v14044_v36  ;;  %v1850_v57 = vsel %vm1839_vm6, nan, %v1849_v58  ;;  %v4787_v23 = vsel %vm1839_vm6, nan, %v4786_v54 }
 0x2dd   : > { %v1956_v26 = vsel %vm1954_vm0, %v1955_v37, %v12037_v6  ;;  %v2072_v52 = vsel %vm12042_vm3, 1, %v13694_v56  ;;  %v6489_v34 = vsel %vm610_vm15, %v1850_v57, %v4787_v23  ;;  %vm1853_vm11 = vcmp.lt.s32.totalorder %v14045_v2, 0 }
 0x2de   : > { %v2904_v21 = vsel %vm2783_vm9, %v2903_v16, %v2902_v55  ;;  %v1957_v60 = vclz %v1956_v26  ;;  %8539 = vmatmul.msk.f32.gmra.mxu0 %vm6509_vm1, %v6489_v34  ;;  %v3002_v32 = vsel %vm3001_vm14, 1, %v13694_v56  ;;  %v2064_v46 = vshrl.u32 %v14046_v28, 16 }
 0x2df   : > { %v12075_v5 = vsel %vm12023_vm4, %v14032_v59, %v2904_v21  ;;  %v2066_v29 = vshrl.u32 %v14039_v25, 16  ;;  %vm3019_vm9 = vc.u32 %v11233_v45, %v3015_v44  ;;  %v2074_v31 = vadd.s32 %v2072_v52, %v14047_v51 }
 0x2e0   : > { %v2909_v7 = vmul.f32 %v12075_v5, %v12075_v5  ;;  %v8443_v10 = vadd.s32 4294967294, %v1957_v60  ;;  %v1975_v9 = vsub.s32 4, %v12030_v3  ;;  %v2994_v15 = vshrl.u32 %v11208_v17, 16 }
 0x2e1   : > { %v2996_v35 = vshrl.u32 %v11216_v61, 16  ;;  %v2085_v14 = vshll.u32 %v14048_v62, 16  ;;  %v3004_v11 = vadd.s32 %v3002_v32, %v11551_v50  ;;  %v3017_v49 = vshll.u32 %v11248_v1, 16 }
 0x2e2   : > { %v2910_v4 = vmul.f32 -0.001358992, %v2909_v7  ;;  %v2917_v39 = vmul.f32 -0.00019511016, %v2909_v7  ;;  %vm8444_vm4 = vcmp.lt.s32.totalorder %v8443_v10, 0  ;;  %v3020_v55 = vsel %vm3019_vm9, 1, %v13694_v56 }
 0x2e3   : > { %v1960_v13 = vsel %vm8444_vm4, 0, %v8443_v10  ;;  %v3021_v33 = vadd.s32 %v3015_v44, %v11233_v45  ;;  %v3016_v17 = vshrl.u32 %v11243_v40, 16  ;;  %v3005_v54 = vadd.s32 %v3004_v11, %v2994_v15  ;;  %v14053_v11 = vld [vmem:[#allocation136_spill] sm:$0xff] }
 0x2e4   : > { %v2911_v12 = vadd.f32 0.041655596, %v2910_v4  ;;  %v2918_v37 = vadd.f32 0.008332121, %v2917_v39  ;;  %v1961_v58 = vsub.s32 32, %v1960_v13  ;;  %v1965_v61 = vsub.s32 4294967266, %v1960_v13 }
 0x2e5   : > { %v3022_v16 = vadd.s32 %v3020_v55, %v11253_v47  ;;  %vm3023_vm6 = vc.u32 %v3021_v33, %v3017_v49  ;;  %v14049_v50 = vand.u32 2147483647, %v14045_v2  ;;  %v1962_v44 = vshll.u32 %v12037_v6, %v1960_v13  ;;  %v14052_v4 = vld [vmem:[#allocation138_spill] sm:$0xff] }
 0x2e6   : > { %v2912_v36 = vmul.f32 %v2911_v12, %v2909_v7  ;;  %v2919_v57 = vmul.f32 %v2918_v37, %v2909_v7  ;;  %v1963_v26 = vshrl.u32 %v1945_v30, %v1961_v58  ;;  %v3024_v45 = vsel %vm3023_vm6, 1, %v13694_v56  ;;  %v14054_v37 = vld [vmem:[#allocation139_spill] sm:$0xff] }
 0x2e7   : > { %vm12096_vm13 = vcmp.le.f32.partialorder %v14049_v50, 0.7853982  ;;  %v1966_v52 = vadd.s32 127, %v1965_v61  ;;  %v12102_v40 = vadd.s32 %v3005_v54, %v2996_v35  ;;  %v3026_v34 = vadd.s32 %v3024_v45, %v3022_v16 }
 0x2e8   : > { %v2913_v21 = vadd.f32 -0.4999988, %v2912_v36  ;;  %v2920_v47 = vadd.f32 -0.16666654, %v2919_v57  ;;  %vm2931_vm5 = vcmp.eq.s32.totalorder %v12068_v42, 2  ;;  %v1976_v60 = vsel %vm1853_vm11, %v1975_v9, %v12030_v3 }
 0x2e9   : > { %v12108_v32 = vadd.s32 %v3021_v33, %v3017_v49  ;;  %vm2928_vm10 = vcmp.eq.s32.totalorder %v12068_v42, 0  ;;  %vm5858_vm7 = vcmp.eq.s32.totalorder %v12035_v38, 0  ;;  %vm5861_vm3 = vcmp.eq.s32.totalorder %v12035_v38, 2 }
 0x2ea   : > { %v1964_v30 = vor.u32 %v1963_v26, %v1962_v44  ;;  %v1967_v6 = vshll.u32 %v1966_v52, 23  ;;  %v3018_v28 = vshrl.u32 %v11248_v1, 16  ;;  %v3027_v10 = vadd.s32 %v3026_v34, %v3016_v17 }
 0x2eb   : > { %v2914_v51 = vmul.f32 %v2913_v21, %v2909_v7  ;;  %v2921_v15 = vmul.f32 %v2920_v47, %v2909_v7  ;;  %vm2927_vm0 = vcmp.lt.s32.totalorder %v12068_v42, 2  ;;  %vm5857_vm14 = vcmp.lt.s32.totalorder %v12035_v38, 2 }
 0x2ec   : > { %vm3031_vm9 = vc.u32 %v12102_v40, %v12108_v32  ;;  %v2075_v3 = vadd.s32 %v2074_v31, %v2064_v46  ;;  %vm2924_vm4 = vweird.f32 %v14032_v59  ;;  %v1968_v9 = vor.u32 4788187, %v1967_v6 }
 0x2ed   : > { %v3028_v35 = vadd.s32 %v3027_v10, %v3018_v28  ;;  %v2087_v39 = vshll.u32 %v14052_v4, 16  ;;  %vm2089_vm6 = vc.u32 %v14053_v11, %v2085_v14  ;;  %v2915_v1 = vadd.f32 1.0, %v2914_v51 }
 0x2ee   : > { %v2922_v13 = vadd.f32 1.0, %v2921_v15  ;;  %v2090_v7 = vsel %vm2089_vm6, 1, %v13694_v56  ;;  %v2091_v49 = vadd.s32 %v2085_v14, %v14053_v11  ;;  %v1969_v55 = vand.u32 2147483647, %v1968_v9 }
 0x2ef   : > { %v1971_v33 = vcvt.s32.f32 %v1964_v30  ;;  %v3032_v12 = vadd.s32 1, %v3028_v35  ;;  %v2092_v58 = vadd.s32 %v2090_v7, %v14054_v37  ;;  %v2932_v31 = vxor.u32 2147483648, %v2915_v1 }
 0x2f0   : > { %v2923_v46 = vmul.f32 %v2922_v13, %v12075_v5  ;;  %v2086_v17 = vshrl.u32 %v14048_v62, 16  ;;  %vm2093_vm8 = vc.u32 %v2091_v49, %v2087_v39  ;;  %v1978_v54 = vsel %vm12096_vm13, 0, %v1976_v60 }
 0x2f1   : > { %v1972_v61 = vmul.f32 %v1971_v33, %v1969_v55  ;;  %v3033_v16 = vsel %vm3031_vm9, %v3032_v12, %v3028_v35  ;;  %v2094_v14 = vsel %vm2093_vm8, 1, %v13694_v56  ;;  %v14055_v57 = vmul.u32 %v10619_v19, %v10814_v63 }
 0x2f2   : > { %v2929_v36 = vxor.u32 2147483648, %v2923_v46  ;;  %v12137_v5 = vadd.s32 %v2075_v3, %v2066_v29  ;;  %v2088_v62 = vshrl.u32 %v14052_v4, 16  ;;  %v2933_v26 = vsel %vm2931_vm5, %v2932_v31, %v2923_v46 }
 0x2f3   : > { %v3034_v50 = vadd.s32 %v3033_v16, %v14055_v57  ;;  %v1973_v45 = vxor.u32 2147483648, %v1972_v61  ;;  %v12142_v44 = vadd.s32 %v2091_v49, %v2087_v39  ;;  %v2096_v52 = vadd.s32 %v2094_v14, %v2092_v58  ;;  %v14056_v58 = vld [vmem:[#allocation145_spill] sm:$0xff] }
 0x2f4   : > { %v2930_v34 = vsel %vm2928_vm10, %v2915_v1, %v2929_v36  ;;  %v5860_v19 = vsel %vm5858_vm7, %v2915_v1, %v2929_v36  ;;  %v5863_v63 = vsel %vm5861_vm3, %v2932_v31, %v2923_v46  ;;  %v12169_v38 = vsel %vm3434_vm12, %v11896_v18, %v11901_v24 }
 0x2f5   : > { %v3035_v25 = vadd.s32 536870912, %v3034_v50  ;;  %v2934_v29 = vsel %vm2927_vm0, %v2930_v34, %v2933_v26  ;;  %v5864_v21 = vsel %vm5857_vm14, %v5860_v19, %v5863_v63  ;;  %v1974_v47 = vsel %vm1853_vm11, %v1973_v45, %v1972_v61  ;;  %v14058_v61 = vld [vmem:[#allocation129_spill] sm:$0xff]  ;;  %v14060_v63 = vld [vmem:[#allocation156_spill] sm:$0xff] }
 0x2f6   : > { %v2097_v60 = vadd.s32 %v2096_v52, %v2086_v17  ;;  %v2935_v30 = vsel %vm2924_vm4, nan, %v2934_v29  ;;  %v5865_v6 = vsel %vm2924_vm4, nan, %v5864_v21  ;;  %v1977_v28 = vsel %vm12096_vm13, %v14045_v2, %v1974_v47  ;;  %v14057_v17 = vld [vmem:[#allocation122_spill] sm:$0xff]  ;;  %v14062_v29 = vld [vmem:[#allocation161_spill] sm:$0xff] }
 0x2f7   : > { %v12163_v10 = vshrl.u32 %v3035_v25, 30  ;;  %v6496_v42 = vsel %vm610_vm15, %v2935_v30, %v5865_v6  ;;  %v1979_v51 = vmul.f32 %v1977_v28, %v1977_v28  ;;  %v12174_v59 = vand.u32 65535, %v11142_v43 }
 0x2f8   : > { %v2098_v15 = vadd.s32 %v2097_v60, %v2088_v62  ;;  %v3453_v3 = vshrl.u32 %v12008_v48, 16  ;;  %8546 = vmatmul.msk.f32.gmra.mxu1 %vm6509_vm1, %v6496_v42  ;;  %vm2101_vm8 = vc.u32 %v12137_v5, %v12142_v44  ;;  %v1995_v24 = vadd.s32 3, %v1978_v54  ;;  %v14063_v42 = vld [vmem:[#allocation158_spill] sm:$0xff] }
 0x2f9   : > { %v3037_v23 = vshll.u32 %v12163_v10, 30  ;;  %v1980_v9 = vmul.f32 -0.001358992, %v1979_v51  ;;  %v1987_v18 = vmul.f32 -0.00019511016, %v1979_v51  ;;  %v12182_v4 = vshrl.u32 %v11142_v43, 16 }
 0x2fa   : > { %v2102_v35 = vadd.s32 1, %v2098_v15  ;;  %v3452_v39 = vand.u32 65535, %v12008_v48  ;;  %v3474_v11 = vand.u32 65535, %v12169_v38  ;;  %v3475_v13 = vshrl.u32 %v12169_v38, 16 }
 0x2fb   : > { %v12186_v1 = vsub.s32 %v3034_v50, %v3037_v23  ;;  %v1981_v7 = vadd.f32 0.041655596, %v1980_v9  ;;  %v1988_v49 = vadd.f32 0.008332121, %v1987_v18  ;;  %v12190_v33 = vmul.u32 %v3453_v3, %v12174_v59 }
 0x2fc   : > { %v2103_v55 = vsel %vm2101_vm8, %v2102_v35, %v2098_v15  ;;  %v4932_v12 = vand.u32 3, %v1978_v54  ;;  %vm2938_vm13 = vcmp.lt.s32.totalorder %v14056_v58, 0  ;;  %v1996_v31 = vand.u32 3, %v1995_v24 }
 0x2fd   : > { %vm3039_vm11 = vcmp.lt.s32.totalorder %v12186_v1, 0  ;;  %v3040_v37 = vsub.s32 0, %v12186_v1  ;;  %v1982_v48 = vmul.f32 %v1981_v7, %v1979_v51  ;;  %v1989_v46 = vmul.f32 %v1988_v49, %v1979_v51 }
 0x2fe   : > { %v14059_v16 = vmul.u32 %v14057_v17, %v14058_v61  ;;  %v12199_v36 = vmul.u32 %v3452_v39, %v12174_v59  ;;  %v12202_v57 = vmul.u32 %v3452_v39, %v12182_v4  ;;  %v12205_v54 = vmul.u32 %v3453_v3, %v12182_v4 }
 0x2ff   : > { %v3041_v50 = vsel %vm3039_vm11, %v3040_v37, %v12186_v1  ;;  %v12211_v62 = vmul.u32 %v3475_v13, %v12174_v59  ;;  %v1983_v26 = vadd.f32 -0.4999988, %v1982_v48  ;;  %v1990_v45 = vadd.f32 -0.16666654, %v1989_v46  ;;  %v14064_v48 = vld [vmem:[#allocation55_spill] sm:$0xff] }
 0x300   : > { %v2104_v14 = vadd.s32 %v2103_v55, %v14059_v16  ;;  %v3042_v52 = vclz %v3041_v50  ;;  %v3458_v34 = vshll.u32 %v12190_v33, 16  ;;  %vm4934_vm5 = vcmp.eq.s32.totalorder %v4932_v12, 0  ;;  %v14065_v50 = vld [vmem:[#allocation157_spill] sm:$0xff] }
 0x301   : > { %v14061_v25 = vshll.u32 %v14060_v63, 16  ;;  %v1984_v21 = vmul.f32 %v1983_v26, %v1979_v51  ;;  %v1991_v47 = vmul.f32 %v1990_v45, %v1979_v51  ;;  %vm1997_vm7 = vcmp.lt.s32.totalorder %v1996_v31, 2 }
 0x302   : > { %v2105_v19 = vadd.s32 536870912, %v2104_v14  ;;  %vm4933_vm3 = vcmp.lt.s32.totalorder %v4932_v12, 2  ;;  %v8464_v60 = vadd.s32 4294967294, %v3042_v52  ;;  %vm1994_vm0 = vweird.f32 %v14045_v2 }
 0x303   : > { %vm3156_vm10 = vc.u32 %v14062_v29, %v14061_v25  ;;  %vm1998_vm14 = vcmp.eq.s32.totalorder %v1996_v31, 0  ;;  %v3060_v30 = vsub.s32 4, %v12163_v10  ;;  %v3170_v15 = vshll.u32 %v14063_v42, 16 }
 0x304   : > { %v12219_v6 = vshrl.u32 %v2105_v19, 30  ;;  %v1985_v3 = vadd.f32 1.0, %v1984_v21  ;;  %v1992_v23 = vadd.f32 1.0, %v1991_v47  ;;  %vm8465_vm9 = vcmp.lt.s32.totalorder %v8464_v60, 0 }
 0x305   : > { %v3157_v9 = vsel %vm3156_vm10, 1, %v13694_v56  ;;  %vm2001_vm4 = vcmp.eq.s32.totalorder %v1996_v31, 2  ;;  %vm4937_vm6 = vcmp.eq.s32.totalorder %v4932_v12, 2  ;;  %v3045_v51 = vsel %vm8465_vm9, 0, %v8464_v60 }
 0x306   : > { %v2107_v18 = vshll.u32 %v12219_v6, 30  ;;  %v1993_v24 = vmul.f32 %v1992_v23, %v1977_v28  ;;  %v2002_v35 = vxor.u32 2147483648, %v1985_v3  ;;  %v3030_v39 = vadd.s32 %v12108_v32, %v12102_v40  ;;  %v14081_v23 = vld [vmem:[#allocation91_spill] sm:$0xff] }
 0x307   : > { %v3046_v7 = vsub.s32 32, %v3045_v51  ;;  %v3050_v49 = vsub.s32 4294967266, %v3045_v51  ;;  %v3061_v55 = vsel %vm2938_vm13, %v3060_v30, %v12163_v10  ;;  %v3159_v46 = vadd.s32 %v3157_v9, %v14064_v48 }
 0x308   : > { %v12229_v37 = vsub.s32 %v2104_v14, %v2107_v18  ;;  %v1999_v17 = vxor.u32 2147483648, %v1993_v24  ;;  %v3047_v61 = vshll.u32 %v12186_v1, %v3045_v51  ;;  %vm12234_vm8 = vc.u32 %v14065_v50, %v3170_v15  ;;  %v14071_v51 = vld [vmem:[#allocation96_spill] sm:$0xff]  ;;  %v14072_v18 = vld [vmem:[#allocation155_spill] sm:$0xff] }
 0x309   : > { %v3048_v16 = vshrl.u32 %v3030_v39, %v3046_v7  ;;  %v2003_v40 = vsel %vm2001_vm4, %v2002_v35, %v1993_v24  ;;  %v3051_v32 = vadd.s32 127, %v3050_v49  ;;  %v4939_v45 = vsel %vm4937_vm6, %v2002_v35, %v1993_v24  ;;  %v14073_v35 = vld [vmem:[#allocation159_spill] sm:$0xff] }
 0x30a   : > { %vm2109_vm11 = vcmp.lt.s32.totalorder %v12229_v37, 0  ;;  %v2110_v10 = vsub.s32 0, %v12229_v37  ;;  %v2000_v14 = vsel %vm1998_vm14, %v1985_v3, %v1999_v17  ;;  %v4936_v26 = vsel %vm4934_vm5, %v1985_v3, %v1999_v17 }
 0x30b   : > { %v3049_v1 = vor.u32 %v3048_v16, %v3047_v61  ;;  %v2004_v52 = vsel %vm1997_vm7, %v2000_v14, %v2003_v40  ;;  %v4940_v19 = vsel %vm4933_vm3, %v4936_v26, %v4939_v45  ;;  %v3052_v25 = vshll.u32 %v3051_v32, 23  ;;  %v14074_v61 = vld [vmem:[#allocation160_spill] sm:$0xff] }
 0x30c   : > { %v2111_v29 = vsel %vm2109_vm11, %v2110_v10, %v12229_v37  ;;  %v2005_v21 = vsel %vm1994_vm0, nan, %v2004_v52  ;;  %v4941_v47 = vsel %vm1994_vm0, nan, %v4940_v19  ;;  %v3175_v30 = vsel %vm12234_vm8, 1, %v13694_v56 }
 0x30d   : > { %v2112_v60 = vclz %v2111_v29  ;;  %v3460_v3 = vshll.u32 %v12202_v57, 16  ;;  %v6490_v12 = vsel %vm610_vm15, %v2005_v21, %v4941_v47  ;;  %v14068_v31 = vand.u32 2147483647, %v14056_v58 }
 0x30e   : > { %v3053_v9 = vor.u32 4788187, %v3052_v25  ;;  %vm2008_vm10 = vcmp.lt.s32.totalorder %v14071_v51, 0  ;;  %8540 = vmatmul.msk.f32.gmra.mxu0 %vm6509_vm1, %v6490_v12  ;;  %v3149_v24 = vshrl.u32 %v14072_v18, 16  ;;  %v3172_v39 = vshll.u32 %v14073_v35, 16  ;;  %v14080_v12 = vld [vmem:[#allocation93_spill] sm:$0xff] }
 0x30f   : > { %vm12259_vm5 = vcmp.le.f32.partialorder %v14068_v31, 0.7853982  ;;  %v8446_v2 = vadd.s32 4294967294, %v2112_v60  ;;  %v3176_v7 = vadd.s32 %v3170_v15, %v14065_v50  ;;  %v3056_v48 = vcvt.s32.f32 %v3049_v1 }
 0x310   : > { %v3054_v49 = vand.u32 2147483647, %v3053_v9  ;;  %v3063_v17 = vsel %vm12259_vm5, 0, %v3061_v55  ;;  %v3177_v16 = vadd.s32 %v3175_v30, %v14074_v61  ;;  %v2100_v28 = vadd.s32 %v12142_v44, %v12137_v5 }
 0x311   : > { %vm8447_vm7 = vcmp.lt.s32.totalorder %v8446_v2, 0  ;;  %v3151_v40 = vshrl.u32 %v14060_v63, 16  ;;  %v3160_v32 = vadd.s32 %v3159_v46, %v3149_v24  ;;  %v3171_v26 = vshrl.u32 %v14063_v42, 16 }
 0x312   : > { %v3057_v10 = vmul.f32 %v3056_v48, %v3054_v49  ;;  %v2115_v14 = vsel %vm8447_vm7, 0, %v8446_v2  ;;  %vm3178_vm3 = vc.u32 %v3176_v7, %v3172_v39  ;;  %v3080_v15 = vadd.s32 3, %v3063_v17 }
 0x313   : > { %v2116_v50 = vsub.s32 32, %v2115_v14  ;;  %v2120_v45 = vsub.s32 4294967266, %v2115_v14  ;;  %v3179_v1 = vsel %vm3178_vm3, 1, %v13694_v56  ;;  %vm12279_vm0 = vc.u32 %v12199_v36, %v3458_v34 }
 0x314   : > { %v3058_v5 = vxor.u32 2147483648, %v3057_v10  ;;  %v12283_v44 = vand.u32 3, %v3063_v17  ;;  %v2130_v63 = vsub.s32 4, %v12219_v6  ;;  %v3181_v46 = vadd.s32 %v3179_v1, %v3177_v16  ;;  %v14083_v16 = vld [vmem:[#allocation97_spill] sm:$0xff] }
 0x315   : > { %v14077_v42 = vand.u32 2147483647, %v14071_v51  ;;  %v2117_v19 = vshll.u32 %v12229_v37, %v2115_v14  ;;  %v2118_v25 = vshrl.u32 %v2100_v28, %v2116_v50  ;;  %v2121_v29 = vadd.s32 127, %v2120_v45  ;;  %v14087_v14 = vld [vmem:[#allocation92_spill] sm:$0xff] }
 0x316   : > { %v12293_v21 = vadd.s32 %v3160_v32, %v3151_v40  ;;  %v3059_v47 = vsel %vm2938_vm13, %v3058_v5, %v3057_v10  ;;  %v3173_v60 = vshrl.u32 %v14073_v35, 16  ;;  %v3182_v30 = vadd.s32 %v3181_v46, %v3171_v26 }
 0x317   : > { %vm12288_vm14 = vcmp.le.f32.partialorder %v14077_v42, 0.7853982  ;;  %v3325_v31 = vshll.u32 %v14080_v12, 16  ;;  %v12302_v9 = vsel %vm12259_vm5, %v14056_v58, %v3059_v47  ;;  %v2119_v2 = vor.u32 %v2118_v25, %v2117_v19  ;;  %v14089_v19 = vld [vmem:[#allocation152_spill] sm:$0xff]  ;;  %v14090_v25 = vld [vmem:[#allocation154_spill] sm:$0xff] }
 0x318   : > { %v2122_v18 = vshll.u32 %v2121_v29, 23  ;;  %v12304_v37 = vadd.s32 %v3176_v7, %v3172_v39  ;;  %v3064_v24 = vmul.f32 %v12302_v9, %v12302_v9  ;;  %v12308_v49 = vand.u32 3, %v3080_v15  ;;  %v14086_v7 = vld [vmem:[#allocation94_spill] sm:$0xff] }
 0x319   : > { %v2131_v35 = vsel %vm2008_vm10, %v2130_v63, %v12219_v6  ;;  %v3183_v48 = vadd.s32 %v3182_v30, %v3173_v60  ;;  %v14082_v61 = vshll.u32 %v14081_v23, 16  ;;  %v3327_v28 = vshll.u32 %v14086_v7, 16  ;;  %v14088_v63 = vld [vmem:[#allocation95_spill] sm:$0xff] }
 0x31a   : > { %v2123_v17 = vor.u32 4788187, %v2122_v18  ;;  %vm3186_vm13 = vc.u32 %v12293_v21, %v12304_v37  ;;  %v3065_v40 = vmul.f32 -0.001358992, %v3064_v24  ;;  %v3072_v32 = vmul.f32 -0.00019511016, %v3064_v24 }
 0x31b   : > { %vm12318_vm9 = vc.u32 %v14083_v16, %v14082_v61  ;;  %v3187_v10 = vadd.s32 1, %v3183_v48  ;;  %vm3329_vm4 = vc.u32 %v14087_v14, %v3325_v31  ;;  %v2126_v26 = vcvt.s32.f32 %v2119_v2 }
 0x31c   : > { %v2124_v6 = vand.u32 2147483647, %v2123_v17  ;;  %v3330_v15 = vsel %vm3329_vm4, 1, %v13694_v56  ;;  %v3331_v50 = vadd.s32 %v3325_v31, %v14087_v14  ;;  %v3066_v45 = vadd.f32 0.041655596, %v3065_v40 }
 0x31d   : > { %v3073_v1 = vadd.f32 0.008332121, %v3072_v32  ;;  %v3188_v5 = vsel %vm3186_vm13, %v3187_v10, %v3183_v48  ;;  %v3332_v46 = vadd.s32 %v3330_v15, %v14088_v63  ;;  %v14091_v29 = vmul.u32 %v14089_v19, %v14090_v25  ;;  %v14092_v32 = vld [vmem:[#allocation98_spill] sm:$0xff] }
 0x31e   : > { %v2127_v42 = vmul.f32 %v2126_v26, %v2124_v6  ;;  %v3312_v60 = vsel %vm12318_vm9, 1, %v13694_v56  ;;  %vm3333_vm6 = vc.u32 %v3331_v50, %v3327_v28  ;;  %v3067_v30 = vmul.f32 %v3066_v45, %v3064_v24 }
 0x31f   : > { %v3189_v47 = vadd.s32 %v3188_v5, %v14091_v29  ;;  %v3074_v2 = vmul.f32 %v3073_v1, %v3064_v24  ;;  %v12337_v31 = vsel %vm12288_vm14, 0, %v2131_v35  ;;  %v3334_v18 = vsel %vm3333_vm6, 1, %v13694_v56 }
 0x320   : > { %v12343_v48 = vsel %vm12279_vm0, 1, %v13694_v56  ;;  %v12348_v17 = vadd.s32 %v3458_v34, %v12199_v36  ;;  %v2128_v61 = vxor.u32 2147483648, %v2127_v42  ;;  %v3068_v39 = vadd.f32 -0.4999988, %v3067_v30  ;;  %v14093_v36 = vld [vmem:[#allocation88_spill] sm:$0xff] }
 0x321   : > { %v3190_v16 = vadd.s32 536870912, %v3189_v47  ;;  %v3075_v40 = vadd.f32 -0.16666654, %v3074_v2  ;;  %v3314_v10 = vadd.s32 %v3312_v60, %v14092_v32  ;;  %v3336_v35 = vadd.s32 %v3334_v18, %v3332_v46 }
 0x322   : > { %vm6012_vm8 = vcmp.eq.s32.totalorder %v12283_v44, 0  ;;  %vm6015_vm11 = vcmp.eq.s32.totalorder %v12283_v44, 2  ;;  %v2129_v55 = vsel %vm2008_vm10, %v2128_v61, %v2127_v42  ;;  %v2150_v14 = vadd.s32 3, %v12337_v31 }
 0x323   : > { %v12356_v6 = vshrl.u32 %v3190_v16, 30  ;;  %v3304_v34 = vshrl.u32 %v14093_v36, 16  ;;  %v3069_v26 = vmul.f32 %v3068_v39, %v3064_v24  ;;  %v3076_v15 = vmul.f32 %v3075_v40, %v3064_v24 }
 0x324   : > { %vm3082_vm5 = vcmp.lt.s32.totalorder %v12308_v49, 2  ;;  %vm6011_vm7 = vcmp.lt.s32.totalorder %v12283_v44, 2  ;;  %v2132_v45 = vsel %vm12288_vm14, %v14071_v51, %v2129_v55  ;;  %v3326_v1 = vshrl.u32 %v14080_v12, 16 }
 0x325   : > { %vm3079_vm10 = vweird.f32 %v14056_v58  ;;  %vm3083_vm3 = vcmp.eq.s32.totalorder %v12308_v49, 0  ;;  %vm3086_vm0 = vcmp.eq.s32.totalorder %v12308_v49, 2  ;;  %v2134_v5 = vmul.f32 %v2132_v45, %v2132_v45 }
 0x326   : > { %v3192_v63 = vshll.u32 %v12356_v6, 30  ;;  %v3070_v24 = vadd.f32 1.0, %v3069_v26  ;;  %v3077_v46 = vadd.f32 1.0, %v3076_v15  ;;  %v3315_v42 = vadd.s32 %v3314_v10, %v3304_v34 }
 0x327   : > { %v3337_v19 = vadd.s32 %v3336_v35, %v3326_v1  ;;  %v2135_v25 = vmul.f32 -0.001358992, %v2134_v5  ;;  %v2142_v29 = vmul.f32 -0.00019511016, %v2134_v5  ;;  %v12369_v60 = vand.u32 3, %v2150_v14 }
 0x328   : > { %v3193_v52 = vsub.s32 %v3189_v47, %v3192_v63  ;;  %v3078_v12 = vmul.f32 %v3077_v46, %v12302_v9  ;;  %v3087_v30 = vxor.u32 2147483648, %v3070_v24  ;;  %v3306_v2 = vshrl.u32 %v14081_v23, 16 }
 0x329   : > { %v3328_v18 = vshrl.u32 %v14086_v7, 16  ;;  %v2136_v61 = vadd.f32 0.041655596, %v2135_v25  ;;  %v2143_v16 = vadd.f32 0.008332121, %v2142_v29  ;;  %v12378_v10 = vadd.s32 %v3331_v50, %v3327_v28 }
 0x32a   : > { %vm3194_vm14 = vcmp.lt.s32.totalorder %v3193_v52, 0  ;;  %v3195_v39 = vsub.s32 0, %v3193_v52  ;;  %v3084_v40 = vxor.u32 2147483648, %v3078_v12  ;;  %v12374_v32 = vadd.s32 %v3315_v42, %v3306_v2 }
 0x32b   : > { %v3338_v35 = vadd.s32 %v3337_v19, %v3328_v18  ;;  %v3088_v9 = vsel %vm3086_vm0, %v3087_v30, %v3078_v12  ;;  %v2137_v47 = vmul.f32 %v2136_v61, %v2134_v5  ;;  %v2144_v55 = vmul.f32 %v2143_v16, %v2134_v5  ;;  %v14094_v16 = vld [vmem:[#allocation86_spill] sm:$0xff] }
 0x32c   : > { %v3196_v23 = vsel %vm3194_vm14, %v3195_v39, %v3193_v52  ;;  %v3085_v14 = vsel %vm3083_vm3, %v3070_v24, %v3084_v40  ;;  %v6014_v36 = vsel %vm6012_vm8, %v3070_v24, %v3084_v40  ;;  %v6017_v34 = vsel %vm6015_vm11, %v3087_v30, %v3078_v12  ;;  %v14095_v39 = vld [vmem:[#allocation89_spill] sm:$0xff] }
 0x32d   : > { %v3197_v26 = vclz %v3196_v23  ;;  %v3089_v7 = vsel %vm3082_vm5, %v3085_v14, %v3088_v9  ;;  %v6018_v28 = vsel %vm6011_vm7, %v6014_v36, %v6017_v34  ;;  %v2138_v50 = vadd.f32 -0.4999988, %v2137_v47 }
 0x32e   : > { %v2145_v15 = vadd.f32 -0.16666654, %v2144_v55  ;;  %v3090_v1 = vsel %vm3079_vm10, nan, %v3089_v7  ;;  %v6019_v63 = vsel %vm3079_vm10, nan, %v6018_v28  ;;  %v3342_v24 = vadd.s32 1, %v3338_v35 }
 0x32f   : > { %v8467_v46 = vadd.s32 4294967294, %v3197_v26  ;;  %v6497_v42 = vsel %vm610_vm15, %v3090_v1, %v6019_v63  ;;  %v2139_v19 = vmul.f32 %v2138_v50, %v2134_v5  ;;  %vm3341_vm13 = vc.u32 %v12374_v32, %v12378_v10 }
 0x330   : > { %v2146_v25 = vmul.f32 %v2145_v15, %v2134_v5  ;;  %8547 = vmatmul.msk.f32.gmra.mxu1 %vm6509_vm1, %v6497_v42  ;;  %vm2149_vm9 = vweird.f32 %v14071_v51  ;;  %vm2152_vm4 = vcmp.lt.s32.totalorder %v12369_v60, 2  ;;  %v5086_v44 = vand.u32 3, %v12337_v31 }
 0x331   : > { %vm8468_vm6 = vcmp.lt.s32.totalorder %v8467_v46, 0  ;;  %v2140_v58 = vadd.f32 1.0, %v2139_v19  ;;  %vm2153_vm8 = vcmp.eq.s32.totalorder %v12369_v60, 0  ;;  %v3185_v5 = vadd.s32 %v12304_v37, %v12293_v21 }
 0x332   : > { %v2147_v49 = vadd.f32 1.0, %v2146_v25  ;;  %v3200_v29 = vsel %vm8468_vm6, 0, %v8467_v46  ;;  %v3343_v2 = vsel %vm3341_vm13, %v3342_v24, %v3338_v35  ;;  %vm2156_vm11 = vcmp.eq.s32.totalorder %v12369_v60, 2  ;;  %v14099_v25 = vld [vmem:[#allocation124_spill] sm:$0xff] }
 0x333   : > { %v3201_v12 = vsub.s32 32, %v3200_v29  ;;  %v3205_v30 = vsub.s32 4294967266, %v3200_v29  ;;  %v2157_v61 = vxor.u32 2147483648, %v2140_v58  ;;  %v14096_v40 = vmul.u32 %v14094_v16, %v14095_v39 }
 0x334   : > { %v2148_v18 = vmul.f32 %v2147_v49, %v2132_v45  ;;  %vm5087_vm5 = vcmp.lt.s32.totalorder %v5086_v44, 2  ;;  %v3202_v9 = vshll.u32 %v3193_v52, %v3200_v29  ;;  %vm5088_vm7 = vcmp.eq.s32.totalorder %v5086_v44, 0 }
 0x335   : > { %v3344_v31 = vadd.s32 %v3343_v2, %v14096_v40  ;;  %v3203_v47 = vshrl.u32 %v3185_v5, %v3201_v12  ;;  %v3206_v55 = vadd.s32 127, %v3205_v30  ;;  %vm5091_vm10 = vcmp.eq.s32.totalorder %v5086_v44, 2 }
 0x336   : > { %v2154_v23 = vxor.u32 2147483648, %v2148_v18  ;;  %v2158_v21 = vsel %vm2156_vm11, %v2157_v61, %v2148_v18  ;;  %vm12414_vm3 = vc.u32 %v12348_v17, %v3460_v3  ;;  %v5093_v34 = vsel %vm5091_vm10, %v2157_v61, %v2148_v18 }
 0x337   : > { %v3345_v14 = vadd.s32 536870912, %v3344_v31  ;;  %v3204_v37 = vor.u32 %v3203_v47, %v3202_v9  ;;  %v3207_v36 = vshll.u32 %v3206_v55, 23  ;;  %v3480_v15 = vshll.u32 %v12211_v62, 16 }
 0x338   : > { %v2155_v35 = vsel %vm2153_vm8, %v2140_v58, %v2154_v23  ;;  %v5090_v52 = vsel %vm5088_vm7, %v2140_v58, %v2154_v23  ;;  %v3476_v3 = vmul.u32 %v3474_v11, %v12174_v59  ;;  %v3465_v60 = vadd.s32 %v12343_v48, %v12205_v54 }
 0x339   : > { %v12420_v26 = vshrl.u32 %v3345_v14, 30  ;;  %v2159_v7 = vsel %vm2152_vm4, %v2155_v35, %v2158_v21  ;;  %v5094_v28 = vsel %vm5087_vm5, %v5090_v52, %v5093_v34  ;;  %v3208_v50 = vor.u32 4788187, %v3207_v36 }
 0x33a   : > { %v2160_v17 = vsel %vm2149_vm9, nan, %v2159_v7  ;;  %v5095_v1 = vsel %vm2149_vm9, nan, %v5094_v28  ;;  %v3211_v42 = vcvt.s32.f32 %v3204_v37  ;;  %v3467_v59 = vsel %vm12414_vm3, 1, %v13694_v56 }
 0x33b   : > { %v3347_v63 = vshll.u32 %v12420_v26, 30  ;;  %v6491_v46 = vsel %vm610_vm15, %v2160_v17, %v5095_v1  ;;  %v3209_v24 = vand.u32 2147483647, %v3208_v50  ;;  %vm3093_vm0 = vcmp.lt.s32.totalorder %v14099_v25, 0 }
 0x33c   : > { %8541 = vmatmul.msk.f32.gmra.mxu0 %vm6509_vm1, %v6491_v46  ;;  %v3478_v51 = vmul.u32 %v3474_v11, %v12182_v4  ;;  %vm3484_vm14 = vc.u32 %v3476_v3, %v3480_v15  ;;  %v3479_v54 = vmul.u32 %v3475_v13, %v12182_v4  ;;  %v3215_v48 = vsub.s32 4, %v12356_v6 }
 0x33d   : > { %v3348_v19 = vsub.s32 %v3344_v31, %v3347_v63  ;;  %v3212_v44 = vmul.f32 %v3211_v42, %v3209_v24  ;;  %v3469_v29 = vadd.s32 %v3467_v59, %v3465_v60  ;;  %v3485_v5 = vsel %vm3484_vm14, 1, %v13694_v56 }
 0x33e   : > { %v3486_v12 = vadd.s32 %v3480_v15, %v3476_v3  ;;  %v3438_v30 = vsel %vm3436_vm2, %v11875_v27, 2102212464  ;;  %v14100_v11 = vand.u32 2147483647, %v14099_v25  ;;  %v3459_v4 = vshrl.u32 %v12190_v33, 16 }
 0x33f   : > { %vm3349_vm13 = vcmp.lt.s32.totalorder %v3348_v19, 0  ;;  %v3350_v58 = vsub.s32 0, %v3348_v19  ;;  %v3213_v49 = vxor.u32 2147483648, %v3212_v44  ;;  %v3482_v61 = vshll.u32 %v3478_v51, 16 }
 0x340   : > { %vm12456_vm9 = vcmp.le.f32.partialorder %v14100_v11, 0.7853982  ;;  %v3487_v16 = vadd.s32 %v3485_v5, %v3479_v54  ;;  %v3417_v39 = vshrl.u32 %v13690_v0, %v11546_v53  ;;  %v3216_v27 = vsel %vm3093_vm0, %v3215_v48, %v12356_v6  ;;  %v14105_v5 = vld [vmem:[#allocation62_spill] sm:$0xff] }
 0x341   : > { %v3351_v38 = vsel %vm3349_vm13, %v3350_v58, %v3348_v19  ;;  %v3214_v13 = vsel %vm3093_vm0, %v3213_v49, %v3212_v44  ;;  %v3470_v33 = vadd.s32 %v3469_v29, %v3459_v4  ;;  %vm3488_vm2 = vc.u32 %v3486_v12, %v3482_v61 }
 0x342   : > { %v3352_v18 = vclz %v3351_v38  ;;  %v3217_v40 = vsel %vm12456_vm9, %v14099_v25, %v3214_v13  ;;  %vm14103_vm4 = vcmp.lt.s32.totalorder %v11541_v41, 1  ;;  %vm14104_vm6 = vcmp.lt.s32.totalorder %v11541_v41, 3 }
 0x343   : > { %v3219_v31 = vmul.f32 %v3217_v40, %v3217_v40  ;;  %v3437_v47 = vsel %vm14103_vm4, %v3417_v39, %v11600_v22  ;;  %v3439_v0 = vsel %vm14104_vm6, %v11606_v20, %v3438_v30  ;;  %v3461_v53 = vshrl.u32 %v12202_v57, 16 }
 0x344   : > { %v8470_v9 = vadd.s32 4294967294, %v3352_v18  ;;  %v3489_v6 = vsel %vm3488_vm2, 1, %v13694_v56  ;;  %v3218_v21 = vsel %vm12456_vm9, 0, %v3216_v27  ;;  %v3340_v37 = vadd.s32 %v12378_v10, %v12374_v32 }
 0x345   : > { %v3220_v55 = vmul.f32 -0.001358992, %v3219_v31  ;;  %v3227_v23 = vmul.f32 -0.00019511016, %v3219_v31  ;;  %v3491_v14 = vadd.s32 %v3489_v6, %v3487_v16  ;;  %v3481_v22 = vshrl.u32 %v12211_v62, 16 }
 0x346   : > { %vm8471_vm8 = vcmp.lt.s32.totalorder %v8470_v9, 0  ;;  %v12484_v52 = vadd.s32 %v3470_v33, %v3461_v53  ;;  %v3440_v56 = vsel %vm3434_vm12, %v3437_v47, %v3439_v0  ;;  %v3483_v34 = vshrl.u32 %v3478_v51, 16 }
 0x347   : > { %v3355_v36 = vsel %vm8471_vm8, 0, %v8470_v9  ;;  %v3221_v45 = vadd.f32 0.041655596, %v3220_v55  ;;  %v3228_v35 = vadd.f32 0.008332121, %v3227_v23  ;;  %v3492_v7 = vadd.s32 %v3491_v14, %v3481_v22 }
 0x348   : > { %v3356_v20 = vsub.s32 32, %v3355_v36  ;;  %v3360_v57 = vsub.s32 4294967266, %v3355_v36  ;;  %v12488_v3 = vadd.s32 %v3486_v12, %v3482_v61  ;;  %v3235_v32 = vadd.s32 3, %v3218_v21 }
 0x349   : > { %v3222_v28 = vmul.f32 %v3221_v45, %v3219_v31  ;;  %v3229_v50 = vmul.f32 %v3228_v35, %v3219_v31  ;;  %v3357_v10 = vshll.u32 %v3348_v19, %v3355_v36  ;;  %v3493_v62 = vadd.s32 %v3492_v7, %v3483_v34  ;;  %v7026_v19 = vld [vmem:[%s13442_s6 + $0x18] sm:$0xff] }
 0x34a   : > { %v3358_v15 = vshrl.u32 %v3340_v37, %v3356_v20  ;;  %v3361_v17 = vadd.s32 127, %v3360_v57  ;;  %vm3496_vm11 = vc.u32 %v12484_v52, %v12488_v3  ;;  %v3494_v24 = vmul.u32 %v11142_v43, %v3440_v56  ;;  %7096 = vmatpush.msrb.mxu1 %v7026_v19 }
 0x34b   : > { %v3223_v1 = vadd.f32 -0.4999988, %v3222_v28  ;;  %v3230_v63 = vadd.f32 -0.16666654, %v3229_v50  ;;  %v3497_v46 = vadd.s32 1, %v3493_v62  ;;  %v3236_v51 = vand.u32 3, %v3235_v32 }
 0x34c   : > { %v3359_v60 = vor.u32 %v3358_v15, %v3357_v10  ;;  %v3362_v41 = vshll.u32 %v3361_v17, 23  ;;  %v6164_v49 = vand.u32 3, %v3218_v21  ;;  %vm3248_vm12 = vcmp.lt.s32.totalorder %v14105_v5, 0 }
 0x34d   : > { %v3224_v42 = vmul.f32 %v3223_v1, %v3219_v31  ;;  %v3231_v59 = vmul.f32 %v3230_v63, %v3219_v31  ;;  %v3498_v54 = vsel %vm3496_vm11, %v3497_v46, %v3493_v62  ;;  %vm3234_vm5 = vweird.f32 %v14099_v25 }
 0x34e   : > { %v3363_v44 = vor.u32 4788187, %v3362_v41  ;;  %v3499_v29 = vadd.s32 %v3498_v54, %v3494_v24  ;;  %v3366_v30 = vcvt.s32.f32 %v3359_v60  ;;  %vm3237_vm7 = vcmp.lt.s32.totalorder %v3236_v51, 2 }
 0x34f   : > { %v3225_v48 = vadd.f32 1.0, %v3224_v42  ;;  %v3232_v58 = vadd.f32 1.0, %v3231_v59  ;;  %vm3238_vm10 = vcmp.eq.s32.totalorder %v3236_v51, 0  ;;  %vm3241_vm3 = vcmp.eq.s32.totalorder %v3236_v51, 2 }
 0x350   : > { %v3364_v12 = vand.u32 2147483647, %v3363_v44  ;;  %v3500_v2 = vadd.s32 536870912, %v3499_v29  ;;  %vm6165_vm0 = vcmp.lt.s32.totalorder %v6164_v49, 2  ;;  %vm6166_vm14 = vcmp.eq.s32.totalorder %v6164_v49, 0 }
 0x351   : > { %v3233_v11 = vmul.f32 %v3232_v58, %v3217_v40  ;;  %v3242_v43 = vxor.u32 2147483648, %v3225_v48  ;;  %vm6169_vm13 = vcmp.eq.s32.totalorder %v6164_v49, 2  ;;  %v3370_v16 = vsub.s32 4, %v12420_v26  ;;  %v7025_v49 = vld [vmem:[%s13442_s6 + $0x10] sm:$0xff] }
 0x352   : > { %v3367_v38 = vmul.f32 %v3366_v30, %v3364_v12  ;;  %v12498_v13 = vshrl.u32 %v3500_v2, 30  ;;  %v14106_v47 = vand.u32 2147483647, %v14105_v5  ;;  %v12530_v12 = vld [vmem:[%s13440_s4] ss:$0 sm:$0xff]  ;;  %v6584_v30 = vpop.f32.mrf.mxu0  ;;  %7097 = vmatpush.msrb.mxu1 %v7025_v49 }
 0x353   : > { %v3239_v4 = vxor.u32 2147483648, %v3233_v11  ;;  %v3243_v18 = vsel %vm3241_vm3, %v3242_v43, %v3233_v11  ;;  %v6171_v40 = vsel %vm6169_vm13, %v3242_v43, %v3233_v11  ;;  %v3371_v37 = vsel %vm3248_vm12, %v3370_v16, %v12420_v26 }
 0x354   : > { %v3368_v61 = vxor.u32 2147483648, %v3367_v38  ;;  %v3502_v31 = vshll.u32 %v12498_v13, 30  ;;  %vm3247_vm9 = vcmp.le.f32.partialorder %v14106_v47, 0.7853982  ;;  %v3495_v26 = vadd.s32 %v12488_v3, %v12484_v52 }
 0x355   : > { %v3240_v39 = vsel %vm3238_vm10, %v3225_v48, %v3239_v4  ;;  %v6168_v27 = vsel %vm6166_vm14, %v3225_v48, %v3239_v4  ;;  %v3373_v25 = vsel %vm3247_vm9, 0, %v3371_v37  ;;  %vm3389_vm10 = vweird.f32 %v14105_v5 }
 0x356   : > { %v3244_v9 = vsel %vm3237_vm7, %v3240_v39, %v3243_v18  ;;  %v6172_v33 = vsel %vm6165_vm0, %v6168_v27, %v6171_v40  ;;  %v3369_v0 = vsel %vm3248_vm12, %v3368_v61, %v3367_v38  ;;  %v3503_v23 = vsub.s32 %v3499_v29, %v3502_v31  ;;  %v7024_v29 = vld [vmem:[%s13442_s6 + $0x8] sm:$0xff] }
 0x357   : > { %v3245_v53 = vsel %vm3234_vm5, nan, %v3244_v9  ;;  %v6173_v6 = vsel %vm3234_vm5, nan, %v6172_v33  ;;  %v3372_v55 = vsel %vm3247_vm9, %v14105_v5, %v3369_v0  ;;  %v3390_v50 = vadd.s32 3, %v3373_v25  ;;  %7098 = vmatpush.msrb.mxu1 %v7024_v29  ;;  %v14107_v0 = vld [vmem:[#allocation153_spill] sm:$0xff] }
 0x358   : > { %v6498_v14 = vsel %vm610_vm15, %v3245_v53, %v6173_v6  ;;  %v3374_v21 = vmul.f32 %v3372_v55, %v3372_v55  ;;  %vm3504_vm2 = vcmp.lt.s32.totalorder %v3503_v23, 0  ;;  %v3505_v36 = vsub.s32 0, %v3503_v23 }
 0x359   : > { %8548 = vmatmul.msk.f32.gmra.mxu1 %vm6509_vm1, %v6498_v14  ;;  %v3391_v63 = vand.u32 3, %v3390_v50  ;;  %v6318_v60 = vand.u32 3, %v3373_v25  ;;  %v12535_v16 = vadd.f32 %v12530_v12, %v6584_v30  ;;  %v3525_v47 = vsub.s32 4, %v12498_v13 }
 0x35a   : > { %v3375_v22 = vmul.f32 -0.001358992, %v3374_v21  ;;  %v3382_v45 = vmul.f32 -0.00019511016, %v3374_v21  ;;  %v3506_v35 = vsel %vm3504_vm2, %v3505_v36, %v3503_v23  ;;  %vm3403_vm3 = vcmp.lt.s32.totalorder %v14107_v0, 0  ;;  %v6587_v6 = vpop.f32.mrf.mxu0 }
 0x35b   : > { %v3507_v57 = vclz %v3506_v35  ;;  %vm6319_vm6 = vcmp.lt.s32.totalorder %v6318_v60, 2  ;;  %vm6320_vm8 = vcmp.eq.s32.totalorder %v6318_v60, 0  ;;  %vm6323_vm11 = vcmp.eq.s32.totalorder %v6318_v60, 2 }
 0x35c   : > { %v3376_v20 = vadd.f32 0.041655596, %v3375_v22  ;;  %v3383_v56 = vadd.f32 0.008332121, %v3382_v45  ;;  %vm3392_vm12 = vcmp.lt.s32.totalorder %v3391_v63, 2  ;;  %vm3393_vm5 = vcmp.eq.s32.totalorder %v3391_v63, 0 }
 0x35d   : > { %v8473_v28 = vadd.s32 4294967294, %v3507_v57  ;;  %vm3396_vm7 = vcmp.eq.s32.totalorder %v3391_v63, 2  ;;  %v8551_v9 = vmul.f32 -1.442695, %v12535_v16  ;;  %v14108_v53 = vand.u32 2147483647, %v14107_v0 }
 0x35e   : > { %v3377_v34 = vmul.f32 %v3376_v20, %v3374_v21  ;;  %v3384_v7 = vmul.f32 %v3383_v56, %v3374_v21  ;;  %v12554_v14 = vadd.f32 %v12530_v12, %v6587_v6  ;;  %vm3544_vm14 = vweird.f32 %v14107_v0 }
 0x35f   : > { %vm8474_vm4 = vcmp.lt.s32.totalorder %v8473_v28, 0  ;;  %8679 = vpow2.f32 %v8551_v9  ;;  %vm3402_vm0 = vcmp.le.f32.partialorder %v14108_v53, 0.7853982 }
 0x360   : > { %v3378_v15 = vadd.f32 -0.4999988, %v3377_v34  ;;  %v3385_v32 = vadd.f32 -0.16666654, %v3384_v7  ;;  %v3510_v10 = vsel %vm8474_vm4, 0, %v8473_v28 }
 0x361   : > { %v3511_v1 = vsub.s32 32, %v3510_v10  ;;  %v3515_v41 = vsub.s32 4294967266, %v3510_v10  ;;  %v3512_v42 = vshll.u32 %v3503_v23, %v3510_v10  ;;  %v8552_v36 = vmul.f32 -1.442695, %v12554_v14 }
 0x362   : > { %v3379_v17 = vmul.f32 %v3378_v15, %v3374_v21  ;;  %v3386_v62 = vmul.f32 %v3385_v32, %v3374_v21  ;;  %v3526_v21 = vsel %vm3403_vm3, %v3525_v47, %v12498_v13  ;;  %v6590_v50 = vpop.f32.mrf.mxu0 }
 0x363   : > { %v3513_v59 = vshrl.u32 %v3495_v26, %v3511_v1  ;;  %v3516_v51 = vadd.s32 127, %v3515_v41  ;;  %v3528_v25 = vsel %vm3402_vm0, 0, %v3526_v21  ;;  %8681 = vpow2.f32 %v8552_v36 }
 0x364   : > { %v3380_v46 = vadd.f32 1.0, %v3379_v17  ;;  %v3387_v24 = vadd.f32 1.0, %v3386_v62  ;;  %v3545_v28 = vadd.s32 3, %v3528_v25  ;;  %v12562_v13 = vadd.f32 %v12530_v12, %v6590_v50 }
 0x365   : > { %v3514_v54 = vor.u32 %v3513_v59, %v3512_v42  ;;  %v3517_v48 = vshll.u32 %v3516_v51, 23  ;;  %v8680_v22 = vpop.eup %8679  ;;  %v6472_v17 = vand.u32 3, %v3528_v25 }
 0x366   : > { %v3388_v44 = vmul.f32 %v3387_v24, %v3372_v55  ;;  %v3397_v19 = vxor.u32 2147483648, %v3380_v46  ;;  %v7023_v55 = vld [vmem:[%s13442_s6] sm:$0xff]  ;;  %v12558_v20 = vadd.f32 1.0, %v8680_v22  ;;  %v8553_v62 = vmul.f32 -1.442695, %v12562_v13 }
 0x367   : > { %v3518_v3 = vor.u32 4788187, %v3517_v48  ;;  %v3521_v38 = vcvt.s32.f32 %v3514_v54  ;;  %7099 = vmatpush.msrb.mxu1 %v7023_v55  ;;  %v3546_v63 = vand.u32 3, %v3545_v28  ;;  %vm6473_vm13 = vcmp.lt.s32.totalorder %v6472_v17, 2  ;;  %v8909_v55 = vld [vmem:[%s9035_s2] sm:$0xff] }
 0x368   : > { %v3394_v58 = vxor.u32 2147483648, %v3388_v44  ;;  %v3398_v52 = vsel %vm3396_vm7, %v3397_v19, %v3388_v44  ;;  %v6325_v2 = vsel %vm6323_vm11, %v3397_v19, %v3388_v44  ;;  %8683 = vrcp.f32 %v12558_v20 }
 0x369   : > { %v3519_v61 = vand.u32 2147483647, %v3518_v3  ;;  %v8682_v10 = vpop.eup %8681  ;;  %8685 = vpow2.f32 %v8553_v62  ;;  %vm6474_vm9 = vcmp.eq.s32.totalorder %v6472_v17, 0  ;;  %vm6477_vm2 = vcmp.eq.s32.totalorder %v6472_v17, 2 }
 0x36a   : > { %v3395_v11 = vsel %vm3393_vm5, %v3380_v46, %v3394_v58  ;;  %v6322_v43 = vsel %vm6320_vm8, %v3380_v46, %v3394_v58  ;;  %v12565_v60 = vadd.f32 1.0, %v8682_v10  ;;  %vm3547_vm4 = vcmp.lt.s32.totalorder %v3546_v63, 2  ;;  %v6593_v19 = vpop.f32.mrf.mxu0 }
 0x36b   : > { %v3399_v4 = vsel %vm3392_vm12, %v3395_v11, %v3398_v52  ;;  %v6326_v18 = vsel %vm6319_vm6, %v6322_v43, %v6325_v2  ;;  %v3522_v31 = vmul.f32 %v3521_v38, %v3519_v61  ;;  %vm3548_vm6 = vcmp.eq.s32.totalorder %v3546_v63, 0  ;;  %v7022_v43 = vld [vmem:[%s13441_s5 + $0x8] sm:$0xff]  ;;  %v7021_v2 = vld [vmem:[%s13441_s5] sm:$0xff] }
 0x36c   : > { %v3400_v39 = vsel %vm3389_vm10, nan, %v3399_v4  ;;  %v6327_v27 = vsel %vm3389_vm10, nan, %v6326_v18  ;;  %8687 = vrcp.f32 %v12565_v60  ;;  %vm3551_vm8 = vcmp.eq.s32.totalorder %v3546_v63, 2  ;;  %7211 = vmatpush.msra.mxu2 %v7022_v43  ;;  %8652 = vmatpush.msra.mxu3 %v7022_v43 }
 0x36d   : > { %v6499_v40 = vsel %vm610_vm15, %v3400_v39, %v6327_v27  ;;  %v3523_v33 = vxor.u32 2147483648, %v3522_v31  ;;  %vm6722_vm11 = vweird.f32 %v12558_v20  ;;  %v12572_v54 = vadd.f32 %v12530_v12, %v6593_v19 }
 0x36e   : > { %8549 = vmatmul.msk.f32.gmra.mxu1 %vm6509_vm1, %v6499_v40  ;;  %v8684_v41 = vpop.eup %8683  ;;  %v6726_v52 = vand.u32 2147483647, %v12558_v20  ;;  %v6728_v30 = vand.u32 2147483648, %v12558_v20  ;;  %vm7158_vm7 = vcmask 130048   ;;  %7212 = vmatpush.msra.mxu2 %v7021_v2 }
 0x36f   : > { %v3524_v5 = vsel %vm3403_vm3, %v3523_v33, %v3522_v31  ;;  %v6718_v42 = vmul.f32 %v8684_v41, %v12558_v20  ;;  %vm6723_vm12 = vweird.f32 %v8684_v41  ;;  %v8686_v3 = vpop.eup %8685  ;;  %v8554_v11 = vmul.f32 -1.442695, %v12572_v54  ;;  %8653 = vmatpush.msra.mxu3 %v7021_v2  ;;  %8589 = vmatmul.msk.f32.vlgmr.msra.gmra.mxu2 %vm7158_vm7, %v8909_v55  ;;  %v8915_v31 = vld [vmem:[%s9035_s2 + $0x18] sm:$0xff] }
 0x370   : > { %v3527_v23 = vsel %vm3402_vm0, %v14107_v0, %v3524_v5  ;;  %v12585_v61 = vadd.f32 1.0, %v8686_v3  ;;  %vm12592_vm5 = vmor %vm6722_vm11, %vm6723_vm12  ;;  %v6729_v6 = vor.u32 1.1754944e-38, %v6728_v30  ;;  %vm6727_vm10 = vcmp.eq.f32.partialorder %v6726_v52, 8.507059e+37  ;;  %v8914_v52 = vld [vmem:[%s9035_s2 + $0x60] sm:$0xff] }
 0x371   : > { %v3529_v37 = vmul.f32 %v3527_v23, %v3527_v23  ;;  %v6719_v44 = vsub.f32 1.0, %v6718_v42  ;;  %8689 = vpow2.f32 %v8554_v11  ;;  %vm6737_vm3 = vweird.f32 %v12565_v60 }
 0x372   : > { %v8688_v39 = vpop.eup %8687  ;;  %8691 = vrcp.f32 %v12585_v61  ;;  %v6596_v21 = vpop.f32.mrf.mxu0  ;;  %v6758_v63 = vand.u32 2147483648, %v12585_v61  ;;  %v6756_v42 = vand.u32 2147483647, %v12585_v61 }
 0x373   : > { %v3530_v45 = vmul.f32 -0.001358992, %v3529_v37  ;;  %v3537_v35 = vmul.f32 -0.00019511016, %v3529_v37  ;;  %v6720_v58 = vmul.f32 %v8684_v41, %v6719_v44  ;;  %v6733_v53 = vmul.f32 %v8688_v39, %v12565_v60 }
 0x374   : > { %v12612_v36 = vadd.f32 %v12530_v12, %v6596_v21  ;;  %v6759_v19 = vor.u32 1.1754944e-38, %v6758_v63 }
 0x375   : > { %v3531_v56 = vadd.f32 0.041655596, %v3530_v45  ;;  %v3538_v57 = vadd.f32 0.008332121, %v3537_v35  ;;  %v6721_v18 = vadd.f32 %v8684_v41, %v6720_v58  ;;  %v6734_v0 = vsub.f32 1.0, %v6733_v53  ;;  %v8913_v58 = vld [vmem:[%s9035_s2 + $0x10] sm:$0xff] }
 0x376   : > { %v6743_v45 = vand.u32 2147483648, %v12565_v60  ;;  %v8555_v35 = vmul.f32 -1.442695, %v12612_v36 }
 0x377   : > { %v3532_v34 = vmul.f32 %v3531_v56, %v3529_v37  ;;  %v3539_v7 = vmul.f32 %v3538_v57, %v3529_v37  ;;  %v6725_v47 = vsel %vm12592_vm5, %v8684_v41, %v6721_v18  ;;  %v6735_v8 = vmul.f32 %v8688_v39, %v6734_v0  ;;  %v8690_v22 = vpop.eup %8689 }
 0x378   : > { %v6741_v56 = vand.u32 2147483647, %v12565_v60  ;;  %v12619_v57 = vadd.f32 1.0, %v8690_v22  ;;  %8693 = vpow2.f32 %v8555_v35  ;;  %v6744_v50 = vor.u32 1.1754944e-38, %v6743_v45 }
 0x379   : > { %v3533_v15 = vadd.f32 -0.4999988, %v3532_v34  ;;  %v3540_v32 = vadd.f32 -0.16666654, %v3539_v7  ;;  %v6736_v20 = vadd.f32 %v8688_v39, %v6735_v8  ;;  %v8692_v34 = vpop.eup %8691 }
 0x37a   : > { %v6748_v28 = vmul.f32 %v8692_v34, %v12585_v61  ;;  %8695 = vrcp.f32 %v12619_v57  ;;  %v6599_v10 = vpop.f32.mrf.mxu0  ;;  %v6773_v11 = vand.u32 2147483648, %v12619_v57 }
 0x37b   : > { %v3534_v26 = vmul.f32 %v3533_v15, %v3529_v37  ;;  %v3541_v1 = vmul.f32 %v3540_v32, %v3529_v37  ;;  %v6730_v37 = vsel %vm6727_vm10, %v6729_v6, %v6725_v47  ;;  %v8911_v15 = vld [vmem:[%s9035_s2 + $0x8] sm:$0xff]  ;;  %v8912_v32 = vld [vmem:[%s9035_s2 + $0x58] sm:$0xff]  ;;  %v12629_v62 = vadd.f32 %v12530_v12, %v6599_v10 }
 0x37c   : > { %v7002_v25 = vmul.f32 %v6730_v37, %v12535_v16  ;;  %8590 = vmatmul.msk.f32.gmra.mxu2 %vm7158_vm7, %v8911_v15  ;;  %v6749_v16 = vsub.f32 1.0, %v6748_v28 }
 0x37d   : > { %v3535_v46 = vadd.f32 1.0, %v3534_v26  ;;  %v3542_v24 = vadd.f32 1.0, %v3541_v1  ;;  %v8556_v60 = vmul.f32 -1.442695, %v12629_v62 }
 0x37e   : > { %v6750_v26 = vmul.f32 %v8692_v34, %v6749_v16  ;;  %v8694_v1 = vpop.eup %8693 }
 0x37f   : > { %v3543_v59 = vmul.f32 %v3542_v24, %v3527_v23  ;;  %v3552_v51 = vxor.u32 2147483648, %v3535_v46  ;;  %v8910_v23 = vld [vmem:[%s9035_s2 + $0x50] sm:$0xff]  ;;  %8697 = vpow2.f32 %v8556_v60  ;;  %v8919_v60 = vld [vmem:[%s9035_s2 + $0x28] sm:$0xff] }
 0x380   : > { %8599 = vmatmul.msk.f32.vlgmr.msra.gmra.mxu3 %vm7158_vm7, %v8910_v23  ;;  %v8696_v41 = vpop.eup %8695  ;;  %v6751_v24 = vadd.f32 %v8692_v34, %v6750_v26 }
 0x381   : > { %v3549_v48 = vxor.u32 2147483648, %v3543_v59  ;;  %v3553_v49 = vsel %vm3551_vm8, %v3552_v51, %v3543_v59  ;;  %v6479_v29 = vsel %vm6477_vm2, %v3552_v51, %v3543_v59  ;;  %v12636_v59 = vadd.f32 1.0, %v8694_v1 }
 0x382   : > { %v6763_v51 = vmul.f32 %v8696_v41, %v12619_v57  ;;  %vm6767_vm8 = vweird.f32 %v12619_v57 }
 0x383   : > { %v3550_v38 = vsel %vm3548_vm6, %v3535_v46, %v3549_v48  ;;  %v6476_v4 = vsel %vm6474_vm9, %v3535_v46, %v3549_v48  ;;  %vm6752_vm9 = vweird.f32 %v12585_v61  ;;  %8699 = vrcp.f32 %v12636_v59 }
 0x384   : > { %v3554_v27 = vsel %vm3547_vm4, %v3550_v38, %v3553_v49  ;;  %v6480_v40 = vsel %vm6473_vm13, %v6476_v4, %v6479_v29  ;;  %vm6753_vm13 = vweird.f32 %v8692_v34  ;;  %v6764_v48 = vsub.f32 1.0, %v6763_v51  ;;  %8591 = vmatmul.msk.f32.gmra.mxu2 %vm7158_vm7, %v8913_v58 }
 0x385   : > { %v3555_v9 = vsel %vm3544_vm14, nan, %v3554_v27  ;;  %v6481_v33 = vsel %vm3544_vm14, nan, %v6480_v40  ;;  %vm6742_vm14 = vcmp.eq.f32.partialorder %v6741_v56, 8.507059e+37  ;;  %vm6754_vm2 = vmor %vm6752_vm9, %vm6753_vm13  ;;  %vm6757_vm4 = vcmp.eq.f32.partialorder %v6756_v42, 8.507059e+37  ;;  %v8698_v29 = vpop.eup %8697  ;;  %v8918_v56 = vld [vmem:[%s9035_s2 + $0x70] sm:$0xff] }
 0x386   : > { %v6500_v5 = vsel %vm610_vm15, %v3555_v9, %v6481_v33  ;;  %vm6738_vm15 = vweird.f32 %v8688_v39  ;;  %v6755_v44 = vsel %vm6754_vm2, %v8692_v34, %v6751_v24  ;;  %v6765_v49 = vmul.f32 %v8696_v41, %v6764_v48  ;;  %v8916_v9 = vld [vmem:[%s9035_s2 + $0x68] sm:$0xff] }
 0x387   : > { %8550 = vmatmul.msk.f32.gmra.mxu1 %vm6509_vm1, %v6500_v5  ;;  %vm6739_vm0 = vmor %vm6737_vm3, %vm6738_vm15  ;;  %v6760_v3 = vsel %vm6757_vm4, %v6759_v19, %v6755_v44  ;;  %vm6768_vm6 = vweird.f32 %v8696_v41  ;;  %v6771_v38 = vand.u32 2147483647, %v12619_v57  ;;  %v12649_v4 = vadd.f32 1.0, %v8698_v29  ;;  %v6614_v5 = vpop.f32.mrf.mxu1  ;;  %v8922_v29 = vld [vmem:[%s9035_s2 + $0x80] sm:$0xff] }
 0x388   : > { %v6740_v7 = vsel %vm6739_vm0, %v8688_v39, %v6736_v20  ;;  %8600 = vmatmul.msk.f32.gmra.mxu3 %vm7158_vm7, %v8912_v32  ;;  %v6766_v30 = vadd.f32 %v8696_v41, %v6765_v49  ;;  %v7004_v2 = vmul.f32 %v6760_v3, %v12562_v13  ;;  %vm6769_vm11 = vmor %vm6767_vm8, %vm6768_vm6  ;;  %v6774_v27 = vor.u32 1.1754944e-38, %v6773_v11  ;;  %v8917_v20 = vld [vmem:[%s9035_s2 + $0x20] sm:$0xff]  ;;  %v8921_v49 = vld [vmem:[%s9035_s2 + $0x30] sm:$0xff] }
 0x389   : > { %v6745_v17 = vsel %vm6742_vm14, %v6744_v50, %v6740_v7  ;;  %v8700_v43 = vpop.eup %8699  ;;  %8701 = vrcp.f32 %v12649_v4  ;;  %vm6772_vm12 = vcmp.eq.f32.partialorder %v6771_v38, 8.507059e+37  ;;  %vm6782_vm10 = vweird.f32 %v12636_v59 }
 0x38a   : > { %v7003_v46 = vmul.f32 %v6745_v17, %v12554_v14  ;;  %v6602_v14 = vpop.f32.mrf.mxu0  ;;  %v6778_v61 = vmul.f32 %v8700_v43, %v12636_v59  ;;  %v6770_v39 = vsel %vm6769_vm11, %v8696_v41, %v6766_v30  ;;  %vm6783_vm5 = vweird.f32 %v8700_v43  ;;  %v8920_v41 = vld [vmem:[%s9035_s2 + $0x78] sm:$0xff] }
 0x38b   : > { %v12652_v18 = vadd.f32 %v12530_v12, %v6602_v14  ;;  %v6775_v33 = vsel %vm6772_vm12, %v6774_v27, %v6770_v39  ;;  %v6788_v55 = vand.u32 2147483648, %v12636_v59  ;;  %v6786_v21 = vand.u32 2147483647, %v12636_v59  ;;  %vm6784_vm15 = vmor %vm6782_vm10, %vm6783_vm5 }
 0x38c   : > { %v6779_v40 = vsub.f32 1.0, %v6778_v61  ;;  %8592 = vmatmul.msk.f32.gmra.mxu2 %vm7158_vm7, %v8915_v31  ;;  %v7005_v0 = vmul.f32 %v6775_v33, %v12572_v54  ;;  %v6803_v15 = vand.u32 2147483648, %v12649_v4  ;;  %vm6797_vm14 = vweird.f32 %v12649_v4 }
 0x38d   : > { %v8557_v13 = vmul.f32 -1.442695, %v12652_v18  ;;  %v6789_v45 = vor.u32 1.1754944e-38, %v6788_v55  ;;  %vm6787_vm3 = vcmp.eq.f32.partialorder %v6786_v21, 8.507059e+37  ;;  %v6801_v10 = vand.u32 2147483647, %v12649_v4 }
 0x38e   : > { %v6780_v47 = vmul.f32 %v8700_v43, %v6779_v40  ;;  %v6804_v63 = vor.u32 1.1754944e-38, %v6803_v15  ;;  %v8923_v55 = vld [vmem:[%s9035_s2 + $0x38] sm:$0xff] }
 0x38f   : > { %8570 = vmatmul.msk.f32.vlgmr.msrb.gmra.mxu1 %vm6509_vm1, %v7002_v25  ;;  %v8702_v23 = vpop.eup %8701  ;;  %8703 = vpow2.f32 %v8557_v13  ;;  %v6617_v26 = vpop.f32.mrf.mxu1  ;;  %vm6802_vm9 = vcmp.eq.f32.partialorder %v6801_v10, 8.507059e+37  ;;  %v8925_v10 = vld [vmem:[%s9035_s2 + $0x40] sm:$0xff] }
 0x390   : > { %8601 = vmatmul.msk.f32.gmra.mxu3 %vm7158_vm7, %v8914_v52  ;;  %v6781_v6 = vadd.f32 %v8700_v43, %v6780_v47  ;;  %v6793_v8 = vmul.f32 %v8702_v23, %v12649_v4  ;;  %vm6798_vm0 = vweird.f32 %v8702_v23 }
 0x391   : > { %vm6799_vm13 = vmor %vm6797_vm14, %vm6798_vm0 }
 0x392   : > { %v6605_v53 = vpop.f32.mrf.mxu0  ;;  %v6785_v22 = vsel %vm6784_vm15, %v8700_v43, %v6781_v6  ;;  %v6794_v35 = vsub.f32 1.0, %v6793_v8  ;;  %v12702_v43 = vadd.f32 %v12530_v12, %v6617_v26 }
 0x393   : > { %v12667_v37 = vadd.f32 %v12530_v12, %v6605_v53  ;;  %v6790_v54 = vsel %vm6787_vm3, %v6789_v45, %v6785_v22 }
 0x394   : > { %8593 = vmatmul.msk.f32.gmra.mxu2 %vm7158_vm7, %v8917_v20  ;;  %v6795_v57 = vmul.f32 %v8702_v23, %v6794_v35  ;;  %v7006_v16 = vmul.f32 %v6790_v54, %v12612_v36  ;;  %v12689_v36 = vadd.f32 %v12530_v12, %v6614_v5  ;;  %v8562_v40 = vmul.f32 -1.442695, %v12702_v43 }
 0x395   : > { %v8558_v25 = vmul.f32 -1.442695, %v12667_v37  ;;  %v8704_v7 = vpop.eup %8703 }
 0x396   : > { %v6796_v50 = vadd.f32 %v8702_v23, %v6795_v57  ;;  %v6704_v32 = vadd.f32 1.0, %v8704_v7  ;;  %v8561_v51 = vmul.f32 -1.442695, %v12689_v36 }
 0x397   : > { %8571 = vmatmul.msk.f32.gmra.mxu1 %vm6509_vm1, %v7003_v46  ;;  %8705 = vpow2.f32 %v8558_v25  ;;  %v6620_v14 = vpop.f32.mrf.mxu1 }
 0x398   : > { %8602 = vmatmul.msk.f32.gmra.mxu3 %vm7158_vm7, %v8916_v9  ;;  %8707 = vrcp.f32 %v6704_v32  ;;  %v6800_v1 = vsel %vm6799_vm13, %v8702_v23, %v6796_v50  ;;  %v6818_v3 = vand.u32 2147483648, %v6704_v32  ;;  %v6816_v11 = vand.u32 2147483647, %v6704_v32  ;;  %v8924_v23 = vld [vmem:[%s9035_s2 + $0x88] sm:$0xff] }
 0x399   : > { %v6805_v24 = vsel %vm6802_vm9, %v6804_v63, %v6800_v1  ;;  %vm6812_vm4 = vweird.f32 %v6704_v32 }
 0x39a   : > { %v6608_v34 = vpop.f32.mrf.mxu0  ;;  %v7007_v44 = vmul.f32 %v6805_v24, %v12629_v62  ;;  %v6819_v4 = vor.u32 1.1754944e-38, %v6818_v3  ;;  %vm6817_vm8 = vcmp.eq.f32.partialorder %v6816_v11, 8.507059e+37 }
 0x39b   : > { %v12677_v28 = vadd.f32 %v12530_v12, %v6608_v34 }
 0x39c   : > { %8594 = vmatmul.msk.f32.gmra.mxu2 %vm7158_vm7, %v8919_v60 }
 0x39d   : > { %v8559_v17 = vmul.f32 -1.442695, %v12677_v28  ;;  %v8706_v46 = vpop.eup %8705 }
 0x39e   : > { %v6705_v42 = vadd.f32 1.0, %v8706_v46  ;;  %v8708_v59 = vpop.eup %8707 }
 0x39f   : > { %8572 = vmatmul.msk.f32.gmra.mxu1 %vm6509_vm1, %v7004_v2  ;;  %8709 = vpow2.f32 %v8559_v17  ;;  %v6808_v19 = vmul.f32 %v8708_v59, %v6704_v32  ;;  %vm6813_vm2 = vweird.f32 %v8708_v59  ;;  %v6623_v22 = vpop.f32.mrf.mxu1  ;;  %v8926_v17 = vld [vmem:[%s9035_s2 + $0x90] sm:$0xff] }
 0x3a0   : > { %8603 = vmatmul.msk.f32.gmra.mxu3 %vm7158_vm7, %v8918_v56  ;;  %8711 = vrcp.f32 %v6705_v42  ;;  %vm6814_vm6 = vmor %vm6812_vm4, %vm6813_vm2  ;;  %v6831_v9 = vand.u32 2147483647, %v6705_v42  ;;  %v6833_v13 = vand.u32 2147483648, %v6705_v42  ;;  %vm6827_vm12 = vweird.f32 %v6705_v42 }
 0x3a1   : > { %v6809_v58 = vsub.f32 1.0, %v6808_v19  ;;  %8713 = vpow2.f32 %v8561_v51  ;;  %v12735_v63 = vadd.f32 %v12530_v12, %v6623_v22 }
 0x3a2   : > { %v6834_v45 = vor.u32 1.1754944e-38, %v6833_v13  ;;  %vm6832_vm10 = vcmp.eq.f32.partialorder %v6831_v9, 8.507059e+37 }
 0x3a3   : > { %v6810_v30 = vmul.f32 %v8708_v59, %v6809_v58 }
 0x3a4   : > { %8595 = vmatmul.msk.f32.gmra.mxu2 %vm7158_vm7, %v8921_v49 }
 0x3a5   : > { %v8710_v48 = vpop.eup %8709  ;;  %v6811_v2 = vadd.f32 %v8708_v59, %v6810_v30 }
 0x3a6   : > { %v12694_v52 = vadd.f32 1.0, %v8710_v48  ;;  %v8712_v62 = vpop.eup %8711 }
 0x3a7   : > { %8573 = vmatmul.msk.f32.gmra.mxu1 %vm6509_vm1, %v7005_v0  ;;  %v6823_v38 = vmul.f32 %v8712_v62, %v6705_v42  ;;  %v6815_v39 = vsel %vm6814_vm6, %v8708_v59, %v6811_v2  ;;  %v8714_v33 = vpop.eup %8713  ;;  %vm6828_vm11 = vweird.f32 %v8712_v62  ;;  %v8564_v59 = vmul.f32 -1.442695, %v12735_v63 }
 0x3a8   : > { %8604 = vmatmul.msk.f32.gmra.mxu3 %vm7158_vm7, %v8920_v41  ;;  %8715 = vrcp.f32 %v12694_v52  ;;  %v6820_v31 = vsel %vm6817_vm8, %v6819_v4, %v6815_v39  ;;  %v12716_v8 = vadd.f32 1.0, %v8714_v33  ;;  %vm6829_vm5 = vmor %vm6827_vm12, %vm6828_vm11  ;;  %v6846_v54 = vand.u32 2147483647, %v12694_v52  ;;  %v6626_v41 = vpop.f32.mrf.mxu1 }
 0x3a9   : > { %v6824_v27 = vsub.f32 1.0, %v6823_v38  ;;  %v7008_v47 = vmul.f32 %v6820_v31, %v12652_v18  ;;  %8717 = vpow2.f32 %v8562_v40  ;;  %v12719_v18 = vadd.f32 %v12530_v12, %v6620_v14 }
 0x3aa   : > { %v6848_v57 = vand.u32 2147483648, %v12694_v52  ;;  %vm6842_vm3 = vweird.f32 %v12694_v52  ;;  %vm6847_vm14 = vcmp.eq.f32.partialorder %v6846_v54, 8.507059e+37  ;;  %v12747_v48 = vadd.f32 %v12530_v12, %v6626_v41 }
 0x3ab   : > { %v6825_v53 = vmul.f32 %v8712_v62, %v6824_v27  ;;  %v8563_v50 = vmul.f32 -1.442695, %v12719_v18  ;;  %vm6872_vm8 = vweird.f32 %v12716_v8 }
 0x3ac   : > { %8596 = vmatmul.msk.f32.gmra.mxu2 %vm7158_vm7, %v8923_v55  ;;  %v6876_v55 = vand.u32 2147483647, %v12716_v8 }
 0x3ad   : > { %v6826_v0 = vadd.f32 %v8712_v62, %v6825_v53  ;;  %v6878_v53 = vand.u32 2147483648, %v12716_v8 }
 0x3ae   : > { %v8716_v6 = vpop.eup %8715  ;;  %vm6877_vm12 = vcmp.eq.f32.partialorder %v6876_v55, 8.507059e+37 }
 0x3af   : > { %8574 = vmatmul.msk.f32.gmra.mxu1 %vm6509_vm1, %v7006_v16  ;;  %v6838_v21 = vmul.f32 %v8716_v6, %v12694_v52  ;;  %v6830_v35 = vsel %vm6829_vm5, %v8712_v62, %v6826_v0  ;;  %vm6843_vm15 = vweird.f32 %v8716_v6  ;;  %v8718_v32 = vpop.eup %8717  ;;  %v6849_v16 = vor.u32 1.1754944e-38, %v6848_v57 }
 0x3b0   : > { %8605 = vmatmul.msk.f32.gmra.mxu3 %vm7158_vm7, %v8922_v29  ;;  %v6835_v56 = vsel %vm6832_vm10, %v6834_v45, %v6830_v35  ;;  %vm6844_vm0 = vmor %vm6842_vm3, %vm6843_vm15  ;;  %v12737_v60 = vadd.f32 1.0, %v8718_v32  ;;  %v6629_v49 = vpop.f32.mrf.mxu1  ;;  %v8565_v29 = vmul.f32 -1.442695, %v12747_v48 }
 0x3b1   : > { %v6839_v25 = vsub.f32 1.0, %v6838_v21  ;;  %v7009_v34 = vmul.f32 %v6835_v56, %v12667_v37  ;;  %v12758_v39 = vadd.f32 %v12530_v12, %v6629_v49 }
 0x3b2   : > { %vm6887_vm10 = vweird.f32 %v12737_v60 }
 0x3b3   : > { %v6840_v7 = vmul.f32 %v8716_v6, %v6839_v25 }
 0x3b4   : > { %8597 = vmatmul.msk.f32.gmra.mxu2 %vm7158_vm7, %v8925_v10 }
 0x3b5   : > { %v6841_v15 = vadd.f32 %v8716_v6, %v6840_v7  ;;  %v6893_v7 = vand.u32 2147483648, %v12737_v60 }
 0x3b7   : > { %8575 = vmatmul.msk.f32.gmra.mxu1 %vm6509_vm1, %v7007_v44  ;;  %v6845_v37 = vsel %vm6844_vm0, %v8716_v6, %v6841_v15  ;;  %v8927_v44 = vld [vmem:[%s9035_s2 + $0x48] sm:$0xff]  ;;  %v6891_v15 = vand.u32 2147483647, %v12737_v60 }
 0x3b8   : > { %8606 = vmatmul.msk.f32.gmra.mxu3 %vm7158_vm7, %v8924_v23  ;;  %v6850_v26 = vsel %vm6847_vm14, %v6849_v16, %v6845_v37  ;;  %v8566_v23 = vmul.f32 -1.442695, %v12758_v39 }
 0x3b9   : > { %v6611_v61 = vpop.f32.mrf.mxu0  ;;  %v7010_v42 = vmul.f32 %v6850_v26, %v12677_v28  ;;  %v6894_v26 = vor.u32 1.1754944e-38, %v6893_v7  ;;  %vm6892_vm3 = vcmp.eq.f32.partialorder %v6891_v15, 8.507059e+37 }
 0x3ba   : > { %v12708_v5 = vadd.f32 %v12530_v12, %v6611_v61 }
 0x3bc   : > { %v8560_v20 = vmul.f32 -1.442695, %v12708_v5  ;;  %8598 = vmatmul.msk.f32.gmra.mxu2 %vm7158_vm7, %v8927_v44 }
 0x3be   : > { %8719 = vpow2.f32 %v8560_v20  ;;  %v6879_v20 = vor.u32 1.1754944e-38, %v6878_v53 }
 0x3bf   : > { %8576 = vmatmul.msk.f32.gmra.mxu1 %vm6509_vm1, %v7008_v47  ;;  %8721 = vrcp.f32 %v12716_v8 }
 0x3c0   : > { %8607 = vmatmul.msk.f32.gmra.mxu3 %vm7158_vm7, %v8926_v17  ;;  %8723 = vpow2.f32 %v8563_v50 }
 0x3c4   : > { %v8720_v1 = vpop.eup %8719 }
 0x3c5   : > { %v6707_v46 = vadd.f32 1.0, %v8720_v1  ;;  %v8722_v24 = vpop.eup %8721 }
 0x3c6   : > { %v6868_v51 = vmul.f32 %v8722_v24, %v12716_v8  ;;  %v8724_v19 = vpop.eup %8723  ;;  %vm6873_vm2 = vweird.f32 %v8722_v24 }
 0x3c7   : > { %8577 = vmatmul.msk.f32.gmra.mxu1 %vm6509_vm1, %v7009_v34  ;;  %8725 = vrcp.f32 %v6707_v46  ;;  %v12749_v28 = vadd.f32 1.0, %v8724_v19  ;;  %v6863_v62 = vand.u32 2147483648, %v6707_v46  ;;  %v6861_v61 = vand.u32 2147483647, %v6707_v46  ;;  %vm6874_vm11 = vmor %vm6872_vm8, %vm6873_vm2 }
 0x3c8   : > { %8727 = vrcp.f32 %v12737_v60  ;;  %v6869_v52 = vsub.f32 1.0, %v6868_v51  ;;  %vm6857_vm9 = vweird.f32 %v6707_v46 }
 0x3c9   : > { %8729 = vpow2.f32 %v8564_v59  ;;  %v6864_v31 = vor.u32 1.1754944e-38, %v6863_v62  ;;  %vm6862_vm6 = vcmp.eq.f32.partialorder %v6861_v61, 8.507059e+37  ;;  %v6908_v59 = vand.u32 2147483648, %v12749_v28 }
 0x3ca   : > { %v6870_v11 = vmul.f32 %v8722_v24, %v6869_v52  ;;  %8731 = vrcp.f32 %v12749_v28  ;;  %vm6902_vm14 = vweird.f32 %v12749_v28  ;;  %v6906_v44 = vand.u32 2147483647, %v12749_v28 }
 0x3cb   : > { %8733 = vpow2.f32 %v8565_v29  ;;  %v6909_v49 = vor.u32 1.1754944e-38, %v6908_v59 }
 0x3cc   : > { %v6871_v9 = vadd.f32 %v8722_v24, %v6870_v11 }
 0x3cd   : > { %v8726_v58 = vpop.eup %8725 }
 0x3ce   : > { %v6853_v14 = vmul.f32 %v8726_v58, %v6707_v46  ;;  %v12751_v3 = vpop.eup %8727  ;;  %vm6858_vm13 = vweird.f32 %v8726_v58  ;;  %v6875_v45 = vsel %vm6874_vm11, %v8722_v24, %v6871_v9 }
 0x3cf   : > { %8578 = vmatmul.msk.f32.gmra.mxu1 %vm6509_vm1, %v7010_v42  ;;  %v8730_v2 = vpop.eup %8729  ;;  %v6883_v38 = vmul.f32 %v12751_v3, %v12737_v60  ;;  %vm6859_vm4 = vmor %vm6857_vm9, %vm6858_vm13  ;;  %vm6888_vm5 = vweird.f32 %v12751_v3  ;;  %vm6907_vm9 = vcmp.eq.f32.partialorder %v6906_v44, 8.507059e+37 }
 0x3d0   : > { %v6854_v30 = vsub.f32 1.0, %v6853_v14  ;;  %v12760_v40 = vadd.f32 1.0, %v8730_v2  ;;  %v12762_v47 = vpop.eup %8731  ;;  %vm6889_vm15 = vmor %vm6887_vm10, %vm6888_vm5 }
 0x3d1   : > { %v6884_v13 = vsub.f32 1.0, %v6883_v38  ;;  %v8734_v22 = vpop.eup %8733  ;;  %v6898_v25 = vmul.f32 %v12762_v47, %v12749_v28  ;;  %vm6903_vm0 = vweird.f32 %v12762_v47 }
 0x3d2   : > { %v6855_v4 = vmul.f32 %v8726_v58, %v6854_v30  ;;  %8735 = vrcp.f32 %v12760_v40  ;;  %v12778_v56 = vadd.f32 1.0, %v8734_v22  ;;  %vm6904_vm13 = vmor %vm6902_vm14, %vm6903_vm0  ;;  %v6923_v62 = vand.u32 2147483648, %v12760_v40 }
 0x3d3   : > { %v6885_v35 = vmul.f32 %v12751_v3, %v6884_v13  ;;  %8737 = vpow2.f32 %v8566_v23  ;;  %v6899_v57 = vsub.f32 1.0, %v6898_v25  ;;  %v6921_v38 = vand.u32 2147483647, %v12760_v40  ;;  %v7309_v25 = vld [vmem:[%s13444_s8 + $0x78] sm:$0xff] }
 0x3d4   : > { %v6856_v27 = vadd.f32 %v8726_v58, %v6855_v4  ;;  %8739 = vrcp.f32 %v12778_v56  ;;  %v6924_v9 = vor.u32 1.1754944e-38, %v6923_v62  ;;  %v6938_v53 = vand.u32 2147483648, %v12778_v56  ;;  %7314 = vmatpush.msrb.mxu3 %v7309_v25 }
 0x3d5   : > { %v6886_v54 = vadd.f32 %v12751_v3, %v6885_v35  ;;  %v6900_v17 = vmul.f32 %v12762_v47, %v6899_v57  ;;  %vm6922_vm8 = vcmp.eq.f32.partialorder %v6921_v38, 8.507059e+37  ;;  %v6936_v55 = vand.u32 2147483647, %v12778_v56  ;;  %v7299_v38 = vld [vmem:[%s13444_s8 + $0x28] sm:$0xff] }
 0x3d6   : > { %v6860_v33 = vsel %vm6859_vm4, %v8726_v58, %v6856_v27  ;;  %v6632_v21 = vpop.f32.mrf.mxu1  ;;  %vm6917_vm4 = vweird.f32 %v12760_v40  ;;  %v6939_v22 = vor.u32 1.1754944e-38, %v6938_v53  ;;  %v12912_v53 = vld [vmem:[%s13443_s7] ss:$0 sm:$0xff] }
 0x3d7   : > { %v6865_v6 = vsel %vm6862_vm6, %v6864_v31, %v6860_v33  ;;  %v12776_v8 = vadd.f32 %v12530_v12, %v6632_v21  ;;  %v6890_v10 = vsel %vm6889_vm15, %v12751_v3, %v6886_v54  ;;  %v6901_v46 = vadd.f32 %v12762_v47, %v6900_v17  ;;  %v7305_v17 = vld [vmem:[%s13444_s8 + $0x58] sm:$0xff] }
 0x3d8   : > { %v7011_v0 = vmul.f32 %v6865_v6, %v12708_v5  ;;  %v6880_v5 = vsel %vm6877_vm12, %v6879_v20, %v6875_v45  ;;  %v8736_v34 = vpop.eup %8735  ;;  %v6895_v1 = vsel %vm6892_vm3, %v6894_v26, %v6890_v10  ;;  %vm6932_vm12 = vweird.f32 %v12778_v56  ;;  %v7308_v20 = vld [vmem:[%s13444_s8 + $0x70] sm:$0xff] }
 0x3d9   : > { %v7012_v50 = vmul.f32 %v6880_v5, %v12689_v36  ;;  %v8567_v32 = vmul.f32 -1.442695, %v12776_v8  ;;  %v8738_v16 = vpop.eup %8737  ;;  %v6913_v37 = vmul.f32 %v8736_v34, %v12760_v40  ;;  %v7013_v51 = vmul.f32 %v6895_v1, %v12702_v43  ;;  %7315 = vmatpush.msrb.mxu3 %v7308_v20 }
 0x3da   : > { %8579 = vmatmul.msk.f32.gmra.mxu1 %vm6509_vm1, %v7011_v0  ;;  %v12792_v60 = vadd.f32 1.0, %v8738_v16  ;;  %v8740_v42 = vpop.eup %8739  ;;  %v6905_v52 = vsel %vm6904_vm13, %v12762_v47, %v6901_v46  ;;  %vm6918_vm2 = vweird.f32 %v8736_v34  ;;  %vm6937_vm10 = vcmp.eq.f32.partialorder %v6936_v55, 8.507059e+37 }
 0x3db   : > { %8741 = vpow2.f32 %v8567_v32  ;;  %v6914_v24 = vsub.f32 1.0, %v6913_v37  ;;  %v6928_v3 = vmul.f32 %v8740_v42, %v12778_v56  ;;  %v6910_v43 = vsel %vm6907_vm9, %v6909_v49, %v6905_v52  ;;  %vm6919_vm6 = vmor %vm6917_vm4, %vm6918_vm2  ;;  %v7302_v52 = vld [vmem:[%s13444_s8 + $0x40] sm:$0xff] }
 0x3dc   : > { %8743 = vrcp.f32 %v12792_v60  ;;  %v7014_v2 = vmul.f32 %v6910_v43, %v12719_v18  ;;  %vm6933_vm11 = vweird.f32 %v8740_v42  ;;  %v6953_v56 = vand.u32 2147483648, %v12792_v60 }
 0x3dd   : > { %v6915_v14 = vmul.f32 %v8736_v34, %v6914_v24  ;;  %v6929_v30 = vsub.f32 1.0, %v6928_v3  ;;  %vm6934_vm5 = vmor %vm6932_vm12, %vm6933_vm11  ;;  %vm6947_vm3 = vweird.f32 %v12792_v60  ;;  %v7301_v3 = vld [vmem:[%s13444_s8 + $0x38] sm:$0xff] }
 0x3de   : > { %v6954_v10 = vor.u32 1.1754944e-38, %v6953_v56 }
 0x3df   : > { %v6916_v28 = vadd.f32 %v8736_v34, %v6915_v14  ;;  %v6930_v27 = vmul.f32 %v8740_v42, %v6929_v30 }
 0x3e1   : > { %v8742_v58 = vpop.eup %8741  ;;  %v6920_v61 = vsel %vm6919_vm6, %v8736_v34, %v6916_v28  ;;  %v6931_v18 = vadd.f32 %v8740_v42, %v6930_v27  ;;  %v6951_v34 = vand.u32 2147483647, %v12792_v60  ;;  %v7300_v28 = vld [vmem:[%s13444_s8 + $0x30] sm:$0xff] }
 0x3e2   : > { %8580 = vmatmul.msk.f32.gmra.mxu1 %vm6509_vm1, %v7012_v50  ;;  %v12808_v29 = vadd.f32 1.0, %v8742_v58  ;;  %v12810_v11 = vpop.eup %8743  ;;  %v6925_v13 = vsel %vm6922_vm8, %v6924_v9, %v6920_v61  ;;  %v7307_v50 = vld [vmem:[%s13444_s8 + $0x68] sm:$0xff]  ;;  %v7298_v61 = vld [vmem:[%s13444_s8 + $0x20] sm:$0xff]  ;;  %v7297_v9 = vld [vmem:[%s13444_s8 + $0x18] sm:$0xff] }
 0x3e3   : > { %v6943_v31 = vmul.f32 %v12810_v11, %v12792_v60  ;;  %v7015_v6 = vmul.f32 %v6925_v13, %v12735_v63  ;;  %v6935_v23 = vsel %vm6934_vm5, %v8740_v42, %v6931_v18  ;;  %vm6948_vm15 = vweird.f32 %v12810_v11  ;;  %7316 = vmatpush.msrb.mxu3 %v7307_v50  ;;  %v7304_v60 = vld [vmem:[%s13444_s8 + $0x50] sm:$0xff] }
 0x3e4   : > { %v6940_v45 = vsel %vm6937_vm10, %v6939_v22, %v6935_v23  ;;  %vm6949_vm0 = vmor %vm6947_vm3, %vm6948_vm15  ;;  %vm6952_vm14 = vcmp.eq.f32.partialorder %v6951_v34, 8.507059e+37  ;;  %v6968_v46 = vand.u32 2147483648, %v12808_v29  ;;  %vm6962_vm9 = vweird.f32 %v12808_v29  ;;  %v7295_v22 = vld [vmem:[%s13444_s8 + $0x8] sm:$0xff] }
 0x3e5   : > { %v6944_v47 = vsub.f32 1.0, %v6943_v31  ;;  %v7016_v57 = vmul.f32 %v6940_v45, %v12747_v48  ;;  %v6966_v59 = vand.u32 2147483647, %v12808_v29 }
 0x3e7   : > { %v6945_v0 = vmul.f32 %v12810_v11, %v6944_v47  ;;  %vm6967_vm4 = vcmp.eq.f32.partialorder %v6966_v59, 8.507059e+37  ;;  %v7296_v47 = vld [vmem:[%s13444_s8 + $0x10] sm:$0xff] }
 0x3e9   : > { %v6946_v63 = vadd.f32 %v12810_v11, %v6945_v0 }
 0x3ea   : > { %8581 = vmatmul.msk.f32.gmra.mxu1 %vm6509_vm1, %v7013_v51  ;;  %v7303_v51 = vld [vmem:[%s13444_s8 + $0x48] sm:$0xff] }
 0x3eb   : > { %v6635_v36 = vpop.f32.mrf.mxu1  ;;  %v6950_v15 = vsel %vm6949_vm0, %v12810_v11, %v6946_v63 }
 0x3ec   : > { %v12795_v41 = vadd.f32 %v12530_v12, %v6635_v36  ;;  %v6955_v26 = vsel %vm6952_vm14, %v6954_v10, %v6950_v15 }
 0x3ed   : > { %v7017_v42 = vmul.f32 %v6955_v26, %v12758_v39  ;;  %v6969_v39 = vor.u32 1.1754944e-38, %v6968_v46 }
 0x3ee   : > { %v8568_v19 = vmul.f32 -1.442695, %v12795_v41 }
 0x3f0   : > { %8745 = vpow2.f32 %v8568_v19 }
 0x3f1   : > { %8747 = vrcp.f32 %v12808_v29 }
 0x3f2   : > { %8582 = vmatmul.msk.f32.gmra.mxu1 %vm6509_vm1, %v7014_v2  ;;  %v7214_v37 = vpop.f32.mrf.mxu2 }
 0x3f6   : > { %v8746_v4 = vpop.eup %8745 }
 0x3f7   : > { %v12820_v33 = vadd.f32 1.0, %v8746_v4  ;;  %v12822_v40 = vpop.eup %8747 }
 0x3f8   : > { %v6958_v21 = vmul.f32 %v12822_v40, %v12808_v29  ;;  %vm6963_vm13 = vweird.f32 %v12822_v40 }
 0x3f9   : > { %8749 = vrcp.f32 %v12820_v33  ;;  %vm6964_vm2 = vmor %vm6962_vm9, %vm6963_vm13  ;;  %v6983_v30 = vand.u32 2147483648, %v12820_v33  ;;  %vm6977_vm8 = vweird.f32 %v12820_v33  ;;  %v6981_v2 = vand.u32 2147483647, %v12820_v33 }
 0x3fa   : > { %8583 = vmatmul.msk.f32.gmra.mxu1 %vm6509_vm1, %v7015_v6  ;;  %v6959_v35 = vsub.f32 1.0, %v6958_v21 }
 0x3fb   : > { %vm6982_vm12 = vcmp.eq.f32.partialorder %v6981_v2, 8.507059e+37  ;;  %v7780_v2 = vld [vmem:[%s13446_s10 + $0x60] sm:$0xff] }
 0x3fc   : > { %v6960_v32 = vmul.f32 %v12822_v40, %v6959_v35  ;;  %v7294_v35 = vld [vmem:[%s13444_s8] sm:$0xff] }
 0x3fe   : > { %v6961_v36 = vadd.f32 %v12822_v40, %v6960_v32 }
 0x3ff   : > { %v12841_v5 = vpop.eup %8749  ;;  %v7217_v49 = vpop.f32.mrf.mxu2 }
 0x400   : > { %v6973_v48 = vmul.f32 %v12841_v5, %v12820_v33  ;;  %v6965_v19 = vsel %vm6964_vm2, %v12822_v40, %v6961_v36  ;;  %vm6978_vm6 = vweird.f32 %v12841_v5 }
 0x401   : > { %v6970_v43 = vsel %vm6967_vm4, %v6969_v39, %v6965_v19  ;;  %vm6979_vm11 = vmor %vm6977_vm8, %vm6978_vm6 }
 0x402   : > { %8584 = vmatmul.msk.f32.gmra.mxu1 %vm6509_vm1, %v7016_v57  ;;  %v6974_v1 = vsub.f32 1.0, %v6973_v48  ;;  %v7018_v62 = vmul.f32 %v6970_v43, %v12776_v8  ;;  %v6984_v8 = vor.u32 1.1754944e-38, %v6983_v30  ;;  %v7781_v43 = vld [vmem:[%s13446_s10 + $0x68] sm:$0xff] }
 0x403   : > { %v7244_v59 = vpop.f32.mrf.mxu3 }
 0x404   : > { %v6638_v54 = vpop.f32.mrf.mxu1  ;;  %v6975_v58 = vmul.f32 %v12841_v5, %v6974_v1 }
 0x405   : > { %v12848_v7 = vadd.f32 %v12530_v12, %v6638_v54  ;;  %v7306_v12 = vld [vmem:[%s13444_s8 + $0x60] sm:$0xff] }
 0x406   : > { %7317 = vmatpush.msrb.mxu3 %v7306_v12  ;;  %v6976_v29 = vadd.f32 %v12841_v5, %v6975_v58  ;;  %v7783_v58 = vld [vmem:[%s13446_s10 + $0x78] sm:$0xff] }
 0x407   : > { %v8569_v16 = vmul.f32 -1.442695, %v12848_v7  ;;  %v7220_v33 = vpop.f32.mrf.mxu2  ;;  %7788 = vmatpush.msrb.mxu2 %v7783_v58 }
 0x408   : > { %7318 = vmatpush.msrb.mxu3 %v7305_v17  ;;  %v6980_v4 = vsel %vm6979_vm11, %v12841_v5, %v6976_v29 }
 0x409   : > { %8751 = vpow2.f32 %v8569_v16  ;;  %v6985_v13 = vsel %vm6982_vm12, %v6984_v8, %v6980_v4  ;;  %v7779_v8 = vld [vmem:[%s13446_s10 + $0x58] sm:$0xff] }
 0x40a   : > { %7319 = vmatpush.msrb.mxu3 %v7304_v60  ;;  %8585 = vmatmul.msk.f32.gmra.mxu1 %vm6509_vm1, %v7017_v42  ;;  %v7019_v23 = vmul.f32 %v6985_v13, %v12795_v41 }
 0x40b   : > { %v7247_v39 = vpop.f32.mrf.mxu3 }
 0x40c   : > { %v7101_v24 = vpop.f32.mrf.mxu1  ;;  %7320 = vmatpush.msrb.mxu3 %v7303_v51 }
 0x40d   : > { %v7215_v40 = vadd.f32 %v7214_v37, %v7101_v24 }
 0x40e   : > { %7321 = vmatpush.msrb.mxu3 %v7302_v52 }
 0x40f   : > { %v8752_v44 = vpop.eup %8751  ;;  %v7275_v63 = vadd.f32 %v12912_v53, %v7215_v40  ;;  %v7223_v54 = vpop.f32.mrf.mxu2 }
 0x410   : > { %v6716_v14 = vadd.f32 1.0, %v8752_v44  ;;  %7322 = vmatpush.msrb.mxu3 %v7301_v3 }
 0x412   : > { %8753 = vrcp.f32 %v6716_v14  ;;  %7323 = vmatpush.msrb.mxu3 %v7300_v28  ;;  %8586 = vmatmul.msk.f32.gmra.mxu1 %vm6509_vm1, %v7018_v62  ;;  %v6998_v6 = vand.u32 2147483648, %v6716_v14  ;;  %v6996_v21 = vand.u32 2147483647, %v6716_v14  ;;  %vm6992_vm10 = vweird.f32 %v6716_v14 }
 0x414   : > { %v7104_v11 = vpop.f32.mrf.mxu1  ;;  %7324 = vmatpush.msrb.mxu3 %v7299_v38  ;;  %v6999_v41 = vor.u32 1.1754944e-38, %v6998_v6  ;;  %vm6997_vm3 = vcmp.eq.f32.partialorder %v6996_v21, 8.507059e+37 }
 0x415   : > { %v7218_v5 = vadd.f32 %v7217_v49, %v7104_v11  ;;  %v7782_v49 = vld [vmem:[%s13446_s10 + $0x70] sm:$0xff]  ;;  %v7250_v11 = vpop.f32.mrf.mxu3 }
 0x416   : > { %7325 = vmatpush.msrb.mxu3 %v7298_v61  ;;  %7789 = vmatpush.msrb.mxu2 %v7782_v49 }
 0x417   : > { %v7276_v34 = vadd.f32 %v12912_v53, %v7218_v5  ;;  %v7226_v32 = vpop.f32.mrf.mxu2 }
 0x418   : > { %v8754_v27 = vpop.eup %8753  ;;  %7326 = vmatpush.msrb.mxu3 %v7297_v9  ;;  %7790 = vmatpush.msrb.mxu2 %v7781_v43 }
 0x419   : > { %v6988_v31 = vmul.f32 %v8754_v27, %v6716_v14  ;;  %vm6993_vm5 = vweird.f32 %v8754_v27 }
 0x41a   : > { %7327 = vmatpush.msrb.mxu3 %v7296_v47  ;;  %8587 = vmatmul.msk.f32.gmra.mxu1 %vm6509_vm1, %v7019_v23  ;;  %vm6994_vm15 = vmor %vm6992_vm10, %vm6993_vm5  ;;  %v7776_v47 = vld [vmem:[%s13446_s10 + $0x40] sm:$0xff] }
 0x41b   : > { %v6989_v18 = vsub.f32 1.0, %v6988_v31  ;;  %7791 = vmatpush.msrb.mxu2 %v7780_v2  ;;  %v7778_v31 = vld [vmem:[%s13446_s10 + $0x50] sm:$0xff] }
 0x41c   : > { %v7107_v55 = vpop.f32.mrf.mxu1  ;;  %7328 = vmatpush.msrb.mxu3 %v7295_v22 }
 0x41d   : > { %v6990_v0 = vmul.f32 %v8754_v27, %v6989_v18  ;;  %v7221_v50 = vadd.f32 %v7220_v33, %v7107_v55  ;;  %v7253_v61 = vpop.f32.mrf.mxu3  ;;  %7792 = vmatpush.msrb.mxu2 %v7779_v8  ;;  %v7777_v18 = vld [vmem:[%s13446_s10 + $0x48] sm:$0xff] }
 0x41e   : > { %7329 = vmatpush.msrb.mxu3 %v7294_v35  ;;  %v7774_v35 = vld [vmem:[%s13446_s10 + $0x30] sm:$0xff] }
 0x41f   : > { %v6991_v45 = vadd.f32 %v8754_v27, %v6990_v0  ;;  %7330 = vmatmul.f32.vlgmr.msrb.gmra.mxu3 %v7275_v63  ;;  %v7277_v48 = vadd.f32 %v12912_v53, %v7221_v50  ;;  %v7229_v17 = vpop.f32.mrf.mxu2  ;;  %7793 = vmatpush.msrb.mxu2 %v7778_v31  ;;  %v7775_v0 = vld [vmem:[%s13446_s10 + $0x38] sm:$0xff] }
 0x421   : > { %v6995_v25 = vsel %vm6994_vm15, %v8754_v27, %v6991_v45  ;;  %7794 = vmatpush.msrb.mxu2 %v7777_v18 }
 0x422   : > { %v7000_v20 = vsel %vm6997_vm3, %v6999_v41, %v6995_v25 }
 0x423   : > { %v7020_v57 = vmul.f32 %v7000_v20, %v12848_v7  ;;  %7795 = vmatpush.msrb.mxu2 %v7776_v47 }
 0x424   : > { %v7110_v56 = vpop.f32.mrf.mxu1 }
 0x425   : > { %8588 = vmatmul.msk.f32.gmra.mxu1 %vm6509_vm1, %v7020_v57  ;;  %v7224_v16 = vadd.f32 %v7223_v54, %v7110_v56  ;;  %v7256_v6 = vpop.f32.mrf.mxu3  ;;  %7796 = vmatpush.msrb.mxu2 %v7775_v0 }
 0x427   : > { %7333 = vmatmul.f32.gmra.mxu3 %v7276_v34  ;;  %v7278_v10 = vadd.f32 %v12912_v53, %v7224_v16  ;;  %v7232_v36 = vpop.f32.mrf.mxu2  ;;  %7797 = vmatpush.msrb.mxu2 %v7774_v35 }
 0x42c   : > { %v7113_v15 = vpop.f32.mrf.mxu1 }
 0x42d   : > { %v7227_v37 = vadd.f32 %v7226_v32, %v7113_v15  ;;  %v7259_v22 = vpop.f32.mrf.mxu3 }
 0x42f   : > { %7336 = vmatmul.f32.gmra.mxu3 %v7277_v48  ;;  %v7279_v7 = vadd.f32 %v12912_v53, %v7227_v37  ;;  %v7235_v42 = vpop.f32.mrf.mxu2  ;;  %v7773_v37 = vld [vmem:[%s13446_s10 + $0x28] sm:$0xff] }
 0x430   : > { %7798 = vmatpush.msrb.mxu2 %v7773_v37 }
 0x434   : > { %v7116_v12 = vpop.f32.mrf.mxu1 }
 0x435   : > { %v7230_v1 = vadd.f32 %v7229_v17, %v7116_v12  ;;  %v7262_v20 = vpop.f32.mrf.mxu3  ;;  %v12974_v17 = vld [vmem:[%s13445_s9] ss:$0 sm:$0xff] }
 0x437   : > { %7339 = vmatmul.f32.gmra.mxu3 %v7278_v10  ;;  %v7280_v60 = vadd.f32 %v12912_v53, %v7230_v1  ;;  %v7238_v52 = vpop.f32.mrf.mxu2 }
 0x43c   : > { %v7119_v26 = vpop.f32.mrf.mxu1 }
 0x43d   : > { %v7233_v24 = vadd.f32 %v7232_v36, %v7119_v26  ;;  %v7265_v57 = vpop.f32.mrf.mxu3  ;;  %v7772_v26 = vld [vmem:[%s13446_s10 + $0x20] sm:$0xff] }
 0x43e   : > { %7799 = vmatpush.msrb.mxu2 %v7772_v26 }
 0x43f   : > { %7342 = vmatmul.f32.gmra.mxu3 %v7279_v7  ;;  %v7281_v51 = vadd.f32 %v12912_v53, %v7233_v24  ;;  %v7241_v30 = vpop.f32.mrf.mxu2 }
 0x444   : > { %v7122_v46 = vpop.f32.mrf.mxu1 }
 0x445   : > { %v7236_v19 = vadd.f32 %v7235_v42, %v7122_v46  ;;  %v7268_v48 = vpop.f32.mrf.mxu3  ;;  %v7770_v42 = vld [vmem:[%s13446_s10 + $0x10] sm:$0xff] }
 0x447   : > { %7345 = vmatmul.f32.gmra.mxu3 %v7280_v60  ;;  %v7282_v14 = vadd.f32 %v12912_v53, %v7236_v19  ;;  %v7771_v60 = vld [vmem:[%s13446_s10 + $0x18] sm:$0xff] }
 0x448   : > { %7800 = vmatpush.msrb.mxu2 %v7771_v60 }
 0x44a   : > { %7801 = vmatpush.msrb.mxu2 %v7770_v42 }
 0x44c   : > { %v7125_v44 = vpop.f32.mrf.mxu1 }
 0x44d   : > { %v7239_v3 = vadd.f32 %v7238_v52, %v7125_v44  ;;  %v7768_v44 = vld [vmem:[%s13446_s10] sm:$0xff] }
 0x44f   : > { %7348 = vmatmul.f32.gmra.mxu3 %v7281_v51  ;;  %v7283_v28 = vadd.f32 %v12912_v53, %v7239_v3  ;;  %v7769_v51 = vld [vmem:[%s13446_s10 + $0x8] sm:$0xff] }
 0x450   : > { %7802 = vmatpush.msrb.mxu2 %v7769_v51 }
 0x452   : > { %7803 = vmatpush.msrb.mxu2 %v7768_v44 }
 0x457   : > { %7351 = vmatmul.f32.gmra.mxu3 %v7282_v14  ;;  %v7128_v29 = vpop.f32.mrf.mxu1 }
 0x458   : > { %v7242_v62 = vadd.f32 %v7241_v30, %v7128_v29 }
 0x45a   : > { %v7284_v4 = vadd.f32 %v12912_v53, %v7242_v62 }
 0x45f   : > { %7354 = vmatmul.f32.gmra.mxu3 %v7283_v28  ;;  %v7131_v38 = vpop.f32.mrf.mxu1 }
 0x460   : > { %v7245_v27 = vadd.f32 %v7244_v59, %v7131_v38 }
 0x462   : > { %v7285_v13 = vadd.f32 %v12912_v53, %v7245_v27 }
 0x467   : > { %7357 = vmatmul.f32.gmra.mxu3 %v7284_v4  ;;  %v7134_v9 = vpop.f32.mrf.mxu1 }
 0x468   : > { %v7248_v33 = vadd.f32 %v7247_v39, %v7134_v9 }
 0x46a   : > { %v7286_v55 = vadd.f32 %v12912_v53, %v7248_v33 }
 0x46f   : > { %7360 = vmatmul.f32.gmra.mxu3 %v7285_v13  ;;  %v7137_v40 = vpop.f32.mrf.mxu1 }
 0x470   : > { %v7251_v23 = vadd.f32 %v7250_v11, %v7137_v40 }
 0x472   : > { %v7287_v45 = vadd.f32 %v12912_v53, %v7251_v23 }
 0x477   : > { %7363 = vmatmul.f32.gmra.mxu3 %v7286_v55  ;;  %v7140_v21 = vpop.f32.mrf.mxu1 }
 0x478   : > { %v7254_v63 = vadd.f32 %v7253_v61, %v7140_v21 }
 0x47a   : > { %v7288_v25 = vadd.f32 %v12912_v53, %v7254_v63 }
 0x47f   : > { %7366 = vmatmul.f32.gmra.mxu3 %v7287_v45  ;;  %v7143_v41 = vpop.f32.mrf.mxu1 }
 0x480   : > { %v7257_v5 = vadd.f32 %v7256_v6, %v7143_v41 }
 0x482   : > { %v7289_v54 = vadd.f32 %v12912_v53, %v7257_v5 }
 0x487   : > { %7369 = vmatmul.f32.gmra.mxu3 %v7288_v25  ;;  %v7146_v56 = vpop.f32.mrf.mxu1 }
 0x488   : > { %v7260_v34 = vadd.f32 %v7259_v22, %v7146_v56 }
 0x48a   : > { %v7290_v15 = vadd.f32 %v12912_v53, %v7260_v34 }
 0x48f   : > { %7372 = vmatmul.f32.gmra.mxu3 %v7289_v54  ;;  %v7149_v50 = vpop.f32.mrf.mxu1 }
 0x490   : > { %v7263_v32 = vadd.f32 %v7262_v20, %v7149_v50 }
 0x492   : > { %v7291_v12 = vadd.f32 %v12912_v53, %v7263_v32 }
 0x497   : > { %7375 = vmatmul.f32.gmra.mxu3 %v7290_v15  ;;  %v7152_v16 = vpop.f32.mrf.mxu1 }
 0x498   : > { %v7266_v10 = vadd.f32 %v7265_v57, %v7152_v16 }
 0x49a   : > { %v7292_v36 = vadd.f32 %v12912_v53, %v7266_v10 }
 0x49f   : > { %7378 = vmatmul.f32.gmra.mxu3 %v7291_v12 }
 0x4a2   : > { %v7331_v7 = vpop.f32.mrf.mxu3  ;;  %v7155_v46 = vpop.f32.mrf.mxu1 }
 0x4a3   : > { %v7332_v1 = vadd.f32 %v12974_v17, %v7331_v7  ;;  %v7269_v59 = vadd.f32 %v7268_v48, %v7155_v46 }
 0x4a5   : > { %v8608_v24 = vmul.f32 -1.442695, %v7332_v1  ;;  %v7293_v58 = vadd.f32 %v12912_v53, %v7269_v59 }
 0x4a7   : > { %8755 = vpow2.f32 %v8608_v24  ;;  %7381 = vmatmul.f32.gmra.mxu3 %v7292_v36 }
 0x4aa   : > { %v7334_v19 = vpop.f32.mrf.mxu3 }
 0x4ab   : > { %v7335_v52 = vadd.f32 %v12974_v17, %v7334_v19 }
 0x4ad   : > { %v8756_v39 = vpop.eup %8755  ;;  %v8609_v14 = vmul.f32 -1.442695, %v7335_v52 }
 0x4ae   : > { %v7445_v3 = vadd.f32 1.0, %v8756_v39 }
 0x4af   : > { %8757 = vpow2.f32 %v8609_v14  ;;  %7384 = vmatmul.f32.gmra.mxu3 %v7293_v58 }
 0x4b0   : > { %8759 = vrcp.f32 %v7445_v3  ;;  %v7475_v2 = vand.u32 2147483648, %v7445_v3  ;;  %v7473_v61 = vand.u32 2147483647, %v7445_v3  ;;  %vm7469_vm0 = vweird.f32 %v7445_v3 }
 0x4b2   : > { %v7337_v49 = vpop.f32.mrf.mxu3  ;;  %v7476_v33 = vor.u32 1.1754944e-38, %v7475_v2  ;;  %vm7474_vm13 = vcmp.eq.f32.partialorder %v7473_v61, 8.507059e+37 }
 0x4b3   : > { %v12999_v43 = vadd.f32 %v12974_v17, %v7337_v49 }
 0x4b5   : > { %v8758_v29 = vpop.eup %8757  ;;  %v8610_v28 = vmul.f32 -1.442695, %v12999_v43 }
 0x4b6   : > { %v8760_v30 = vpop.eup %8759  ;;  %v7446_v11 = vadd.f32 1.0, %v8758_v29 }
 0x4b7   : > { %v7465_v62 = vmul.f32 %v8760_v30, %v7445_v3  ;;  %8761 = vpow2.f32 %v8610_v28  ;;  %vm7470_vm1 = vweird.f32 %v8760_v30 }
 0x4b8   : > { %8763 = vrcp.f32 %v7446_v11  ;;  %vm7471_vm14 = vmor %vm7469_vm0, %vm7470_vm1  ;;  %v7490_v21 = vand.u32 2147483648, %v7446_v11  ;;  %v7488_v63 = vand.u32 2147483647, %v7446_v11  ;;  %vm7484_vm2 = vweird.f32 %v7446_v11 }
 0x4b9   : > { %v7466_v53 = vsub.f32 1.0, %v7465_v62 }
 0x4ba   : > { %v7340_v38 = vpop.f32.mrf.mxu3  ;;  %v7491_v56 = vor.u32 1.1754944e-38, %v7490_v21  ;;  %vm7489_vm6 = vcmp.eq.f32.partialorder %v7488_v63, 8.507059e+37 }
 0x4bb   : > { %v7467_v4 = vmul.f32 %v8760_v30, %v7466_v53  ;;  %v13003_v27 = vadd.f32 %v12974_v17, %v7340_v38 }
 0x4bd   : > { %v8762_v8 = vpop.eup %8761  ;;  %v7468_v31 = vadd.f32 %v8760_v30, %v7467_v4  ;;  %v8611_v9 = vmul.f32 -1.442695, %v13003_v27 }
 0x4be   : > { %v8764_v13 = vpop.eup %8763  ;;  %v7447_v18 = vadd.f32 1.0, %v8762_v8 }
 0x4bf   : > { %v7472_v47 = vsel %vm7471_vm14, %v8760_v30, %v7468_v31  ;;  %8765 = vpow2.f32 %v8611_v9  ;;  %v7480_v40 = vmul.f32 %v8764_v13, %v7446_v11  ;;  %vm7485_vm9 = vweird.f32 %v8764_v13 }
 0x4c0   : > { %v7477_v6 = vsel %vm7474_vm13, %v7476_v33, %v7472_v47  ;;  %8767 = vrcp.f32 %v7447_v18  ;;  %vm7486_vm4 = vmor %vm7484_vm2, %vm7485_vm9  ;;  %v7505_v48 = vand.u32 2147483648, %v7447_v18  ;;  %v7503_v10 = vand.u32 2147483647, %v7447_v18 }
 0x4c1   : > { %v7749_v55 = vmul.f32 %v7477_v6, %v7332_v1  ;;  %v7481_v23 = vsub.f32 1.0, %v7480_v40  ;;  %vm7499_vm11 = vweird.f32 %v7447_v18 }
 0x4c2   : > { %v7343_v0 = vpop.f32.mrf.mxu3  ;;  %v7506_v60 = vor.u32 1.1754944e-38, %v7505_v48  ;;  %vm7504_vm5 = vcmp.eq.f32.partialorder %v7503_v10, 8.507059e+37 }
 0x4c3   : > { %v13007_v22 = vadd.f32 %v12974_v17, %v7343_v0  ;;  %7804 = vmatmul.f32.vlgmr.msrb.gmra.mxu2 %v7749_v55  ;;  %v7482_v45 = vmul.f32 %v8764_v13, %v7481_v23 }
 0x4c5   : > { %v8766_v35 = vpop.eup %8765  ;;  %v8612_v41 = vmul.f32 -1.442695, %v13007_v22  ;;  %v7483_v25 = vadd.f32 %v8764_v13, %v7482_v45 }
 0x4c6   : > { %v8768_v20 = vpop.eup %8767  ;;  %v7448_v5 = vadd.f32 1.0, %v8766_v35 }
 0x4c7   : > { %8769 = vpow2.f32 %v8612_v41  ;;  %v7487_v54 = vsel %vm7486_vm4, %v8764_v13, %v7483_v25  ;;  %v7495_v57 = vmul.f32 %v8768_v20, %v7447_v18  ;;  %vm7500_vm8 = vweird.f32 %v8768_v20 }
 0x4c8   : > { %8771 = vrcp.f32 %v7448_v5  ;;  %v7492_v34 = vsel %vm7489_vm6, %v7491_v56, %v7487_v54  ;;  %vm7501_vm12 = vmor %vm7499_vm11, %vm7500_vm8  ;;  %v7520_v19 = vand.u32 2147483648, %v7448_v5  ;;  %v7518_v39 = vand.u32 2147483647, %v7448_v5 }
 0x4c9   : > { %v7750_v50 = vmul.f32 %v7492_v34, %v7335_v52  ;;  %v7496_v15 = vsub.f32 1.0, %v7495_v57  ;;  %vm7514_vm15 = vweird.f32 %v7448_v5 }
 0x4ca   : > { %v7346_v32 = vpop.f32.mrf.mxu3  ;;  %v7521_v30 = vor.u32 1.1754944e-38, %v7520_v19  ;;  %vm7519_vm1 = vcmp.eq.f32.partialorder %v7518_v39, 8.507059e+37 }
 0x4cb   : > { %v13011_v16 = vadd.f32 %v12974_v17, %v7346_v32  ;;  %7807 = vmatmul.f32.gmra.mxu2 %v7750_v50  ;;  %v7497_v12 = vmul.f32 %v8768_v20, %v7496_v15 }
 0x4cd   : > { %v8770_v37 = vpop.eup %8769  ;;  %v8613_v26 = vmul.f32 -1.442695, %v13011_v16  ;;  %v7498_v7 = vadd.f32 %v8768_v20, %v7497_v12 }
 0x4ce   : > { %v8772_v36 = vpop.eup %8771  ;;  %v7449_v1 = vadd.f32 1.0, %v8770_v37 }
 0x4cf   : > { %8773 = vpow2.f32 %v8613_v26  ;;  %v7502_v46 = vsel %vm7501_vm12, %v8768_v20, %v7498_v7  ;;  %v7510_v24 = vmul.f32 %v8772_v36, %v7448_v5  ;;  %vm7515_vm10 = vweird.f32 %v8772_v36 }
 0x4d0   : > { %8775 = vrcp.f32 %v7449_v1  ;;  %v7507_v42 = vsel %vm7504_vm5, %v7506_v60, %v7502_v46  ;;  %vm7516_vm3 = vmor %vm7514_vm15, %vm7515_vm10  ;;  %v7535_v4 = vand.u32 2147483648, %v7449_v1  ;;  %v7533_v31 = vand.u32 2147483647, %v7449_v1 }
 0x4d1   : > { %v7751_v59 = vmul.f32 %v7507_v42, %v12999_v43  ;;  %v7511_v51 = vsub.f32 1.0, %v7510_v24  ;;  %vm7529_vm14 = vweird.f32 %v7449_v1 }
 0x4d2   : > { %v7349_v44 = vpop.f32.mrf.mxu3  ;;  %v7536_v40 = vor.u32 1.1754944e-38, %v7535_v4  ;;  %vm7534_vm9 = vcmp.eq.f32.partialorder %v7533_v31, 8.507059e+37 }
 0x4d3   : > { %v13016_v58 = vadd.f32 %v12974_v17, %v7349_v44  ;;  %7810 = vmatmul.f32.gmra.mxu2 %v7751_v59  ;;  %v7512_v52 = vmul.f32 %v8772_v36, %v7511_v51 }
 0x4d5   : > { %v8774_v14 = vpop.eup %8773  ;;  %v8614_v3 = vmul.f32 -1.442695, %v13016_v58  ;;  %v7513_v49 = vadd.f32 %v8772_v36, %v7512_v52 }
 0x4d6   : > { %v8776_v29 = vpop.eup %8775  ;;  %v7450_v28 = vadd.f32 1.0, %v8774_v14 }
 0x4d7   : > { %8777 = vpow2.f32 %v8614_v3  ;;  %v7517_v43 = vsel %vm7516_vm3, %v8772_v36, %v7513_v49  ;;  %v7525_v11 = vmul.f32 %v8776_v29, %v7449_v1  ;;  %vm7530_vm0 = vweird.f32 %v8776_v29 }
 0x4d8   : > { %8779 = vrcp.f32 %v7450_v28  ;;  %v7522_v62 = vsel %vm7519_vm1, %v7521_v30, %v7517_v43  ;;  %vm7531_vm13 = vmor %vm7529_vm14, %vm7530_vm0  ;;  %v7550_v45 = vand.u32 2147483648, %v7450_v28  ;;  %v7548_v41 = vand.u32 2147483647, %v7450_v28 }
 0x4d9   : > { %v7752_v53 = vmul.f32 %v7522_v62, %v13003_v27  ;;  %v7526_v2 = vsub.f32 1.0, %v7525_v11  ;;  %vm7544_vm4 = vweird.f32 %v7450_v28 }
 0x4da   : > { %v7352_v38 = vpop.f32.mrf.mxu3  ;;  %v7551_v57 = vor.u32 1.1754944e-38, %v7550_v45  ;;  %vm7549_vm8 = vcmp.eq.f32.partialorder %v7548_v41, 8.507059e+37 }
 0x4db   : > { %v13021_v61 = vadd.f32 %v12974_v17, %v7352_v38  ;;  %7813 = vmatmul.f32.gmra.mxu2 %v7752_v53  ;;  %v7527_v8 = vmul.f32 %v8776_v29, %v7526_v2 }
 0x4dd   : > { %v8778_v9 = vpop.eup %8777  ;;  %v8615_v13 = vmul.f32 -1.442695, %v13021_v61  ;;  %v7528_v33 = vadd.f32 %v8776_v29, %v7527_v8 }
 0x4de   : > { %v8780_v18 = vpop.eup %8779  ;;  %v7451_v47 = vadd.f32 1.0, %v8778_v9 }
 0x4df   : > { %8781 = vpow2.f32 %v8615_v13  ;;  %v7532_v27 = vsel %vm7531_vm13, %v8776_v29, %v7528_v33  ;;  %v7540_v6 = vmul.f32 %v8780_v18, %v7450_v28  ;;  %vm7545_vm2 = vweird.f32 %v8780_v18 }
 0x4e0   : > { %8783 = vrcp.f32 %v7451_v47  ;;  %v7537_v55 = vsel %vm7534_vm9, %v7536_v40, %v7532_v27  ;;  %vm7546_vm6 = vmor %vm7544_vm4, %vm7545_vm2  ;;  %v7565_v12 = vand.u32 2147483648, %v7451_v47  ;;  %v7563_v26 = vand.u32 2147483647, %v7451_v47 }
 0x4e1   : > { %v7753_v23 = vmul.f32 %v7537_v55, %v13007_v22  ;;  %v7541_v0 = vsub.f32 1.0, %v7540_v6  ;;  %vm7559_vm12 = vweird.f32 %v7451_v47 }
 0x4e2   : > { %v7355_v21 = vpop.f32.mrf.mxu3  ;;  %v7566_v24 = vor.u32 1.1754944e-38, %v7565_v12  ;;  %vm7564_vm10 = vcmp.eq.f32.partialorder %v7563_v26, 8.507059e+37 }
 0x4e3   : > { %v13026_v63 = vadd.f32 %v12974_v17, %v7355_v21  ;;  %7816 = vmatmul.f32.gmra.mxu2 %v7753_v23  ;;  %v7542_v35 = vmul.f32 %v8780_v18, %v7541_v0 }
 0x4e5   : > { %v8782_v25 = vpop.eup %8781  ;;  %v8616_v20 = vmul.f32 -1.442695, %v13026_v63  ;;  %v7543_v5 = vadd.f32 %v8780_v18, %v7542_v35 }
 0x4e6   : > { %v8784_v56 = vpop.eup %8783  ;;  %v7452_v54 = vadd.f32 1.0, %v8782_v25 }
 0x4e7   : > { %8785 = vpow2.f32 %v8616_v20  ;;  %v7547_v22 = vsel %vm7546_vm6, %v8780_v18, %v7543_v5  ;;  %v7555_v34 = vmul.f32 %v8784_v56, %v7451_v47  ;;  %vm7560_vm11 = vweird.f32 %v8784_v56 }
 0x4e8   : > { %8787 = vrcp.f32 %v7452_v54  ;;  %v7552_v50 = vsel %vm7549_vm8, %v7551_v57, %v7547_v22  ;;  %vm7561_vm5 = vmor %vm7559_vm12, %vm7560_vm11  ;;  %v7580_v52 = vand.u32 2147483648, %v7452_v54  ;;  %v7578_v3 = vand.u32 2147483647, %v7452_v54 }
 0x4e9   : > { %v7754_v15 = vmul.f32 %v7552_v50, %v13011_v16  ;;  %v7556_v32 = vsub.f32 1.0, %v7555_v34  ;;  %vm7574_vm3 = vweird.f32 %v7452_v54 }
 0x4ea   : > { %v7358_v48 = vpop.f32.mrf.mxu3  ;;  %v7581_v43 = vor.u32 1.1754944e-38, %v7580_v52  ;;  %vm7579_vm0 = vcmp.eq.f32.partialorder %v7578_v3, 8.507059e+37  ;;  %v8256_v3 = vld [vmem:[%s13448_s12 + $0x70] sm:$0xff] }
 0x4eb   : > { %v13031_v10 = vadd.f32 %v12974_v17, %v7358_v48  ;;  %7819 = vmatmul.f32.gmra.mxu2 %v7754_v15  ;;  %v7557_v37 = vmul.f32 %v8784_v56, %v7556_v32 }
 0x4ed   : > { %v8786_v7 = vpop.eup %8785  ;;  %v8617_v36 = vmul.f32 -1.442695, %v13031_v10  ;;  %v7558_v1 = vadd.f32 %v8784_v56, %v7557_v37 }
 0x4ee   : > { %v8788_v60 = vpop.eup %8787  ;;  %v7453_v46 = vadd.f32 1.0, %v8786_v7  ;;  %v8257_v7 = vld [vmem:[%s13448_s12 + $0x78] sm:$0xff] }
 0x4ef   : > { %8789 = vpow2.f32 %v8617_v36  ;;  %v7562_v16 = vsel %vm7561_vm5, %v8784_v56, %v7558_v1  ;;  %v7570_v42 = vmul.f32 %v8788_v60, %v7452_v54  ;;  %vm7575_vm15 = vweird.f32 %v8788_v60  ;;  %8262 = vmatpush.msrb.mxu0 %v8257_v7 }
 0x4f0   : > { %8791 = vrcp.f32 %v7453_v46  ;;  %v7567_v59 = vsel %vm7564_vm10, %v7566_v24, %v7562_v16  ;;  %vm7576_vm1 = vmor %vm7574_vm3, %vm7575_vm15  ;;  %v7593_v8 = vand.u32 2147483647, %v7453_v46  ;;  %v7595_v31 = vand.u32 2147483648, %v7453_v46 }
 0x4f1   : > { %v7755_v51 = vmul.f32 %v7567_v59, %v13016_v58  ;;  %v7571_v44 = vsub.f32 1.0, %v7570_v42  ;;  %vm7589_vm13 = vweird.f32 %v7453_v46  ;;  %8263 = vmatpush.msrb.mxu0 %v8256_v3 }
 0x4f2   : > { %v7361_v19 = vpop.f32.mrf.mxu3  ;;  %v7596_v47 = vor.u32 1.1754944e-38, %v7595_v31  ;;  %vm7594_vm2 = vcmp.eq.f32.partialorder %v7593_v8, 8.507059e+37 }
 0x4f3   : > { %v13036_v39 = vadd.f32 %v12974_v17, %v7361_v19  ;;  %7822 = vmatmul.f32.gmra.mxu2 %v7755_v51  ;;  %v7572_v14 = vmul.f32 %v8788_v60, %v7571_v44 }
 0x4f5   : > { %v8790_v49 = vpop.eup %8789  ;;  %v7573_v29 = vadd.f32 %v8788_v60, %v7572_v14  ;;  %v8618_v11 = vmul.f32 -1.442695, %v13036_v39 }
 0x4f6   : > { %v8792_v28 = vpop.eup %8791  ;;  %v7454_v30 = vadd.f32 1.0, %v8790_v49  ;;  %v8255_v49 = vld [vmem:[%s13448_s12 + $0x68] sm:$0xff] }
 0x4f7   : > { %v7577_v58 = vsel %vm7576_vm1, %v8788_v60, %v7573_v29  ;;  %v7585_v62 = vmul.f32 %v8792_v28, %v7453_v46  ;;  %vm7590_vm14 = vweird.f32 %v8792_v28  ;;  %8264 = vmatpush.msrb.mxu0 %v8255_v49 }
 0x4f8   : > { %8793 = vrcp.f32 %v7454_v30  ;;  %v7582_v53 = vsel %vm7579_vm0, %v7581_v43, %v7577_v58  ;;  %vm7591_vm9 = vmor %vm7589_vm13, %vm7590_vm14  ;;  %v7608_v45 = vand.u32 2147483647, %v7454_v30  ;;  %v7610_v35 = vand.u32 2147483648, %v7454_v30 }
 0x4f9   : > { %v7756_v2 = vmul.f32 %v7582_v53, %v13021_v61  ;;  %v7586_v38 = vsub.f32 1.0, %v7585_v62  ;;  %8795 = vpow2.f32 %v8618_v11  ;;  %vm7604_vm6 = vweird.f32 %v7454_v30 }
 0x4fa   : > { %v7364_v4 = vpop.f32.mrf.mxu3  ;;  %v7611_v56 = vor.u32 1.1754944e-38, %v7610_v35  ;;  %vm7609_vm11 = vcmp.eq.f32.partialorder %v7608_v45, 8.507059e+37 }
 0x4fb   : > { %v13041_v9 = vadd.f32 %v12974_v17, %v7364_v4  ;;  %7825 = vmatmul.f32.gmra.mxu2 %v7756_v2  ;;  %v7587_v13 = vmul.f32 %v8792_v28, %v7586_v38 }
 0x4fd   : > { %v7588_v33 = vadd.f32 %v8792_v28, %v7587_v13  ;;  %v8619_v40 = vmul.f32 -1.442695, %v13041_v9 }
 0x4fe   : > { %v8794_v18 = vpop.eup %8793 }
 0x4ff   : > { %v7592_v27 = vsel %vm7591_vm9, %v8792_v28, %v7588_v33  ;;  %v7600_v61 = vmul.f32 %v8794_v18, %v7454_v30  ;;  %v8796_v55 = vpop.eup %8795  ;;  %8797 = vpow2.f32 %v8619_v40  ;;  %vm7605_vm4 = vweird.f32 %v8794_v18 }
 0x500   : > { %v7597_v6 = vsel %vm7594_vm2, %v7596_v47, %v7592_v27  ;;  %v7455_v20 = vadd.f32 1.0, %v8796_v55  ;;  %vm7606_vm8 = vmor %vm7604_vm6, %vm7605_vm4  ;;  %v8254_v47 = vld [vmem:[%s13448_s12 + $0x60] sm:$0xff] }
 0x501   : > { %v7757_v23 = vmul.f32 %v7597_v6, %v13026_v63  ;;  %v7601_v0 = vsub.f32 1.0, %v7600_v61  ;;  %8265 = vmatpush.msrb.mxu0 %v8254_v47 }
 0x502   : > { %v7367_v21 = vpop.f32.mrf.mxu3  ;;  %8799 = vrcp.f32 %v7455_v20  ;;  %v7625_v46 = vand.u32 2147483648, %v7455_v20  ;;  %v7623_v42 = vand.u32 2147483647, %v7455_v20  ;;  %vm7619_vm5 = vweird.f32 %v7455_v20 }
 0x503   : > { %v13046_v41 = vadd.f32 %v12974_v17, %v7367_v21  ;;  %7828 = vmatmul.f32.gmra.mxu2 %v7757_v23  ;;  %v7602_v25 = vmul.f32 %v8794_v18, %v7601_v0 }
 0x504   : > { %v7626_v19 = vor.u32 1.1754944e-38, %v7625_v46  ;;  %vm7624_vm15 = vcmp.eq.f32.partialorder %v7623_v42, 8.507059e+37 }
 0x505   : > { %v7603_v5 = vadd.f32 %v8794_v18, %v7602_v25  ;;  %v8620_v54 = vmul.f32 -1.442695, %v13046_v41  ;;  %v8798_v22 = vpop.eup %8797 }
 0x506   : > { %v7456_v32 = vadd.f32 1.0, %v8798_v22 }
 0x507   : > { %v7607_v57 = vsel %vm7606_vm8, %v8794_v18, %v7603_v5  ;;  %8801 = vpow2.f32 %v8620_v54 }
 0x508   : > { %v7612_v63 = vsel %vm7609_vm11, %v7611_v56, %v7607_v57  ;;  %v8800_v12 = vpop.eup %8799  ;;  %8803 = vrcp.f32 %v7456_v32  ;;  %v7640_v62 = vand.u32 2147483648, %v7456_v32  ;;  %v7638_v4 = vand.u32 2147483647, %v7456_v32 }
 0x509   : > { %v7758_v34 = vmul.f32 %v7612_v63, %v13031_v10  ;;  %v7615_v26 = vmul.f32 %v8800_v12, %v7455_v20  ;;  %vm7620_vm12 = vweird.f32 %v8800_v12  ;;  %vm7634_vm1 = vweird.f32 %v7456_v32 }
 0x50a   : > { %v7370_v50 = vpop.f32.mrf.mxu3  ;;  %vm7621_vm10 = vmor %vm7619_vm5, %vm7620_vm12  ;;  %v7641_v13 = vor.u32 1.1754944e-38, %v7640_v62  ;;  %vm7639_vm14 = vcmp.eq.f32.partialorder %v7638_v4, 8.507059e+37 }
 0x50b   : > { %v13051_v15 = vadd.f32 %v12974_v17, %v7370_v50  ;;  %7831 = vmatmul.f32.gmra.mxu2 %v7758_v34  ;;  %v7616_v1 = vsub.f32 1.0, %v7615_v26  ;;  %v8253_v34 = vld [vmem:[%s13448_s12 + $0x58] sm:$0xff]  ;;  %v8252_v50 = vld [vmem:[%s13448_s12 + $0x50] sm:$0xff] }
 0x50c   : > { %8266 = vmatpush.msrb.mxu0 %v8253_v34  ;;  %v8247_v34 = vld [vmem:[%s13448_s12 + $0x28] sm:$0xff] }
 0x50d   : > { %v8621_v48 = vmul.f32 -1.442695, %v13051_v15  ;;  %v8802_v37 = vpop.eup %8801  ;;  %v7617_v16 = vmul.f32 %v8800_v12, %v7616_v1 }
 0x50e   : > { %v13060_v60 = vadd.f32 1.0, %v8802_v37  ;;  %v8804_v59 = vpop.eup %8803  ;;  %8267 = vmatpush.msrb.mxu0 %v8252_v50 }
 0x50f   : > { %8805 = vpow2.f32 %v8621_v48  ;;  %v7618_v44 = vadd.f32 %v8800_v12, %v7617_v16  ;;  %v7630_v14 = vmul.f32 %v8804_v59, %v7456_v32  ;;  %vm7635_vm3 = vweird.f32 %v8804_v59 }
 0x510   : > { %vm7636_vm0 = vmor %vm7634_vm1, %vm7635_vm3  ;;  %v7655_v0 = vand.u32 2147483648, %v13060_v60  ;;  %v7653_v25 = vand.u32 2147483647, %v13060_v60  ;;  %vm7649_vm9 = vweird.f32 %v13060_v60 }
 0x511   : > { %v7622_v52 = vsel %vm7621_vm10, %v8800_v12, %v7618_v44  ;;  %v7631_v58 = vsub.f32 1.0, %v7630_v14 }
 0x512   : > { %v7373_v36 = vpop.f32.mrf.mxu3  ;;  %v7627_v28 = vsel %vm7624_vm15, %v7626_v19, %v7622_v52  ;;  %v7656_v54 = vor.u32 1.1754944e-38, %v7655_v0  ;;  %vm7654_vm4 = vcmp.eq.f32.partialorder %v7653_v25, 8.507059e+37  ;;  %v8251_v19 = vld [vmem:[%s13448_s12 + $0x48] sm:$0xff]  ;;  %v8250_v52 = vld [vmem:[%s13448_s12 + $0x40] sm:$0xff] }
 0x513   : > { %v13058_v10 = vadd.f32 %v12974_v17, %v7373_v36  ;;  %v7759_v43 = vmul.f32 %v7627_v28, %v13036_v39  ;;  %v7632_v38 = vmul.f32 %v8804_v59, %v7631_v58  ;;  %8268 = vmatpush.msrb.mxu0 %v8251_v19  ;;  %v8242_v19 = vld [vmem:[%s13448_s12] sm:$0xff] }
 0x515   : > { %v8622_v24 = vmul.f32 -1.442695, %v13058_v10  ;;  %v8806_v51 = vpop.eup %8805  ;;  %7834 = vmatmul.f32.gmra.mxu2 %v7759_v43  ;;  %v7633_v39 = vadd.f32 %v8804_v59, %v7632_v38  ;;  %v8249_v43 = vld [vmem:[%s13448_s12 + $0x38] sm:$0xff]  ;;  %8269 = vmatpush.msrb.mxu0 %v8250_v52 }
 0x516   : > { %v13070_v29 = vadd.f32 1.0, %v8806_v51 }
 0x517   : > { %8807 = vpow2.f32 %v8622_v24  ;;  %v7637_v33 = vsel %vm7636_vm0, %v8804_v59, %v7633_v39  ;;  %8270 = vmatpush.msrb.mxu0 %v8249_v43 }
 0x518   : > { %8809 = vrcp.f32 %v13060_v60  ;;  %v7642_v40 = vsel %vm7639_vm14, %v7641_v13, %v7637_v33  ;;  %v7670_v16 = vand.u32 2147483648, %v13070_v29  ;;  %v7668_v42 = vand.u32 2147483647, %v13070_v29 }
 0x519   : > { %8811 = vrcp.f32 %v13070_v29  ;;  %v7760_v61 = vmul.f32 %v7642_v40, %v13041_v9  ;;  %vm7664_vm11 = vweird.f32 %v13070_v29 }
 0x51a   : > { %v7376_v30 = vpop.f32.mrf.mxu3  ;;  %v7671_v3 = vor.u32 1.1754944e-38, %v7670_v16  ;;  %vm7669_vm10 = vcmp.eq.f32.partialorder %v7668_v42, 8.507059e+37 }
 0x51b   : > { %v13074_v11 = vadd.f32 %v12974_v17, %v7376_v30 }
 0x51d   : > { %v8808_v53 = vpop.eup %8807  ;;  %v8623_v2 = vmul.f32 -1.442695, %v13074_v11  ;;  %7837 = vmatmul.f32.gmra.mxu2 %v7760_v61 }
 0x51e   : > { %v8810_v8 = vpop.eup %8809  ;;  %v13078_v31 = vadd.f32 1.0, %v8808_v53 }
 0x51f   : > { %8813 = vpow2.f32 %v8623_v2  ;;  %v7645_v18 = vmul.f32 %v8810_v8, %v13060_v60  ;;  %v13089_v23 = vpop.eup %8811  ;;  %vm7650_vm13 = vweird.f32 %v8810_v8 }
 0x520   : > { %8815 = vrcp.f32 %v13078_v31  ;;  %vm7651_vm2 = vmor %vm7649_vm9, %vm7650_vm13  ;;  %v7660_v22 = vmul.f32 %v13089_v23, %v13070_v29  ;;  %vm7665_vm6 = vweird.f32 %v13089_v23  ;;  %vm7679_vm12 = vweird.f32 %v13078_v31 }
 0x521   : > { %v7646_v55 = vsub.f32 1.0, %v7645_v18  ;;  %v7685_v14 = vand.u32 2147483648, %v13078_v31  ;;  %vm7666_vm5 = vmor %vm7664_vm11, %vm7665_vm6  ;;  %v7683_v28 = vand.u32 2147483647, %v13078_v31 }
 0x522   : > { %v7379_v27 = vpop.f32.mrf.mxu3  ;;  %v7661_v26 = vsub.f32 1.0, %v7660_v22 }
 0x523   : > { %v13087_v6 = vadd.f32 %v12974_v17, %v7379_v27  ;;  %v7647_v35 = vmul.f32 %v8810_v8, %v7646_v55  ;;  %v7686_v39 = vor.u32 1.1754944e-38, %v7685_v14  ;;  %vm7684_vm3 = vcmp.eq.f32.partialorder %v7683_v28, 8.507059e+37 }
 0x524   : > { %v7662_v60 = vmul.f32 %v13089_v23, %v7661_v26 }
 0x525   : > { %v8814_v21 = vpop.eup %8813  ;;  %v8624_v45 = vmul.f32 -1.442695, %v13087_v6  ;;  %v7648_v56 = vadd.f32 %v8810_v8, %v7647_v35 }
 0x526   : > { %v13094_v20 = vpop.eup %8815  ;;  %v13096_v5 = vadd.f32 1.0, %v8814_v21  ;;  %v7663_v44 = vadd.f32 %v13089_v23, %v7662_v60 }
 0x527   : > { %v7675_v9 = vmul.f32 %v13094_v20, %v13078_v31  ;;  %8817 = vpow2.f32 %v8624_v45  ;;  %v7652_v63 = vsel %vm7651_vm2, %v8810_v8, %v7648_v56  ;;  %vm7680_vm8 = vweird.f32 %v13094_v20  ;;  %v8248_v8 = vld [vmem:[%s13448_s12 + $0x30] sm:$0xff] }
 0x528   : > { %8819 = vrcp.f32 %v13096_v5  ;;  %v7657_v32 = vsel %vm7654_vm4, %v7656_v54, %v7652_v63  ;;  %v7667_v29 = vsel %vm7666_vm5, %v13089_v23, %v7663_v44  ;;  %vm13149_vm15 = vmor %vm7679_vm12, %vm7680_vm8  ;;  %8271 = vmatpush.msrb.mxu0 %v8248_v8  ;;  %v7700_v40 = vand.u32 2147483648, %v13096_v5 }
 0x529   : > { %v7676_v57 = vsub.f32 1.0, %v7675_v9  ;;  %v7761_v12 = vmul.f32 %v7657_v32, %v13046_v41  ;;  %v7672_v62 = vsel %vm7669_vm10, %v7671_v3, %v7667_v29  ;;  %vm7694_vm0 = vweird.f32 %v13096_v5 }
 0x52a   : > { %v7382_v48 = vpop.f32.mrf.mxu3  ;;  %v7762_v38 = vmul.f32 %v7672_v62, %v13051_v15  ;;  %v7698_v61 = vand.u32 2147483647, %v13096_v5  ;;  %v7701_v45 = vor.u32 1.1754944e-38, %v7700_v40  ;;  %8272 = vmatpush.msrb.mxu0 %v8247_v34 }
 0x52b   : > { %v13112_v37 = vadd.f32 %v12974_v17, %v7382_v48  ;;  %v7677_v36 = vmul.f32 %v13094_v20, %v7676_v57  ;;  %7840 = vmatmul.f32.gmra.mxu2 %v7761_v12  ;;  %v13184_v57 = vld [vmem:[%s13447_s11] ss:$0 sm:$0xff] }
 0x52c   : > { %vm7699_vm13 = vcmp.eq.f32.partialorder %v7698_v61, 8.507059e+37 }
 0x52d   : > { %v8818_v7 = vpop.eup %8817  ;;  %v8625_v1 = vmul.f32 -1.442695, %v13112_v37  ;;  %v7678_v59 = vadd.f32 %v13094_v20, %v7677_v36 }
 0x52e   : > { %v13117_v46 = vpop.eup %8819  ;;  %v13119_v24 = vadd.f32 1.0, %v8818_v7  ;;  %v8245_v7 = vld [vmem:[%s13448_s12 + $0x18] sm:$0xff] }
 0x52f   : > { %v7690_v41 = vmul.f32 %v13117_v46, %v13096_v5  ;;  %8821 = vpow2.f32 %v8625_v1  ;;  %v7682_v2 = vsel %vm13149_vm15, %v13094_v20, %v7678_v59  ;;  %vm7695_vm1 = vweird.f32 %v13117_v46  ;;  %v8243_v59 = vld [vmem:[%s13448_s12 + $0x8] sm:$0xff] }
 0x530   : > { %8823 = vrcp.f32 %v13119_v24  ;;  %v7687_v18 = vsel %vm7684_vm3, %v7686_v39, %v7682_v2  ;;  %vm7696_vm14 = vmor %vm7694_vm0, %vm7695_vm1  ;;  %v7715_v5 = vand.u32 2147483648, %v13119_v24  ;;  %vm7709_vm2 = vweird.f32 %v13119_v24 }
 0x531   : > { %v7691_v51 = vsub.f32 1.0, %v7690_v41  ;;  %v7763_v27 = vmul.f32 %v7687_v18, %v13058_v10  ;;  %v7713_v54 = vand.u32 2147483647, %v13119_v24 }
 0x532   : > { %v7385_v49 = vpop.f32.mrf.mxu3  ;;  %v7716_v32 = vor.u32 1.1754944e-38, %v7715_v5 }
 0x533   : > { %v13142_v30 = vadd.f32 %v12974_v17, %v7385_v49  ;;  %v7692_v17 = vmul.f32 %v13117_v46, %v7691_v51  ;;  %7843 = vmatmul.f32.gmra.mxu2 %v7762_v38  ;;  %vm7714_vm6 = vcmp.eq.f32.partialorder %v7713_v54, 8.507059e+37 }
 0x535   : > { %v8822_v53 = vpop.eup %8821  ;;  %v8626_v4 = vmul.f32 -1.442695, %v13142_v30  ;;  %v7693_v15 = vadd.f32 %v13117_v46, %v7692_v17 }
 0x536   : > { %v8824_v31 = vpop.eup %8823  ;;  %v13162_v13 = vadd.f32 1.0, %v8822_v53 }
 0x537   : > { %v7705_v33 = vmul.f32 %v8824_v31, %v13119_v24  ;;  %8825 = vpow2.f32 %v8626_v4  ;;  %v7697_v23 = vsel %vm7696_vm14, %v13117_v46, %v7693_v15  ;;  %vm7710_vm9 = vweird.f32 %v8824_v31  ;;  %v8244_v24 = vld [vmem:[%s13448_s12 + $0x10] sm:$0xff] }
 0x538   : > { %8827 = vrcp.f32 %v13162_v13  ;;  %v7702_v20 = vsel %vm7699_vm13, %v7701_v45, %v7697_v23  ;;  %vm7711_vm4 = vmor %vm7709_vm2, %vm7710_vm9  ;;  %v7730_v16 = vand.u32 2147483648, %v13162_v13  ;;  %vm7724_vm11 = vweird.f32 %v13162_v13 }
 0x539   : > { %v7706_v47 = vsub.f32 1.0, %v7705_v33  ;;  %v7764_v56 = vmul.f32 %v7702_v20, %v13074_v11  ;;  %v8246_v11 = vld [vmem:[%s13448_s12 + $0x20] sm:$0xff]  ;;  %v7728_v42 = vand.u32 2147483647, %v13162_v13 }
 0x53a   : > { %8273 = vmatpush.msrb.mxu0 %v8246_v11  ;;  %v7731_v52 = vor.u32 1.1754944e-38, %v7730_v16 }
 0x53b   : > { %v7707_v0 = vmul.f32 %v8824_v31, %v7706_v47  ;;  %7846 = vmatmul.f32.gmra.mxu2 %v7763_v27  ;;  %vm7729_vm5 = vcmp.eq.f32.partialorder %v7728_v42, 8.507059e+37 }
 0x53c   : > { %8274 = vmatpush.msrb.mxu0 %v8245_v7 }
 0x53d   : > { %v8826_v55 = vpop.eup %8825  ;;  %v7708_v10 = vadd.f32 %v8824_v31, %v7707_v0 }
 0x53e   : > { %v8828_v21 = vpop.eup %8827  ;;  %v13173_v35 = vadd.f32 1.0, %v8826_v55  ;;  %8275 = vmatpush.msrb.mxu0 %v8244_v24 }
 0x53f   : > { %v7720_v25 = vmul.f32 %v8828_v21, %v13162_v13  ;;  %v7712_v63 = vsel %vm7711_vm4, %v8824_v31, %v7708_v10  ;;  %vm7725_vm8 = vweird.f32 %v8828_v21 }
 0x540   : > { %8829 = vrcp.f32 %v13173_v35  ;;  %v7717_v36 = vsel %vm7714_vm6, %v7716_v32, %v7712_v63  ;;  %vm7726_vm12 = vmor %vm7724_vm11, %vm7725_vm8  ;;  %8276 = vmatpush.msrb.mxu0 %v8243_v59  ;;  %v7745_v43 = vand.u32 2147483648, %v13173_v35  ;;  %vm7739_vm15 = vweird.f32 %v13173_v35 }
 0x541   : > { %v7721_v9 = vsub.f32 1.0, %v7720_v25  ;;  %v7765_v41 = vmul.f32 %v7717_v36, %v13087_v6  ;;  %v7743_v53 = vand.u32 2147483647, %v13173_v35 }
 0x542   : > { %8277 = vmatpush.msrb.mxu0 %v8242_v19  ;;  %v7746_v17 = vor.u32 1.1754944e-38, %v7745_v43 }
 0x543   : > { %v7722_v22 = vmul.f32 %v8828_v21, %v7721_v9  ;;  %7849 = vmatmul.f32.gmra.mxu2 %v7764_v56  ;;  %vm7744_vm1 = vcmp.eq.f32.partialorder %v7743_v53, 8.507059e+37 }
 0x545   : > { %v7723_v1 = vadd.f32 %v8828_v21, %v7722_v22 }
 0x546   : > { %v8830_v50 = vpop.eup %8829  ;;  %v7805_v48 = vpop.f32.mrf.mxu2 }
 0x547   : > { %v7735_v12 = vmul.f32 %v8830_v50, %v13173_v35  ;;  %v13194_v26 = vadd.f32 %v13184_v57, %v7805_v48  ;;  %v7727_v51 = vsel %vm7726_vm12, %v8828_v21, %v7723_v1  ;;  %vm7740_vm10 = vweird.f32 %v8830_v50 }
 0x548   : > { %v7732_v3 = vsel %vm7729_vm5, %v7731_v52, %v7727_v51  ;;  %vm7741_vm3 = vmor %vm7739_vm15, %vm7740_vm10 }
 0x549   : > { %v7736_v60 = vsub.f32 1.0, %v7735_v12  ;;  %v8627_v46 = vmul.f32 -1.442695, %v13194_v26  ;;  %v7766_v62 = vmul.f32 %v7732_v3, %v13112_v37 }
 0x54b   : > { %8831 = vpow2.f32 %v8627_v46  ;;  %v7737_v44 = vmul.f32 %v8830_v50, %v7736_v60  ;;  %7852 = vmatmul.f32.gmra.mxu2 %v7765_v41 }
 0x54d   : > { %v7738_v28 = vadd.f32 %v8830_v50, %v7737_v44 }
 0x54e   : > { %v7808_v14 = vpop.f32.mrf.mxu2 }
 0x54f   : > { %v13214_v6 = vadd.f32 %v13184_v57, %v7808_v14  ;;  %v7742_v2 = vsel %vm7741_vm3, %v8830_v50, %v7738_v28 }
 0x550   : > { %v7747_v8 = vsel %vm7744_vm1, %v7746_v17, %v7742_v2 }
 0x551   : > { %v8832_v49 = vpop.eup %8831  ;;  %v8628_v29 = vmul.f32 -1.442695, %v13214_v6  ;;  %v7767_v33 = vmul.f32 %v7747_v8, %v13142_v30 }
 0x552   : > { %v7919_v58 = vadd.f32 1.0, %v8832_v49 }
 0x553   : > { %8833 = vpow2.f32 %v8628_v29  ;;  %7855 = vmatmul.f32.gmra.mxu2 %v7766_v62 }
 0x554   : > { %8835 = vrcp.f32 %v7919_v58  ;;  %v7949_v47 = vand.u32 2147483648, %v7919_v58  ;;  %v7947_v61 = vand.u32 2147483647, %v7919_v58  ;;  %vm7943_vm14 = vweird.f32 %v7919_v58 }
 0x556   : > { %v7811_v38 = vpop.f32.mrf.mxu2  ;;  %v7950_v30 = vor.u32 1.1754944e-38, %v7949_v47  ;;  %vm7948_vm9 = vcmp.eq.f32.partialorder %v7947_v61, 8.507059e+37 }
 0x557   : > { %v13222_v4 = vadd.f32 %v13184_v57, %v7811_v38 }
 0x559   : > { %v8834_v31 = vpop.eup %8833  ;;  %v8629_v39 = vmul.f32 -1.442695, %v13222_v4 }
 0x55a   : > { %v8836_v37 = vpop.eup %8835  ;;  %v7920_v13 = vadd.f32 1.0, %v8834_v31 }
 0x55b   : > { %v7939_v18 = vmul.f32 %v8836_v37, %v7919_v58  ;;  %8837 = vpow2.f32 %v8629_v39  ;;  %vm7944_vm0 = vweird.f32 %v8836_v37  ;;  %7858 = vmatmul.f32.gmra.mxu2 %v7767_v33 }
 0x55c   : > { %8839 = vrcp.f32 %v7920_v13  ;;  %vm7945_vm13 = vmor %vm7943_vm14, %vm7944_vm0  ;;  %v7964_v54 = vand.u32 2147483648, %v7920_v13  ;;  %v7962_v34 = vand.u32 2147483647, %v7920_v13  ;;  %vm7958_vm4 = vweird.f32 %v7920_v13 }
 0x55d   : > { %v7940_v15 = vsub.f32 1.0, %v7939_v18 }
 0x55e   : > { %v7814_v40 = vpop.f32.mrf.mxu2  ;;  %v7965_v7 = vor.u32 1.1754944e-38, %v7964_v54  ;;  %vm7963_vm8 = vcmp.eq.f32.partialorder %v7962_v34, 8.507059e+37 }
 0x55f   : > { %v7941_v27 = vmul.f32 %v8836_v37, %v7940_v15  ;;  %v13227_v55 = vadd.f32 %v13184_v57, %v7814_v40 }
 0x561   : > { %v8838_v23 = vpop.eup %8837  ;;  %v7942_v0 = vadd.f32 %v8836_v37, %v7941_v27  ;;  %v8630_v21 = vmul.f32 -1.442695, %v13227_v55 }
 0x562   : > { %v8840_v45 = vpop.eup %8839  ;;  %v7921_v35 = vadd.f32 1.0, %v8838_v23 }
 0x563   : > { %v7946_v25 = vsel %vm7945_vm13, %v8836_v37, %v7942_v0  ;;  %8841 = vpow2.f32 %v8630_v21  ;;  %v7954_v20 = vmul.f32 %v8840_v45, %v7920_v13  ;;  %vm7959_vm2 = vweird.f32 %v8840_v45 }
 0x564   : > { %v7951_v10 = vsel %vm7948_vm9, %v7950_v30, %v7946_v25  ;;  %8843 = vrcp.f32 %v7921_v35  ;;  %vm7960_vm6 = vmor %vm7958_vm4, %vm7959_vm2  ;;  %v7979_v16 = vand.u32 2147483648, %v7921_v35  ;;  %v7977_v59 = vand.u32 2147483647, %v7921_v35 }
 0x565   : > { %v8223_v9 = vmul.f32 %v7951_v10, %v13194_v26  ;;  %v7955_v5 = vsub.f32 1.0, %v7954_v20  ;;  %vm7973_vm12 = vweird.f32 %v7921_v35 }
 0x566   : > { %v7817_v56 = vpop.f32.mrf.mxu2  ;;  %v7980_v3 = vor.u32 1.1754944e-38, %v7979_v16  ;;  %vm7978_vm10 = vcmp.eq.f32.partialorder %v7977_v59, 8.507059e+37 }
 0x567   : > { %v13232_v63 = vadd.f32 %v13184_v57, %v7817_v56  ;;  %8278 = vmatmul.f32.vlgmr.msrb.gmra.mxu0 %v8223_v9  ;;  %v7956_v22 = vmul.f32 %v8840_v45, %v7955_v5 }
 0x569   : > { %v8842_v11 = vpop.eup %8841  ;;  %v8631_v50 = vmul.f32 -1.442695, %v13232_v63  ;;  %v7957_v32 = vadd.f32 %v8840_v45, %v7956_v22 }
 0x56a   : > { %v8844_v48 = vpop.eup %8843  ;;  %v7922_v12 = vadd.f32 1.0, %v8842_v11 }
 0x56b   : > { %8845 = vpow2.f32 %v8631_v50  ;;  %v7961_v26 = vsel %vm7960_vm6, %v8840_v45, %v7957_v32  ;;  %v7969_v36 = vmul.f32 %v8844_v48, %v7921_v35  ;;  %vm7974_vm11 = vweird.f32 %v8844_v48 }
 0x56c   : > { %8847 = vrcp.f32 %v7922_v12  ;;  %v7966_v1 = vsel %vm7963_vm8, %v7965_v7, %v7961_v26  ;;  %vm7975_vm5 = vmor %vm7973_vm12, %vm7974_vm11  ;;  %v7994_v62 = vand.u32 2147483648, %v7922_v12  ;;  %v7992_v17 = vand.u32 2147483647, %v7922_v12 }
 0x56d   : > { %v8224_v60 = vmul.f32 %v7966_v1, %v13214_v6  ;;  %v7970_v46 = vsub.f32 1.0, %v7969_v36  ;;  %vm7988_vm3 = vweird.f32 %v7922_v12 }
 0x56e   : > { %v7820_v24 = vpop.f32.mrf.mxu2  ;;  %v7995_v13 = vor.u32 1.1754944e-38, %v7994_v62  ;;  %vm7993_vm0 = vcmp.eq.f32.partialorder %v7992_v17, 8.507059e+37 }
 0x56f   : > { %v13237_v41 = vadd.f32 %v13184_v57, %v7820_v24  ;;  %8281 = vmatmul.f32.gmra.mxu0 %v8224_v60  ;;  %v7971_v42 = vmul.f32 %v8844_v48, %v7970_v46 }
 0x571   : > { %v8846_v51 = vpop.eup %8845  ;;  %v8632_v44 = vmul.f32 -1.442695, %v13237_v41  ;;  %v7972_v19 = vadd.f32 %v8844_v48, %v7971_v42 }
 0x572   : > { %v8848_v52 = vpop.eup %8847  ;;  %v7923_v14 = vadd.f32 1.0, %v8846_v51 }
 0x573   : > { %8849 = vpow2.f32 %v8632_v44  ;;  %v7976_v6 = vsel %vm7975_vm5, %v8844_v48, %v7972_v19  ;;  %v7984_v49 = vmul.f32 %v8848_v52, %v7922_v12  ;;  %vm7989_vm15 = vweird.f32 %v8848_v52 }
 0x574   : > { %8851 = vrcp.f32 %v7923_v14  ;;  %v7981_v28 = vsel %vm7978_vm10, %v7980_v3, %v7976_v6  ;;  %vm7990_vm1 = vmor %vm7988_vm3, %vm7989_vm15  ;;  %v8009_v27 = vand.u32 2147483648, %v7923_v14  ;;  %v8007_v0 = vand.u32 2147483647, %v7923_v14 }
 0x575   : > { %v8225_v29 = vmul.f32 %v7981_v28, %v13222_v4  ;;  %v7985_v43 = vsub.f32 1.0, %v7984_v49  ;;  %vm8003_vm13 = vweird.f32 %v7923_v14 }
 0x576   : > { %v7823_v58 = vpop.f32.mrf.mxu2  ;;  %v8010_v20 = vor.u32 1.1754944e-38, %v8009_v27  ;;  %vm8008_vm2 = vcmp.eq.f32.partialorder %v8007_v0, 8.507059e+37 }
 0x577   : > { %v13242_v53 = vadd.f32 %v13184_v57, %v7823_v58  ;;  %8284 = vmatmul.f32.gmra.mxu0 %v8225_v29  ;;  %v7986_v2 = vmul.f32 %v8848_v52, %v7985_v43 }
 0x579   : > { %v8850_v38 = vpop.eup %8849  ;;  %v8633_v8 = vmul.f32 -1.442695, %v13242_v53  ;;  %v7987_v31 = vadd.f32 %v8848_v52, %v7986_v2 }
 0x57a   : > { %v8852_v39 = vpop.eup %8851  ;;  %v7924_v37 = vadd.f32 1.0, %v8850_v38 }
 0x57b   : > { %8853 = vpow2.f32 %v8633_v8  ;;  %v7991_v4 = vsel %vm7990_vm1, %v8848_v52, %v7987_v31  ;;  %v7999_v33 = vmul.f32 %v8852_v39, %v7923_v14  ;;  %vm8004_vm14 = vweird.f32 %v8852_v39 }
 0x57c   : > { %8855 = vrcp.f32 %v7924_v37  ;;  %v7996_v18 = vsel %vm7993_vm0, %v7995_v13, %v7991_v4  ;;  %vm8005_vm9 = vmor %vm8003_vm13, %vm8004_vm14  ;;  %v8024_v22 = vand.u32 2147483648, %v7924_v37  ;;  %v8022_v50 = vand.u32 2147483647, %v7924_v37 }
 0x57d   : > { %v8226_v15 = vmul.f32 %v7996_v18, %v13227_v55  ;;  %v8000_v47 = vsub.f32 1.0, %v7999_v33  ;;  %vm8018_vm6 = vweird.f32 %v7924_v37 }
 0x57e   : > { %v7826_v40 = vpop.f32.mrf.mxu2  ;;  %v8025_v26 = vor.u32 1.1754944e-38, %v8024_v22  ;;  %vm8023_vm11 = vcmp.eq.f32.partialorder %v8022_v50, 8.507059e+37 }
 0x57f   : > { %v13247_v61 = vadd.f32 %v13184_v57, %v7826_v40  ;;  %8287 = vmatmul.f32.gmra.mxu0 %v8226_v15  ;;  %v8001_v23 = vmul.f32 %v8852_v39, %v8000_v47 }
 0x581   : > { %v8854_v21 = vpop.eup %8853  ;;  %v8634_v45 = vmul.f32 -1.442695, %v13247_v61  ;;  %v8002_v30 = vadd.f32 %v8852_v39, %v8001_v23 }
 0x582   : > { %v8856_v35 = vpop.eup %8855  ;;  %v7925_v25 = vadd.f32 1.0, %v8854_v21 }
 0x583   : > { %8857 = vpow2.f32 %v8634_v45  ;;  %v8006_v55 = vsel %vm8005_vm9, %v8852_v39, %v8002_v30  ;;  %v8014_v10 = vmul.f32 %v8856_v35, %v7924_v37  ;;  %vm8019_vm4 = vweird.f32 %v8856_v35 }
 0x584   : > { %v8011_v9 = vsel %vm8008_vm2, %v8010_v20, %v8006_v55  ;;  %8859 = vrcp.f32 %v7925_v25  ;;  %vm8020_vm8 = vmor %vm8018_vm6, %vm8019_vm4  ;;  %v8039_v44 = vand.u32 2147483648, %v7925_v25  ;;  %v8037_v14 = vand.u32 2147483647, %v7925_v25 }
 0x585   : > { %v8227_v5 = vmul.f32 %v8011_v9, %v13232_v63  ;;  %v8015_v56 = vsub.f32 1.0, %v8014_v10  ;;  %vm8033_vm5 = vweird.f32 %v7925_v25 }
 0x586   : > { %v7829_v54 = vpop.f32.mrf.mxu2  ;;  %vm8038_vm15 = vcmp.eq.f32.partialorder %v8037_v14, 8.507059e+37 }
 0x587   : > { %v13252_v34 = vadd.f32 %v13184_v57, %v7829_v54  ;;  %8290 = vmatmul.f32.gmra.mxu0 %v8227_v5  ;;  %v8016_v11 = vmul.f32 %v8856_v35, %v8015_v56 }
 0x589   : > { %v8858_v32 = vpop.eup %8857  ;;  %v8635_v48 = vmul.f32 -1.442695, %v13252_v34  ;;  %v8017_v12 = vadd.f32 %v8856_v35, %v8016_v11 }
 0x58a   : > { %v7926_v7 = vadd.f32 1.0, %v8858_v32  ;;  %v8860_v36 = vpop.eup %8859 }
 0x58b   : > { %8861 = vpow2.f32 %v8635_v48  ;;  %v8021_v63 = vsel %vm8020_vm8, %v8856_v35, %v8017_v12  ;;  %v8029_v24 = vmul.f32 %v8860_v36, %v7925_v25  ;;  %vm8034_vm12 = vweird.f32 %v8860_v36 }
 0x58c   : > { %v8026_v1 = vsel %vm8023_vm11, %v8025_v26, %v8021_v63  ;;  %8863 = vrcp.f32 %v7926_v7  ;;  %vm8035_vm10 = vmor %vm8033_vm5, %vm8034_vm12  ;;  %v8054_v2 = vand.u32 2147483648, %v7926_v7  ;;  %v8052_v38 = vand.u32 2147483647, %v7926_v7 }
 0x58d   : > { %v8228_v60 = vmul.f32 %v8026_v1, %v13237_v41  ;;  %v8030_v42 = vsub.f32 1.0, %v8029_v24  ;;  %v8040_v41 = vor.u32 1.1754944e-38, %v8039_v44  ;;  %vm8048_vm1 = vweird.f32 %v7926_v7 }
 0x58e   : > { %v7832_v46 = vpop.f32.mrf.mxu2  ;;  %v8055_v37 = vor.u32 1.1754944e-38, %v8054_v2  ;;  %vm8053_vm14 = vcmp.eq.f32.partialorder %v8052_v38, 8.507059e+37 }
 0x58f   : > { %v13257_v16 = vadd.f32 %v13184_v57, %v7832_v46  ;;  %8293 = vmatmul.f32.gmra.mxu0 %v8228_v60  ;;  %v8031_v52 = vmul.f32 %v8860_v36, %v8030_v42 }
 0x591   : > { %v8862_v59 = vpop.eup %8861  ;;  %v8636_v51 = vmul.f32 -1.442695, %v13257_v16  ;;  %v8032_v6 = vadd.f32 %v8860_v36, %v8031_v52 }
 0x592   : > { %v7927_v19 = vadd.f32 1.0, %v8862_v59  ;;  %v8864_v3 = vpop.eup %8863 }
 0x593   : > { %8865 = vpow2.f32 %v8636_v51  ;;  %v8036_v49 = vsel %vm8035_vm10, %v8860_v36, %v8032_v6  ;;  %v8044_v28 = vmul.f32 %v8864_v3, %v7926_v7  ;;  %vm8049_vm3 = vweird.f32 %v8864_v3 }
 0x594   : > { %8867 = vrcp.f32 %v7927_v19  ;;  %v8041_v29 = vsel %vm8038_vm15, %v8040_v41, %v8036_v49  ;;  %vm8050_vm0 = vmor %vm8048_vm1, %vm8049_vm3  ;;  %v8069_v47 = vand.u32 2147483648, %v7927_v19  ;;  %v8067_v27 = vand.u32 2147483647, %v7927_v19 }
 0x595   : > { %v8229_v43 = vmul.f32 %v8041_v29, %v13242_v53  ;;  %v8045_v58 = vsub.f32 1.0, %v8044_v28  ;;  %vm8063_vm9 = vweird.f32 %v7927_v19 }
 0x596   : > { %v8070_v45 = vor.u32 1.1754944e-38, %v8069_v47  ;;  %vm8068_vm4 = vcmp.eq.f32.partialorder %v8067_v27, 8.507059e+37 }
 0x597   : > { %8296 = vmatmul.f32.gmra.mxu0 %v8229_v43  ;;  %v8046_v17 = vmul.f32 %v8864_v3, %v8045_v58 }
 0x598   : > { %v7835_v18 = vpop.f32.mrf.mxu2 }
 0x599   : > { %v8866_v62 = vpop.eup %8865  ;;  %v8047_v39 = vadd.f32 %v8864_v3, %v8046_v17  ;;  %v13263_v23 = vadd.f32 %v13184_v57, %v7835_v18 }
 0x59a   : > { %v8868_v8 = vpop.eup %8867  ;;  %v7928_v31 = vadd.f32 1.0, %v8866_v62 }
 0x59b   : > { %v8051_v13 = vsel %vm8050_vm0, %v8864_v3, %v8047_v39  ;;  %v8059_v4 = vmul.f32 %v8868_v8, %v7927_v19  ;;  %vm8064_vm13 = vweird.f32 %v8868_v8  ;;  %v8637_v35 = vmul.f32 -1.442695, %v13263_v23 }
 0x59c   : > { %8869 = vrcp.f32 %v7928_v31  ;;  %v8056_v33 = vsel %vm8053_vm14, %v8055_v37, %v8051_v13  ;;  %vm8065_vm2 = vmor %vm8063_vm9, %vm8064_vm13  ;;  %v8084_v5 = vand.u32 2147483648, %v7928_v31  ;;  %v8082_v54 = vand.u32 2147483647, %v7928_v31 }
 0x59d   : > { %v8230_v53 = vmul.f32 %v8056_v33, %v13247_v61  ;;  %v8060_v15 = vsub.f32 1.0, %v8059_v4  ;;  %8871 = vpow2.f32 %v8637_v35  ;;  %vm8078_vm8 = vweird.f32 %v7928_v31 }
 0x59e   : > { %v8085_v50 = vor.u32 1.1754944e-38, %v8084_v5  ;;  %vm8083_vm12 = vcmp.eq.f32.partialorder %v8082_v54, 8.507059e+37 }
 0x59f   : > { %8299 = vmatmul.f32.gmra.mxu0 %v8230_v53  ;;  %v8061_v40 = vmul.f32 %v8868_v8, %v8060_v15 }
 0x5a0   : > { %v7838_v61 = vpop.f32.mrf.mxu2 }
 0x5a1   : > { %v8062_v0 = vadd.f32 %v8868_v8, %v8061_v40  ;;  %v13268_v9 = vadd.f32 %v13184_v57, %v7838_v61 }
 0x5a2   : > { %v8870_v21 = vpop.eup %8869 }
 0x5a3   : > { %v8066_v30 = vsel %vm8065_vm2, %v8868_v8, %v8062_v0  ;;  %v8074_v55 = vmul.f32 %v8870_v21, %v7928_v31  ;;  %vm8079_vm6 = vweird.f32 %v8870_v21  ;;  %v8638_v11 = vmul.f32 -1.442695, %v13268_v9 }
 0x5a4   : > { %v8071_v25 = vsel %vm8068_vm4, %v8070_v45, %v8066_v30  ;;  %vm8080_vm11 = vmor %vm8078_vm8, %vm8079_vm6 }
 0x5a5   : > { %v8231_v20 = vmul.f32 %v8071_v25, %v13252_v34  ;;  %v8075_v10 = vsub.f32 1.0, %v8074_v55  ;;  %v8872_v34 = vpop.eup %8871  ;;  %8873 = vpow2.f32 %v8638_v11 }
 0x5a6   : > { %v7929_v36 = vadd.f32 1.0, %v8872_v34 }
 0x5a7   : > { %8302 = vmatmul.f32.gmra.mxu0 %v8231_v20  ;;  %v8076_v56 = vmul.f32 %v8870_v21, %v8075_v10 }
 0x5a8   : > { %8875 = vrcp.f32 %v7929_v36  ;;  %v8099_v3 = vand.u32 2147483648, %v7929_v36  ;;  %v8097_v49 = vand.u32 2147483647, %v7929_v36  ;;  %vm8093_vm10 = vweird.f32 %v7929_v36 }
 0x5a9   : > { %v8077_v22 = vadd.f32 %v8870_v21, %v8076_v56 }
 0x5aa   : > { %v8100_v58 = vor.u32 1.1754944e-38, %v8099_v3  ;;  %vm8098_vm3 = vcmp.eq.f32.partialorder %v8097_v49, 8.507059e+37 }
 0x5ab   : > { %v8081_v48 = vsel %vm8080_vm11, %v8870_v21, %v8077_v22  ;;  %v8874_v1 = vpop.eup %8873 }
 0x5ac   : > { %v8086_v12 = vsel %vm8083_vm12, %v8085_v50, %v8081_v48  ;;  %v7930_v24 = vadd.f32 1.0, %v8874_v1 }
 0x5ad   : > { %v8232_v7 = vmul.f32 %v8086_v12, %v13257_v16 }
 0x5ae   : > { %v7841_v32 = vpop.f32.mrf.mxu2  ;;  %v8876_v59 = vpop.eup %8875  ;;  %v8114_v13 = vand.u32 2147483648, %v7930_v24  ;;  %v8112_v53 = vand.u32 2147483647, %v7930_v24  ;;  %vm8108_vm0 = vweird.f32 %v7930_v24 }
 0x5af   : > { %v13273_v26 = vadd.f32 %v13184_v57, %v7841_v32  ;;  %8305 = vmatmul.f32.gmra.mxu0 %v8232_v7  ;;  %v8089_v51 = vmul.f32 %v8876_v59, %v7929_v36  ;;  %vm8094_vm5 = vweird.f32 %v8876_v59 }
 0x5b0   : > { %vm8095_vm15 = vmor %vm8093_vm10, %vm8094_vm5  ;;  %v8115_v27 = vor.u32 1.1754944e-38, %v8114_v13  ;;  %vm8113_vm13 = vcmp.eq.f32.partialorder %v8112_v53, 8.507059e+37 }
 0x5b1   : > { %v8639_v63 = vmul.f32 -1.442695, %v13273_v26  ;;  %v8090_v52 = vsub.f32 1.0, %v8089_v51 }
 0x5b3   : > { %8877 = vpow2.f32 %v8639_v63  ;;  %v8091_v41 = vmul.f32 %v8876_v59, %v8090_v52 }
 0x5b4   : > { %8879 = vrcp.f32 %v7930_v24 }
 0x5b5   : > { %v8092_v43 = vadd.f32 %v8876_v59, %v8091_v41  ;;  %v13336_v41 = vld [vmem:[%s13449_s13] ss:$0 sm:$0xff] }
 0x5b6   : > { %v7844_v60 = vpop.f32.mrf.mxu2 }
 0x5b7   : > { %v13277_v46 = vadd.f32 %v13184_v57, %v7844_v60  ;;  %v8096_v62 = vsel %vm8095_vm15, %v8876_v59, %v8092_v43 }
 0x5b8   : > { %v8101_v38 = vsel %vm8098_vm3, %v8100_v58, %v8096_v62 }
 0x5b9   : > { %v8640_v42 = vmul.f32 -1.442695, %v13277_v46  ;;  %v8878_v16 = vpop.eup %8877  ;;  %v8233_v31 = vmul.f32 %v8101_v38, %v13263_v23 }
 0x5ba   : > { %v13283_v14 = vadd.f32 1.0, %v8878_v16  ;;  %v8880_v28 = vpop.eup %8879 }
 0x5bb   : > { %8881 = vpow2.f32 %v8640_v42  ;;  %v8104_v2 = vmul.f32 %v8880_v28, %v7930_v24  ;;  %8308 = vmatmul.f32.gmra.mxu0 %v8233_v31  ;;  %vm8109_vm1 = vweird.f32 %v8880_v28 }
 0x5bc   : > { %vm8110_vm14 = vmor %vm8108_vm0, %vm8109_vm1  ;;  %v8129_v20 = vand.u32 2147483648, %v13283_v14  ;;  %v8127_v56 = vand.u32 2147483647, %v13283_v14  ;;  %vm8123_vm2 = vweird.f32 %v13283_v14 }
 0x5bd   : > { %v8105_v37 = vsub.f32 1.0, %v8104_v2 }
 0x5be   : > { %v7847_v44 = vpop.f32.mrf.mxu2  ;;  %v8130_v50 = vor.u32 1.1754944e-38, %v8129_v20  ;;  %vm8128_vm6 = vcmp.eq.f32.partialorder %v8127_v56, 8.507059e+37 }
 0x5bf   : > { %v13281_v19 = vadd.f32 %v13184_v57, %v7847_v44  ;;  %v8106_v18 = vmul.f32 %v8880_v28, %v8105_v37 }
 0x5c1   : > { %v8641_v6 = vmul.f32 -1.442695, %v13281_v19  ;;  %v8882_v29 = vpop.eup %8881  ;;  %v8107_v40 = vadd.f32 %v8880_v28, %v8106_v18 }
 0x5c2   : > { %v13287_v17 = vadd.f32 1.0, %v8882_v29 }
 0x5c3   : > { %8883 = vpow2.f32 %v8641_v6  ;;  %v8111_v23 = vsel %vm8110_vm14, %v8880_v28, %v8107_v40 }
 0x5c4   : > { %8885 = vrcp.f32 %v13283_v14  ;;  %v8116_v21 = vsel %vm8113_vm13, %v8115_v27, %v8111_v23  ;;  %v8144_v44 = vand.u32 2147483648, %v13287_v17  ;;  %v8142_v52 = vand.u32 2147483647, %v13287_v17 }
 0x5c5   : > { %8887 = vrcp.f32 %v13287_v17  ;;  %v8234_v30 = vmul.f32 %v8116_v21, %v13268_v9  ;;  %vm8138_vm12 = vweird.f32 %v13287_v17 }
 0x5c6   : > { %v7850_v8 = vpop.f32.mrf.mxu2  ;;  %v8145_v28 = vor.u32 1.1754944e-38, %v8144_v44  ;;  %vm8143_vm3 = vcmp.eq.f32.partialorder %v8142_v52, 8.507059e+37 }
 0x5c7   : > { %v13291_v39 = vadd.f32 %v13184_v57, %v7850_v8  ;;  %8311 = vmatmul.f32.gmra.mxu0 %v8234_v30 }
 0x5c9   : > { %v8884_v4 = vpop.eup %8883  ;;  %v8642_v33 = vmul.f32 -1.442695, %v13291_v39 }
 0x5ca   : > { %v8886_v15 = vpop.eup %8885  ;;  %v13295_v47 = vadd.f32 1.0, %v8884_v4 }
 0x5cb   : > { %8889 = vpow2.f32 %v8642_v33  ;;  %v8119_v0 = vmul.f32 %v8886_v15, %v13283_v14  ;;  %v8888_v61 = vpop.eup %8887  ;;  %vm8124_vm9 = vweird.f32 %v8886_v15 }
 0x5cc   : > { %8891 = vrcp.f32 %v13295_v47  ;;  %vm8125_vm4 = vmor %vm8123_vm2, %vm8124_vm9  ;;  %v8134_v34 = vmul.f32 %v8888_v61, %v13287_v17  ;;  %vm8139_vm8 = vweird.f32 %v8888_v61  ;;  %vm8153_vm5 = vweird.f32 %v13295_v47 }
 0x5cd   : > { %v8120_v25 = vsub.f32 1.0, %v8119_v0  ;;  %v8159_v49 = vand.u32 2147483648, %v13295_v47  ;;  %vm8140_vm10 = vmor %vm8138_vm12, %vm8139_vm8  ;;  %v8157_v58 = vand.u32 2147483647, %v13295_v47 }
 0x5ce   : > { %v7853_v45 = vpop.f32.mrf.mxu2  ;;  %v8135_v1 = vsub.f32 1.0, %v8134_v34 }
 0x5cf   : > { %v13301_v35 = vadd.f32 %v13184_v57, %v7853_v45  ;;  %v8121_v5 = vmul.f32 %v8886_v15, %v8120_v25  ;;  %v8160_v18 = vor.u32 1.1754944e-38, %v8159_v49  ;;  %vm8158_vm1 = vcmp.eq.f32.partialorder %v8157_v58, 8.507059e+37 }
 0x5d0   : > { %v8136_v59 = vmul.f32 %v8888_v61, %v8135_v1 }
 0x5d1   : > { %v8890_v55 = vpop.eup %8889  ;;  %v8643_v10 = vmul.f32 -1.442695, %v13301_v35  ;;  %v8122_v11 = vadd.f32 %v8886_v15, %v8121_v5 }
 0x5d2   : > { %v13306_v54 = vpop.eup %8891  ;;  %v13308_v22 = vadd.f32 1.0, %v8890_v55  ;;  %v8137_v6 = vadd.f32 %v8888_v61, %v8136_v59 }
 0x5d3   : > { %v8149_v9 = vmul.f32 %v13306_v54, %v13295_v47  ;;  %8893 = vpow2.f32 %v8643_v10  ;;  %v8126_v48 = vsel %vm8125_vm4, %v8886_v15, %v8122_v11  ;;  %vm8154_vm11 = vweird.f32 %v13306_v54 }
 0x5d4   : > { %8895 = vrcp.f32 %v13308_v22  ;;  %v8131_v12 = vsel %vm8128_vm6, %v8130_v50, %v8126_v48  ;;  %vm13340_vm15 = vmor %vm8153_vm5, %vm8154_vm11  ;;  %v8141_v62 = vsel %vm8140_vm10, %v8888_v61, %v8137_v6  ;;  %v8174_v27 = vand.u32 2147483648, %v13308_v22 }
 0x5d5   : > { %v8150_v32 = vsub.f32 1.0, %v8149_v9  ;;  %v8235_v36 = vmul.f32 %v8131_v12, %v13273_v26  ;;  %v8146_v38 = vsel %vm8143_vm3, %v8145_v28, %v8141_v62  ;;  %vm8168_vm14 = vweird.f32 %v13308_v22 }
 0x5d6   : > { %v7856_v7 = vpop.f32.mrf.mxu2  ;;  %v8236_v13 = vmul.f32 %v8146_v38, %v13277_v46  ;;  %v8172_v0 = vand.u32 2147483647, %v13308_v22  ;;  %v8175_v55 = vor.u32 1.1754944e-38, %v8174_v27 }
 0x5d7   : > { %v13317_v63 = vadd.f32 %v13184_v57, %v7856_v7  ;;  %v8151_v60 = vmul.f32 %v13306_v54, %v8150_v32  ;;  %8314 = vmatmul.f32.gmra.mxu0 %v8235_v36 }
 0x5d8   : > { %vm8173_vm9 = vcmp.eq.f32.partialorder %v8172_v0, 8.507059e+37 }
 0x5d9   : > { %v8894_v24 = vpop.eup %8893  ;;  %v8644_v42 = vmul.f32 -1.442695, %v13317_v63  ;;  %v8152_v14 = vadd.f32 %v13306_v54, %v8151_v60 }
 0x5da   : > { %v13321_v16 = vpop.eup %8895  ;;  %v13323_v51 = vadd.f32 1.0, %v8894_v24 }
 0x5db   : > { %v8164_v26 = vmul.f32 %v13321_v16, %v13308_v22  ;;  %8897 = vpow2.f32 %v8644_v42  ;;  %v8156_v17 = vsel %vm13340_vm15, %v13306_v54, %v8152_v14  ;;  %vm8169_vm0 = vweird.f32 %v13321_v16 }
 0x5dc   : > { %8899 = vrcp.f32 %v13323_v51  ;;  %v8161_v47 = vsel %vm8158_vm1, %v8160_v18, %v8156_v17  ;;  %vm8170_vm13 = vmor %vm8168_vm14, %vm8169_vm0  ;;  %v8189_v22 = vand.u32 2147483648, %v13323_v51  ;;  %vm8183_vm4 = vweird.f32 %v13323_v51 }
 0x5dd   : > { %v8165_v3 = vsub.f32 1.0, %v8164_v26  ;;  %v8237_v23 = vmul.f32 %v8161_v47, %v13281_v19  ;;  %v8187_v11 = vand.u32 2147483647, %v13323_v51 }
 0x5de   : > { %v7859_v29 = vpop.f32.mrf.mxu2  ;;  %v8190_v7 = vor.u32 1.1754944e-38, %v8189_v22 }
 0x5df   : > { %v13346_v2 = vadd.f32 %v13184_v57, %v7859_v29  ;;  %v8166_v37 = vmul.f32 %v13321_v16, %v8165_v3  ;;  %8317 = vmatmul.f32.gmra.mxu0 %v8236_v13  ;;  %vm8188_vm8 = vcmp.eq.f32.partialorder %v8187_v11, 8.507059e+37 }
 0x5e1   : > { %v8898_v31 = vpop.eup %8897  ;;  %v8645_v57 = vmul.f32 -1.442695, %v13346_v2  ;;  %v8167_v40 = vadd.f32 %v13321_v16, %v8166_v37 }
 0x5e2   : > { %v8900_v33 = vpop.eup %8899  ;;  %v7936_v53 = vadd.f32 1.0, %v8898_v31 }
 0x5e3   : > { %v8179_v15 = vmul.f32 %v8900_v33, %v13323_v51  ;;  %8901 = vpow2.f32 %v8645_v57  ;;  %v8171_v30 = vsel %vm8170_vm13, %v13321_v16, %v8167_v40  ;;  %vm8184_vm2 = vweird.f32 %v8900_v33 }
 0x5e4   : > { %v8279_v8 = vpop.f32.mrf.mxu0  ;;  %8903 = vrcp.f32 %v7936_v53  ;;  %v8176_v19 = vsel %vm8173_vm9, %v8175_v55, %v8171_v30  ;;  %vm8185_vm6 = vmor %vm8183_vm4, %vm8184_vm2  ;;  %v8204_v24 = vand.u32 2147483648, %v7936_v53  ;;  %vm8198_vm12 = vweird.f32 %v7936_v53 }
 0x5e5   : > { %v8280_v4 = vadd.f32 %v13336_v41, %v8279_v8  ;;  %v8180_v46 = vsub.f32 1.0, %v8179_v15  ;;  %v8238_v9 = vmul.f32 %v8176_v19, %v13291_v39  ;;  %v8202_v59 = vand.u32 2147483647, %v7936_v53 }
 0x5e6   : > { %v8205_v52 = vor.u32 1.1754944e-38, %v8204_v24 }
 0x5e7   : > { %8336 = vst.msk [vmem:[%s13353_s27] sm:$0xff] %vm7158_vm7, %v8280_v4  ;;  %v8181_v25 = vmul.f32 %v8900_v33, %v8180_v46  ;;  %8320 = vmatmul.f32.gmra.mxu0 %v8237_v23  ;;  %vm8203_vm10 = vcmp.eq.f32.partialorder %v8202_v59, 8.507059e+37 }
 0x5e9   : > { %v8902_v45 = vpop.eup %8901  ;;  %v8182_v56 = vadd.f32 %v8900_v33, %v8181_v25 }
 0x5ea   : > { %v8904_v20 = vpop.eup %8903  ;;  %v7937_v10 = vadd.f32 1.0, %v8902_v45 }
 0x5eb   : > { %v8194_v5 = vmul.f32 %v8904_v20, %v7936_v53  ;;  %v8186_v32 = vsel %vm8185_vm6, %v8900_v33, %v8182_v56  ;;  %vm8199_vm11 = vweird.f32 %v8904_v20 }
 0x5ec   : > { %v8282_v21 = vpop.f32.mrf.mxu0  ;;  %8905 = vrcp.f32 %v7937_v10  ;;  %v8191_v1 = vsel %vm8188_vm8, %v8190_v7, %v8186_v32  ;;  %vm8200_vm5 = vmor %vm8198_vm12, %vm8199_vm11  ;;  %v8219_v6 = vand.u32 2147483648, %v7937_v10  ;;  %vm8213_vm3 = vweird.f32 %v7937_v10 }
 0x5ed   : > { %v8283_v61 = vadd.f32 %v13336_v41, %v8282_v21  ;;  %v8195_v54 = vsub.f32 1.0, %v8194_v5  ;;  %v8239_v42 = vmul.f32 %v8191_v1, %v13301_v35  ;;  %v8217_v49 = vand.u32 2147483647, %v7937_v10 }
 0x5ee   : > { %v8220_v58 = vor.u32 1.1754944e-38, %v8219_v6 }
 0x5ef   : > { %8337 = vst.msk [vmem:[%s13353_s27 + $0x8] sm:$0xff] %vm7158_vm7, %v8283_v61  ;;  %v8196_v48 = vmul.f32 %v8904_v20, %v8195_v54  ;;  %8323 = vmatmul.f32.gmra.mxu0 %v8238_v9  ;;  %vm8218_vm0 = vcmp.eq.f32.partialorder %v8217_v49, 8.507059e+37 }
 0x5f1   : > { %v8197_v39 = vadd.f32 %v8904_v20, %v8196_v48 }
 0x5f2   : > { %v8906_v12 = vpop.eup %8905 }
 0x5f3   : > { %v8209_v36 = vmul.f32 %v8906_v12, %v7937_v10  ;;  %v8201_v51 = vsel %vm8200_vm5, %v8904_v20, %v8197_v39  ;;  %vm8214_vm15 = vweird.f32 %v8906_v12 }
 0x5f4   : > { %v8285_v50 = vpop.f32.mrf.mxu0  ;;  %v8206_v14 = vsel %vm8203_vm10, %v8205_v52, %v8201_v51  ;;  %vm8215_vm1 = vmor %vm8213_vm3, %vm8214_vm15 }
 0x5f5   : > { %v8286_v34 = vadd.f32 %v13336_v41, %v8285_v50  ;;  %v8210_v60 = vsub.f32 1.0, %v8209_v36  ;;  %v8240_v35 = vmul.f32 %v8206_v14, %v13317_v63 }
 0x5f7   : > { %8338 = vst.msk [vmem:[%s13353_s27 + $0x10] sm:$0xff] %vm7158_vm7, %v8286_v34  ;;  %v8211_v44 = vmul.f32 %v8906_v12, %v8210_v60  ;;  %8326 = vmatmul.f32.gmra.mxu0 %v8239_v42 }
 0x5f9   : > { %v8212_v3 = vadd.f32 %v8906_v12, %v8211_v44 }
 0x5fb   : > { %v8216_v29 = vsel %vm8215_vm1, %v8906_v12, %v8212_v3 }
 0x5fc   : > { %v8288_v16 = vpop.f32.mrf.mxu0  ;;  %v8221_v62 = vsel %vm8218_vm0, %v8220_v58, %v8216_v29 }
 0x5fd   : > { %v8289_v26 = vadd.f32 %v13336_v41, %v8288_v16  ;;  %v8241_v17 = vmul.f32 %v8221_v62, %v13346_v2 }
 0x5ff   : > { %8339 = vst.msk [vmem:[%s13353_s27 + $0x18] sm:$0xff] %vm7158_vm7, %v8289_v26  ;;  %8329 = vmatmul.f32.gmra.mxu0 %v8240_v35 }
 0x604   : > { %v8291_v28 = vpop.f32.mrf.mxu0 }
 0x605   : > { %v8292_v43 = vadd.f32 %v13336_v41, %v8291_v28 }
 0x607   : > { %8340 = vst.msk [vmem:[%s13353_s27 + $0x20] sm:$0xff] %vm7158_vm7, %v8292_v43  ;;  %8332 = vmatmul.f32.gmra.mxu0 %v8241_v17 }
 0x60c   : > { %v8294_v63 = vpop.f32.mrf.mxu0 }
 0x60d   : > { %v8295_v38 = vadd.f32 %v13336_v41, %v8294_v63 }
 0x60f   : > { %8341 = vst.msk [vmem:[%s13353_s27 + $0x28] sm:$0xff] %vm7158_vm7, %v8295_v38 }
 0x614   : > { %v8297_v8 = vpop.f32.mrf.mxu0 }
 0x615   : > { %v8298_v31 = vadd.f32 %v13336_v41, %v8297_v8 }
 0x617   : > { %8342 = vst.msk [vmem:[%s13353_s27 + $0x30] sm:$0xff] %vm7158_vm7, %v8298_v31 }
 0x61c   : > { %v8300_v37 = vpop.f32.mrf.mxu0 }
 0x61d   : > { %v8301_v13 = vadd.f32 %v13336_v41, %v8300_v37 }
 0x61f   : > { %8343 = vst.msk [vmem:[%s13353_s27 + $0x38] sm:$0xff] %vm7158_vm7, %v8301_v13 }
 0x624   : > { %v8303_v2 = vpop.f32.mrf.mxu0 }
 0x625   : > { %v8304_v57 = vadd.f32 %v13336_v41, %v8303_v2 }
 0x627   : > { %8344 = vst.msk [vmem:[%s13353_s27 + $0x40] sm:$0xff] %vm7158_vm7, %v8304_v57 }
 0x62c   : > { %v8306_v4 = vpop.f32.mrf.mxu0 }
 0x62d   : > { %v8307_v33 = vadd.f32 %v13336_v41, %v8306_v4 }
 0x62f   : > { %8345 = vst.msk [vmem:[%s13353_s27 + $0x48] sm:$0xff] %vm7158_vm7, %v8307_v33 }
 0x638   : > { %v8309_v18 = vpop.f32.mrf.mxu0 }
 0x639   : > { %v8310_v53 = vadd.f32 %v13336_v41, %v8309_v18 }
 0x63b   : > { %8346 = vst.msk [vmem:[%s13353_s27 + $0x50] sm:$0xff] %vm7158_vm7, %v8310_v53 }
 0x644   : > { %v8312_v15 = vpop.f32.mrf.mxu0 }
 0x645   : > { %v8313_v47 = vadd.f32 %v13336_v41, %v8312_v15 }
 0x647   : > { %8347 = vst.msk [vmem:[%s13353_s27 + $0x58] sm:$0xff] %vm7158_vm7, %v8313_v47 }
 0x654   : > { %v8315_v40 = vpop.f32.mrf.mxu0 }
 0x655   : > { %v8316_v46 = vadd.f32 %v13336_v41, %v8315_v40 }
 0x657   : > { %8348 = vst.msk [vmem:[%s13353_s27 + $0x60] sm:$0xff] %vm7158_vm7, %v8316_v46 }
 0x65c   : > { %v8318_v27 = vpop.f32.mrf.mxu0 }
 0x65d   : > { %v8319_v23 = vadd.f32 %v13336_v41, %v8318_v27 }
 0x65f   : > { %8349 = vst.msk [vmem:[%s13353_s27 + $0x68] sm:$0xff] %vm7158_vm7, %v8319_v23 }
 0x664   : > { %v8321_v0 = vpop.f32.mrf.mxu0 }
 0x665   : > { %v8322_v21 = vadd.f32 %v13336_v41, %v8321_v0 }
 0x667   : > { %8350 = vst.msk [vmem:[%s13353_s27 + $0x70] sm:$0xff] %vm7158_vm7, %v8322_v21 }
 0x66c   : > { %v8324_v45 = vpop.f32.mrf.mxu0 }
 0x66d   : > { %v8325_v30 = vadd.f32 %v13336_v41, %v8324_v45 }
 0x66f   : > { %8351 = vst.msk [vmem:[%s13353_s27 + $0x78] sm:$0xff] %vm7158_vm7, %v8325_v30 }
 0x674   : > { %v8327_v25 = vpop.f32.mrf.mxu0 }
 0x675   : > { %v8328_v61 = vadd.f32 %v13336_v41, %v8327_v25 }
 0x677   : > { %8352 = vst.msk [vmem:[%s13353_s27 + $0x80] sm:$0xff] %vm7158_vm7, %v8328_v61 }
 0x67c   : > { %v8330_v20 = vpop.f32.mrf.mxu0 }
 0x67d   : > { %v8331_v55 = vadd.f32 %v13336_v41, %v8330_v20 }
 0x67f   : > { %8353 = vst.msk [vmem:[%s13353_s27 + $0x88] sm:$0xff] %vm7158_vm7, %v8331_v55 }
 0x684   : > { %v8333_v10 = vpop.f32.mrf.mxu0 }
 0x685   : > { %v8334_v5 = vadd.f32 %v13336_v41, %v8333_v10 }
 0x687   : > { %8354 = vst.msk [vmem:[%s13353_s27 + $0x90] sm:$0xff] %vm7158_vm7, %v8334_v5 }
 0x688 PF: > { %s24_s28 = sadd.s32 1, %s8934_s28  }
 0x689   : > { %p21_p4 = scmp.ge.s32.totalorder %s24_s28, 4  }
 0x68b   :  { %23 = sbr.rel (!%p21_p4) target bundleno = 1 (0x1), region = 106 }

</bundles_post_ra>
